<compile_context>
chip_gen: v7x
topology: tpu7x:2x2x1
jax: 0.10.0
libtpu: 0.0.40
codegen_flags: <defaults>
</compile_context>

<pallas_src>
import math

import jax
import jax.numpy as jnp
from jax.experimental import pallas as pl
from jax.experimental.pallas import tpu as pltpu

# ---------------- model hyper-parameters (small synthetic ViT) ----------------
BATCH      = 2
IMG        = 16          # expected image size (resize is identity)
CHANNELS   = 3
PATCH      = 4
HIDDEN     = 32          # torchvision "hidden_dim"
NUM_HEADS  = 4
HEAD_DIM   = HIDDEN // NUM_HEADS
MLP_DIM    = 64
NUM_LAYERS = 2
EMB_DIM    = 16          # ViTBackbone.final_layer output dim
LN_EPS     = 1e-6        # torchvision ViT LayerNorm eps

N_PATCHES  = (IMG // PATCH) ** 2
SEQ        = N_PATCHES + 1              # +1 class token
SEQ_PAD    = ((SEQ + 7) // 8) * 8       # pad 17 -> 24 so per-batch row offsets
                                        # are 8-sublane aligned
PATCH_DIM  = CHANNELS * PATCH * PATCH


# ------------------------------ fused Pallas kernel ----------------------------
def _vit_kernel(tok_ref, addend_ref, pw_ref,
                ln1g_ref, ln1b_ref,
                wq_ref, bq_ref, wk_ref, bk_ref, wv_ref, bv_ref,
                wo_ref, bo_ref,
                ln2g_ref, ln2b_ref,
                w1_ref, b1_ref, w2_ref, b2_ref,
                lng_ref, lnb_ref, fw_ref, fb_ref,
                out_ref, attn_ref):
    """Whole ViT forward for the full (row-stacked) batch in one invocation."""
    nb = tok_ref.shape[0] // SEQ_PAD     # static batch size

    def layernorm(x, g, b):
        mu = jnp.mean(x, axis=-1, keepdims=True)
        var = jnp.mean((x - mu) * (x - mu), axis=-1, keepdims=True)  # biased (torch)
        return (x - mu) * jax.lax.rsqrt(var + LN_EPS) * g + b

    # Patch projection (Conv2d(kernel=stride=patch) as a linear over flattened
    # patches) + class token + positional embedding.  `addend` already carries
    # class_token / pos / conv-bias per row (folded in the wrapper); padded and
    # class-token rows of `tok` are zeros so one matmul + one add suffices.
    hx = jnp.dot(tok_ref[...], pw_ref[...],
                 preferred_element_type=jnp.float32) + addend_ref[...]

    attn_ref[...] = jnp.zeros_like(attn_ref)    # keep padding rows finite

    # NOTE: at real ViT scale on v6e/v7x, cast matmul operands to bf16 here
    # (keep f32 accumulation via preferred_element_type; keep LN/GELU/softmax
    # in f32 — v5e has no bf16 VPU/EUP).
    for l in range(NUM_LAYERS):                 # static unroll; weights VMEM-resident
        # ---------------- multi-head self-attention ----------------
        y = layernorm(hx, ln1g_ref[l], ln1b_ref[l])
        # Per-head Q/K/V over the stacked [B*SEQ_PAD, HIDDEN] rows (full
        # sublane fill).  Weights are pre-split per head, so no activation
        # lane slicing; the 1/sqrt(head_dim) scale is folded into wq/bq.
        qs, ks, vs = [], [], []
        for h in range(NUM_HEADS):
            qs.append(jnp.dot(y, wq_ref[l, h],
                              preferred_element_type=jnp.float32) + bq_ref[l, h])
            ks.append(jnp.dot(y, wk_ref[l, h],
                              preferred_element_type=jnp.float32) + bk_ref[l, h])
            vs.append(jnp.dot(y, wv_ref[l, h],
                              preferred_element_type=jnp.float32) + bv_ref[l, h])
        # Score / value matmuls cannot mix batch elements -> small static loop.
        for b in range(nb):
            r0 = b * SEQ_PAD                    # 8-aligned row offset
            acc_b = jnp.zeros((SEQ, HIDDEN), jnp.float32)
            for h in range(NUM_HEADS):
                qb = qs[h][r0:r0 + SEQ]
                kb = ks[h][r0:r0 + SEQ]
                vb = vs[h][r0:r0 + SEQ]
                # contract last dims of both operands: no transposed activation
                s = jax.lax.dot_general(qb, kb, (((1,), (1,)), ((), ())),
                                        preferred_element_type=jnp.float32)
                s = s - jnp.max(s, axis=-1, keepdims=True)
                p = jnp.exp(s)
                # EUP fast reciprocal (~1e-4 rel. error vs exact softmax; use
                # approx=False if bit-parity with PyTorch matters).
                p = p * pl.reciprocal(jnp.sum(p, axis=-1, keepdims=True),
                                      approx=True)
                oh = jnp.dot(p, vb, preferred_element_type=jnp.float32)
                # fold the output projection into the head loop
                acc_b = acc_b + jnp.dot(oh, wo_ref[l, h],
                                        preferred_element_type=jnp.float32)
            attn_ref[r0:r0 + SEQ, :] = acc_b
        hx = hx + attn_ref[...] + bo_ref[l]     # residual + out-proj bias

        # --------------------------- MLP ----------------------------
        y = layernorm(hx, ln2g_ref[l], ln2b_ref[l])
        m = jnp.dot(y, w1_ref[l], preferred_element_type=jnp.float32) + b1_ref[l]
        m = 0.5 * m * (1.0 + jax.lax.erf(m * (1.0 / math.sqrt(2.0))))  # exact GELU
        hx = hx + jnp.dot(m, w2_ref[l],
                          preferred_element_type=jnp.float32) + b2_ref[l]

    # -------- final encoder LayerNorm + ViTBackbone.final_layer --------
    yf = layernorm(hx, lng_ref[...], lnb_ref[...])
    out_ref[...] = (jnp.dot(yf, fw_ref[...], preferred_element_type=jnp.float32)
                    + fb_ref[...]).astype(out_ref.dtype)


# ------------------------------ parameter init ---------------------------------
def init_params(key):
    ks = iter(jax.random.split(key, 16))

    def nrm(shape, scale=0.02):
        return (scale * jax.random.normal(next(ks), shape)).astype(jnp.float32)

    L = NUM_LAYERS
    return {
        # conv_proj expressed as a linear over flattened (C, ph, pw) patches
        "patch_w": nrm((PATCH_DIM, HIDDEN)),
        "patch_b": jnp.zeros((1, HIDDEN), jnp.float32),
        "class_token": nrm((1, 1, HIDDEN)),
        "pos_embedding": nrm((1, SEQ, HIDDEN)),
        "ln_g": jnp.ones((1, HIDDEN), jnp.float32),
        "ln_b": jnp.zeros((1, HIDDEN), jnp.float32),
        "final_w": nrm((HIDDEN, EMB_DIM)),
        "final_b": jnp.zeros((1, EMB_DIM), jnp.float32),
        # per-layer weights stacked on a leading NUM_LAYERS axis
        "ln1_g": jnp.ones((L, 1, HIDDEN), jnp.float32),
        "ln1_b": jnp.zeros((L, 1, HIDDEN), jnp.float32),
        "qkv_w": nrm((L, HIDDEN, 3 * HIDDEN)),        # columns = [Wq | Wk | Wv], head-major
        "qkv_b": jnp.zeros((L, 1, 3 * HIDDEN), jnp.float32),
        "out_w": nrm((L, HIDDEN, HIDDEN)),            # rows ordered (head, head_dim)
        "out_b": jnp.zeros((L, 1, HIDDEN), jnp.float32),
        "ln2_g": jnp.ones((L, 1, HIDDEN), jnp.float32),
        "ln2_b": jnp.zeros((L, 1, HIDDEN), jnp.float32),
        "mlp_w1": nrm((L, HIDDEN, MLP_DIM)),
        "mlp_b1": jnp.zeros((L, 1, MLP_DIM), jnp.float32),
        "mlp_w2": nrm((L, MLP_DIM, HIDDEN)),
        "mlp_b2": jnp.zeros((L, 1, HIDDEN), jnp.float32),
    }


# ------------------------------ forward pass ------------------------------------
def vit_backbone_forward(x, params):
    """x: [B, H, W, C] float32  ->  [B, SEQ, EMB_DIM] float32."""
    B, H, W, C = x.shape
    p = PATCH
    nH, nW = H // p, W // p
    rows = B * SEQ_PAD

    # _process_input: patchify (one tiny XLA copy on the ~3 KB image); each
    # patch flattened as (C, ph, pw) to match Conv2d(kernel=stride=patch).
    patches = x.reshape(B, nH, p, nW, p, C)
    patches = patches.transpose(0, 1, 3, 5, 2, 4).reshape(B, nH * nW, C * p * p)
    # Row layout per batch element: [class | N_PATCHES tokens | pad rows].
    tok = jnp.zeros((B, SEQ_PAD, PATCH_DIM), jnp.float32)
    tok = tok.at[:, 1:SEQ].set(patches)
    tok = tok.reshape(rows, PATCH_DIM)

    # Fold class token, positional embedding and the conv bias into a single
    # per-row addend so the kernel prologue is one matmul + one add.
    pos = params["pos_embedding"].reshape(SEQ, HIDDEN)
    addend = jnp.zeros((SEQ_PAD, HIDDEN), jnp.float32)
    addend = addend.at[:SEQ].set(pos)
    addend = addend.at[1:SEQ].add(params["patch_b"])
    addend = addend.at[0:1].add(params["class_token"].reshape(1, HIDDEN))
    addend = jnp.tile(addend, (B, 1))                         # [B*SEQ_PAD, HIDDEN]

    # Per-head weight split + attention-scale folding (trace-time, free).
    L = NUM_LAYERS
    scale = 1.0 / math.sqrt(HEAD_DIM)
    qkv_w = params["qkv_w"].reshape(L, HIDDEN, 3, NUM_HEADS, HEAD_DIM)
    wq = jnp.transpose(qkv_w[:, :, 0], (0, 2, 1, 3)) * scale  # [L, NH, HIDDEN, Dh]
    wk = jnp.transpose(qkv_w[:, :, 1], (0, 2, 1, 3))
    wv = jnp.transpose(qkv_w[:, :, 2], (0, 2, 1, 3))
    qkv_b = params["qkv_b"].reshape(L, 3, NUM_HEADS, 1, HEAD_DIM)
    bq = qkv_b[:, 0] * scale                                  # [L, NH, 1, Dh]
    bk = qkv_b[:, 1]
    bv = qkv_b[:, 2]
    wo = params["out_w"].reshape(L, NUM_HEADS, HEAD_DIM, HIDDEN)

    # Single pallas_call, no grid: every operand is DMA'd into VMEM exactly
    # once and the whole forward runs as straight-line code (total weights
    # ~64 KB f32, trivially resident on v5e/v6e/v7x).  At real ViT scale,
    # reinstate a layer grid axis (bf16 weight streaming + vmem_limit_bytes on
    # v7x) and a CORE_PARALLEL batch axis for v7x's two TensorCores.
    out = pl.pallas_call(
        _vit_kernel,
        out_shape=jax.ShapeDtypeStruct((rows, EMB_DIM), jnp.float32),
        scratch_shapes=[pltpu.VMEM((rows, HIDDEN), jnp.float32)],   # attn assembly
    )(tok, addend, params["patch_w"],
      params["ln1_g"], params["ln1_b"], wq, bq, wk, bk, wv, bv,
      wo, params["out_b"], params["ln2_g"], params["ln2_b"],
      params["mlp_w1"], params["mlp_b1"], params["mlp_w2"], params["mlp_b2"],
      params["ln_g"], params["ln_b"], params["final_w"], params["final_b"])

    # Drop the 8-row alignment padding; wrapper-side reshape/slice is free.
    return out.reshape(B, SEQ_PAD, EMB_DIM)[:, :SEQ]


# ------------------------------------ main ---------------------------------------
if __name__ == "__main__":
    key = jax.random.PRNGKey(0)
    k_x, k_p = jax.random.split(key)
    x = jax.random.normal(k_x, (BATCH, IMG, IMG, CHANNELS), dtype=jnp.float32)
    params = init_params(k_p)

    out = jax.jit(vit_backbone_forward)(x, params)
    out = jax.block_until_ready(out)
    assert out.shape == (BATCH, SEQ, EMB_DIM), out.shape
    assert bool(jnp.all(jnp.isfinite(out)))
    print("KERNEL_OK")
</pallas_src>

<mosaic_0001>
module attributes {stable_mosaic.version = 11 : i64} {
  func.func @_vit_kernel(%arg0: memref<48x48xf32, #tpu.memory_space<vmem>>, %arg1: memref<48x32xf32, #tpu.memory_space<vmem>>, %arg2: memref<48x32xf32, #tpu.memory_space<vmem>>, %arg3: memref<2x1x32xf32, #tpu.memory_space<vmem>>, %arg4: memref<2x1x32xf32, #tpu.memory_space<vmem>>, %arg5: memref<2x4x32x8xf32, #tpu.memory_space<vmem>>, %arg6: memref<2x4x1x8xf32, #tpu.memory_space<vmem>>, %arg7: memref<2x4x32x8xf32, #tpu.memory_space<vmem>>, %arg8: memref<2x4x1x8xf32, #tpu.memory_space<vmem>>, %arg9: memref<2x4x32x8xf32, #tpu.memory_space<vmem>>, %arg10: memref<2x4x1x8xf32, #tpu.memory_space<vmem>>, %arg11: memref<2x4x8x32xf32, #tpu.memory_space<vmem>>, %arg12: memref<2x1x32xf32, #tpu.memory_space<vmem>>, %arg13: memref<2x1x32xf32, #tpu.memory_space<vmem>>, %arg14: memref<2x1x32xf32, #tpu.memory_space<vmem>>, %arg15: memref<2x32x64xf32, #tpu.memory_space<vmem>>, %arg16: memref<2x1x64xf32, #tpu.memory_space<vmem>>, %arg17: memref<2x64x32xf32, #tpu.memory_space<vmem>>, %arg18: memref<2x1x32xf32, #tpu.memory_space<vmem>>, %arg19: memref<1x32xf32, #tpu.memory_space<vmem>>, %arg20: memref<1x32xf32, #tpu.memory_space<vmem>>, %arg21: memref<32x16xf32, #tpu.memory_space<vmem>>, %arg22: memref<1x16xf32, #tpu.memory_space<vmem>>, %arg23: memref<48x16xf32, #tpu.memory_space<vmem>>, %arg24: memref<48x32xf32, #tpu.memory_space<vmem>>) attributes {dimension_semantics = [], scalar_prefetch = 0 : i64, scratch_operands = 1 : i64, tpu.core_type = #tpu.core_type<tc>} {
    %c0 = arith.constant 0 : index
    %c0_0 = arith.constant 0 : index
    %0 = vector.load %arg0[%c0, %c0_0] : memref<48x48xf32, #tpu.memory_space<vmem>>, vector<48x48xf32>
    %c0_1 = arith.constant 0 : index
    %c0_2 = arith.constant 0 : index
    %1 = vector.load %arg2[%c0_1, %c0_2] : memref<48x32xf32, #tpu.memory_space<vmem>>, vector<48x32xf32>
    %cst = arith.constant dense<0.000000e+00> : vector<48x32xf32>
    %2 = tpu.matmul %0, %1, %cst {dimension_numbers = #tpu.dot_dimension_numbers<[1], [0], [0], [1], [0, 0, 1, 1], [], []>} : vector<48x48xf32>, vector<48x32xf32>, vector<48x32xf32> -> vector<48x32xf32>
    %c0_3 = arith.constant 0 : index
    %c0_4 = arith.constant 0 : index
    %3 = vector.load %arg1[%c0_3, %c0_4] : memref<48x32xf32, #tpu.memory_space<vmem>>, vector<48x32xf32>
    %4 = arith.addf %2, %3 : vector<48x32xf32>
    %cst_5 = arith.constant 0.000000e+00 : f32
    %5 = vector.broadcast %cst_5 : f32 to vector<48x32xf32>
    %c0_6 = arith.constant 0 : index
    %c0_7 = arith.constant 0 : index
    %6 = vector.load %arg24[%c0_6, %c0_7] : memref<48x32xf32, #tpu.memory_space<vmem>>, vector<48x32xf32>
    tpu.vector_store %arg24[%c0_6, %c0_7], %5 {strides = array<i32>} : memref<48x32xf32, #tpu.memory_space<vmem>>, vector<48x32xf32>,
    %c0_8 = arith.constant 0 : index
    %c0_9 = arith.constant 0 : index
    %c0_10 = arith.constant 0 : index
    %7 = vector.load %arg3[%c0_8, %c0_9, %c0_10] : memref<2x1x32xf32, #tpu.memory_space<vmem>>, vector<1x1x32xf32>
    %8 = vector.shape_cast %7 : vector<1x1x32xf32> to vector<1x32xf32>
    %c0_11 = arith.constant 0 : index
    %c0_12 = arith.constant 0 : index
    %c0_13 = arith.constant 0 : index
    %9 = vector.load %arg4[%c0_11, %c0_12, %c0_13] : memref<2x1x32xf32, #tpu.memory_space<vmem>>, vector<1x1x32xf32>
    %10 = vector.shape_cast %9 : vector<1x1x32xf32> to vector<1x32xf32>
    %cst_14 = arith.constant dense<0.000000e+00> : vector<48xf32>
    %11 = vector.multi_reduction <add>, %4, %cst_14 [1] : vector<48x32xf32> to vector<48xf32>
    %12 = vector.shape_cast %11 : vector<48xf32> to vector<48x1xf32>
    %cst_15 = arith.constant 3.200000e+01 : f32
    %13 = vector.broadcast %cst_15 : f32 to vector<48x1xf32>
    %14 = arith.divf %12, %13 : vector<48x1xf32>
    %15 = vector.broadcast %14 : vector<48x1xf32> to vector<48x32xf32>
    %16 = arith.subf %4, %15 : vector<48x32xf32>
    %17 = vector.broadcast %14 : vector<48x1xf32> to vector<48x32xf32>
    %18 = arith.subf %4, %17 : vector<48x32xf32>
    %19 = arith.mulf %16, %18 : vector<48x32xf32>
    %cst_16 = arith.constant dense<0.000000e+00> : vector<48xf32>
    %20 = vector.multi_reduction <add>, %19, %cst_16 [1] : vector<48x32xf32> to vector<48xf32>
    %21 = vector.shape_cast %20 : vector<48xf32> to vector<48x1xf32>
    %cst_17 = arith.constant 3.200000e+01 : f32
    %22 = vector.broadcast %cst_17 : f32 to vector<48x1xf32>
    %23 = arith.divf %21, %22 : vector<48x1xf32>
    %24 = vector.broadcast %14 : vector<48x1xf32> to vector<48x32xf32>
    %25 = arith.subf %4, %24 : vector<48x32xf32>
    %cst_18 = arith.constant 9.99999997E-7 : f32
    %26 = vector.broadcast %cst_18 : f32 to vector<48x1xf32>
    %27 = arith.addf %23, %26 : vector<48x1xf32>
    %28 = math.rsqrt %27 : vector<48x1xf32>
    %29 = vector.broadcast %28 : vector<48x1xf32> to vector<48x32xf32>
    %30 = arith.mulf %25, %29 : vector<48x32xf32>
    %31 = vector.broadcast %8 : vector<1x32xf32> to vector<48x32xf32>
    %32 = arith.mulf %30, %31 : vector<48x32xf32>
    %33 = vector.broadcast %10 : vector<1x32xf32> to vector<48x32xf32>
    %34 = arith.addf %32, %33 : vector<48x32xf32>
    %c0_19 = arith.constant 0 : index
    %c0_20 = arith.constant 0 : index
    %c0_21 = arith.constant 0 : index
    %c0_22 = arith.constant 0 : index
    %35 = vector.load %arg5[%c0_19, %c0_20, %c0_21, %c0_22] : memref<2x4x32x8xf32, #tpu.memory_space<vmem>>, vector<1x1x32x8xf32>
    %36 = vector.shape_cast %35 : vector<1x1x32x8xf32> to vector<32x8xf32>
    %cst_23 = arith.constant dense<0.000000e+00> : vector<48x8xf32>
    %37 = tpu.matmul %34, %36, %cst_23 {dimension_numbers = #tpu.dot_dimension_numbers<[1], [0], [0], [1], [0, 0, 1, 1], [], []>} : vector<48x32xf32>, vector<32x8xf32>, vector<48x8xf32> -> vector<48x8xf32>
    %c0_24 = arith.constant 0 : index
    %c0_25 = arith.constant 0 : index
    %c0_26 = arith.constant 0 : index
    %c0_27 = arith.constant 0 : index
    %38 = vector.load %arg6[%c0_24, %c0_25, %c0_26, %c0_27] : memref<2x4x1x8xf32, #tpu.memory_space<vmem>>, vector<1x1x1x8xf32>
    %39 = vector.shape_cast %38 : vector<1x1x1x8xf32> to vector<1x8xf32>
    %40 = vector.broadcast %39 : vector<1x8xf32> to vector<48x8xf32>
    %41 = arith.addf %37, %40 : vector<48x8xf32>
    %c0_28 = arith.constant 0 : index
    %c0_29 = arith.constant 0 : index
    %c0_30 = arith.constant 0 : index
    %c0_31 = arith.constant 0 : index
    %42 = vector.load %arg7[%c0_28, %c0_29, %c0_30, %c0_31] : memref<2x4x32x8xf32, #tpu.memory_space<vmem>>, vector<1x1x32x8xf32>
    %43 = vector.shape_cast %42 : vector<1x1x32x8xf32> to vector<32x8xf32>
    %cst_32 = arith.constant dense<0.000000e+00> : vector<48x8xf32>
    %44 = tpu.matmul %34, %43, %cst_32 {dimension_numbers = #tpu.dot_dimension_numbers<[1], [0], [0], [1], [0, 0, 1, 1], [], []>} : vector<48x32xf32>, vector<32x8xf32>, vector<48x8xf32> -> vector<48x8xf32>
    %c0_33 = arith.constant 0 : index
    %c0_34 = arith.constant 0 : index
    %c0_35 = arith.constant 0 : index
    %c0_36 = arith.constant 0 : index
    %45 = vector.load %arg8[%c0_33, %c0_34, %c0_35, %c0_36] : memref<2x4x1x8xf32, #tpu.memory_space<vmem>>, vector<1x1x1x8xf32>
    %46 = vector.shape_cast %45 : vector<1x1x1x8xf32> to vector<1x8xf32>
    %47 = vector.broadcast %46 : vector<1x8xf32> to vector<48x8xf32>
    %48 = arith.addf %44, %47 : vector<48x8xf32>
    %c0_37 = arith.constant 0 : index
    %c0_38 = arith.constant 0 : index
    %c0_39 = arith.constant 0 : index
    %c0_40 = arith.constant 0 : index
    %49 = vector.load %arg9[%c0_37, %c0_38, %c0_39, %c0_40] : memref<2x4x32x8xf32, #tpu.memory_space<vmem>>, vector<1x1x32x8xf32>
    %50 = vector.shape_cast %49 : vector<1x1x32x8xf32> to vector<32x8xf32>
    %cst_41 = arith.constant dense<0.000000e+00> : vector<48x8xf32>
    %51 = tpu.matmul %34, %50, %cst_41 {dimension_numbers = #tpu.dot_dimension_numbers<[1], [0], [0], [1], [0, 0, 1, 1], [], []>} : vector<48x32xf32>, vector<32x8xf32>, vector<48x8xf32> -> vector<48x8xf32>
    %c0_42 = arith.constant 0 : index
    %c0_43 = arith.constant 0 : index
    %c0_44 = arith.constant 0 : index
    %c0_45 = arith.constant 0 : index
    %52 = vector.load %arg10[%c0_42, %c0_43, %c0_44, %c0_45] : memref<2x4x1x8xf32, #tpu.memory_space<vmem>>, vector<1x1x1x8xf32>
    %53 = vector.shape_cast %52 : vector<1x1x1x8xf32> to vector<1x8xf32>
    %54 = vector.broadcast %53 : vector<1x8xf32> to vector<48x8xf32>
    %55 = arith.addf %51, %54 : vector<48x8xf32>
    %c0_46 = arith.constant 0 : index
    %c1 = arith.constant 1 : index
    %c0_47 = arith.constant 0 : index
    %c0_48 = arith.constant 0 : index
    %56 = vector.load %arg5[%c0_46, %c1, %c0_47, %c0_48] : memref<2x4x32x8xf32, #tpu.memory_space<vmem>>, vector<1x1x32x8xf32>
    %57 = vector.shape_cast %56 : vector<1x1x32x8xf32> to vector<32x8xf32>
    %cst_49 = arith.constant dense<0.000000e+00> : vector<48x8xf32>
    %58 = tpu.matmul %34, %57, %cst_49 {dimension_numbers = #tpu.dot_dimension_numbers<[1], [0], [0], [1], [0, 0, 1, 1], [], []>} : vector<48x32xf32>, vector<32x8xf32>, vector<48x8xf32> -> vector<48x8xf32>
    %c0_50 = arith.constant 0 : index
    %c1_51 = arith.constant 1 : index
    %c0_52 = arith.constant 0 : index
    %c0_53 = arith.constant 0 : index
    %59 = vector.load %arg6[%c0_50, %c1_51, %c0_52, %c0_53] : memref<2x4x1x8xf32, #tpu.memory_space<vmem>>, vector<1x1x1x8xf32>
    %60 = vector.shape_cast %59 : vector<1x1x1x8xf32> to vector<1x8xf32>
    %61 = vector.broadcast %60 : vector<1x8xf32> to vector<48x8xf32>
    %62 = arith.addf %58, %61 : vector<48x8xf32>
    %c0_54 = arith.constant 0 : index
    %c1_55 = arith.constant 1 : index
    %c0_56 = arith.constant 0 : index
    %c0_57 = arith.constant 0 : index
    %63 = vector.load %arg7[%c0_54, %c1_55, %c0_56, %c0_57] : memref<2x4x32x8xf32, #tpu.memory_space<vmem>>, vector<1x1x32x8xf32>
    %64 = vector.shape_cast %63 : vector<1x1x32x8xf32> to vector<32x8xf32>
    %cst_58 = arith.constant dense<0.000000e+00> : vector<48x8xf32>
    %65 = tpu.matmul %34, %64, %cst_58 {dimension_numbers = #tpu.dot_dimension_numbers<[1], [0], [0], [1], [0, 0, 1, 1], [], []>} : vector<48x32xf32>, vector<32x8xf32>, vector<48x8xf32> -> vector<48x8xf32>
    %c0_59 = arith.constant 0 : index
    %c1_60 = arith.constant 1 : index
    %c0_61 = arith.constant 0 : index
    %c0_62 = arith.constant 0 : index
    %66 = vector.load %arg8[%c0_59, %c1_60, %c0_61, %c0_62] : memref<2x4x1x8xf32, #tpu.memory_space<vmem>>, vector<1x1x1x8xf32>
    %67 = vector.shape_cast %66 : vector<1x1x1x8xf32> to vector<1x8xf32>
    %68 = vector.broadcast %67 : vector<1x8xf32> to vector<48x8xf32>
    %69 = arith.addf %65, %68 : vector<48x8xf32>
    %c0_63 = arith.constant 0 : index
    %c1_64 = arith.constant 1 : index
    %c0_65 = arith.constant 0 : index
    %c0_66 = arith.constant 0 : index
    %70 = vector.load %arg9[%c0_63, %c1_64, %c0_65, %c0_66] : memref<2x4x32x8xf32, #tpu.memory_space<vmem>>, vector<1x1x32x8xf32>
    %71 = vector.shape_cast %70 : vector<1x1x32x8xf32> to vector<32x8xf32>
    %cst_67 = arith.constant dense<0.000000e+00> : vector<48x8xf32>
    %72 = tpu.matmul %34, %71, %cst_67 {dimension_numbers = #tpu.dot_dimension_numbers<[1], [0], [0], [1], [0, 0, 1, 1], [], []>} : vector<48x32xf32>, vector<32x8xf32>, vector<48x8xf32> -> vector<48x8xf32>
    %c0_68 = arith.constant 0 : index
    %c1_69 = arith.constant 1 : index
    %c0_70 = arith.constant 0 : index
    %c0_71 = arith.constant 0 : index
    %73 = vector.load %arg10[%c0_68, %c1_69, %c0_70, %c0_71] : memref<2x4x1x8xf32, #tpu.memory_space<vmem>>, vector<1x1x1x8xf32>
    %74 = vector.shape_cast %73 : vector<1x1x1x8xf32> to vector<1x8xf32>
    %75 = vector.broadcast %74 : vector<1x8xf32> to vector<48x8xf32>
    %76 = arith.addf %72, %75 : vector<48x8xf32>
    %c0_72 = arith.constant 0 : index
    %c2 = arith.constant 2 : index
    %c0_73 = arith.constant 0 : index
    %c0_74 = arith.constant 0 : index
    %77 = vector.load %arg5[%c0_72, %c2, %c0_73, %c0_74] : memref<2x4x32x8xf32, #tpu.memory_space<vmem>>, vector<1x1x32x8xf32>
    %78 = vector.shape_cast %77 : vector<1x1x32x8xf32> to vector<32x8xf32>
    %cst_75 = arith.constant dense<0.000000e+00> : vector<48x8xf32>
    %79 = tpu.matmul %34, %78, %cst_75 {dimension_numbers = #tpu.dot_dimension_numbers<[1], [0], [0], [1], [0, 0, 1, 1], [], []>} : vector<48x32xf32>, vector<32x8xf32>, vector<48x8xf32> -> vector<48x8xf32>
    %c0_76 = arith.constant 0 : index
    %c2_77 = arith.constant 2 : index
    %c0_78 = arith.constant 0 : index
    %c0_79 = arith.constant 0 : index
    %80 = vector.load %arg6[%c0_76, %c2_77, %c0_78, %c0_79] : memref<2x4x1x8xf32, #tpu.memory_space<vmem>>, vector<1x1x1x8xf32>
    %81 = vector.shape_cast %80 : vector<1x1x1x8xf32> to vector<1x8xf32>
    %82 = vector.broadcast %81 : vector<1x8xf32> to vector<48x8xf32>
    %83 = arith.addf %79, %82 : vector<48x8xf32>
    %c0_80 = arith.constant 0 : index
    %c2_81 = arith.constant 2 : index
    %c0_82 = arith.constant 0 : index
    %c0_83 = arith.constant 0 : index
    %84 = vector.load %arg7[%c0_80, %c2_81, %c0_82, %c0_83] : memref<2x4x32x8xf32, #tpu.memory_space<vmem>>, vector<1x1x32x8xf32>
    %85 = vector.shape_cast %84 : vector<1x1x32x8xf32> to vector<32x8xf32>
    %cst_84 = arith.constant dense<0.000000e+00> : vector<48x8xf32>
    %86 = tpu.matmul %34, %85, %cst_84 {dimension_numbers = #tpu.dot_dimension_numbers<[1], [0], [0], [1], [0, 0, 1, 1], [], []>} : vector<48x32xf32>, vector<32x8xf32>, vector<48x8xf32> -> vector<48x8xf32>
    %c0_85 = arith.constant 0 : index
    %c2_86 = arith.constant 2 : index
    %c0_87 = arith.constant 0 : index
    %c0_88 = arith.constant 0 : index
    %87 = vector.load %arg8[%c0_85, %c2_86, %c0_87, %c0_88] : memref<2x4x1x8xf32, #tpu.memory_space<vmem>>, vector<1x1x1x8xf32>
    %88 = vector.shape_cast %87 : vector<1x1x1x8xf32> to vector<1x8xf32>
    %89 = vector.broadcast %88 : vector<1x8xf32> to vector<48x8xf32>
    %90 = arith.addf %86, %89 : vector<48x8xf32>
    %c0_89 = arith.constant 0 : index
    %c2_90 = arith.constant 2 : index
    %c0_91 = arith.constant 0 : index
    %c0_92 = arith.constant 0 : index
    %91 = vector.load %arg9[%c0_89, %c2_90, %c0_91, %c0_92] : memref<2x4x32x8xf32, #tpu.memory_space<vmem>>, vector<1x1x32x8xf32>
    %92 = vector.shape_cast %91 : vector<1x1x32x8xf32> to vector<32x8xf32>
    %cst_93 = arith.constant dense<0.000000e+00> : vector<48x8xf32>
    %93 = tpu.matmul %34, %92, %cst_93 {dimension_numbers = #tpu.dot_dimension_numbers<[1], [0], [0], [1], [0, 0, 1, 1], [], []>} : vector<48x32xf32>, vector<32x8xf32>, vector<48x8xf32> -> vector<48x8xf32>
    %c0_94 = arith.constant 0 : index
    %c2_95 = arith.constant 2 : index
    %c0_96 = arith.constant 0 : index
    %c0_97 = arith.constant 0 : index
    %94 = vector.load %arg10[%c0_94, %c2_95, %c0_96, %c0_97] : memref<2x4x1x8xf32, #tpu.memory_space<vmem>>, vector<1x1x1x8xf32>
    %95 = vector.shape_cast %94 : vector<1x1x1x8xf32> to vector<1x8xf32>
    %96 = vector.broadcast %95 : vector<1x8xf32> to vector<48x8xf32>
    %97 = arith.addf %93, %96 : vector<48x8xf32>
    %c0_98 = arith.constant 0 : index
    %c3 = arith.constant 3 : index
    %c0_99 = arith.constant 0 : index
    %c0_100 = arith.constant 0 : index
    %98 = vector.load %arg5[%c0_98, %c3, %c0_99, %c0_100] : memref<2x4x32x8xf32, #tpu.memory_space<vmem>>, vector<1x1x32x8xf32>
    %99 = vector.shape_cast %98 : vector<1x1x32x8xf32> to vector<32x8xf32>
    %cst_101 = arith.constant dense<0.000000e+00> : vector<48x8xf32>
    %100 = tpu.matmul %34, %99, %cst_101 {dimension_numbers = #tpu.dot_dimension_numbers<[1], [0], [0], [1], [0, 0, 1, 1], [], []>} : vector<48x32xf32>, vector<32x8xf32>, vector<48x8xf32> -> vector<48x8xf32>
    %c0_102 = arith.constant 0 : index
    %c3_103 = arith.constant 3 : index
    %c0_104 = arith.constant 0 : index
    %c0_105 = arith.constant 0 : index
    %101 = vector.load %arg6[%c0_102, %c3_103, %c0_104, %c0_105] : memref<2x4x1x8xf32, #tpu.memory_space<vmem>>, vector<1x1x1x8xf32>
    %102 = vector.shape_cast %101 : vector<1x1x1x8xf32> to vector<1x8xf32>
    %103 = vector.broadcast %102 : vector<1x8xf32> to vector<48x8xf32>
    %104 = arith.addf %100, %103 : vector<48x8xf32>
    %c0_106 = arith.constant 0 : index
    %c3_107 = arith.constant 3 : index
    %c0_108 = arith.constant 0 : index
    %c0_109 = arith.constant 0 : index
    %105 = vector.load %arg7[%c0_106, %c3_107, %c0_108, %c0_109] : memref<2x4x32x8xf32, #tpu.memory_space<vmem>>, vector<1x1x32x8xf32>
    %106 = vector.shape_cast %105 : vector<1x1x32x8xf32> to vector<32x8xf32>
    %cst_110 = arith.constant dense<0.000000e+00> : vector<48x8xf32>
    %107 = tpu.matmul %34, %106, %cst_110 {dimension_numbers = #tpu.dot_dimension_numbers<[1], [0], [0], [1], [0, 0, 1, 1], [], []>} : vector<48x32xf32>, vector<32x8xf32>, vector<48x8xf32> -> vector<48x8xf32>
    %c0_111 = arith.constant 0 : index
    %c3_112 = arith.constant 3 : index
    %c0_113 = arith.constant 0 : index
    %c0_114 = arith.constant 0 : index
    %108 = vector.load %arg8[%c0_111, %c3_112, %c0_113, %c0_114] : memref<2x4x1x8xf32, #tpu.memory_space<vmem>>, vector<1x1x1x8xf32>
    %109 = vector.shape_cast %108 : vector<1x1x1x8xf32> to vector<1x8xf32>
    %110 = vector.broadcast %109 : vector<1x8xf32> to vector<48x8xf32>
    %111 = arith.addf %107, %110 : vector<48x8xf32>
    %c0_115 = arith.constant 0 : index
    %c3_116 = arith.constant 3 : index
    %c0_117 = arith.constant 0 : index
    %c0_118 = arith.constant 0 : index
    %112 = vector.load %arg9[%c0_115, %c3_116, %c0_117, %c0_118] : memref<2x4x32x8xf32, #tpu.memory_space<vmem>>, vector<1x1x32x8xf32>
    %113 = vector.shape_cast %112 : vector<1x1x32x8xf32> to vector<32x8xf32>
    %cst_119 = arith.constant dense<0.000000e+00> : vector<48x8xf32>
    %114 = tpu.matmul %34, %113, %cst_119 {dimension_numbers = #tpu.dot_dimension_numbers<[1], [0], [0], [1], [0, 0, 1, 1], [], []>} : vector<48x32xf32>, vector<32x8xf32>, vector<48x8xf32> -> vector<48x8xf32>
    %c0_120 = arith.constant 0 : index
    %c3_121 = arith.constant 3 : index
    %c0_122 = arith.constant 0 : index
    %c0_123 = arith.constant 0 : index
    %115 = vector.load %arg10[%c0_120, %c3_121, %c0_122, %c0_123] : memref<2x4x1x8xf32, #tpu.memory_space<vmem>>, vector<1x1x1x8xf32>
    %116 = vector.shape_cast %115 : vector<1x1x1x8xf32> to vector<1x8xf32>
    %117 = vector.broadcast %116 : vector<1x8xf32> to vector<48x8xf32>
    %118 = arith.addf %114, %117 : vector<48x8xf32>
    %cst_124 = arith.constant 0.000000e+00 : f32
    %119 = vector.broadcast %cst_124 : f32 to vector<17x32xf32>
    %120 = vector.extract_strided_slice %41 {offsets = [0, 0], sizes = [17, 8], strides = [1, 1]} : vector<48x8xf32> to vector<17x8xf32>
    %121 = vector.extract_strided_slice %48 {offsets = [0, 0], sizes = [17, 8], strides = [1, 1]} : vector<48x8xf32> to vector<17x8xf32>
    %122 = vector.extract_strided_slice %55 {offsets = [0, 0], sizes = [17, 8], strides = [1, 1]} : vector<48x8xf32> to vector<17x8xf32>
    %cst_125 = arith.constant dense<0.000000e+00> : vector<17x17xf32>
    %123 = tpu.matmul %120, %121, %cst_125 {dimension_numbers = #tpu.dot_dimension_numbers<[1], [1], [0], [0], [0, 0, 1, 0], [], []>} : vector<17x8xf32>, vector<17x8xf32>, vector<17x17xf32> -> vector<17x17xf32>
    %cst_126 = arith.constant dense<0xFF800000> : vector<17xf32>
    %124 = vector.multi_reduction <maximumf>, %123, %cst_126 [1] : vector<17x17xf32> to vector<17xf32>
    %125 = vector.shape_cast %124 : vector<17xf32> to vector<17x1xf32>
    %126 = vector.broadcast %125 : vector<17x1xf32> to vector<17x17xf32>
    %127 = arith.subf %123, %126 : vector<17x17xf32>
    %128 = math.exp %127 : vector<17x17xf32>
    %cst_127 = arith.constant dense<0.000000e+00> : vector<17xf32>
    %129 = vector.multi_reduction <add>, %128, %cst_127 [1] : vector<17x17xf32> to vector<17xf32>
    %130 = vector.shape_cast %129 : vector<17xf32> to vector<17x1xf32>
    %131 = tpu.reciprocal %130 {approx = true} : vector<17x1xf32> -> vector<17x1xf32>
    %132 = vector.broadcast %131 : vector<17x1xf32> to vector<17x17xf32>
    %133 = arith.mulf %128, %132 : vector<17x17xf32>
    %cst_128 = arith.constant dense<0.000000e+00> : vector<17x8xf32>
    %134 = tpu.matmul %133, %122, %cst_128 {dimension_numbers = #tpu.dot_dimension_numbers<[1], [0], [0], [1], [0, 0, 1, 1], [], []>} : vector<17x17xf32>, vector<17x8xf32>, vector<17x8xf32> -> vector<17x8xf32>
    %c0_129 = arith.constant 0 : index
    %c0_130 = arith.constant 0 : index
    %c0_131 = arith.constant 0 : index
    %c0_132 = arith.constant 0 : index
    %135 = vector.load %arg11[%c0_129, %c0_130, %c0_131, %c0_132] : memref<2x4x8x32xf32, #tpu.memory_space<vmem>>, vector<1x1x8x32xf32>
    %136 = vector.shape_cast %135 : vector<1x1x8x32xf32> to vector<8x32xf32>
    %cst_133 = arith.constant dense<0.000000e+00> : vector<17x32xf32>
    %137 = tpu.matmul %134, %136, %cst_133 {dimension_numbers = #tpu.dot_dimension_numbers<[1], [0], [0], [1], [0, 0, 1, 1], [], []>} : vector<17x8xf32>, vector<8x32xf32>, vector<17x32xf32> -> vector<17x32xf32>
    %138 = arith.addf %119, %137 : vector<17x32xf32>
    %139 = vector.extract_strided_slice %62 {offsets = [0, 0], sizes = [17, 8], strides = [1, 1]} : vector<48x8xf32> to vector<17x8xf32>
    %140 = vector.extract_strided_slice %69 {offsets = [0, 0], sizes = [17, 8], strides = [1, 1]} : vector<48x8xf32> to vector<17x8xf32>
    %141 = vector.extract_strided_slice %76 {offsets = [0, 0], sizes = [17, 8], strides = [1, 1]} : vector<48x8xf32> to vector<17x8xf32>
    %cst_134 = arith.constant dense<0.000000e+00> : vector<17x17xf32>
    %142 = tpu.matmul %139, %140, %cst_134 {dimension_numbers = #tpu.dot_dimension_numbers<[1], [1], [0], [0], [0, 0, 1, 0], [], []>} : vector<17x8xf32>, vector<17x8xf32>, vector<17x17xf32> -> vector<17x17xf32>
    %cst_135 = arith.constant dense<0xFF800000> : vector<17xf32>
    %143 = vector.multi_reduction <maximumf>, %142, %cst_135 [1] : vector<17x17xf32> to vector<17xf32>
    %144 = vector.shape_cast %143 : vector<17xf32> to vector<17x1xf32>
    %145 = vector.broadcast %144 : vector<17x1xf32> to vector<17x17xf32>
    %146 = arith.subf %142, %145 : vector<17x17xf32>
    %147 = math.exp %146 : vector<17x17xf32>
    %cst_136 = arith.constant dense<0.000000e+00> : vector<17xf32>
    %148 = vector.multi_reduction <add>, %147, %cst_136 [1] : vector<17x17xf32> to vector<17xf32>
    %149 = vector.shape_cast %148 : vector<17xf32> to vector<17x1xf32>
    %150 = tpu.reciprocal %149 {approx = true} : vector<17x1xf32> -> vector<17x1xf32>
    %151 = vector.broadcast %150 : vector<17x1xf32> to vector<17x17xf32>
    %152 = arith.mulf %147, %151 : vector<17x17xf32>
    %cst_137 = arith.constant dense<0.000000e+00> : vector<17x8xf32>
    %153 = tpu.matmul %152, %141, %cst_137 {dimension_numbers = #tpu.dot_dimension_numbers<[1], [0], [0], [1], [0, 0, 1, 1], [], []>} : vector<17x17xf32>, vector<17x8xf32>, vector<17x8xf32> -> vector<17x8xf32>
    %c0_138 = arith.constant 0 : index
    %c1_139 = arith.constant 1 : index
    %c0_140 = arith.constant 0 : index
    %c0_141 = arith.constant 0 : index
    %154 = vector.load %arg11[%c0_138, %c1_139, %c0_140, %c0_141] : memref<2x4x8x32xf32, #tpu.memory_space<vmem>>, vector<1x1x8x32xf32>
    %155 = vector.shape_cast %154 : vector<1x1x8x32xf32> to vector<8x32xf32>
    %cst_142 = arith.constant dense<0.000000e+00> : vector<17x32xf32>
    %156 = tpu.matmul %153, %155, %cst_142 {dimension_numbers = #tpu.dot_dimension_numbers<[1], [0], [0], [1], [0, 0, 1, 1], [], []>} : vector<17x8xf32>, vector<8x32xf32>, vector<17x32xf32> -> vector<17x32xf32>
    %157 = arith.addf %138, %156 : vector<17x32xf32>
    %158 = vector.extract_strided_slice %83 {offsets = [0, 0], sizes = [17, 8], strides = [1, 1]} : vector<48x8xf32> to vector<17x8xf32>
    %159 = vector.extract_strided_slice %90 {offsets = [0, 0], sizes = [17, 8], strides = [1, 1]} : vector<48x8xf32> to vector<17x8xf32>
    %160 = vector.extract_strided_slice %97 {offsets = [0, 0], sizes = [17, 8], strides = [1, 1]} : vector<48x8xf32> to vector<17x8xf32>
    %cst_143 = arith.constant dense<0.000000e+00> : vector<17x17xf32>
    %161 = tpu.matmul %158, %159, %cst_143 {dimension_numbers = #tpu.dot_dimension_numbers<[1], [1], [0], [0], [0, 0, 1, 0], [], []>} : vector<17x8xf32>, vector<17x8xf32>, vector<17x17xf32> -> vector<17x17xf32>
    %cst_144 = arith.constant dense<0xFF800000> : vector<17xf32>
    %162 = vector.multi_reduction <maximumf>, %161, %cst_144 [1] : vector<17x17xf32> to vector<17xf32>
    %163 = vector.shape_cast %162 : vector<17xf32> to vector<17x1xf32>
    %164 = vector.broadcast %163 : vector<17x1xf32> to vector<17x17xf32>
    %165 = arith.subf %161, %164 : vector<17x17xf32>
    %166 = math.exp %165 : vector<17x17xf32>
    %cst_145 = arith.constant dense<0.000000e+00> : vector<17xf32>
    %167 = vector.multi_reduction <add>, %166, %cst_145 [1] : vector<17x17xf32> to vector<17xf32>
    %168 = vector.shape_cast %167 : vector<17xf32> to vector<17x1xf32>
    %169 = tpu.reciprocal %168 {approx = true} : vector<17x1xf32> -> vector<17x1xf32>
    %170 = vector.broadcast %169 : vector<17x1xf32> to vector<17x17xf32>
    %171 = arith.mulf %166, %170 : vector<17x17xf32>
    %cst_146 = arith.constant dense<0.000000e+00> : vector<17x8xf32>
    %172 = tpu.matmul %171, %160, %cst_146 {dimension_numbers = #tpu.dot_dimension_numbers<[1], [0], [0], [1], [0, 0, 1, 1], [], []>} : vector<17x17xf32>, vector<17x8xf32>, vector<17x8xf32> -> vector<17x8xf32>
    %c0_147 = arith.constant 0 : index
    %c2_148 = arith.constant 2 : index
    %c0_149 = arith.constant 0 : index
    %c0_150 = arith.constant 0 : index
    %173 = vector.load %arg11[%c0_147, %c2_148, %c0_149, %c0_150] : memref<2x4x8x32xf32, #tpu.memory_space<vmem>>, vector<1x1x8x32xf32>
    %174 = vector.shape_cast %173 : vector<1x1x8x32xf32> to vector<8x32xf32>
    %cst_151 = arith.constant dense<0.000000e+00> : vector<17x32xf32>
    %175 = tpu.matmul %172, %174, %cst_151 {dimension_numbers = #tpu.dot_dimension_numbers<[1], [0], [0], [1], [0, 0, 1, 1], [], []>} : vector<17x8xf32>, vector<8x32xf32>, vector<17x32xf32> -> vector<17x32xf32>
    %176 = arith.addf %157, %175 : vector<17x32xf32>
    %177 = vector.extract_strided_slice %104 {offsets = [0, 0], sizes = [17, 8], strides = [1, 1]} : vector<48x8xf32> to vector<17x8xf32>
    %178 = vector.extract_strided_slice %111 {offsets = [0, 0], sizes = [17, 8], strides = [1, 1]} : vector<48x8xf32> to vector<17x8xf32>
    %179 = vector.extract_strided_slice %118 {offsets = [0, 0], sizes = [17, 8], strides = [1, 1]} : vector<48x8xf32> to vector<17x8xf32>
    %cst_152 = arith.constant dense<0.000000e+00> : vector<17x17xf32>
    %180 = tpu.matmul %177, %178, %cst_152 {dimension_numbers = #tpu.dot_dimension_numbers<[1], [1], [0], [0], [0, 0, 1, 0], [], []>} : vector<17x8xf32>, vector<17x8xf32>, vector<17x17xf32> -> vector<17x17xf32>
    %cst_153 = arith.constant dense<0xFF800000> : vector<17xf32>
    %181 = vector.multi_reduction <maximumf>, %180, %cst_153 [1] : vector<17x17xf32> to vector<17xf32>
    %182 = vector.shape_cast %181 : vector<17xf32> to vector<17x1xf32>
    %183 = vector.broadcast %182 : vector<17x1xf32> to vector<17x17xf32>
    %184 = arith.subf %180, %183 : vector<17x17xf32>
    %185 = math.exp %184 : vector<17x17xf32>
    %cst_154 = arith.constant dense<0.000000e+00> : vector<17xf32>
    %186 = vector.multi_reduction <add>, %185, %cst_154 [1] : vector<17x17xf32> to vector<17xf32>
    %187 = vector.shape_cast %186 : vector<17xf32> to vector<17x1xf32>
    %188 = tpu.reciprocal %187 {approx = true} : vector<17x1xf32> -> vector<17x1xf32>
    %189 = vector.broadcast %188 : vector<17x1xf32> to vector<17x17xf32>
    %190 = arith.mulf %185, %189 : vector<17x17xf32>
    %cst_155 = arith.constant dense<0.000000e+00> : vector<17x8xf32>
    %191 = tpu.matmul %190, %179, %cst_155 {dimension_numbers = #tpu.dot_dimension_numbers<[1], [0], [0], [1], [0, 0, 1, 1], [], []>} : vector<17x17xf32>, vector<17x8xf32>, vector<17x8xf32> -> vector<17x8xf32>
    %c0_156 = arith.constant 0 : index
    %c3_157 = arith.constant 3 : index
    %c0_158 = arith.constant 0 : index
    %c0_159 = arith.constant 0 : index
    %192 = vector.load %arg11[%c0_156, %c3_157, %c0_158, %c0_159] : memref<2x4x8x32xf32, #tpu.memory_space<vmem>>, vector<1x1x8x32xf32>
    %193 = vector.shape_cast %192 : vector<1x1x8x32xf32> to vector<8x32xf32>
    %cst_160 = arith.constant dense<0.000000e+00> : vector<17x32xf32>
    %194 = tpu.matmul %191, %193, %cst_160 {dimension_numbers = #tpu.dot_dimension_numbers<[1], [0], [0], [1], [0, 0, 1, 1], [], []>} : vector<17x8xf32>, vector<8x32xf32>, vector<17x32xf32> -> vector<17x32xf32>
    %195 = arith.addf %176, %194 : vector<17x32xf32>
    %c0_161 = arith.constant 0 : index
    %c0_162 = arith.constant 0 : index
    %196 = vector.load %arg24[%c0_161, %c0_162] : memref<48x32xf32, #tpu.memory_space<vmem>>, vector<17x32xf32>
    tpu.vector_store %arg24[%c0_161, %c0_162], %195 {strides = array<i32>} : memref<48x32xf32, #tpu.memory_space<vmem>>, vector<17x32xf32>,
    %cst_163 = arith.constant 0.000000e+00 : f32
    %197 = vector.broadcast %cst_163 : f32 to vector<17x32xf32>
    %198 = vector.extract_strided_slice %41 {offsets = [24, 0], sizes = [17, 8], strides = [1, 1]} : vector<48x8xf32> to vector<17x8xf32>
    %199 = vector.extract_strided_slice %48 {offsets = [24, 0], sizes = [17, 8], strides = [1, 1]} : vector<48x8xf32> to vector<17x8xf32>
    %200 = vector.extract_strided_slice %55 {offsets = [24, 0], sizes = [17, 8], strides = [1, 1]} : vector<48x8xf32> to vector<17x8xf32>
    %cst_164 = arith.constant dense<0.000000e+00> : vector<17x17xf32>
    %201 = tpu.matmul %198, %199, %cst_164 {dimension_numbers = #tpu.dot_dimension_numbers<[1], [1], [0], [0], [0, 0, 1, 0], [], []>} : vector<17x8xf32>, vector<17x8xf32>, vector<17x17xf32> -> vector<17x17xf32>
    %cst_165 = arith.constant dense<0xFF800000> : vector<17xf32>
    %202 = vector.multi_reduction <maximumf>, %201, %cst_165 [1] : vector<17x17xf32> to vector<17xf32>
    %203 = vector.shape_cast %202 : vector<17xf32> to vector<17x1xf32>
    %204 = vector.broadcast %203 : vector<17x1xf32> to vector<17x17xf32>
    %205 = arith.subf %201, %204 : vector<17x17xf32>
    %206 = math.exp %205 : vector<17x17xf32>
    %cst_166 = arith.constant dense<0.000000e+00> : vector<17xf32>
    %207 = vector.multi_reduction <add>, %206, %cst_166 [1] : vector<17x17xf32> to vector<17xf32>
    %208 = vector.shape_cast %207 : vector<17xf32> to vector<17x1xf32>
    %209 = tpu.reciprocal %208 {approx = true} : vector<17x1xf32> -> vector<17x1xf32>
    %210 = vector.broadcast %209 : vector<17x1xf32> to vector<17x17xf32>
    %211 = arith.mulf %206, %210 : vector<17x17xf32>
    %cst_167 = arith.constant dense<0.000000e+00> : vector<17x8xf32>
    %212 = tpu.matmul %211, %200, %cst_167 {dimension_numbers = #tpu.dot_dimension_numbers<[1], [0], [0], [1], [0, 0, 1, 1], [], []>} : vector<17x17xf32>, vector<17x8xf32>, vector<17x8xf32> -> vector<17x8xf32>
    %c0_168 = arith.constant 0 : index
    %c0_169 = arith.constant 0 : index
    %c0_170 = arith.constant 0 : index
    %c0_171 = arith.constant 0 : index
    %213 = vector.load %arg11[%c0_168, %c0_169, %c0_170, %c0_171] : memref<2x4x8x32xf32, #tpu.memory_space<vmem>>, vector<1x1x8x32xf32>
    %214 = vector.shape_cast %213 : vector<1x1x8x32xf32> to vector<8x32xf32>
    %cst_172 = arith.constant dense<0.000000e+00> : vector<17x32xf32>
    %215 = tpu.matmul %212, %214, %cst_172 {dimension_numbers = #tpu.dot_dimension_numbers<[1], [0], [0], [1], [0, 0, 1, 1], [], []>} : vector<17x8xf32>, vector<8x32xf32>, vector<17x32xf32> -> vector<17x32xf32>
    %216 = arith.addf %197, %215 : vector<17x32xf32>
    %217 = vector.extract_strided_slice %62 {offsets = [24, 0], sizes = [17, 8], strides = [1, 1]} : vector<48x8xf32> to vector<17x8xf32>
    %218 = vector.extract_strided_slice %69 {offsets = [24, 0], sizes = [17, 8], strides = [1, 1]} : vector<48x8xf32> to vector<17x8xf32>
    %219 = vector.extract_strided_slice %76 {offsets = [24, 0], sizes = [17, 8], strides = [1, 1]} : vector<48x8xf32> to vector<17x8xf32>
    %cst_173 = arith.constant dense<0.000000e+00> : vector<17x17xf32>
    %220 = tpu.matmul %217, %218, %cst_173 {dimension_numbers = #tpu.dot_dimension_numbers<[1], [1], [0], [0], [0, 0, 1, 0], [], []>} : vector<17x8xf32>, vector<17x8xf32>, vector<17x17xf32> -> vector<17x17xf32>
    %cst_174 = arith.constant dense<0xFF800000> : vector<17xf32>
    %221 = vector.multi_reduction <maximumf>, %220, %cst_174 [1] : vector<17x17xf32> to vector<17xf32>
    %222 = vector.shape_cast %221 : vector<17xf32> to vector<17x1xf32>
    %223 = vector.broadcast %222 : vector<17x1xf32> to vector<17x17xf32>
    %224 = arith.subf %220, %223 : vector<17x17xf32>
    %225 = math.exp %224 : vector<17x17xf32>
    %cst_175 = arith.constant dense<0.000000e+00> : vector<17xf32>
    %226 = vector.multi_reduction <add>, %225, %cst_175 [1] : vector<17x17xf32> to vector<17xf32>
    %227 = vector.shape_cast %226 : vector<17xf32> to vector<17x1xf32>
    %228 = tpu.reciprocal %227 {approx = true} : vector<17x1xf32> -> vector<17x1xf32>
    %229 = vector.broadcast %228 : vector<17x1xf32> to vector<17x17xf32>
    %230 = arith.mulf %225, %229 : vector<17x17xf32>
    %cst_176 = arith.constant dense<0.000000e+00> : vector<17x8xf32>
    %231 = tpu.matmul %230, %219, %cst_176 {dimension_numbers = #tpu.dot_dimension_numbers<[1], [0], [0], [1], [0, 0, 1, 1], [], []>} : vector<17x17xf32>, vector<17x8xf32>, vector<17x8xf32> -> vector<17x8xf32>
    %c0_177 = arith.constant 0 : index
    %c1_178 = arith.constant 1 : index
    %c0_179 = arith.constant 0 : index
    %c0_180 = arith.constant 0 : index
    %232 = vector.load %arg11[%c0_177, %c1_178, %c0_179, %c0_180] : memref<2x4x8x32xf32, #tpu.memory_space<vmem>>, vector<1x1x8x32xf32>
    %233 = vector.shape_cast %232 : vector<1x1x8x32xf32> to vector<8x32xf32>
    %cst_181 = arith.constant dense<0.000000e+00> : vector<17x32xf32>
    %234 = tpu.matmul %231, %233, %cst_181 {dimension_numbers = #tpu.dot_dimension_numbers<[1], [0], [0], [1], [0, 0, 1, 1], [], []>} : vector<17x8xf32>, vector<8x32xf32>, vector<17x32xf32> -> vector<17x32xf32>
    %235 = arith.addf %216, %234 : vector<17x32xf32>
    %236 = vector.extract_strided_slice %83 {offsets = [24, 0], sizes = [17, 8], strides = [1, 1]} : vector<48x8xf32> to vector<17x8xf32>
    %237 = vector.extract_strided_slice %90 {offsets = [24, 0], sizes = [17, 8], strides = [1, 1]} : vector<48x8xf32> to vector<17x8xf32>
    %238 = vector.extract_strided_slice %97 {offsets = [24, 0], sizes = [17, 8], strides = [1, 1]} : vector<48x8xf32> to vector<17x8xf32>
    %cst_182 = arith.constant dense<0.000000e+00> : vector<17x17xf32>
    %239 = tpu.matmul %236, %237, %cst_182 {dimension_numbers = #tpu.dot_dimension_numbers<[1], [1], [0], [0], [0, 0, 1, 0], [], []>} : vector<17x8xf32>, vector<17x8xf32>, vector<17x17xf32> -> vector<17x17xf32>
    %cst_183 = arith.constant dense<0xFF800000> : vector<17xf32>
    %240 = vector.multi_reduction <maximumf>, %239, %cst_183 [1] : vector<17x17xf32> to vector<17xf32>
    %241 = vector.shape_cast %240 : vector<17xf32> to vector<17x1xf32>
    %242 = vector.broadcast %241 : vector<17x1xf32> to vector<17x17xf32>
    %243 = arith.subf %239, %242 : vector<17x17xf32>
    %244 = math.exp %243 : vector<17x17xf32>
    %cst_184 = arith.constant dense<0.000000e+00> : vector<17xf32>
    %245 = vector.multi_reduction <add>, %244, %cst_184 [1] : vector<17x17xf32> to vector<17xf32>
    %246 = vector.shape_cast %245 : vector<17xf32> to vector<17x1xf32>
    %247 = tpu.reciprocal %246 {approx = true} : vector<17x1xf32> -> vector<17x1xf32>
    %248 = vector.broadcast %247 : vector<17x1xf32> to vector<17x17xf32>
    %249 = arith.mulf %244, %248 : vector<17x17xf32>
    %cst_185 = arith.constant dense<0.000000e+00> : vector<17x8xf32>
    %250 = tpu.matmul %249, %238, %cst_185 {dimension_numbers = #tpu.dot_dimension_numbers<[1], [0], [0], [1], [0, 0, 1, 1], [], []>} : vector<17x17xf32>, vector<17x8xf32>, vector<17x8xf32> -> vector<17x8xf32>
    %c0_186 = arith.constant 0 : index
    %c2_187 = arith.constant 2 : index
    %c0_188 = arith.constant 0 : index
    %c0_189 = arith.constant 0 : index
    %251 = vector.load %arg11[%c0_186, %c2_187, %c0_188, %c0_189] : memref<2x4x8x32xf32, #tpu.memory_space<vmem>>, vector<1x1x8x32xf32>
    %252 = vector.shape_cast %251 : vector<1x1x8x32xf32> to vector<8x32xf32>
    %cst_190 = arith.constant dense<0.000000e+00> : vector<17x32xf32>
    %253 = tpu.matmul %250, %252, %cst_190 {dimension_numbers = #tpu.dot_dimension_numbers<[1], [0], [0], [1], [0, 0, 1, 1], [], []>} : vector<17x8xf32>, vector<8x32xf32>, vector<17x32xf32> -> vector<17x32xf32>
    %254 = arith.addf %235, %253 : vector<17x32xf32>
    %255 = vector.extract_strided_slice %104 {offsets = [24, 0], sizes = [17, 8], strides = [1, 1]} : vector<48x8xf32> to vector<17x8xf32>
    %256 = vector.extract_strided_slice %111 {offsets = [24, 0], sizes = [17, 8], strides = [1, 1]} : vector<48x8xf32> to vector<17x8xf32>
    %257 = vector.extract_strided_slice %118 {offsets = [24, 0], sizes = [17, 8], strides = [1, 1]} : vector<48x8xf32> to vector<17x8xf32>
    %cst_191 = arith.constant dense<0.000000e+00> : vector<17x17xf32>
    %258 = tpu.matmul %255, %256, %cst_191 {dimension_numbers = #tpu.dot_dimension_numbers<[1], [1], [0], [0], [0, 0, 1, 0], [], []>} : vector<17x8xf32>, vector<17x8xf32>, vector<17x17xf32> -> vector<17x17xf32>
    %cst_192 = arith.constant dense<0xFF800000> : vector<17xf32>
    %259 = vector.multi_reduction <maximumf>, %258, %cst_192 [1] : vector<17x17xf32> to vector<17xf32>
    %260 = vector.shape_cast %259 : vector<17xf32> to vector<17x1xf32>
    %261 = vector.broadcast %260 : vector<17x1xf32> to vector<17x17xf32>
    %262 = arith.subf %258, %261 : vector<17x17xf32>
    %263 = math.exp %262 : vector<17x17xf32>
    %cst_193 = arith.constant dense<0.000000e+00> : vector<17xf32>
    %264 = vector.multi_reduction <add>, %263, %cst_193 [1] : vector<17x17xf32> to vector<17xf32>
    %265 = vector.shape_cast %264 : vector<17xf32> to vector<17x1xf32>
    %266 = tpu.reciprocal %265 {approx = true} : vector<17x1xf32> -> vector<17x1xf32>
    %267 = vector.broadcast %266 : vector<17x1xf32> to vector<17x17xf32>
    %268 = arith.mulf %263, %267 : vector<17x17xf32>
    %cst_194 = arith.constant dense<0.000000e+00> : vector<17x8xf32>
    %269 = tpu.matmul %268, %257, %cst_194 {dimension_numbers = #tpu.dot_dimension_numbers<[1], [0], [0], [1], [0, 0, 1, 1], [], []>} : vector<17x17xf32>, vector<17x8xf32>, vector<17x8xf32> -> vector<17x8xf32>
    %c0_195 = arith.constant 0 : index
    %c3_196 = arith.constant 3 : index
    %c0_197 = arith.constant 0 : index
    %c0_198 = arith.constant 0 : index
    %270 = vector.load %arg11[%c0_195, %c3_196, %c0_197, %c0_198] : memref<2x4x8x32xf32, #tpu.memory_space<vmem>>, vector<1x1x8x32xf32>
    %271 = vector.shape_cast %270 : vector<1x1x8x32xf32> to vector<8x32xf32>
    %cst_199 = arith.constant dense<0.000000e+00> : vector<17x32xf32>
    %272 = tpu.matmul %269, %271, %cst_199 {dimension_numbers = #tpu.dot_dimension_numbers<[1], [0], [0], [1], [0, 0, 1, 1], [], []>} : vector<17x8xf32>, vector<8x32xf32>, vector<17x32xf32> -> vector<17x32xf32>
    %273 = arith.addf %254, %272 : vector<17x32xf32>
    %c24 = arith.constant 24 : index
    %c0_200 = arith.constant 0 : index
    %274 = vector.load %arg24[%c24, %c0_200] : memref<48x32xf32, #tpu.memory_space<vmem>>, vector<17x32xf32>
    tpu.vector_store %arg24[%c24, %c0_200], %273 {strides = array<i32>} : memref<48x32xf32, #tpu.memory_space<vmem>>, vector<17x32xf32>,
    %c0_201 = arith.constant 0 : index
    %c0_202 = arith.constant 0 : index
    %275 = vector.load %arg24[%c0_201, %c0_202] : memref<48x32xf32, #tpu.memory_space<vmem>>, vector<48x32xf32>
    %276 = arith.addf %4, %275 : vector<48x32xf32>
    %c0_203 = arith.constant 0 : index
    %c0_204 = arith.constant 0 : index
    %c0_205 = arith.constant 0 : index
    %277 = vector.load %arg12[%c0_203, %c0_204, %c0_205] : memref<2x1x32xf32, #tpu.memory_space<vmem>>, vector<1x1x32xf32>
    %278 = vector.shape_cast %277 : vector<1x1x32xf32> to vector<1x32xf32>
    %279 = vector.broadcast %278 : vector<1x32xf32> to vector<48x32xf32>
    %280 = arith.addf %276, %279 : vector<48x32xf32>
    %c0_206 = arith.constant 0 : index
    %c0_207 = arith.constant 0 : index
    %c0_208 = arith.constant 0 : index
    %281 = vector.load %arg13[%c0_206, %c0_207, %c0_208] : memref<2x1x32xf32, #tpu.memory_space<vmem>>, vector<1x1x32xf32>
    %282 = vector.shape_cast %281 : vector<1x1x32xf32> to vector<1x32xf32>
    %c0_209 = arith.constant 0 : index
    %c0_210 = arith.constant 0 : index
    %c0_211 = arith.constant 0 : index
    %283 = vector.load %arg14[%c0_209, %c0_210, %c0_211] : memref<2x1x32xf32, #tpu.memory_space<vmem>>, vector<1x1x32xf32>
    %284 = vector.shape_cast %283 : vector<1x1x32xf32> to vector<1x32xf32>
    %cst_212 = arith.constant dense<0.000000e+00> : vector<48xf32>
    %285 = vector.multi_reduction <add>, %280, %cst_212 [1] : vector<48x32xf32> to vector<48xf32>
    %286 = vector.shape_cast %285 : vector<48xf32> to vector<48x1xf32>
    %cst_213 = arith.constant 3.200000e+01 : f32
    %287 = vector.broadcast %cst_213 : f32 to vector<48x1xf32>
    %288 = arith.divf %286, %287 : vector<48x1xf32>
    %289 = vector.broadcast %288 : vector<48x1xf32> to vector<48x32xf32>
    %290 = arith.subf %280, %289 : vector<48x32xf32>
    %291 = vector.broadcast %288 : vector<48x1xf32> to vector<48x32xf32>
    %292 = arith.subf %280, %291 : vector<48x32xf32>
    %293 = arith.mulf %290, %292 : vector<48x32xf32>
    %cst_214 = arith.constant dense<0.000000e+00> : vector<48xf32>
    %294 = vector.multi_reduction <add>, %293, %cst_214 [1] : vector<48x32xf32> to vector<48xf32>
    %295 = vector.shape_cast %294 : vector<48xf32> to vector<48x1xf32>
    %cst_215 = arith.constant 3.200000e+01 : f32
    %296 = vector.broadcast %cst_215 : f32 to vector<48x1xf32>
    %297 = arith.divf %295, %296 : vector<48x1xf32>
    %298 = vector.broadcast %288 : vector<48x1xf32> to vector<48x32xf32>
    %299 = arith.subf %280, %298 : vector<48x32xf32>
    %cst_216 = arith.constant 9.99999997E-7 : f32
    %300 = vector.broadcast %cst_216 : f32 to vector<48x1xf32>
    %301 = arith.addf %297, %300 : vector<48x1xf32>
    %302 = math.rsqrt %301 : vector<48x1xf32>
    %303 = vector.broadcast %302 : vector<48x1xf32> to vector<48x32xf32>
    %304 = arith.mulf %299, %303 : vector<48x32xf32>
    %305 = vector.broadcast %282 : vector<1x32xf32> to vector<48x32xf32>
    %306 = arith.mulf %304, %305 : vector<48x32xf32>
    %307 = vector.broadcast %284 : vector<1x32xf32> to vector<48x32xf32>
    %308 = arith.addf %306, %307 : vector<48x32xf32>
    %c0_217 = arith.constant 0 : index
    %c0_218 = arith.constant 0 : index
    %c0_219 = arith.constant 0 : index
    %309 = vector.load %arg15[%c0_217, %c0_218, %c0_219] : memref<2x32x64xf32, #tpu.memory_space<vmem>>, vector<1x32x64xf32>
    %310 = vector.shape_cast %309 : vector<1x32x64xf32> to vector<32x64xf32>
    %cst_220 = arith.constant dense<0.000000e+00> : vector<48x64xf32>
    %311 = tpu.matmul %308, %310, %cst_220 {dimension_numbers = #tpu.dot_dimension_numbers<[1], [0], [0], [1], [0, 0, 1, 1], [], []>} : vector<48x32xf32>, vector<32x64xf32>, vector<48x64xf32> -> vector<48x64xf32>
    %c0_221 = arith.constant 0 : index
    %c0_222 = arith.constant 0 : index
    %c0_223 = arith.constant 0 : index
    %312 = vector.load %arg16[%c0_221, %c0_222, %c0_223] : memref<2x1x64xf32, #tpu.memory_space<vmem>>, vector<1x1x64xf32>
    %313 = vector.shape_cast %312 : vector<1x1x64xf32> to vector<1x64xf32>
    %314 = vector.broadcast %313 : vector<1x64xf32> to vector<48x64xf32>
    %315 = arith.addf %311, %314 : vector<48x64xf32>
    %cst_224 = arith.constant 5.000000e-01 : f32
    %316 = vector.broadcast %cst_224 : f32 to vector<48x64xf32>
    %317 = arith.mulf %316, %315 : vector<48x64xf32>
    %cst_225 = arith.constant 0.707106769 : f32
    %318 = vector.broadcast %cst_225 : f32 to vector<48x64xf32>
    %319 = arith.mulf %315, %318 : vector<48x64xf32>
    %320 = math.erf %319 : vector<48x64xf32>
    %cst_226 = arith.constant 1.000000e+00 : f32
    %321 = vector.broadcast %cst_226 : f32 to vector<48x64xf32>
    %322 = arith.addf %321, %320 : vector<48x64xf32>
    %323 = arith.mulf %317, %322 : vector<48x64xf32>
    %c0_227 = arith.constant 0 : index
    %c0_228 = arith.constant 0 : index
    %c0_229 = arith.constant 0 : index
    %324 = vector.load %arg17[%c0_227, %c0_228, %c0_229] : memref<2x64x32xf32, #tpu.memory_space<vmem>>, vector<1x64x32xf32>
    %325 = vector.shape_cast %324 : vector<1x64x32xf32> to vector<64x32xf32>
    %cst_230 = arith.constant dense<0.000000e+00> : vector<48x32xf32>
    %326 = tpu.matmul %323, %325, %cst_230 {dimension_numbers = #tpu.dot_dimension_numbers<[1], [0], [0], [1], [0, 0, 1, 1], [], []>} : vector<48x64xf32>, vector<64x32xf32>, vector<48x32xf32> -> vector<48x32xf32>
    %327 = arith.addf %280, %326 : vector<48x32xf32>
    %c0_231 = arith.constant 0 : index
    %c0_232 = arith.constant 0 : index
    %c0_233 = arith.constant 0 : index
    %328 = vector.load %arg18[%c0_231, %c0_232, %c0_233] : memref<2x1x32xf32, #tpu.memory_space<vmem>>, vector<1x1x32xf32>
    %329 = vector.shape_cast %328 : vector<1x1x32xf32> to vector<1x32xf32>
    %330 = vector.broadcast %329 : vector<1x32xf32> to vector<48x32xf32>
    %331 = arith.addf %327, %330 : vector<48x32xf32>
    %c1_234 = arith.constant 1 : index
    %c0_235 = arith.constant 0 : index
    %c0_236 = arith.constant 0 : index
    %332 = vector.load %arg3[%c1_234, %c0_235, %c0_236] : memref<2x1x32xf32, #tpu.memory_space<vmem>>, vector<1x1x32xf32>
    %333 = vector.shape_cast %332 : vector<1x1x32xf32> to vector<1x32xf32>
    %c1_237 = arith.constant 1 : index
    %c0_238 = arith.constant 0 : index
    %c0_239 = arith.constant 0 : index
    %334 = vector.load %arg4[%c1_237, %c0_238, %c0_239] : memref<2x1x32xf32, #tpu.memory_space<vmem>>, vector<1x1x32xf32>
    %335 = vector.shape_cast %334 : vector<1x1x32xf32> to vector<1x32xf32>
    %cst_240 = arith.constant dense<0.000000e+00> : vector<48xf32>
    %336 = vector.multi_reduction <add>, %331, %cst_240 [1] : vector<48x32xf32> to vector<48xf32>
    %337 = vector.shape_cast %336 : vector<48xf32> to vector<48x1xf32>
    %cst_241 = arith.constant 3.200000e+01 : f32
    %338 = vector.broadcast %cst_241 : f32 to vector<48x1xf32>
    %339 = arith.divf %337, %338 : vector<48x1xf32>
    %340 = vector.broadcast %339 : vector<48x1xf32> to vector<48x32xf32>
    %341 = arith.subf %331, %340 : vector<48x32xf32>
    %342 = vector.broadcast %339 : vector<48x1xf32> to vector<48x32xf32>
    %343 = arith.subf %331, %342 : vector<48x32xf32>
    %344 = arith.mulf %341, %343 : vector<48x32xf32>
    %cst_242 = arith.constant dense<0.000000e+00> : vector<48xf32>
    %345 = vector.multi_reduction <add>, %344, %cst_242 [1] : vector<48x32xf32> to vector<48xf32>
    %346 = vector.shape_cast %345 : vector<48xf32> to vector<48x1xf32>
    %cst_243 = arith.constant 3.200000e+01 : f32
    %347 = vector.broadcast %cst_243 : f32 to vector<48x1xf32>
    %348 = arith.divf %346, %347 : vector<48x1xf32>
    %349 = vector.broadcast %339 : vector<48x1xf32> to vector<48x32xf32>
    %350 = arith.subf %331, %349 : vector<48x32xf32>
    %cst_244 = arith.constant 9.99999997E-7 : f32
    %351 = vector.broadcast %cst_244 : f32 to vector<48x1xf32>
    %352 = arith.addf %348, %351 : vector<48x1xf32>
    %353 = math.rsqrt %352 : vector<48x1xf32>
    %354 = vector.broadcast %353 : vector<48x1xf32> to vector<48x32xf32>
    %355 = arith.mulf %350, %354 : vector<48x32xf32>
    %356 = vector.broadcast %333 : vector<1x32xf32> to vector<48x32xf32>
    %357 = arith.mulf %355, %356 : vector<48x32xf32>
    %358 = vector.broadcast %335 : vector<1x32xf32> to vector<48x32xf32>
    %359 = arith.addf %357, %358 : vector<48x32xf32>
    %c1_245 = arith.constant 1 : index
    %c0_246 = arith.constant 0 : index
    %c0_247 = arith.constant 0 : index
    %c0_248 = arith.constant 0 : index
    %360 = vector.load %arg5[%c1_245, %c0_246, %c0_247, %c0_248] : memref<2x4x32x8xf32, #tpu.memory_space<vmem>>, vector<1x1x32x8xf32>
    %361 = vector.shape_cast %360 : vector<1x1x32x8xf32> to vector<32x8xf32>
    %cst_249 = arith.constant dense<0.000000e+00> : vector<48x8xf32>
    %362 = tpu.matmul %359, %361, %cst_249 {dimension_numbers = #tpu.dot_dimension_numbers<[1], [0], [0], [1], [0, 0, 1, 1], [], []>} : vector<48x32xf32>, vector<32x8xf32>, vector<48x8xf32> -> vector<48x8xf32>
    %c1_250 = arith.constant 1 : index
    %c0_251 = arith.constant 0 : index
    %c0_252 = arith.constant 0 : index
    %c0_253 = arith.constant 0 : index
    %363 = vector.load %arg6[%c1_250, %c0_251, %c0_252, %c0_253] : memref<2x4x1x8xf32, #tpu.memory_space<vmem>>, vector<1x1x1x8xf32>
    %364 = vector.shape_cast %363 : vector<1x1x1x8xf32> to vector<1x8xf32>
    %365 = vector.broadcast %364 : vector<1x8xf32> to vector<48x8xf32>
    %366 = arith.addf %362, %365 : vector<48x8xf32>
    %c1_254 = arith.constant 1 : index
    %c0_255 = arith.constant 0 : index
    %c0_256 = arith.constant 0 : index
    %c0_257 = arith.constant 0 : index
    %367 = vector.load %arg7[%c1_254, %c0_255, %c0_256, %c0_257] : memref<2x4x32x8xf32, #tpu.memory_space<vmem>>, vector<1x1x32x8xf32>
    %368 = vector.shape_cast %367 : vector<1x1x32x8xf32> to vector<32x8xf32>
    %cst_258 = arith.constant dense<0.000000e+00> : vector<48x8xf32>
    %369 = tpu.matmul %359, %368, %cst_258 {dimension_numbers = #tpu.dot_dimension_numbers<[1], [0], [0], [1], [0, 0, 1, 1], [], []>} : vector<48x32xf32>, vector<32x8xf32>, vector<48x8xf32> -> vector<48x8xf32>
    %c1_259 = arith.constant 1 : index
    %c0_260 = arith.constant 0 : index
    %c0_261 = arith.constant 0 : index
    %c0_262 = arith.constant 0 : index
    %370 = vector.load %arg8[%c1_259, %c0_260, %c0_261, %c0_262] : memref<2x4x1x8xf32, #tpu.memory_space<vmem>>, vector<1x1x1x8xf32>
    %371 = vector.shape_cast %370 : vector<1x1x1x8xf32> to vector<1x8xf32>
    %372 = vector.broadcast %371 : vector<1x8xf32> to vector<48x8xf32>
    %373 = arith.addf %369, %372 : vector<48x8xf32>
    %c1_263 = arith.constant 1 : index
    %c0_264 = arith.constant 0 : index
    %c0_265 = arith.constant 0 : index
    %c0_266 = arith.constant 0 : index
    %374 = vector.load %arg9[%c1_263, %c0_264, %c0_265, %c0_266] : memref<2x4x32x8xf32, #tpu.memory_space<vmem>>, vector<1x1x32x8xf32>
    %375 = vector.shape_cast %374 : vector<1x1x32x8xf32> to vector<32x8xf32>
    %cst_267 = arith.constant dense<0.000000e+00> : vector<48x8xf32>
    %376 = tpu.matmul %359, %375, %cst_267 {dimension_numbers = #tpu.dot_dimension_numbers<[1], [0], [0], [1], [0, 0, 1, 1], [], []>} : vector<48x32xf32>, vector<32x8xf32>, vector<48x8xf32> -> vector<48x8xf32>
    %c1_268 = arith.constant 1 : index
    %c0_269 = arith.constant 0 : index
    %c0_270 = arith.constant 0 : index
    %c0_271 = arith.constant 0 : index
    %377 = vector.load %arg10[%c1_268, %c0_269, %c0_270, %c0_271] : memref<2x4x1x8xf32, #tpu.memory_space<vmem>>, vector<1x1x1x8xf32>
    %378 = vector.shape_cast %377 : vector<1x1x1x8xf32> to vector<1x8xf32>
    %379 = vector.broadcast %378 : vector<1x8xf32> to vector<48x8xf32>
    %380 = arith.addf %376, %379 : vector<48x8xf32>
    %c1_272 = arith.constant 1 : index
    %c1_273 = arith.constant 1 : index
    %c0_274 = arith.constant 0 : index
    %c0_275 = arith.constant 0 : index
    %381 = vector.load %arg5[%c1_272, %c1_273, %c0_274, %c0_275] : memref<2x4x32x8xf32, #tpu.memory_space<vmem>>, vector<1x1x32x8xf32>
    %382 = vector.shape_cast %381 : vector<1x1x32x8xf32> to vector<32x8xf32>
    %cst_276 = arith.constant dense<0.000000e+00> : vector<48x8xf32>
    %383 = tpu.matmul %359, %382, %cst_276 {dimension_numbers = #tpu.dot_dimension_numbers<[1], [0], [0], [1], [0, 0, 1, 1], [], []>} : vector<48x32xf32>, vector<32x8xf32>, vector<48x8xf32> -> vector<48x8xf32>
    %c1_277 = arith.constant 1 : index
    %c1_278 = arith.constant 1 : index
    %c0_279 = arith.constant 0 : index
    %c0_280 = arith.constant 0 : index
    %384 = vector.load %arg6[%c1_277, %c1_278, %c0_279, %c0_280] : memref<2x4x1x8xf32, #tpu.memory_space<vmem>>, vector<1x1x1x8xf32>
    %385 = vector.shape_cast %384 : vector<1x1x1x8xf32> to vector<1x8xf32>
    %386 = vector.broadcast %385 : vector<1x8xf32> to vector<48x8xf32>
    %387 = arith.addf %383, %386 : vector<48x8xf32>
    %c1_281 = arith.constant 1 : index
    %c1_282 = arith.constant 1 : index
    %c0_283 = arith.constant 0 : index
    %c0_284 = arith.constant 0 : index
    %388 = vector.load %arg7[%c1_281, %c1_282, %c0_283, %c0_284] : memref<2x4x32x8xf32, #tpu.memory_space<vmem>>, vector<1x1x32x8xf32>
    %389 = vector.shape_cast %388 : vector<1x1x32x8xf32> to vector<32x8xf32>
    %cst_285 = arith.constant dense<0.000000e+00> : vector<48x8xf32>
    %390 = tpu.matmul %359, %389, %cst_285 {dimension_numbers = #tpu.dot_dimension_numbers<[1], [0], [0], [1], [0, 0, 1, 1], [], []>} : vector<48x32xf32>, vector<32x8xf32>, vector<48x8xf32> -> vector<48x8xf32>
    %c1_286 = arith.constant 1 : index
    %c1_287 = arith.constant 1 : index
    %c0_288 = arith.constant 0 : index
    %c0_289 = arith.constant 0 : index
    %391 = vector.load %arg8[%c1_286, %c1_287, %c0_288, %c0_289] : memref<2x4x1x8xf32, #tpu.memory_space<vmem>>, vector<1x1x1x8xf32>
    %392 = vector.shape_cast %391 : vector<1x1x1x8xf32> to vector<1x8xf32>
    %393 = vector.broadcast %392 : vector<1x8xf32> to vector<48x8xf32>
    %394 = arith.addf %390, %393 : vector<48x8xf32>
    %c1_290 = arith.constant 1 : index
    %c1_291 = arith.constant 1 : index
    %c0_292 = arith.constant 0 : index
    %c0_293 = arith.constant 0 : index
    %395 = vector.load %arg9[%c1_290, %c1_291, %c0_292, %c0_293] : memref<2x4x32x8xf32, #tpu.memory_space<vmem>>, vector<1x1x32x8xf32>
    %396 = vector.shape_cast %395 : vector<1x1x32x8xf32> to vector<32x8xf32>
    %cst_294 = arith.constant dense<0.000000e+00> : vector<48x8xf32>
    %397 = tpu.matmul %359, %396, %cst_294 {dimension_numbers = #tpu.dot_dimension_numbers<[1], [0], [0], [1], [0, 0, 1, 1], [], []>} : vector<48x32xf32>, vector<32x8xf32>, vector<48x8xf32> -> vector<48x8xf32>
    %c1_295 = arith.constant 1 : index
    %c1_296 = arith.constant 1 : index
    %c0_297 = arith.constant 0 : index
    %c0_298 = arith.constant 0 : index
    %398 = vector.load %arg10[%c1_295, %c1_296, %c0_297, %c0_298] : memref<2x4x1x8xf32, #tpu.memory_space<vmem>>, vector<1x1x1x8xf32>
    %399 = vector.shape_cast %398 : vector<1x1x1x8xf32> to vector<1x8xf32>
    %400 = vector.broadcast %399 : vector<1x8xf32> to vector<48x8xf32>
    %401 = arith.addf %397, %400 : vector<48x8xf32>
    %c1_299 = arith.constant 1 : index
    %c2_300 = arith.constant 2 : index
    %c0_301 = arith.constant 0 : index
    %c0_302 = arith.constant 0 : index
    %402 = vector.load %arg5[%c1_299, %c2_300, %c0_301, %c0_302] : memref<2x4x32x8xf32, #tpu.memory_space<vmem>>, vector<1x1x32x8xf32>
    %403 = vector.shape_cast %402 : vector<1x1x32x8xf32> to vector<32x8xf32>
    %cst_303 = arith.constant dense<0.000000e+00> : vector<48x8xf32>
    %404 = tpu.matmul %359, %403, %cst_303 {dimension_numbers = #tpu.dot_dimension_numbers<[1], [0], [0], [1], [0, 0, 1, 1], [], []>} : vector<48x32xf32>, vector<32x8xf32>, vector<48x8xf32> -> vector<48x8xf32>
    %c1_304 = arith.constant 1 : index
    %c2_305 = arith.constant 2 : index
    %c0_306 = arith.constant 0 : index
    %c0_307 = arith.constant 0 : index
    %405 = vector.load %arg6[%c1_304, %c2_305, %c0_306, %c0_307] : memref<2x4x1x8xf32, #tpu.memory_space<vmem>>, vector<1x1x1x8xf32>
    %406 = vector.shape_cast %405 : vector<1x1x1x8xf32> to vector<1x8xf32>
    %407 = vector.broadcast %406 : vector<1x8xf32> to vector<48x8xf32>
    %408 = arith.addf %404, %407 : vector<48x8xf32>
    %c1_308 = arith.constant 1 : index
    %c2_309 = arith.constant 2 : index
    %c0_310 = arith.constant 0 : index
    %c0_311 = arith.constant 0 : index
    %409 = vector.load %arg7[%c1_308, %c2_309, %c0_310, %c0_311] : memref<2x4x32x8xf32, #tpu.memory_space<vmem>>, vector<1x1x32x8xf32>
    %410 = vector.shape_cast %409 : vector<1x1x32x8xf32> to vector<32x8xf32>
    %cst_312 = arith.constant dense<0.000000e+00> : vector<48x8xf32>
    %411 = tpu.matmul %359, %410, %cst_312 {dimension_numbers = #tpu.dot_dimension_numbers<[1], [0], [0], [1], [0, 0, 1, 1], [], []>} : vector<48x32xf32>, vector<32x8xf32>, vector<48x8xf32> -> vector<48x8xf32>
    %c1_313 = arith.constant 1 : index
    %c2_314 = arith.constant 2 : index
    %c0_315 = arith.constant 0 : index
    %c0_316 = arith.constant 0 : index
    %412 = vector.load %arg8[%c1_313, %c2_314, %c0_315, %c0_316] : memref<2x4x1x8xf32, #tpu.memory_space<vmem>>, vector<1x1x1x8xf32>
    %413 = vector.shape_cast %412 : vector<1x1x1x8xf32> to vector<1x8xf32>
    %414 = vector.broadcast %413 : vector<1x8xf32> to vector<48x8xf32>
    %415 = arith.addf %411, %414 : vector<48x8xf32>
    %c1_317 = arith.constant 1 : index
    %c2_318 = arith.constant 2 : index
    %c0_319 = arith.constant 0 : index
    %c0_320 = arith.constant 0 : index
    %416 = vector.load %arg9[%c1_317, %c2_318, %c0_319, %c0_320] : memref<2x4x32x8xf32, #tpu.memory_space<vmem>>, vector<1x1x32x8xf32>
    %417 = vector.shape_cast %416 : vector<1x1x32x8xf32> to vector<32x8xf32>
    %cst_321 = arith.constant dense<0.000000e+00> : vector<48x8xf32>
    %418 = tpu.matmul %359, %417, %cst_321 {dimension_numbers = #tpu.dot_dimension_numbers<[1], [0], [0], [1], [0, 0, 1, 1], [], []>} : vector<48x32xf32>, vector<32x8xf32>, vector<48x8xf32> -> vector<48x8xf32>
    %c1_322 = arith.constant 1 : index
    %c2_323 = arith.constant 2 : index
    %c0_324 = arith.constant 0 : index
    %c0_325 = arith.constant 0 : index
    %419 = vector.load %arg10[%c1_322, %c2_323, %c0_324, %c0_325] : memref<2x4x1x8xf32, #tpu.memory_space<vmem>>, vector<1x1x1x8xf32>
    %420 = vector.shape_cast %419 : vector<1x1x1x8xf32> to vector<1x8xf32>
    %421 = vector.broadcast %420 : vector<1x8xf32> to vector<48x8xf32>
    %422 = arith.addf %418, %421 : vector<48x8xf32>
    %c1_326 = arith.constant 1 : index
    %c3_327 = arith.constant 3 : index
    %c0_328 = arith.constant 0 : index
    %c0_329 = arith.constant 0 : index
    %423 = vector.load %arg5[%c1_326, %c3_327, %c0_328, %c0_329] : memref<2x4x32x8xf32, #tpu.memory_space<vmem>>, vector<1x1x32x8xf32>
    %424 = vector.shape_cast %423 : vector<1x1x32x8xf32> to vector<32x8xf32>
    %cst_330 = arith.constant dense<0.000000e+00> : vector<48x8xf32>
    %425 = tpu.matmul %359, %424, %cst_330 {dimension_numbers = #tpu.dot_dimension_numbers<[1], [0], [0], [1], [0, 0, 1, 1], [], []>} : vector<48x32xf32>, vector<32x8xf32>, vector<48x8xf32> -> vector<48x8xf32>
    %c1_331 = arith.constant 1 : index
    %c3_332 = arith.constant 3 : index
    %c0_333 = arith.constant 0 : index
    %c0_334 = arith.constant 0 : index
    %426 = vector.load %arg6[%c1_331, %c3_332, %c0_333, %c0_334] : memref<2x4x1x8xf32, #tpu.memory_space<vmem>>, vector<1x1x1x8xf32>
    %427 = vector.shape_cast %426 : vector<1x1x1x8xf32> to vector<1x8xf32>
    %428 = vector.broadcast %427 : vector<1x8xf32> to vector<48x8xf32>
    %429 = arith.addf %425, %428 : vector<48x8xf32>
    %c1_335 = arith.constant 1 : index
    %c3_336 = arith.constant 3 : index
    %c0_337 = arith.constant 0 : index
    %c0_338 = arith.constant 0 : index
    %430 = vector.load %arg7[%c1_335, %c3_336, %c0_337, %c0_338] : memref<2x4x32x8xf32, #tpu.memory_space<vmem>>, vector<1x1x32x8xf32>
    %431 = vector.shape_cast %430 : vector<1x1x32x8xf32> to vector<32x8xf32>
    %cst_339 = arith.constant dense<0.000000e+00> : vector<48x8xf32>
    %432 = tpu.matmul %359, %431, %cst_339 {dimension_numbers = #tpu.dot_dimension_numbers<[1], [0], [0], [1], [0, 0, 1, 1], [], []>} : vector<48x32xf32>, vector<32x8xf32>, vector<48x8xf32> -> vector<48x8xf32>
    %c1_340 = arith.constant 1 : index
    %c3_341 = arith.constant 3 : index
    %c0_342 = arith.constant 0 : index
    %c0_343 = arith.constant 0 : index
    %433 = vector.load %arg8[%c1_340, %c3_341, %c0_342, %c0_343] : memref<2x4x1x8xf32, #tpu.memory_space<vmem>>, vector<1x1x1x8xf32>
    %434 = vector.shape_cast %433 : vector<1x1x1x8xf32> to vector<1x8xf32>
    %435 = vector.broadcast %434 : vector<1x8xf32> to vector<48x8xf32>
    %436 = arith.addf %432, %435 : vector<48x8xf32>
    %c1_344 = arith.constant 1 : index
    %c3_345 = arith.constant 3 : index
    %c0_346 = arith.constant 0 : index
    %c0_347 = arith.constant 0 : index
    %437 = vector.load %arg9[%c1_344, %c3_345, %c0_346, %c0_347] : memref<2x4x32x8xf32, #tpu.memory_space<vmem>>, vector<1x1x32x8xf32>
    %438 = vector.shape_cast %437 : vector<1x1x32x8xf32> to vector<32x8xf32>
    %cst_348 = arith.constant dense<0.000000e+00> : vector<48x8xf32>
    %439 = tpu.matmul %359, %438, %cst_348 {dimension_numbers = #tpu.dot_dimension_numbers<[1], [0], [0], [1], [0, 0, 1, 1], [], []>} : vector<48x32xf32>, vector<32x8xf32>, vector<48x8xf32> -> vector<48x8xf32>
    %c1_349 = arith.constant 1 : index
    %c3_350 = arith.constant 3 : index
    %c0_351 = arith.constant 0 : index
    %c0_352 = arith.constant 0 : index
    %440 = vector.load %arg10[%c1_349, %c3_350, %c0_351, %c0_352] : memref<2x4x1x8xf32, #tpu.memory_space<vmem>>, vector<1x1x1x8xf32>
    %441 = vector.shape_cast %440 : vector<1x1x1x8xf32> to vector<1x8xf32>
    %442 = vector.broadcast %441 : vector<1x8xf32> to vector<48x8xf32>
    %443 = arith.addf %439, %442 : vector<48x8xf32>
    %cst_353 = arith.constant 0.000000e+00 : f32
    %444 = vector.broadcast %cst_353 : f32 to vector<17x32xf32>
    %445 = vector.extract_strided_slice %366 {offsets = [0, 0], sizes = [17, 8], strides = [1, 1]} : vector<48x8xf32> to vector<17x8xf32>
    %446 = vector.extract_strided_slice %373 {offsets = [0, 0], sizes = [17, 8], strides = [1, 1]} : vector<48x8xf32> to vector<17x8xf32>
    %447 = vector.extract_strided_slice %380 {offsets = [0, 0], sizes = [17, 8], strides = [1, 1]} : vector<48x8xf32> to vector<17x8xf32>
    %cst_354 = arith.constant dense<0.000000e+00> : vector<17x17xf32>
    %448 = tpu.matmul %445, %446, %cst_354 {dimension_numbers = #tpu.dot_dimension_numbers<[1], [1], [0], [0], [0, 0, 1, 0], [], []>} : vector<17x8xf32>, vector<17x8xf32>, vector<17x17xf32> -> vector<17x17xf32>
    %cst_355 = arith.constant dense<0xFF800000> : vector<17xf32>
    %449 = vector.multi_reduction <maximumf>, %448, %cst_355 [1] : vector<17x17xf32> to vector<17xf32>
    %450 = vector.shape_cast %449 : vector<17xf32> to vector<17x1xf32>
    %451 = vector.broadcast %450 : vector<17x1xf32> to vector<17x17xf32>
    %452 = arith.subf %448, %451 : vector<17x17xf32>
    %453 = math.exp %452 : vector<17x17xf32>
    %cst_356 = arith.constant dense<0.000000e+00> : vector<17xf32>
    %454 = vector.multi_reduction <add>, %453, %cst_356 [1] : vector<17x17xf32> to vector<17xf32>
    %455 = vector.shape_cast %454 : vector<17xf32> to vector<17x1xf32>
    %456 = tpu.reciprocal %455 {approx = true} : vector<17x1xf32> -> vector<17x1xf32>
    %457 = vector.broadcast %456 : vector<17x1xf32> to vector<17x17xf32>
    %458 = arith.mulf %453, %457 : vector<17x17xf32>
    %cst_357 = arith.constant dense<0.000000e+00> : vector<17x8xf32>
    %459 = tpu.matmul %458, %447, %cst_357 {dimension_numbers = #tpu.dot_dimension_numbers<[1], [0], [0], [1], [0, 0, 1, 1], [], []>} : vector<17x17xf32>, vector<17x8xf32>, vector<17x8xf32> -> vector<17x8xf32>
    %c1_358 = arith.constant 1 : index
    %c0_359 = arith.constant 0 : index
    %c0_360 = arith.constant 0 : index
    %c0_361 = arith.constant 0 : index
    %460 = vector.load %arg11[%c1_358, %c0_359, %c0_360, %c0_361] : memref<2x4x8x32xf32, #tpu.memory_space<vmem>>, vector<1x1x8x32xf32>
    %461 = vector.shape_cast %460 : vector<1x1x8x32xf32> to vector<8x32xf32>
    %cst_362 = arith.constant dense<0.000000e+00> : vector<17x32xf32>
    %462 = tpu.matmul %459, %461, %cst_362 {dimension_numbers = #tpu.dot_dimension_numbers<[1], [0], [0], [1], [0, 0, 1, 1], [], []>} : vector<17x8xf32>, vector<8x32xf32>, vector<17x32xf32> -> vector<17x32xf32>
    %463 = arith.addf %444, %462 : vector<17x32xf32>
    %464 = vector.extract_strided_slice %387 {offsets = [0, 0], sizes = [17, 8], strides = [1, 1]} : vector<48x8xf32> to vector<17x8xf32>
    %465 = vector.extract_strided_slice %394 {offsets = [0, 0], sizes = [17, 8], strides = [1, 1]} : vector<48x8xf32> to vector<17x8xf32>
    %466 = vector.extract_strided_slice %401 {offsets = [0, 0], sizes = [17, 8], strides = [1, 1]} : vector<48x8xf32> to vector<17x8xf32>
    %cst_363 = arith.constant dense<0.000000e+00> : vector<17x17xf32>
    %467 = tpu.matmul %464, %465, %cst_363 {dimension_numbers = #tpu.dot_dimension_numbers<[1], [1], [0], [0], [0, 0, 1, 0], [], []>} : vector<17x8xf32>, vector<17x8xf32>, vector<17x17xf32> -> vector<17x17xf32>
    %cst_364 = arith.constant dense<0xFF800000> : vector<17xf32>
    %468 = vector.multi_reduction <maximumf>, %467, %cst_364 [1] : vector<17x17xf32> to vector<17xf32>
    %469 = vector.shape_cast %468 : vector<17xf32> to vector<17x1xf32>
    %470 = vector.broadcast %469 : vector<17x1xf32> to vector<17x17xf32>
    %471 = arith.subf %467, %470 : vector<17x17xf32>
    %472 = math.exp %471 : vector<17x17xf32>
    %cst_365 = arith.constant dense<0.000000e+00> : vector<17xf32>
    %473 = vector.multi_reduction <add>, %472, %cst_365 [1] : vector<17x17xf32> to vector<17xf32>
    %474 = vector.shape_cast %473 : vector<17xf32> to vector<17x1xf32>
    %475 = tpu.reciprocal %474 {approx = true} : vector<17x1xf32> -> vector<17x1xf32>
    %476 = vector.broadcast %475 : vector<17x1xf32> to vector<17x17xf32>
    %477 = arith.mulf %472, %476 : vector<17x17xf32>
    %cst_366 = arith.constant dense<0.000000e+00> : vector<17x8xf32>
    %478 = tpu.matmul %477, %466, %cst_366 {dimension_numbers = #tpu.dot_dimension_numbers<[1], [0], [0], [1], [0, 0, 1, 1], [], []>} : vector<17x17xf32>, vector<17x8xf32>, vector<17x8xf32> -> vector<17x8xf32>
    %c1_367 = arith.constant 1 : index
    %c1_368 = arith.constant 1 : index
    %c0_369 = arith.constant 0 : index
    %c0_370 = arith.constant 0 : index
    %479 = vector.load %arg11[%c1_367, %c1_368, %c0_369, %c0_370] : memref<2x4x8x32xf32, #tpu.memory_space<vmem>>, vector<1x1x8x32xf32>
    %480 = vector.shape_cast %479 : vector<1x1x8x32xf32> to vector<8x32xf32>
    %cst_371 = arith.constant dense<0.000000e+00> : vector<17x32xf32>
    %481 = tpu.matmul %478, %480, %cst_371 {dimension_numbers = #tpu.dot_dimension_numbers<[1], [0], [0], [1], [0, 0, 1, 1], [], []>} : vector<17x8xf32>, vector<8x32xf32>, vector<17x32xf32> -> vector<17x32xf32>
    %482 = arith.addf %463, %481 : vector<17x32xf32>
    %483 = vector.extract_strided_slice %408 {offsets = [0, 0], sizes = [17, 8], strides = [1, 1]} : vector<48x8xf32> to vector<17x8xf32>
    %484 = vector.extract_strided_slice %415 {offsets = [0, 0], sizes = [17, 8], strides = [1, 1]} : vector<48x8xf32> to vector<17x8xf32>
    %485 = vector.extract_strided_slice %422 {offsets = [0, 0], sizes = [17, 8], strides = [1, 1]} : vector<48x8xf32> to vector<17x8xf32>
    %cst_372 = arith.constant dense<0.000000e+00> : vector<17x17xf32>
    %486 = tpu.matmul %483, %484, %cst_372 {dimension_numbers = #tpu.dot_dimension_numbers<[1], [1], [0], [0], [0, 0, 1, 0], [], []>} : vector<17x8xf32>, vector<17x8xf32>, vector<17x17xf32> -> vector<17x17xf32>
    %cst_373 = arith.constant dense<0xFF800000> : vector<17xf32>
    %487 = vector.multi_reduction <maximumf>, %486, %cst_373 [1] : vector<17x17xf32> to vector<17xf32>
    %488 = vector.shape_cast %487 : vector<17xf32> to vector<17x1xf32>
    %489 = vector.broadcast %488 : vector<17x1xf32> to vector<17x17xf32>
    %490 = arith.subf %486, %489 : vector<17x17xf32>
    %491 = math.exp %490 : vector<17x17xf32>
    %cst_374 = arith.constant dense<0.000000e+00> : vector<17xf32>
    %492 = vector.multi_reduction <add>, %491, %cst_374 [1] : vector<17x17xf32> to vector<17xf32>
    %493 = vector.shape_cast %492 : vector<17xf32> to vector<17x1xf32>
    %494 = tpu.reciprocal %493 {approx = true} : vector<17x1xf32> -> vector<17x1xf32>
    %495 = vector.broadcast %494 : vector<17x1xf32> to vector<17x17xf32>
    %496 = arith.mulf %491, %495 : vector<17x17xf32>
    %cst_375 = arith.constant dense<0.000000e+00> : vector<17x8xf32>
    %497 = tpu.matmul %496, %485, %cst_375 {dimension_numbers = #tpu.dot_dimension_numbers<[1], [0], [0], [1], [0, 0, 1, 1], [], []>} : vector<17x17xf32>, vector<17x8xf32>, vector<17x8xf32> -> vector<17x8xf32>
    %c1_376 = arith.constant 1 : index
    %c2_377 = arith.constant 2 : index
    %c0_378 = arith.constant 0 : index
    %c0_379 = arith.constant 0 : index
    %498 = vector.load %arg11[%c1_376, %c2_377, %c0_378, %c0_379] : memref<2x4x8x32xf32, #tpu.memory_space<vmem>>, vector<1x1x8x32xf32>
    %499 = vector.shape_cast %498 : vector<1x1x8x32xf32> to vector<8x32xf32>
    %cst_380 = arith.constant dense<0.000000e+00> : vector<17x32xf32>
    %500 = tpu.matmul %497, %499, %cst_380 {dimension_numbers = #tpu.dot_dimension_numbers<[1], [0], [0], [1], [0, 0, 1, 1], [], []>} : vector<17x8xf32>, vector<8x32xf32>, vector<17x32xf32> -> vector<17x32xf32>
    %501 = arith.addf %482, %500 : vector<17x32xf32>
    %502 = vector.extract_strided_slice %429 {offsets = [0, 0], sizes = [17, 8], strides = [1, 1]} : vector<48x8xf32> to vector<17x8xf32>
    %503 = vector.extract_strided_slice %436 {offsets = [0, 0], sizes = [17, 8], strides = [1, 1]} : vector<48x8xf32> to vector<17x8xf32>
    %504 = vector.extract_strided_slice %443 {offsets = [0, 0], sizes = [17, 8], strides = [1, 1]} : vector<48x8xf32> to vector<17x8xf32>
    %cst_381 = arith.constant dense<0.000000e+00> : vector<17x17xf32>
    %505 = tpu.matmul %502, %503, %cst_381 {dimension_numbers = #tpu.dot_dimension_numbers<[1], [1], [0], [0], [0, 0, 1, 0], [], []>} : vector<17x8xf32>, vector<17x8xf32>, vector<17x17xf32> -> vector<17x17xf32>
    %cst_382 = arith.constant dense<0xFF800000> : vector<17xf32>
    %506 = vector.multi_reduction <maximumf>, %505, %cst_382 [1] : vector<17x17xf32> to vector<17xf32>
    %507 = vector.shape_cast %506 : vector<17xf32> to vector<17x1xf32>
    %508 = vector.broadcast %507 : vector<17x1xf32> to vector<17x17xf32>
    %509 = arith.subf %505, %508 : vector<17x17xf32>
    %510 = math.exp %509 : vector<17x17xf32>
    %cst_383 = arith.constant dense<0.000000e+00> : vector<17xf32>
    %511 = vector.multi_reduction <add>, %510, %cst_383 [1] : vector<17x17xf32> to vector<17xf32>
    %512 = vector.shape_cast %511 : vector<17xf32> to vector<17x1xf32>
    %513 = tpu.reciprocal %512 {approx = true} : vector<17x1xf32> -> vector<17x1xf32>
    %514 = vector.broadcast %513 : vector<17x1xf32> to vector<17x17xf32>
    %515 = arith.mulf %510, %514 : vector<17x17xf32>
    %cst_384 = arith.constant dense<0.000000e+00> : vector<17x8xf32>
    %516 = tpu.matmul %515, %504, %cst_384 {dimension_numbers = #tpu.dot_dimension_numbers<[1], [0], [0], [1], [0, 0, 1, 1], [], []>} : vector<17x17xf32>, vector<17x8xf32>, vector<17x8xf32> -> vector<17x8xf32>
    %c1_385 = arith.constant 1 : index
    %c3_386 = arith.constant 3 : index
    %c0_387 = arith.constant 0 : index
    %c0_388 = arith.constant 0 : index
    %517 = vector.load %arg11[%c1_385, %c3_386, %c0_387, %c0_388] : memref<2x4x8x32xf32, #tpu.memory_space<vmem>>, vector<1x1x8x32xf32>
    %518 = vector.shape_cast %517 : vector<1x1x8x32xf32> to vector<8x32xf32>
    %cst_389 = arith.constant dense<0.000000e+00> : vector<17x32xf32>
    %519 = tpu.matmul %516, %518, %cst_389 {dimension_numbers = #tpu.dot_dimension_numbers<[1], [0], [0], [1], [0, 0, 1, 1], [], []>} : vector<17x8xf32>, vector<8x32xf32>, vector<17x32xf32> -> vector<17x32xf32>
    %520 = arith.addf %501, %519 : vector<17x32xf32>
    %c0_390 = arith.constant 0 : index
    %c0_391 = arith.constant 0 : index
    %521 = vector.load %arg24[%c0_390, %c0_391] : memref<48x32xf32, #tpu.memory_space<vmem>>, vector<17x32xf32>
    tpu.vector_store %arg24[%c0_390, %c0_391], %520 {strides = array<i32>} : memref<48x32xf32, #tpu.memory_space<vmem>>, vector<17x32xf32>,
    %cst_392 = arith.constant 0.000000e+00 : f32
    %522 = vector.broadcast %cst_392 : f32 to vector<17x32xf32>
    %523 = vector.extract_strided_slice %366 {offsets = [24, 0], sizes = [17, 8], strides = [1, 1]} : vector<48x8xf32> to vector<17x8xf32>
    %524 = vector.extract_strided_slice %373 {offsets = [24, 0], sizes = [17, 8], strides = [1, 1]} : vector<48x8xf32> to vector<17x8xf32>
    %525 = vector.extract_strided_slice %380 {offsets = [24, 0], sizes = [17, 8], strides = [1, 1]} : vector<48x8xf32> to vector<17x8xf32>
    %cst_393 = arith.constant dense<0.000000e+00> : vector<17x17xf32>
    %526 = tpu.matmul %523, %524, %cst_393 {dimension_numbers = #tpu.dot_dimension_numbers<[1], [1], [0], [0], [0, 0, 1, 0], [], []>} : vector<17x8xf32>, vector<17x8xf32>, vector<17x17xf32> -> vector<17x17xf32>
    %cst_394 = arith.constant dense<0xFF800000> : vector<17xf32>
    %527 = vector.multi_reduction <maximumf>, %526, %cst_394 [1] : vector<17x17xf32> to vector<17xf32>
    %528 = vector.shape_cast %527 : vector<17xf32> to vector<17x1xf32>
    %529 = vector.broadcast %528 : vector<17x1xf32> to vector<17x17xf32>
    %530 = arith.subf %526, %529 : vector<17x17xf32>
    %531 = math.exp %530 : vector<17x17xf32>
    %cst_395 = arith.constant dense<0.000000e+00> : vector<17xf32>
    %532 = vector.multi_reduction <add>, %531, %cst_395 [1] : vector<17x17xf32> to vector<17xf32>
    %533 = vector.shape_cast %532 : vector<17xf32> to vector<17x1xf32>
    %534 = tpu.reciprocal %533 {approx = true} : vector<17x1xf32> -> vector<17x1xf32>
    %535 = vector.broadcast %534 : vector<17x1xf32> to vector<17x17xf32>
    %536 = arith.mulf %531, %535 : vector<17x17xf32>
    %cst_396 = arith.constant dense<0.000000e+00> : vector<17x8xf32>
    %537 = tpu.matmul %536, %525, %cst_396 {dimension_numbers = #tpu.dot_dimension_numbers<[1], [0], [0], [1], [0, 0, 1, 1], [], []>} : vector<17x17xf32>, vector<17x8xf32>, vector<17x8xf32> -> vector<17x8xf32>
    %c1_397 = arith.constant 1 : index
    %c0_398 = arith.constant 0 : index
    %c0_399 = arith.constant 0 : index
    %c0_400 = arith.constant 0 : index
    %538 = vector.load %arg11[%c1_397, %c0_398, %c0_399, %c0_400] : memref<2x4x8x32xf32, #tpu.memory_space<vmem>>, vector<1x1x8x32xf32>
    %539 = vector.shape_cast %538 : vector<1x1x8x32xf32> to vector<8x32xf32>
    %cst_401 = arith.constant dense<0.000000e+00> : vector<17x32xf32>
    %540 = tpu.matmul %537, %539, %cst_401 {dimension_numbers = #tpu.dot_dimension_numbers<[1], [0], [0], [1], [0, 0, 1, 1], [], []>} : vector<17x8xf32>, vector<8x32xf32>, vector<17x32xf32> -> vector<17x32xf32>
    %541 = arith.addf %522, %540 : vector<17x32xf32>
    %542 = vector.extract_strided_slice %387 {offsets = [24, 0], sizes = [17, 8], strides = [1, 1]} : vector<48x8xf32> to vector<17x8xf32>
    %543 = vector.extract_strided_slice %394 {offsets = [24, 0], sizes = [17, 8], strides = [1, 1]} : vector<48x8xf32> to vector<17x8xf32>
    %544 = vector.extract_strided_slice %401 {offsets = [24, 0], sizes = [17, 8], strides = [1, 1]} : vector<48x8xf32> to vector<17x8xf32>
    %cst_402 = arith.constant dense<0.000000e+00> : vector<17x17xf32>
    %545 = tpu.matmul %542, %543, %cst_402 {dimension_numbers = #tpu.dot_dimension_numbers<[1], [1], [0], [0], [0, 0, 1, 0], [], []>} : vector<17x8xf32>, vector<17x8xf32>, vector<17x17xf32> -> vector<17x17xf32>
    %cst_403 = arith.constant dense<0xFF800000> : vector<17xf32>
    %546 = vector.multi_reduction <maximumf>, %545, %cst_403 [1] : vector<17x17xf32> to vector<17xf32>
    %547 = vector.shape_cast %546 : vector<17xf32> to vector<17x1xf32>
    %548 = vector.broadcast %547 : vector<17x1xf32> to vector<17x17xf32>
    %549 = arith.subf %545, %548 : vector<17x17xf32>
    %550 = math.exp %549 : vector<17x17xf32>
    %cst_404 = arith.constant dense<0.000000e+00> : vector<17xf32>
    %551 = vector.multi_reduction <add>, %550, %cst_404 [1] : vector<17x17xf32> to vector<17xf32>
    %552 = vector.shape_cast %551 : vector<17xf32> to vector<17x1xf32>
    %553 = tpu.reciprocal %552 {approx = true} : vector<17x1xf32> -> vector<17x1xf32>
    %554 = vector.broadcast %553 : vector<17x1xf32> to vector<17x17xf32>
    %555 = arith.mulf %550, %554 : vector<17x17xf32>
    %cst_405 = arith.constant dense<0.000000e+00> : vector<17x8xf32>
    %556 = tpu.matmul %555, %544, %cst_405 {dimension_numbers = #tpu.dot_dimension_numbers<[1], [0], [0], [1], [0, 0, 1, 1], [], []>} : vector<17x17xf32>, vector<17x8xf32>, vector<17x8xf32> -> vector<17x8xf32>
    %c1_406 = arith.constant 1 : index
    %c1_407 = arith.constant 1 : index
    %c0_408 = arith.constant 0 : index
    %c0_409 = arith.constant 0 : index
    %557 = vector.load %arg11[%c1_406, %c1_407, %c0_408, %c0_409] : memref<2x4x8x32xf32, #tpu.memory_space<vmem>>, vector<1x1x8x32xf32>
    %558 = vector.shape_cast %557 : vector<1x1x8x32xf32> to vector<8x32xf32>
    %cst_410 = arith.constant dense<0.000000e+00> : vector<17x32xf32>
    %559 = tpu.matmul %556, %558, %cst_410 {dimension_numbers = #tpu.dot_dimension_numbers<[1], [0], [0], [1], [0, 0, 1, 1], [], []>} : vector<17x8xf32>, vector<8x32xf32>, vector<17x32xf32> -> vector<17x32xf32>
    %560 = arith.addf %541, %559 : vector<17x32xf32>
    %561 = vector.extract_strided_slice %408 {offsets = [24, 0], sizes = [17, 8], strides = [1, 1]} : vector<48x8xf32> to vector<17x8xf32>
    %562 = vector.extract_strided_slice %415 {offsets = [24, 0], sizes = [17, 8], strides = [1, 1]} : vector<48x8xf32> to vector<17x8xf32>
    %563 = vector.extract_strided_slice %422 {offsets = [24, 0], sizes = [17, 8], strides = [1, 1]} : vector<48x8xf32> to vector<17x8xf32>
    %cst_411 = arith.constant dense<0.000000e+00> : vector<17x17xf32>
    %564 = tpu.matmul %561, %562, %cst_411 {dimension_numbers = #tpu.dot_dimension_numbers<[1], [1], [0], [0], [0, 0, 1, 0], [], []>} : vector<17x8xf32>, vector<17x8xf32>, vector<17x17xf32> -> vector<17x17xf32>
    %cst_412 = arith.constant dense<0xFF800000> : vector<17xf32>
    %565 = vector.multi_reduction <maximumf>, %564, %cst_412 [1] : vector<17x17xf32> to vector<17xf32>
    %566 = vector.shape_cast %565 : vector<17xf32> to vector<17x1xf32>
    %567 = vector.broadcast %566 : vector<17x1xf32> to vector<17x17xf32>
    %568 = arith.subf %564, %567 : vector<17x17xf32>
    %569 = math.exp %568 : vector<17x17xf32>
    %cst_413 = arith.constant dense<0.000000e+00> : vector<17xf32>
    %570 = vector.multi_reduction <add>, %569, %cst_413 [1] : vector<17x17xf32> to vector<17xf32>
    %571 = vector.shape_cast %570 : vector<17xf32> to vector<17x1xf32>
    %572 = tpu.reciprocal %571 {approx = true} : vector<17x1xf32> -> vector<17x1xf32>
    %573 = vector.broadcast %572 : vector<17x1xf32> to vector<17x17xf32>
    %574 = arith.mulf %569, %573 : vector<17x17xf32>
    %cst_414 = arith.constant dense<0.000000e+00> : vector<17x8xf32>
    %575 = tpu.matmul %574, %563, %cst_414 {dimension_numbers = #tpu.dot_dimension_numbers<[1], [0], [0], [1], [0, 0, 1, 1], [], []>} : vector<17x17xf32>, vector<17x8xf32>, vector<17x8xf32> -> vector<17x8xf32>
    %c1_415 = arith.constant 1 : index
    %c2_416 = arith.constant 2 : index
    %c0_417 = arith.constant 0 : index
    %c0_418 = arith.constant 0 : index
    %576 = vector.load %arg11[%c1_415, %c2_416, %c0_417, %c0_418] : memref<2x4x8x32xf32, #tpu.memory_space<vmem>>, vector<1x1x8x32xf32>
    %577 = vector.shape_cast %576 : vector<1x1x8x32xf32> to vector<8x32xf32>
    %cst_419 = arith.constant dense<0.000000e+00> : vector<17x32xf32>
    %578 = tpu.matmul %575, %577, %cst_419 {dimension_numbers = #tpu.dot_dimension_numbers<[1], [0], [0], [1], [0, 0, 1, 1], [], []>} : vector<17x8xf32>, vector<8x32xf32>, vector<17x32xf32> -> vector<17x32xf32>
    %579 = arith.addf %560, %578 : vector<17x32xf32>
    %580 = vector.extract_strided_slice %429 {offsets = [24, 0], sizes = [17, 8], strides = [1, 1]} : vector<48x8xf32> to vector<17x8xf32>
    %581 = vector.extract_strided_slice %436 {offsets = [24, 0], sizes = [17, 8], strides = [1, 1]} : vector<48x8xf32> to vector<17x8xf32>
    %582 = vector.extract_strided_slice %443 {offsets = [24, 0], sizes = [17, 8], strides = [1, 1]} : vector<48x8xf32> to vector<17x8xf32>
    %cst_420 = arith.constant dense<0.000000e+00> : vector<17x17xf32>
    %583 = tpu.matmul %580, %581, %cst_420 {dimension_numbers = #tpu.dot_dimension_numbers<[1], [1], [0], [0], [0, 0, 1, 0], [], []>} : vector<17x8xf32>, vector<17x8xf32>, vector<17x17xf32> -> vector<17x17xf32>
    %cst_421 = arith.constant dense<0xFF800000> : vector<17xf32>
    %584 = vector.multi_reduction <maximumf>, %583, %cst_421 [1] : vector<17x17xf32> to vector<17xf32>
    %585 = vector.shape_cast %584 : vector<17xf32> to vector<17x1xf32>
    %586 = vector.broadcast %585 : vector<17x1xf32> to vector<17x17xf32>
    %587 = arith.subf %583, %586 : vector<17x17xf32>
    %588 = math.exp %587 : vector<17x17xf32>
    %cst_422 = arith.constant dense<0.000000e+00> : vector<17xf32>
    %589 = vector.multi_reduction <add>, %588, %cst_422 [1] : vector<17x17xf32> to vector<17xf32>
    %590 = vector.shape_cast %589 : vector<17xf32> to vector<17x1xf32>
    %591 = tpu.reciprocal %590 {approx = true} : vector<17x1xf32> -> vector<17x1xf32>
    %592 = vector.broadcast %591 : vector<17x1xf32> to vector<17x17xf32>
    %593 = arith.mulf %588, %592 : vector<17x17xf32>
    %cst_423 = arith.constant dense<0.000000e+00> : vector<17x8xf32>
    %594 = tpu.matmul %593, %582, %cst_423 {dimension_numbers = #tpu.dot_dimension_numbers<[1], [0], [0], [1], [0, 0, 1, 1], [], []>} : vector<17x17xf32>, vector<17x8xf32>, vector<17x8xf32> -> vector<17x8xf32>
    %c1_424 = arith.constant 1 : index
    %c3_425 = arith.constant 3 : index
    %c0_426 = arith.constant 0 : index
    %c0_427 = arith.constant 0 : index
    %595 = vector.load %arg11[%c1_424, %c3_425, %c0_426, %c0_427] : memref<2x4x8x32xf32, #tpu.memory_space<vmem>>, vector<1x1x8x32xf32>
    %596 = vector.shape_cast %595 : vector<1x1x8x32xf32> to vector<8x32xf32>
    %cst_428 = arith.constant dense<0.000000e+00> : vector<17x32xf32>
    %597 = tpu.matmul %594, %596, %cst_428 {dimension_numbers = #tpu.dot_dimension_numbers<[1], [0], [0], [1], [0, 0, 1, 1], [], []>} : vector<17x8xf32>, vector<8x32xf32>, vector<17x32xf32> -> vector<17x32xf32>
    %598 = arith.addf %579, %597 : vector<17x32xf32>
    %c24_429 = arith.constant 24 : index
    %c0_430 = arith.constant 0 : index
    %599 = vector.load %arg24[%c24_429, %c0_430] : memref<48x32xf32, #tpu.memory_space<vmem>>, vector<17x32xf32>
    tpu.vector_store %arg24[%c24_429, %c0_430], %598 {strides = array<i32>} : memref<48x32xf32, #tpu.memory_space<vmem>>, vector<17x32xf32>,
    %c0_431 = arith.constant 0 : index
    %c0_432 = arith.constant 0 : index
    %600 = vector.load %arg24[%c0_431, %c0_432] : memref<48x32xf32, #tpu.memory_space<vmem>>, vector<48x32xf32>
    %601 = arith.addf %331, %600 : vector<48x32xf32>
    %c1_433 = arith.constant 1 : index
    %c0_434 = arith.constant 0 : index
    %c0_435 = arith.constant 0 : index
    %602 = vector.load %arg12[%c1_433, %c0_434, %c0_435] : memref<2x1x32xf32, #tpu.memory_space<vmem>>, vector<1x1x32xf32>
    %603 = vector.shape_cast %602 : vector<1x1x32xf32> to vector<1x32xf32>
    %604 = vector.broadcast %603 : vector<1x32xf32> to vector<48x32xf32>
    %605 = arith.addf %601, %604 : vector<48x32xf32>
    %c1_436 = arith.constant 1 : index
    %c0_437 = arith.constant 0 : index
    %c0_438 = arith.constant 0 : index
    %606 = vector.load %arg13[%c1_436, %c0_437, %c0_438] : memref<2x1x32xf32, #tpu.memory_space<vmem>>, vector<1x1x32xf32>
    %607 = vector.shape_cast %606 : vector<1x1x32xf32> to vector<1x32xf32>
    %c1_439 = arith.constant 1 : index
    %c0_440 = arith.constant 0 : index
    %c0_441 = arith.constant 0 : index
    %608 = vector.load %arg14[%c1_439, %c0_440, %c0_441] : memref<2x1x32xf32, #tpu.memory_space<vmem>>, vector<1x1x32xf32>
    %609 = vector.shape_cast %608 : vector<1x1x32xf32> to vector<1x32xf32>
    %cst_442 = arith.constant dense<0.000000e+00> : vector<48xf32>
    %610 = vector.multi_reduction <add>, %605, %cst_442 [1] : vector<48x32xf32> to vector<48xf32>
    %611 = vector.shape_cast %610 : vector<48xf32> to vector<48x1xf32>
    %cst_443 = arith.constant 3.200000e+01 : f32
    %612 = vector.broadcast %cst_443 : f32 to vector<48x1xf32>
    %613 = arith.divf %611, %612 : vector<48x1xf32>
    %614 = vector.broadcast %613 : vector<48x1xf32> to vector<48x32xf32>
    %615 = arith.subf %605, %614 : vector<48x32xf32>
    %616 = vector.broadcast %613 : vector<48x1xf32> to vector<48x32xf32>
    %617 = arith.subf %605, %616 : vector<48x32xf32>
    %618 = arith.mulf %615, %617 : vector<48x32xf32>
    %cst_444 = arith.constant dense<0.000000e+00> : vector<48xf32>
    %619 = vector.multi_reduction <add>, %618, %cst_444 [1] : vector<48x32xf32> to vector<48xf32>
    %620 = vector.shape_cast %619 : vector<48xf32> to vector<48x1xf32>
    %cst_445 = arith.constant 3.200000e+01 : f32
    %621 = vector.broadcast %cst_445 : f32 to vector<48x1xf32>
    %622 = arith.divf %620, %621 : vector<48x1xf32>
    %623 = vector.broadcast %613 : vector<48x1xf32> to vector<48x32xf32>
    %624 = arith.subf %605, %623 : vector<48x32xf32>
    %cst_446 = arith.constant 9.99999997E-7 : f32
    %625 = vector.broadcast %cst_446 : f32 to vector<48x1xf32>
    %626 = arith.addf %622, %625 : vector<48x1xf32>
    %627 = math.rsqrt %626 : vector<48x1xf32>
    %628 = vector.broadcast %627 : vector<48x1xf32> to vector<48x32xf32>
    %629 = arith.mulf %624, %628 : vector<48x32xf32>
    %630 = vector.broadcast %607 : vector<1x32xf32> to vector<48x32xf32>
    %631 = arith.mulf %629, %630 : vector<48x32xf32>
    %632 = vector.broadcast %609 : vector<1x32xf32> to vector<48x32xf32>
    %633 = arith.addf %631, %632 : vector<48x32xf32>
    %c1_447 = arith.constant 1 : index
    %c0_448 = arith.constant 0 : index
    %c0_449 = arith.constant 0 : index
    %634 = vector.load %arg15[%c1_447, %c0_448, %c0_449] : memref<2x32x64xf32, #tpu.memory_space<vmem>>, vector<1x32x64xf32>
    %635 = vector.shape_cast %634 : vector<1x32x64xf32> to vector<32x64xf32>
    %cst_450 = arith.constant dense<0.000000e+00> : vector<48x64xf32>
    %636 = tpu.matmul %633, %635, %cst_450 {dimension_numbers = #tpu.dot_dimension_numbers<[1], [0], [0], [1], [0, 0, 1, 1], [], []>} : vector<48x32xf32>, vector<32x64xf32>, vector<48x64xf32> -> vector<48x64xf32>
    %c1_451 = arith.constant 1 : index
    %c0_452 = arith.constant 0 : index
    %c0_453 = arith.constant 0 : index
    %637 = vector.load %arg16[%c1_451, %c0_452, %c0_453] : memref<2x1x64xf32, #tpu.memory_space<vmem>>, vector<1x1x64xf32>
    %638 = vector.shape_cast %637 : vector<1x1x64xf32> to vector<1x64xf32>
    %639 = vector.broadcast %638 : vector<1x64xf32> to vector<48x64xf32>
    %640 = arith.addf %636, %639 : vector<48x64xf32>
    %cst_454 = arith.constant 5.000000e-01 : f32
    %641 = vector.broadcast %cst_454 : f32 to vector<48x64xf32>
    %642 = arith.mulf %641, %640 : vector<48x64xf32>
    %cst_455 = arith.constant 0.707106769 : f32
    %643 = vector.broadcast %cst_455 : f32 to vector<48x64xf32>
    %644 = arith.mulf %640, %643 : vector<48x64xf32>
    %645 = math.erf %644 : vector<48x64xf32>
    %cst_456 = arith.constant 1.000000e+00 : f32
    %646 = vector.broadcast %cst_456 : f32 to vector<48x64xf32>
    %647 = arith.addf %646, %645 : vector<48x64xf32>
    %648 = arith.mulf %642, %647 : vector<48x64xf32>
    %c1_457 = arith.constant 1 : index
    %c0_458 = arith.constant 0 : index
    %c0_459 = arith.constant 0 : index
    %649 = vector.load %arg17[%c1_457, %c0_458, %c0_459] : memref<2x64x32xf32, #tpu.memory_space<vmem>>, vector<1x64x32xf32>
    %650 = vector.shape_cast %649 : vector<1x64x32xf32> to vector<64x32xf32>
    %cst_460 = arith.constant dense<0.000000e+00> : vector<48x32xf32>
    %651 = tpu.matmul %648, %650, %cst_460 {dimension_numbers = #tpu.dot_dimension_numbers<[1], [0], [0], [1], [0, 0, 1, 1], [], []>} : vector<48x64xf32>, vector<64x32xf32>, vector<48x32xf32> -> vector<48x32xf32>
    %652 = arith.addf %605, %651 : vector<48x32xf32>
    %c1_461 = arith.constant 1 : index
    %c0_462 = arith.constant 0 : index
    %c0_463 = arith.constant 0 : index
    %653 = vector.load %arg18[%c1_461, %c0_462, %c0_463] : memref<2x1x32xf32, #tpu.memory_space<vmem>>, vector<1x1x32xf32>
    %654 = vector.shape_cast %653 : vector<1x1x32xf32> to vector<1x32xf32>
    %655 = vector.broadcast %654 : vector<1x32xf32> to vector<48x32xf32>
    %656 = arith.addf %652, %655 : vector<48x32xf32>
    %c0_464 = arith.constant 0 : index
    %c0_465 = arith.constant 0 : index
    %657 = vector.load %arg19[%c0_464, %c0_465] : memref<1x32xf32, #tpu.memory_space<vmem>>, vector<1x32xf32>
    %c0_466 = arith.constant 0 : index
    %c0_467 = arith.constant 0 : index
    %658 = vector.load %arg20[%c0_466, %c0_467] : memref<1x32xf32, #tpu.memory_space<vmem>>, vector<1x32xf32>
    %cst_468 = arith.constant dense<0.000000e+00> : vector<48xf32>
    %659 = vector.multi_reduction <add>, %656, %cst_468 [1] : vector<48x32xf32> to vector<48xf32>
    %660 = vector.shape_cast %659 : vector<48xf32> to vector<48x1xf32>
    %cst_469 = arith.constant 3.200000e+01 : f32
    %661 = vector.broadcast %cst_469 : f32 to vector<48x1xf32>
    %662 = arith.divf %660, %661 : vector<48x1xf32>
    %663 = vector.broadcast %662 : vector<48x1xf32> to vector<48x32xf32>
    %664 = arith.subf %656, %663 : vector<48x32xf32>
    %665 = vector.broadcast %662 : vector<48x1xf32> to vector<48x32xf32>
    %666 = arith.subf %656, %665 : vector<48x32xf32>
    %667 = arith.mulf %664, %666 : vector<48x32xf32>
    %cst_470 = arith.constant dense<0.000000e+00> : vector<48xf32>
    %668 = vector.multi_reduction <add>, %667, %cst_470 [1] : vector<48x32xf32> to vector<48xf32>
    %669 = vector.shape_cast %668 : vector<48xf32> to vector<48x1xf32>
    %cst_471 = arith.constant 3.200000e+01 : f32
    %670 = vector.broadcast %cst_471 : f32 to vector<48x1xf32>
    %671 = arith.divf %669, %670 : vector<48x1xf32>
    %672 = vector.broadcast %662 : vector<48x1xf32> to vector<48x32xf32>
    %673 = arith.subf %656, %672 : vector<48x32xf32>
    %cst_472 = arith.constant 9.99999997E-7 : f32
    %674 = vector.broadcast %cst_472 : f32 to vector<48x1xf32>
    %675 = arith.addf %671, %674 : vector<48x1xf32>
    %676 = math.rsqrt %675 : vector<48x1xf32>
    %677 = vector.broadcast %676 : vector<48x1xf32> to vector<48x32xf32>
    %678 = arith.mulf %673, %677 : vector<48x32xf32>
    %679 = vector.broadcast %657 : vector<1x32xf32> to vector<48x32xf32>
    %680 = arith.mulf %678, %679 : vector<48x32xf32>
    %681 = vector.broadcast %658 : vector<1x32xf32> to vector<48x32xf32>
    %682 = arith.addf %680, %681 : vector<48x32xf32>
    %c0_473 = arith.constant 0 : index
    %c0_474 = arith.constant 0 : index
    %683 = vector.load %arg21[%c0_473, %c0_474] : memref<32x16xf32, #tpu.memory_space<vmem>>, vector<32x16xf32>
    %cst_475 = arith.constant dense<0.000000e+00> : vector<48x16xf32>
    %684 = tpu.matmul %682, %683, %cst_475 {dimension_numbers = #tpu.dot_dimension_numbers<[1], [0], [0], [1], [0, 0, 1, 1], [], []>} : vector<48x32xf32>, vector<32x16xf32>, vector<48x16xf32> -> vector<48x16xf32>
    %c0_476 = arith.constant 0 : index
    %c0_477 = arith.constant 0 : index
    %685 = vector.load %arg22[%c0_476, %c0_477] : memref<1x16xf32, #tpu.memory_space<vmem>>, vector<1x16xf32>
    %686 = vector.broadcast %685 : vector<1x16xf32> to vector<48x16xf32>
    %687 = arith.addf %684, %686 : vector<48x16xf32>
    %c0_478 = arith.constant 0 : index
    %c0_479 = arith.constant 0 : index
    %688 = vector.load %arg23[%c0_478, %c0_479] : memref<48x16xf32, #tpu.memory_space<vmem>>, vector<48x16xf32>
    tpu.vector_store %arg23[%c0_478, %c0_479], %687 {strides = array<i32>} : memref<48x16xf32, #tpu.memory_space<vmem>>, vector<48x16xf32>,
    return
  }
}

</mosaic_0001>

<bundles_post_ra>
// kernel: vit_backbone_forward.1
= control target key start
LH: loop header
LB: loop body
LE: loop exit
PB: predicated region body
PF: predicated region fallthrough
CT: control target
= control target key end

     0   :  { %vm92_vm0 = vcmask 392192   ;;  %vm206_vm1 = vcmask 261120   ;;  %vm12239_vm2 = vmmov 0   ;;  %vm1769_vm3 = vcmask 1040384   ;;  %s15006_s2 = inlined_call_operand.vmem [shape: f32[48,32], index: 2, kind: input, shape index: {}]   ;;  %s15007_s0 = inlined_call_operand.vmem [shape: f32[48,48], index: 0, kind: input, shape index: {}]   ;;  %s15008_s1 = inlined_call_operand.vmem [shape: f32[48,32], index: 1, kind: input, shape index: {}]   ;;  %s15009_s5 = inlined_call_operand.vmem [shape: f32[2,4,32,8], index: 5, kind: input, shape index: {}]   ;;  %s15010_s9 = inlined_call_operand.vmem [shape: f32[2,4,32,8], index: 9, kind: input, shape index: {}]   ;;  %s15011_s7 = inlined_call_operand.vmem [shape: f32[2,4,32,8], index: 7, kind: input, shape index: {}]   ;;  %s15012_s3 = inlined_call_operand.vmem [shape: f32[2,1,32], index: 3, kind: input, shape index: {}]   ;;  %s15013_s4 = inlined_call_operand.vmem [shape: f32[2,1,32], index: 4, kind: input, shape index: {}]   ;;  %s15014_s10 = inlined_call_operand.vmem [shape: f32[2,4,1,8], index: 10, kind: input, shape index: {}]   ;;  %s15015_s6 = inlined_call_operand.vmem [shape: f32[2,4,1,8], index: 6, kind: input, shape index: {}]   ;;  %s15016_s8 = inlined_call_operand.vmem [shape: f32[2,4,1,8], index: 8, kind: input, shape index: {}]   ;;  %s15017_s11 = inlined_call_operand.vmem [shape: f32[2,4,8,32], index: 11, kind: input, shape index: {}]   ;;  %s15018_s12 = inlined_call_operand.vmem [shape: f32[2,1,32], index: 12, kind: input, shape index: {}]   ;;  %s15019_s15 = inlined_call_operand.vmem [shape: f32[2,32,64], index: 15, kind: input, shape index: {}]   ;;  %s15020_s13 = inlined_call_operand.vmem [shape: f32[2,1,32], index: 13, kind: input, shape index: {}]   ;;  %s15021_s14 = inlined_call_operand.vmem [shape: f32[2,1,32], index: 14, kind: input, shape index: {}]   ;;  %s15022_s17 = inlined_call_operand.vmem [shape: f32[2,64,32], index: 17, kind: input, shape index: {}]   ;;  %s15023_s16 = inlined_call_operand.vmem [shape: f32[2,1,64], index: 16, kind: input, shape index: {}]   ;;  %s15024_s18 = inlined_call_operand.vmem [shape: f32[2,1,32], index: 18, kind: input, shape index: {}]   ;;  %s15025_s21 = inlined_call_operand.vmem [shape: f32[32,16], index: 21, kind: input, shape index: {}]   ;;  %s15026_s19 = inlined_call_operand.vmem [shape: f32[1,32], index: 19, kind: input, shape index: {}]   ;;  %s15027_s20 = inlined_call_operand.vmem [shape: f32[1,32], index: 20, kind: input, shape index: {}]   ;;  %s15028_s22 = inlined_call_operand.vmem [shape: f32[1,16], index: 22, kind: input, shape index: {}]   ;;  %s15029_s23 = inlined_call_operand.vmem [shape: f32[48,16], index: 23, kind: output, shape index: {}]  }
   0x1   :  { %15076 = sst [smem:[#allocation36_spill]] %s15006_s2  ;;  %vm1626_vm4 = vcmask 64512   ;;  %vm1725_vm6 = vcmask 138240   ;;  %vm1732_vm7 = vcmask 131072   ;;  %vm2893_vm8 = vcmask 253952  }
   0x2   :  { %15077 = sst [smem:[#allocation37_spill]] %s15007_s0  ;;  %s15084_s24 = sld [smem:[#allocation36_spill]]  ;;  %vm12864_vm5 = vmpackc.low %vm1626_vm4, %vm1626_vm4  ;;  %vm4447_vm9 = vcmask 523264   ;;  %vm9184_vm10 = vcmask 130048  }
   0x3   :  { %15078 = sst [smem:[#allocation38_spill]] %s15008_s1 }
   0x4   :  { %15079 = sst [smem:[#allocation39_spill]] %s15009_s5  ;;  %s15086_s5 = sld [smem:[#allocation38_spill]] }
   0x5   :  { %15080 = sst [smem:[#allocation40_spill]] %s15010_s9  ;;  %s15085_s9 = sld [smem:[#allocation37_spill]] }
   0x6   :  { %15081 = sst [smem:[#allocation41_spill]] %s15011_s7  ;;  %s15093_s28 = sld [smem:[#allocation39_spill]] }
   0x7   :  { %15082 = sst [smem:[#allocation42_spill]] %s15012_s3  ;;  %s15094_s25 = sld [smem:[#allocation40_spill]] }
   0x8   :  { %15083 = sst [smem:[#allocation43_spill]] %s15013_s4  ;;  %v80_v0 = vld [vmem:[%s15084_s24] sm:$0xff]  ;;  %v81_v1 = vld [vmem:[%s15084_s24 + $0x8] sm:$0xff]  ;;  %v82_v2 = vld [vmem:[%s15084_s24 + $0x10] sm:$0xff]  ;;  %s15095_s30 = sld [smem:[#allocation41_spill]] }
   0x9   :  { %v11514_v3 = vpack.c.bf16 %v81_v1, %v80_v0  ;;  %v83_v4 = vld [vmem:[%s15084_s24 + $0x18] sm:$0xff]  ;;  %v84_v6 = vld [vmem:[%s15084_s24 + $0x20] sm:$0xff]  ;;  %v85_v7 = vld [vmem:[%s15084_s24 + $0x28] sm:$0xff]  ;;  %s15096_s4 = sld [smem:[#allocation42_spill]]  ;;  %s15097_s2 = sld [smem:[#allocation43_spill]] }
   0xa   :  { %v11518_v5 = vpack.c.bf16 %v83_v4, %v82_v2  ;;  %v11522_v9 = vpack.c.bf16 %v85_v7, %v84_v6  ;;  %v86_v15 = vld [vmem:[%s15086_s5] sm:$0xff]  ;;  %v87_v17 = vld [vmem:[%s15086_s5 + $0x8] sm:$0xff]  ;;  %v88_v20 = vld [vmem:[%s15086_s5 + $0x10] sm:$0xff] }
   0xb   :  { %v74_v8 = vld [vmem:[%s15085_s9] sm:$0xff]  ;;  %11515 = vmatprep.subr.bf16.mxu0 %v11514_v3  ;;  %v75_v10 = vld [vmem:[%s15085_s9 + $0x8] sm:$0xff]  ;;  %v76_v11 = vld [vmem:[%s15085_s9 + $0x10] sm:$0xff] }
   0xc   :  { %10340 = vmatprep.mubr.msk.f32.mxu0 %vm92_vm0, %v74_v8  ;;  %11517 = vmatpush3.bf16.msra.mxu0 %v11514_v3  ;;  %v77_v12 = vld [vmem:[%s15085_s9 + $0x18] sm:$0xff]  ;;  %v78_v13 = vld [vmem:[%s15085_s9 + $0x20] sm:$0xff]  ;;  %v79_v14 = vld [vmem:[%s15085_s9 + $0x28] sm:$0xff] }
   0xd   :  { %11519 = vmatprep.subr.bf16.mxu0 %v11518_v5  ;;  %v89_v24 = vld [vmem:[%s15086_s5 + $0x18] sm:$0xff]  ;;  %v90_v27 = vld [vmem:[%s15086_s5 + $0x20] sm:$0xff]  ;;  %v91_v32 = vld [vmem:[%s15086_s5 + $0x28] sm:$0xff] }
   0xe   :  { %v319_v6 = vld [vmem:[%s15093_s28 + $0x8] sm:$0xff]  ;;  %v548_v7 = vld [vmem:[%s15094_s25] sm:$0xff] }
  0x10   :  { %11521 = vmatpush3.bf16.msra.mxu0 %v11518_v5  ;;  %v318_v5 = vld [vmem:[%s15093_s28] sm:$0xff] }
  0x11   :  { %11523 = vmatprep.subr.bf16.mxu0 %v11522_v9  ;;  %v11526_v8 = vpack.c.bf16 %v319_v6, %v318_v5 }
  0x13   :  { %11527 = vmatprep.subr.bf16.mxu1 %v11526_v8 }
  0x14   :  { %11525 = vmatpush3.bf16.msra.mxu0 %v11522_v9  ;;  %v549_v9 = vld [vmem:[%s15094_s25 + $0x8] sm:$0xff]  ;;  %11529 = vmatpush3.bf16.msra.mxu1 %v11526_v8 }
  0x17   :  { %10341 = vmatmul.mubr.msk.f32.vlgmr.msra.gmra.mrb[0].mxu0 %vm92_vm0, %v75_v10  ;;  %v11542_v10 = vpack.c.bf16 %v549_v9, %v548_v7 }
  0x18   :  { %10343 = vmatprep.mubr.msk.f32.mxu0 %vm92_vm0, %v76_v11  ;;  %v320_v11 = vld [vmem:[%s15093_s28 + $0x10] sm:$0xff] }
  0x19   :  { %11543 = vmatprep.subr.bf16.mxu0 %v11542_v10 }
  0x1a   :  { %11545 = vmatpush3.bf16.msra.mxu0 %v11542_v10  ;;  %v9224_v10 = vld [vmem:[%s15093_s28 + $0x20] sm:$0xff] }
  0x1b   :  { %10344 = vmatmul.mubr.msk.f32.gmra.mrb[2].mxu0 %vm92_vm0, %v77_v12  ;;  %v321_v12 = vld [vmem:[%s15093_s28 + $0x18] sm:$0xff] }
  0x1c   :  { %10346 = vmatprep.mubr.msk.f32.mxu0 %vm92_vm0, %v78_v13  ;;  %v550_v13 = vld [vmem:[%s15094_s25 + $0x10] sm:$0xff] }
  0x1f   :  { %10347 = vmatmul.mubr.msk.f32.gmra.mrb[4].mxu0 %vm92_vm0, %v79_v14  ;;  %v11530_v14 = vpack.c.bf16 %v321_v12, %v320_v11  ;;  %v9261_v12 = vld [vmem:[%s15093_s28 + $0x48] sm:$0xff] }
  0x21   :  { %11531 = vmatprep.subr.bf16.mxu1 %v11530_v14 }
  0x22   :  { %11533 = vmatpush3.bf16.msra.mxu1 %v11530_v14 }
  0xea   :  { %v10342_v16 = vpop.f32.mrb[0].mxu0 }
  0xeb   :  { %v177_v18 = vpop.f32.mrb[1].mxu0  ;;  %v12413_v21 = vadd.f32 %v10342_v16, %v87_v17  ;;  %v442_v17 = vld [vmem:[%s15095_s30] sm:$0xff] }
  0xec   :  { %v12408_v19 = vadd.f32 %v177_v18, %v86_v15  ;;  %v551_v15 = vld [vmem:[%s15094_s25 + $0x18] sm:$0xff]  ;;  %v443_v18 = vld [vmem:[%s15095_s30 + $0x8] sm:$0xff] }
  0xed   :  { %15088 = vst [vmem:[#allocation4_spill] sm:$0xff] %v12413_v21  ;;  %v218_v31 = vsel %vm206_vm1, %v12413_v21, 0.0  ;;  %v11546_v16 = vpack.c.bf16 %v551_v15, %v550_v13 }
  0xee   :  { %15087 = vst [vmem:[#allocation3_spill] sm:$0xff] %v12408_v19  ;;  %v10345_v22 = vpop.f32.mrb[2].mxu0  ;;  %v215_v23 = vsel %vm206_vm1, %v12408_v19, 0.0 }
  0xef   :  { %v187_v25 = vpop.f32.mrb[3].mxu0  ;;  %216 = vadd.xlane.f32.xlu0 %v215_v23  ;;  %v12425_v28 = vadd.f32 %v10345_v22, %v89_v24  ;;  %11547 = vmatprep.subr.bf16.mxu0 %v11546_v16  ;;  %v12513_v22 = vpack.c.bf16 %v443_v18, %v442_v17  ;;  %v9237_v23 = vld [vmem:[%s15095_s30 + $0x28] sm:$0xff] }
  0xf0   :  { %v12420_v26 = vadd.f32 %v187_v25, %v88_v20  ;;  %11549 = vmatpush3.bf16.msra.mxu0 %v11546_v16  ;;  %v9236_v20 = vld [vmem:[%s15095_s30 + $0x20] sm:$0xff] }
  0xf1   :  { %15090 = vst [vmem:[#allocation6_spill] sm:$0xff] %v12425_v28  ;;  %v224_v36 = vsel %vm206_vm1, %v12425_v28, 0.0  ;;  %v12518_v24 = vpack.c.bf16 %v9237_v23, %v9236_v20  ;;  %11535 = vmatprep.subr.bf16.mxu1 %v12513_v22 }
  0xf2   :  { %15089 = vst [vmem:[#allocation5_spill] sm:$0xff] %v12420_v26  ;;  %v10348_v29 = vpop.f32.mrb[4].mxu0  ;;  %v221_v30 = vsel %vm206_vm1, %v12420_v26, 0.0 }
  0xf3   :  { %v197_v33 = vpop.f32.mrb[5].mxu0  ;;  %222 = vadd.xlane.f32.xlu1 %v221_v30  ;;  %219 = vadd.xlane.f32.xlu0 %v218_v31  ;;  %v12436_v35 = vadd.f32 %v10348_v29, %v91_v32 }
  0xf4   :  { %v12434_v34 = vadd.f32 %v197_v33, %v90_v27  ;;  %11559 = vmatprep.subr.bf16.mxu0 %v12518_v24 }
  0xf5   :  { %15092 = vst [vmem:[#allocation8_spill] sm:$0xff] %v12436_v35  ;;  %v230_v38 = vsel %vm206_vm1, %v12436_v35, 0.0 }
  0xf6   :  { %15091 = vst [vmem:[#allocation7_spill] sm:$0xff] %v12434_v34  ;;  %v227_v37 = vsel %vm206_vm1, %v12434_v34, 0.0 }
  0xf7   :  { %225 = vadd.xlane.f32.xlu1 %v224_v36  ;;  %228 = vadd.xlane.f32.xlu0 %v227_v37 }
  0xfb   :  { %231 = vadd.xlane.f32.xlu1 %v230_v38 }
 0x17c   :  { %v217_v39 = vpop.xlane.xlu0 %216 }
 0x17d   :  { %v234_v40 = vmul.f32 0.03125, %v217_v39 }
 0x17f   :  { %v12445_v41 = vsub.f32 %v12408_v19, %v234_v40 }
 0x180   :  { %v223_v42 = vpop.xlane.xlu1 %222  ;;  %v220_v43 = vpop.xlane.xlu0 %219 }
 0x181   :  { %v236_v44 = vmul.f32 0.03125, %v223_v42  ;;  %v235_v45 = vmul.f32 0.03125, %v220_v43  ;;  %v246_v46 = vmul.f32 %v12445_v41, %v12445_v41 }
 0x183   :  { %v12450_v47 = vsub.f32 %v12420_v26, %v236_v44  ;;  %v12453_v48 = vsub.f32 %v12413_v21, %v235_v45  ;;  %v252_v49 = vsel %vm206_vm1, %v246_v46, 0.0  ;;  %v13086_v21 = vld [vmem:[%s15014_s10 + $0x3] ss:$0 sm:$0xff] }
 0x184   :  { %v226_v50 = vpop.xlane.xlu1 %225  ;;  %253 = vadd.xlane.f32.xlu0 %v252_v49  ;;  %v229_v51 = vpop.xlane.xlu0 %228 }
 0x185   :  { %v237_v52 = vmul.f32 0.03125, %v226_v50  ;;  %v238_v53 = vmul.f32 0.03125, %v229_v51  ;;  %v248_v54 = vmul.f32 %v12450_v47, %v12450_v47  ;;  %v247_v55 = vmul.f32 %v12453_v48, %v12453_v48  ;;  %v9201_v50 = vld [vmem:[%s15096_s4] ss:$0 sm:$0xff] }
 0x187   :  { %v12461_v56 = vsub.f32 %v12425_v28, %v237_v52  ;;  %v12464_v57 = vsub.f32 %v12434_v34, %v238_v53  ;;  %v258_v58 = vsel %vm206_vm1, %v248_v54, 0.0  ;;  %v255_v59 = vsel %vm206_vm1, %v247_v55, 0.0  ;;  %v9202_v53 = vld [vmem:[%s15097_s2] ss:$0 sm:$0xff] }
 0x188   :  { %v232_v60 = vpop.xlane.xlu1 %231  ;;  %259 = vadd.xlane.f32.xlu0 %v258_v58  ;;  %256 = vadd.xlane.f32.xlu1 %v255_v59 }
 0x189   :  { %v239_v61 = vmul.f32 0.03125, %v232_v60  ;;  %v249_v62 = vmul.f32 %v12461_v56, %v12461_v56  ;;  %v250_v63 = vmul.f32 %v12464_v57, %v12464_v57 }
 0x18b   :  { %v12473_v0 = vsub.f32 %v12436_v35, %v239_v61  ;;  %v261_v1 = vsel %vm206_vm1, %v249_v62, 0.0  ;;  %v264_v2 = vsel %vm206_vm1, %v250_v63, 0.0  ;;  %v444_v62 = vld [vmem:[%s15095_s30 + $0x10] sm:$0xff] }
 0x18c   :  { %262 = vadd.xlane.f32.xlu1 %v261_v1  ;;  %265 = vadd.xlane.f32.xlu0 %v264_v2 }
 0x18d   :  { %v251_v3 = vmul.f32 %v12473_v0, %v12473_v0 }
 0x18f   :  { %v267_v4 = vsel %vm206_vm1, %v251_v3, 0.0 }
 0x190   :  { %268 = vadd.xlane.f32.xlu1 %v267_v4 }
 0x211   :  { %v254_v25 = vpop.xlane.xlu0 %253 }
 0x212   :  { %v270_v27 = vmul.f32 0.03125, %v254_v25  ;;  %v9262_v25 = vld [vmem:[%s15093_s28 + $0x50] sm:$0xff] }
 0x214   :  { %v276_v29 = vadd.f32 1e-06, %v270_v27  ;;  %v9263_v27 = vld [vmem:[%s15093_s28 + $0x58] sm:$0xff] }
 0x215   :  { %v257_v30 = vpop.xlane.xlu1 %256  ;;  %v260_v31 = vpop.xlane.xlu0 %259 }
 0x216   :  { %11961 = vrsqrt.f32 %v276_v29  ;;  %v271_v32 = vmul.f32 0.03125, %v257_v30  ;;  %v272_v33 = vmul.f32 0.03125, %v260_v31  ;;  %v11578_v30 = vpack.c.bf16 %v9263_v27, %v9262_v25  ;;  %v9248_v31 = vld [vmem:[%s15094_s25 + $0x20] sm:$0xff] }
 0x218   :  { %v277_v36 = vadd.f32 1e-06, %v271_v32  ;;  %v278_v37 = vadd.f32 1e-06, %v272_v33  ;;  %v9249_v32 = vld [vmem:[%s15094_s25 + $0x28] sm:$0xff]  ;;  %v9284_v33 = vld [vmem:[%s15094_s25 + $0x40] sm:$0xff] }
 0x219   :  { %v263_v38 = vpop.xlane.xlu1 %262  ;;  %v266_v39 = vpop.xlane.xlu0 %265 }
 0x21a   :  { %11963 = vrsqrt.f32 %v277_v36  ;;  %v273_v40 = vmul.f32 0.03125, %v263_v38  ;;  %v274_v42 = vmul.f32 0.03125, %v266_v39  ;;  %v9285_v36 = vld [vmem:[%s15094_s25 + $0x48] sm:$0xff]  ;;  %v9250_v39 = vld [vmem:[%s15094_s25 + $0x30] sm:$0xff] }
 0x21b   :  { %11965 = vrsqrt.f32 %v278_v37  ;;  %v11566_v37 = vpack.c.bf16 %v9249_v32, %v9248_v31  ;;  %v11590_v38 = vpack.c.bf16 %v9285_v36, %v9284_v33 }
 0x21c   :  { %v279_v43 = vadd.f32 1e-06, %v273_v40  ;;  %v280_v44 = vadd.f32 1e-06, %v274_v42  ;;  %v9251_v40 = vld [vmem:[%s15094_s25 + $0x38] sm:$0xff]  ;;  %v9286_v42 = vld [vmem:[%s15094_s25 + $0x50] sm:$0xff] }
 0x21d   :  { %v269_v45 = vpop.xlane.xlu1 %268 }
 0x21e   :  { %11967 = vrsqrt.f32 %v279_v43  ;;  %v275_v46 = vmul.f32 0.03125, %v269_v45  ;;  %v9287_v43 = vld [vmem:[%s15094_s25 + $0x58] sm:$0xff] }
 0x21f   :  { %11969 = vrsqrt.f32 %v280_v44  ;;  %v11570_v44 = vpack.c.bf16 %v9251_v40, %v9250_v39  ;;  %v11594_v45 = vpack.c.bf16 %v9287_v43, %v9286_v42 }
 0x220   :  { %v11962_v49 = vpop.eup %11961  ;;  %v281_v51 = vadd.f32 1e-06, %v275_v46  ;;  %v9272_v46 = vld [vmem:[%s15095_s30 + $0x40] sm:$0xff] }
 0x221   :  { %v288_v52 = vmul.f32 %v11962_v49, %v12445_v41  ;;  %v445_v41 = vld [vmem:[%s15095_s30 + $0x18] sm:$0xff]  ;;  %v9273_v49 = vld [vmem:[%s15095_s30 + $0x48] sm:$0xff] }
 0x222   :  { %11971 = vrsqrt.f32 %v281_v51  ;;  %v11538_v8 = vpack.c.bf16 %v445_v41, %v444_v62  ;;  %v9309_v51 = vld [vmem:[%s15095_s30 + $0x68] sm:$0xff] }
 0x223   :  { %v300_v54 = vmul.f32 %v9201_v50, %v288_v52  ;;  %v11582_v52 = vpack.c.bf16 %v9273_v49, %v9272_v46  ;;  %v9297_v41 = vld [vmem:[%s15093_s28 + $0x68] sm:$0xff] }
 0x224   :  { %v11964_v55 = vpop.eup %11963 }
 0x225   :  { %v11966_v58 = vpop.eup %11965  ;;  %v12529_v59 = vadd.f32 %v9202_v53, %v300_v54  ;;  %v289_v60 = vmul.f32 %v11964_v55, %v12453_v48  ;;  %v9238_v48 = vld [vmem:[%s15095_s30 + $0x30] sm:$0xff]  ;;  %v9275_v55 = vld [vmem:[%s15095_s30 + $0x58] sm:$0xff] }
 0x226   :  { %v290_v61 = vmul.f32 %v11966_v58, %v12450_v47  ;;  %v9239_v47 = vld [vmem:[%s15095_s30 + $0x38] sm:$0xff]  ;;  %v9274_v54 = vld [vmem:[%s15095_s30 + $0x50] sm:$0xff] }
 0x227   :  { %v301_v63 = vmul.f32 %v9201_v50, %v289_v60  ;;  %10357 = vmatprep.mubr.msk.f32.mxu1 %vm206_vm1, %v12529_v59  ;;  %10391 = vmatprep.mubr.msk.f32.mxu0 %vm206_vm1, %v12529_v59  ;;  %v11562_v9 = vpack.c.bf16 %v9239_v47, %v9238_v48  ;;  %v9310_v58 = vld [vmem:[%s15095_s30 + $0x70] sm:$0xff]  ;;  %v9311_v60 = vld [vmem:[%s15095_s30 + $0x78] sm:$0xff] }
 0x228   :  { %v11968_v1 = vpop.eup %11967  ;;  %v302_v2 = vmul.f32 %v9201_v50, %v290_v61  ;;  %v11586_v61 = vpack.c.bf16 %v9275_v55, %v9274_v54  ;;  %v11610_v62 = vpack.c.bf16 %v9311_v60, %v9310_v58  ;;  %v9298_v47 = vld [vmem:[%s15093_s28 + $0x70] sm:$0xff] }
 0x229   :  { %v11970_v3 = vpop.eup %11969  ;;  %v12549_v4 = vadd.f32 %v9202_v53, %v301_v63  ;;  %v291_v5 = vmul.f32 %v11968_v1, %v12461_v56  ;;  %v9225_v56 = vld [vmem:[%s15093_s28 + $0x28] sm:$0xff]  ;;  %v9296_v63 = vld [vmem:[%s15093_s28 + $0x60] sm:$0xff]  ;;  %v9299_v1 = vld [vmem:[%s15093_s28 + $0x78] sm:$0xff] }
 0x22a   :  { %v12552_v6 = vadd.f32 %v9202_v53, %v302_v2  ;;  %v292_v7 = vmul.f32 %v11970_v3, %v12464_v57  ;;  %v9260_v57 = vld [vmem:[%s15093_s28 + $0x40] sm:$0xff]  ;;  %v11550_v18 = vpack.c.bf16 %v9225_v56, %v9224_v10  ;;  %v11598_v48 = vpack.c.bf16 %v9297_v41, %v9296_v63 }
 0x22b   :  { %v303_v11 = vmul.f32 %v9201_v50, %v291_v5  ;;  %10358 = vmatmul.mubr.msk.f32.vlgmr.msra.gmra.mrb[0].mxu1 %vm206_vm1, %v12549_v4  ;;  %10392 = vmatmul.mubr.msk.f32.vlgmr.msra.gmra.mrb[6].mxu0 %vm206_vm1, %v12549_v4  ;;  %v11574_v20 = vpack.c.bf16 %v9261_v12, %v9260_v57  ;;  %v11602_v2 = vpack.c.bf16 %v9299_v1, %v9298_v47  ;;  %v9320_v3 = vld [vmem:[%s15094_s25 + $0x60] sm:$0xff]  ;;  %v9321_v5 = vld [vmem:[%s15094_s25 + $0x68] sm:$0xff] }
 0x22c   :  { %v11972_v13 = vpop.eup %11971  ;;  %v304_v14 = vmul.f32 %v9201_v50, %v292_v7  ;;  %10360 = vmatprep.mubr.msk.f32.mxu1 %vm206_vm1, %v12552_v6  ;;  %10394 = vmatprep.mubr.msk.f32.mxu0 %vm206_vm1, %v12552_v6  ;;  %v11614_v7 = vpack.c.bf16 %v9321_v5, %v9320_v3 }
 0x22d   :  { %v12575_v15 = vadd.f32 %v9202_v53, %v303_v11  ;;  %v293_v16 = vmul.f32 %v11972_v13, %v12473_v0  ;;  %11537 = vmatpush3.bf16.msra.mxu1 %v12513_v22  ;;  %11561 = vmatpush3.bf16.msra.mxu0 %v12518_v24  ;;  %v9226_v22 = vld [vmem:[%s15093_s28 + $0x30] sm:$0xff]  ;;  %v9227_v24 = vld [vmem:[%s15093_s28 + $0x38] sm:$0xff]  ;;  %v15038_v11 = vmov 0.0|0.0  }
 0x22e   :  { %v12580_v17 = vadd.f32 %v9202_v53, %v304_v14  ;;  %11539 = vmatprep.subr.bf16.mxu1 %v11538_v8  ;;  %11563 = vmatprep.subr.bf16.mxu0 %v11562_v9  ;;  %v11554_v29 = vpack.c.bf16 %v9227_v24, %v9226_v22 }
 0x22f   :  { %v305_v23 = vmul.f32 %v9201_v50, %v293_v16  ;;  %10361 = vmatmul.mubr.msk.f32.gmra.mrb[2].mxu1 %vm206_vm1, %v12575_v15  ;;  %10395 = vmatmul.mubr.msk.f32.gmra.mrb[8].mxu0 %vm206_vm1, %v12575_v15  ;;  %v9308_v50 = vld [vmem:[%s15095_s30 + $0x60] sm:$0xff] }
 0x230   :  { %10363 = vmatprep.mubr.msk.f32.mxu1 %vm206_vm1, %v12580_v17  ;;  %10397 = vmatprep.mubr.msk.f32.mxu0 %vm206_vm1, %v12580_v17 }
 0x231   :  { %v12590_v0 = vadd.f32 %v9202_v53, %v305_v23  ;;  %11541 = vmatpush3.bf16.msra.mxu1 %v11538_v8  ;;  %11565 = vmatpush3.bf16.msra.mxu0 %v11562_v9  ;;  %v11606_v53 = vpack.c.bf16 %v9309_v51, %v9308_v50  ;;  %v9322_v8 = vld [vmem:[%s15094_s25 + $0x70] sm:$0xff]  ;;  %v9323_v9 = vld [vmem:[%s15094_s25 + $0x78] sm:$0xff] }
 0x232   :  { %11551 = vmatprep.subr.bf16.mxu1 %v11550_v18  ;;  %11575 = vmatprep.subr.bf16.mxu0 %v11574_v20  ;;  %v11618_v10 = vpack.c.bf16 %v9323_v9, %v9322_v8 }
 0x233   :  { %10364 = vmatmul.mubr.msk.f32.gmra.mrb[4].mxu1 %vm206_vm1, %v12590_v0  ;;  %10398 = vmatmul.mubr.msk.f32.gmra.mrb[10].mxu0 %vm206_vm1, %v12590_v0 }
 0x234   :  { %10374 = vmatprep.mubr.msk.f32.mxu1 %vm206_vm1, %v12529_v59  ;;  %10425 = vmatprep.mubr.msk.f32.mxu0 %vm206_vm1, %v12529_v59 }
 0x237   :  { %10375 = vmatmul.mubr.msk.f32.vlgmr.msra.gmra.mrb[6].mxu1 %vm206_vm1, %v12549_v4  ;;  %10426 = vmatmul.mubr.msk.f32.vlgmr.msra.gmra.mrb[12].mxu0 %vm206_vm1, %v12549_v4 }
 0x238   :  { %10377 = vmatprep.mubr.msk.f32.mxu1 %vm206_vm1, %v12552_v6  ;;  %10428 = vmatprep.mubr.msk.f32.mxu0 %vm206_vm1, %v12552_v6 }
 0x239   :  { %11553 = vmatpush3.bf16.msra.mxu1 %v11550_v18  ;;  %11577 = vmatpush3.bf16.msra.mxu0 %v11574_v20 }
 0x23a   :  { %11555 = vmatprep.subr.bf16.mxu1 %v11554_v29  ;;  %11579 = vmatprep.subr.bf16.mxu0 %v11578_v30 }
 0x23b   :  { %10378 = vmatmul.mubr.msk.f32.gmra.mrb[8].mxu1 %vm206_vm1, %v12575_v15  ;;  %10429 = vmatmul.mubr.msk.f32.gmra.mrb[14].mxu0 %vm206_vm1, %v12575_v15 }
 0x23c   :  { %10380 = vmatprep.mubr.msk.f32.mxu1 %vm206_vm1, %v12580_v17  ;;  %10431 = vmatprep.mubr.msk.f32.mxu0 %vm206_vm1, %v12580_v17 }
 0x23d   :  { %11557 = vmatpush3.bf16.msra.mxu1 %v11554_v29  ;;  %11581 = vmatpush3.bf16.msra.mxu0 %v11578_v30 }
 0x23e   :  { %11567 = vmatprep.subr.bf16.mxu1 %v11566_v37  ;;  %11591 = vmatprep.subr.bf16.mxu0 %v11590_v38 }
 0x23f   :  { %10381 = vmatmul.mubr.msk.f32.gmra.mrb[10].mxu1 %vm206_vm1, %v12590_v0  ;;  %10432 = vmatmul.mubr.msk.f32.gmra.mrb[16].mxu0 %vm206_vm1, %v12590_v0 }
 0x240   :  { %10408 = vmatprep.mubr.msk.f32.mxu1 %vm206_vm1, %v12529_v59  ;;  %10459 = vmatprep.mubr.msk.f32.mxu0 %vm206_vm1, %v12529_v59 }
 0x243   :  { %10409 = vmatmul.mubr.msk.f32.vlgmr.msra.gmra.mrb[12].mxu1 %vm206_vm1, %v12549_v4  ;;  %10460 = vmatmul.mubr.msk.f32.vlgmr.msra.gmra.mrb[18].mxu0 %vm206_vm1, %v12549_v4 }
 0x244   :  { %10411 = vmatprep.mubr.msk.f32.mxu1 %vm206_vm1, %v12552_v6  ;;  %10462 = vmatprep.mubr.msk.f32.mxu0 %vm206_vm1, %v12552_v6 }
 0x245   :  { %11569 = vmatpush3.bf16.msra.mxu1 %v11566_v37  ;;  %11593 = vmatpush3.bf16.msra.mxu0 %v11590_v38  ;;  %v9210_v37 = vld [vmem:[%s15016_s8] ss:$0 sm:$0xff]  ;;  %v12855_v38 = vld [vmem:[%s15016_s8 + $0x1] ss:$0 sm:$0xff] }
 0x246   :  { %11571 = vmatprep.subr.bf16.mxu1 %v11570_v44  ;;  %11595 = vmatprep.subr.bf16.mxu0 %v11594_v45 }
 0x247   :  { %10412 = vmatmul.mubr.msk.f32.gmra.mrb[14].mxu1 %vm206_vm1, %v12575_v15  ;;  %10463 = vmatmul.mubr.msk.f32.gmra.mrb[20].mxu0 %vm206_vm1, %v12575_v15 }
 0x248   :  { %10414 = vmatprep.mubr.msk.f32.mxu1 %vm206_vm1, %v12580_v17  ;;  %10465 = vmatprep.mubr.msk.f32.mxu0 %vm206_vm1, %v12580_v17 }
 0x249   :  { %11573 = vmatpush3.bf16.msra.mxu1 %v11570_v44  ;;  %11597 = vmatpush3.bf16.msra.mxu0 %v11594_v45 }
 0x24a   :  { %11583 = vmatprep.subr.bf16.mxu1 %v11582_v52  ;;  %11607 = vmatprep.subr.bf16.mxu0 %v11606_v53 }
 0x24b   :  { %10415 = vmatmul.mubr.msk.f32.gmra.mrb[16].mxu1 %vm206_vm1, %v12590_v0  ;;  %10466 = vmatmul.mubr.msk.f32.gmra.mrb[22].mxu0 %vm206_vm1, %v12590_v0 }
 0x24c   :  { %10442 = vmatprep.mubr.msk.f32.mxu1 %vm206_vm1, %v12529_v59  ;;  %10493 = vmatprep.mubr.msk.f32.mxu0 %vm206_vm1, %v12529_v59 }
 0x24f   :  { %10443 = vmatmul.mubr.msk.f32.vlgmr.msra.gmra.mrb[18].mxu1 %vm206_vm1, %v12549_v4  ;;  %10494 = vmatmul.mubr.msk.f32.vlgmr.msra.gmra.mrb[24].mxu0 %vm206_vm1, %v12549_v4 }
 0x250   :  { %10445 = vmatprep.mubr.msk.f32.mxu1 %vm206_vm1, %v12552_v6  ;;  %10496 = vmatprep.mubr.msk.f32.mxu0 %vm206_vm1, %v12552_v6 }
 0x251   :  { %11585 = vmatpush3.bf16.msra.mxu1 %v11582_v52  ;;  %11609 = vmatpush3.bf16.msra.mxu0 %v11606_v53 }
 0x252   :  { %11587 = vmatprep.subr.bf16.mxu1 %v11586_v61  ;;  %11611 = vmatprep.subr.bf16.mxu0 %v11610_v62 }
 0x253   :  { %10446 = vmatmul.mubr.msk.f32.gmra.mrb[20].mxu1 %vm206_vm1, %v12575_v15  ;;  %10497 = vmatmul.mubr.msk.f32.gmra.mrb[26].mxu0 %vm206_vm1, %v12575_v15 }
 0x254   :  { %10448 = vmatprep.mubr.msk.f32.mxu1 %vm206_vm1, %v12580_v17  ;;  %10499 = vmatprep.mubr.msk.f32.mxu0 %vm206_vm1, %v12580_v17 }
 0x255   :  { %11589 = vmatpush3.bf16.msra.mxu1 %v11586_v61  ;;  %11613 = vmatpush3.bf16.msra.mxu0 %v11610_v62 }
 0x256   :  { %11599 = vmatprep.subr.bf16.mxu1 %v11598_v48  ;;  %11622 = vmatprep.subr.bf16.mxu0 %v15038_v11 }
 0x257   :  { %10449 = vmatmul.mubr.msk.f32.gmra.mrb[22].mxu1 %vm206_vm1, %v12590_v0  ;;  %10500 = vmatmul.mubr.msk.f32.gmra.mrb[28].mxu0 %vm206_vm1, %v12590_v0 }
 0x258   :  { %10476 = vmatprep.mubr.msk.f32.mxu1 %vm206_vm1, %v12529_v59  ;;  %10527 = vmatprep.mubr.msk.f32.mxu0 %vm206_vm1, %v12529_v59 }
 0x25b   :  { %10477 = vmatmul.mubr.msk.f32.vlgmr.msra.gmra.mrb[24].mxu1 %vm206_vm1, %v12549_v4  ;;  %10528 = vmatmul.mubr.msk.f32.vlgmr.msra.gmra.mrb[30].mxu0 %vm206_vm1, %v12549_v4 }
 0x25c   :  { %10479 = vmatprep.mubr.msk.f32.mxu1 %vm206_vm1, %v12552_v6  ;;  %10530 = vmatprep.mubr.msk.f32.mxu0 %vm206_vm1, %v12552_v6 }
 0x25d   :  { %11601 = vmatpush3.bf16.msra.mxu1 %v11598_v48 }
 0x25e   :  { %11603 = vmatprep.subr.bf16.mxu1 %v11602_v2 }
 0x25f   :  { %10480 = vmatmul.mubr.msk.f32.gmra.mrb[26].mxu1 %vm206_vm1, %v12575_v15  ;;  %10531 = vmatmul.mubr.msk.f32.gmra.mrb[32].mxu0 %vm206_vm1, %v12575_v15 }
 0x260   :  { %10482 = vmatprep.mubr.msk.f32.mxu1 %vm206_vm1, %v12580_v17  ;;  %10533 = vmatprep.mubr.msk.f32.mxu0 %vm206_vm1, %v12580_v17 }
 0x261   :  { %11605 = vmatpush3.bf16.msra.mxu1 %v11602_v2 }
 0x262   :  { %11615 = vmatprep.subr.bf16.mxu1 %v11614_v7 }
 0x263   :  { %10483 = vmatmul.mubr.msk.f32.gmra.mrb[28].mxu1 %vm206_vm1, %v12590_v0  ;;  %10534 = vmatmul.mubr.msk.f32.gmra.mrb[34].mxu0 %vm206_vm1, %v12590_v0 }
 0x264   :  { %10510 = vmatprep.mubr.msk.f32.mxu1 %vm206_vm1, %v12529_v59 }
 0x267   :  { %10511 = vmatmul.mubr.msk.f32.vlgmr.msra.gmra.mrb[30].mxu1 %vm206_vm1, %v12549_v4 }
 0x268   :  { %10513 = vmatprep.mubr.msk.f32.mxu1 %vm206_vm1, %v12552_v6  ;;  %11617 = vmatpush3.bf16.msra.mxu1 %v11614_v7 }
 0x269   :  { %11619 = vmatprep.subr.bf16.mxu1 %v11618_v10 }
 0x26b   :  { %10514 = vmatmul.mubr.msk.f32.gmra.mrb[32].mxu1 %vm206_vm1, %v12575_v15 }
 0x26c   :  { %10516 = vmatprep.mubr.msk.f32.mxu1 %vm206_vm1, %v12580_v17  ;;  %11621 = vmatpush3.bf16.msra.mxu1 %v11618_v10 }
 0x26d   :  { %11626 = vmatprep.subr.bf16.mxu1 %v15038_v11 }
 0x26f   :  { %10517 = vmatmul.mubr.msk.f32.gmra.mrb[34].mxu1 %vm206_vm1, %v12590_v0 }
 0x270   :  { %10544 = vmatprep.mubr.msk.f32.mxu1 %vm206_vm1, %v12529_v59  ;;  %v15040_v59 = vmov 0.0  }
 0x271   :  { %207 = vst.msk [vmem:[#allocation2] sm:$0xff] %vm206_vm1, %v15040_v59  ;;  %208 = vst.msk [vmem:[#allocation2 + $0x8] sm:$0xff] %vm206_vm1, %v15040_v59  ;;  %10559 = vmatprep.mubr.msk.f32.mxu0 %vm12239_vm2, %v15040_v59 }
 0x272   :  { %209 = vst.msk [vmem:[#allocation2 + $0x10] sm:$0xff] %vm206_vm1, %v15040_v59  ;;  %210 = vst.msk [vmem:[#allocation2 + $0x18] sm:$0xff] %vm206_vm1, %v15040_v59 }
 0x273   :  { %10545 = vmatmul.mubr.msk.f32.vlgmr.msra.gmra.mrb[36].mxu1 %vm206_vm1, %v12549_v4  ;;  %211 = vst.msk [vmem:[#allocation2 + $0x20] sm:$0xff] %vm206_vm1, %v15040_v59  ;;  %212 = vst.msk [vmem:[#allocation2 + $0x28] sm:$0xff] %vm206_vm1, %v15040_v59  ;;  %v9217_v4 = vld [vmem:[%s15014_s10] ss:$0 sm:$0xff] }
 0x274   :  { %10547 = vmatprep.mubr.msk.f32.mxu1 %vm206_vm1, %v12552_v6 }
 0x277   :  { %10548 = vmatmul.mubr.msk.f32.gmra.mrb[38].mxu1 %vm206_vm1, %v12575_v15  ;;  %v12828_v15 = vld [vmem:[%s15015_s6] ss:$0 sm:$0xff] }
 0x278   :  { %10550 = vmatprep.mubr.msk.f32.mxu1 %vm206_vm1, %v12580_v17 }
 0x27b   :  { %10551 = vmatmul.mubr.msk.f32.gmra.mrb[40].mxu1 %vm206_vm1, %v12590_v0 }
 0x27c   :  { %10574 = vmatprep.mubr.msk.f32.mxu1 %vm12239_vm2, %v15040_v59 }
 0x2fe   :  { %v12821_v6 = vpop.f32.mrb[0].mxu1  ;;  %v10393_v56 = vpop.f32.mrb[6].mxu0 }
 0x2ff   :  { %v631_v57 = vadd.f32 %v10393_v56, %v9217_v4  ;;  %v12823_v12 = vpop.f32.mrb[1].mxu1  ;;  %v625_v13 = vpop.f32.mrb[7].mxu0 }
 0x300   :  { %v626_v14 = vadd.f32 %v9217_v4, %v625_v13  ;;  %v414_v13 = vadd.f32 %v12828_v15, %v12823_v12 }
 0x302   :  { %v11627_v16 = vpack.c.bf16 %v631_v57, %v626_v14  ;;  %v10362_v17 = vpop.f32.mrb[2].mxu1  ;;  %v10396_v18 = vpop.f32.mrb[8].mxu0  ;;  %v12901_v14 = vld [vmem:[%s15015_s6 + $0x1] ss:$0 sm:$0xff] }
 0x303   :  { %v12831_v20 = vadd.f32 %v10362_v17, %v12828_v15  ;;  %v12833_v23 = vadd.f32 %v10396_v18, %v9217_v4  ;;  %v12835_v0 = vpop.f32.mrb[3].mxu1  ;;  %v635_v22 = vpop.f32.mrb[9].mxu0 }
 0x304   :  { %11628 = vmatpush3.bf16.msra.mxu1 %v11627_v16  ;;  %v636_v24 = vadd.f32 %v9217_v4, %v635_v22  ;;  %v12906_v16 = vld [vmem:[%s15015_s6 + $0x2] ss:$0 sm:$0xff] }
 0x305   :  { %10572 = vmatprep.subr.mxu1 %v15040_v59 }
 0x306   :  { %v10365_v25 = vpop.f32.mrb[4].mxu1  ;;  %v10399_v27 = vpop.f32.mrb[10].mxu0 }
 0x307   :  { %v12839_v29 = vadd.f32 %v10365_v25, %v12828_v15  ;;  %v12841_v30 = vadd.f32 %v10399_v27, %v9217_v4  ;;  %v433_v31 = vpop.f32.mrb[5].mxu1  ;;  %v645_v32 = vpop.f32.mrb[11].mxu0  ;;  %v419_v27 = vadd.f32 %v12821_v6, %v12828_v15  ;;  %v12940_v6 = vld [vmem:[%s15014_s10 + $0x1] ss:$0 sm:$0xff] }
 0x308   :  { %v12844_v33 = vadd.f32 %v12828_v15, %v433_v31  ;;  %v12846_v36 = vadd.f32 %v9217_v4, %v645_v32  ;;  %10573 = vmatpush3.msk.msra.mxu1 %vm1769_vm3, %v636_v24 }
 0x309   :  { %11633 = vmatprep.subr.bf16.mxu1 %v15038_v11 }
 0x30a   :  { %v10376_v40 = vpop.f32.mrb[6].mxu1  ;;  %v10427_v42 = vpop.f32.mrb[12].mxu0 }
 0x30b   :  { %v525_v43 = vadd.f32 %v10376_v40, %v9210_v37  ;;  %v847_v44 = vadd.f32 %v10427_v42, %v12855_v38  ;;  %v519_v45 = vpop.f32.mrb[7].mxu1  ;;  %v841_v46 = vpop.f32.mrb[13].mxu0 }
 0x30c   :  { %v520_v49 = vadd.f32 %v9210_v37, %v519_v45  ;;  %v842_v50 = vadd.f32 %v12855_v38, %v841_v46  ;;  %v12945_v46 = vld [vmem:[%s15014_s10 + $0x2] ss:$0 sm:$0xff] }
 0x30e   :  { %v11623_v52 = vpack.c.bf16 %v525_v43, %v520_v49  ;;  %v11630_v53 = vpack.c.bf16 %v847_v44, %v842_v50  ;;  %v10379_v54 = vpop.f32.mrb[8].mxu1  ;;  %v10430_v55 = vpop.f32.mrb[14].mxu0  ;;  %v424_v49 = vadd.f32 %v12828_v15, %v12835_v0 }
 0x30f   :  { %v12868_v58 = vadd.f32 %v10379_v54, %v9210_v37  ;;  %v12871_v60 = vadd.f32 %v10430_v55, %v12855_v38  ;;  %v529_v61 = vpop.f32.mrb[9].mxu1  ;;  %v851_v62 = vpop.f32.mrb[15].mxu0 }
 0x310   :  { %11625 = vmatpush3.bf16.xpose.msk.msra.mxu0 %vm12864_vm5, %v11623_v52  ;;  %v530_v7 = vadd.f32 %v9210_v37, %v529_v61  ;;  %v852_v50 = vadd.f32 %v12855_v38, %v851_v62 }
 0x311   :  { %10557 = vmatprep.subr.mxu0 %v15040_v59 }
 0x312   :  { %v10382_v63 = vpop.f32.mrb[10].mxu1  ;;  %v10433_v41 = vpop.f32.mrb[16].mxu0 }
 0x313   :  { %v12876_v48 = vadd.f32 %v10382_v63, %v9210_v37  ;;  %v12879_v47 = vadd.f32 %v10433_v41, %v12855_v38  ;;  %v539_v1 = vpop.f32.mrb[11].mxu1  ;;  %v861_v2 = vpop.f32.mrb[17].mxu0 }
 0x314   :  { %v12881_v3 = vadd.f32 %v9210_v37, %v539_v1  ;;  %v12884_v5 = vadd.f32 %v12855_v38, %v861_v2 }
 0x316   :  { %v10410_v10 = vpop.f32.mrb[12].mxu1  ;;  %v12890_v4 = vpop.f32.mrb[18].mxu0 }
 0x317   :  { %v733_v56 = vpop.f32.mrb[13].mxu1  ;;  %v12892_v57 = vpop.f32.mrb[19].mxu0 }
 0x318   :  { %10558 = vmatpush3.xpose.msk.msra.mxu0 %vm1626_vm4, %v530_v7  ;;  %v734_v15 = vadd.f32 %v12901_v14, %v733_v56  ;;  %v739_v56 = vadd.f32 %v10410_v10, %v12901_v14  ;;  %v13004_v10 = vld [vmem:[%s15016_s8 + $0x2] ss:$0 sm:$0xff] }
 0x319   :  { %11629 = vmatprep.subr.bf16.mxu0 %v15038_v11 }
 0x31a   :  { %v10413_v17 = vpop.f32.mrb[14].mxu1  ;;  %v10464_v18 = vpop.f32.mrb[20].mxu0 }
 0x31b   :  { %v12909_v22 = vadd.f32 %v10413_v17, %v12901_v14  ;;  %v12912_v24 = vadd.f32 %v10464_v18, %v12906_v16  ;;  %v743_v12 = vpop.f32.mrb[15].mxu1  ;;  %v12914_v25 = vpop.f32.mrb[21].mxu0  ;;  %10560 = vmatmul.mubr.msk.f32.vlgmr.msra.gmra.mrb[36].mxu0 %vm1626_vm4, %v414_v13 }
 0x31c   :  { %11632 = vmatpush3.bf16.xpose.msk.msra.mxu0 %vm12864_vm5, %v11630_v53  ;;  %10562 = vmatprep.mubr.msk.f32.mxu0 %vm12239_vm2, %v15040_v59 }
 0x31d   :  { %15100 = vst [vmem:[#allocation9_spill] sm:$0xff] %v12912_v24  ;;  %10587 = vmatprep.subr.mxu0 %v15040_v59 }
 0x31e   :  { %v10416_v31 = vpop.f32.mrb[16].mxu1  ;;  %v10467_v32 = vpop.f32.mrb[22].mxu0 }
 0x31f   :  { %v12925_v37 = vadd.f32 %v10416_v31, %v12901_v14  ;;  %v12928_v40 = vadd.f32 %v10467_v32, %v12906_v16  ;;  %v753_v42 = vpop.f32.mrb[17].mxu1  ;;  %v1077_v43 = vpop.f32.mrb[23].mxu0  ;;  %10563 = vmatmul.mubr.msk.f32.gmra.mrb[38].mxu0 %vm1626_vm4, %v419_v27 }
 0x320   :  { %v12932_v44 = vadd.f32 %v12901_v14, %v753_v42  ;;  %v12935_v45 = vadd.f32 %v12906_v16, %v1077_v43  ;;  %10565 = vmatprep.mubr.msk.f32.mxu0 %vm12239_vm2, %v15040_v59 }
 0x321   :  { %15101 = vst [vmem:[#allocation10_spill] sm:$0xff] %v12925_v37  ;;  %15102 = vst [vmem:[#allocation11_spill] sm:$0xff] %v12928_v40 }
 0x322   :  { %15103 = vst [vmem:[#allocation12_spill] sm:$0xff] %v12932_v44  ;;  %15104 = vst [vmem:[#allocation13_spill] sm:$0xff] %v12935_v45  ;;  %v10444_v52 = vpop.f32.mrb[18].mxu1  ;;  %v10495_v53 = vpop.f32.mrb[24].mxu0 }
 0x323   :  { %v12953_v54 = vadd.f32 %v10444_v52, %v12940_v6  ;;  %v12956_v55 = vadd.f32 %v10495_v53, %v12945_v46  ;;  %v949_v61 = vpop.f32.mrb[19].mxu1  ;;  %v1273_v63 = vpop.f32.mrb[25].mxu0  ;;  %10566 = vmatmul.mubr.msk.f32.gmra.mrb[40].mxu0 %vm1626_vm4, %v424_v49  ;;  %v13009_v53 = vld [vmem:[%s15016_s8 + $0x3] ss:$0 sm:$0xff] }
 0x324   :  { %v12960_v41 = vadd.f32 %v12940_v6, %v949_v61  ;;  %v12963_v1 = vadd.f32 %v12945_v46, %v1273_v63  ;;  %10588 = vmatpush3.xpose.msk.msra.mxu0 %vm1626_vm4, %v852_v50  ;;  %10589 = vmatprep.mubr.msk.f32.mxu0 %vm12239_vm2, %v15040_v59  ;;  %v744_v61 = vadd.f32 %v12901_v14, %v743_v12 }
 0x325   :  { %10613 = vmatprep.subr.mxu0 %v15040_v59 }
 0x326   :  { %v10447_v62 = vpop.f32.mrb[20].mxu1  ;;  %v10498_v2 = vpop.f32.mrb[26].mxu0 }
 0x327   :  { %v12975_v7 = vadd.f32 %v10447_v62, %v12940_v6  ;;  %v12978_v13 = vadd.f32 %v10498_v2, %v12945_v46  ;;  %v12980_v17 = vpop.f32.mrb[21].mxu1  ;;  %v12982_v18 = vpop.f32.mrb[27].mxu0  ;;  %10590 = vmatmul.mubr.msk.f32.vlgmr.msra.gmra.mrb[42].mxu0 %vm1626_vm4, %v734_v15 }
 0x328   :  { %10592 = vmatprep.mubr.msk.f32.mxu0 %vm12239_vm2, %v15040_v59 }
 0x329   :  { %15105 = vst [vmem:[#allocation14_spill] sm:$0xff] %v12975_v7  ;;  %15106 = vst [vmem:[#allocation15_spill] sm:$0xff] %v12978_v13 }
 0x32a   :  { %v10450_v27 = vpop.f32.mrb[22].mxu1  ;;  %v10501_v31 = vpop.f32.mrb[28].mxu0 }
 0x32b   :  { %v12989_v32 = vadd.f32 %v10450_v27, %v12940_v6  ;;  %v12992_v42 = vadd.f32 %v10501_v31, %v12945_v46  ;;  %v969_v43 = vpop.f32.mrb[23].mxu1  ;;  %v1293_v49 = vpop.f32.mrb[29].mxu0  ;;  %10593 = vmatmul.mubr.msk.f32.gmra.mrb[44].mxu0 %vm1626_vm4, %v739_v56 }
 0x32c   :  { %v12996_v50 = vadd.f32 %v12940_v6, %v969_v43  ;;  %v12999_v52 = vadd.f32 %v12945_v46, %v1293_v49  ;;  %10595 = vmatprep.mubr.msk.f32.mxu0 %vm12239_vm2, %v15040_v59 }
 0x32d   :  { %15107 = vst [vmem:[#allocation16_spill] sm:$0xff] %v12989_v32  ;;  %15108 = vst [vmem:[#allocation17_spill] sm:$0xff] %v12992_v42 }
 0x32e   :  { %15109 = vst [vmem:[#allocation18_spill] sm:$0xff] %v12996_v50  ;;  %15110 = vst [vmem:[#allocation19_spill] sm:$0xff] %v12999_v52  ;;  %v10478_v62 = vpop.f32.mrb[24].mxu1  ;;  %v10529_v2 = vpop.f32.mrb[30].mxu0 }
 0x32f   :  { %v13019_v56 = vadd.f32 %v10478_v62, %v13004_v10  ;;  %v13022_v27 = vadd.f32 %v10529_v2, %v13009_v53  ;;  %v1165_v31 = vpop.f32.mrb[25].mxu1  ;;  %v1489_v43 = vpop.f32.mrb[31].mxu0  ;;  %10596 = vmatmul.mubr.msk.f32.gmra.mrb[46].mxu0 %vm1626_vm4, %v744_v61 }
 0x330   :  { %v13026_v14 = vadd.f32 %v13004_v10, %v1165_v31  ;;  %v13029_v12 = vadd.f32 %v13009_v53, %v1489_v43  ;;  %10615 = vmatprep.mubr.msk.f32.mxu0 %vm12239_vm2, %v15040_v59 }
 0x332   :  { %v10481_v2 = vpop.f32.mrb[26].mxu1  ;;  %v10532_v15 = vpop.f32.mrb[32].mxu0 }
 0x333   :  { %v13038_v63 = vadd.f32 %v10481_v2, %v13004_v10  ;;  %v13041_v61 = vadd.f32 %v10532_v15, %v13009_v53  ;;  %v13043_v31 = vpop.f32.mrb[27].mxu1  ;;  %v13045_v43 = vpop.f32.mrb[33].mxu0 }
 0x335   :  { %15111 = vst [vmem:[#allocation20_spill] sm:$0xff] %v13038_v63  ;;  %15112 = vst [vmem:[#allocation21_spill] sm:$0xff] %v13041_v61 }
 0x336   :  { %v10484_v9 = vpop.f32.mrb[28].mxu1  ;;  %v10535_v39 = vpop.f32.mrb[34].mxu0 }
 0x337   :  { %v13048_v8 = vadd.f32 %v10484_v9, %v13004_v10  ;;  %v13051_v38 = vadd.f32 %v10535_v39, %v13009_v53  ;;  %v1185_v62 = vpop.f32.mrb[29].mxu1  ;;  %v1509_v49 = vpop.f32.mrb[35].mxu0  ;;  %v13070_v39 = vld [vmem:[%s15015_s6 + $0x3] ss:$0 sm:$0xff] }
 0x338   :  { %v13054_v2 = vadd.f32 %v13004_v10, %v1185_v62  ;;  %v13057_v15 = vadd.f32 %v13009_v53, %v1509_v49 }
 0x339   :  { %15113 = vst [vmem:[#allocation22_spill] sm:$0xff] %v13048_v8  ;;  %15114 = vst [vmem:[#allocation23_spill] sm:$0xff] %v13051_v38 }
 0x33a   :  { %15115 = vst [vmem:[#allocation24_spill] sm:$0xff] %v13054_v2  ;;  %15116 = vst [vmem:[#allocation25_spill] sm:$0xff] %v13057_v15  ;;  %v13063_v0 = vpop.f32.mrb[30].mxu1 }
 0x33b   :  { %v13065_v9 = vpop.f32.mrb[31].mxu1 }
 0x33e   :  { %v10515_v62 = vpop.f32.mrb[32].mxu1 }
 0x33f   :  { %v13073_v35 = vadd.f32 %v10515_v62, %v13070_v39  ;;  %v13075_v49 = vpop.f32.mrb[33].mxu1 }
 0x341   :  { %15117 = vst [vmem:[#allocation26_spill] sm:$0xff] %v13073_v35 }
 0x342   :  { %v10518_v34 = vpop.f32.mrb[34].mxu1 }
 0x343   :  { %v13078_v11 = vadd.f32 %v10518_v34, %v13070_v39  ;;  %v1401_v59 = vpop.f32.mrb[35].mxu1 }
 0x344   :  { %v13081_v28 = vadd.f32 %v13070_v39, %v1401_v59 }
 0x345   :  { %15118 = vst [vmem:[#allocation27_spill] sm:$0xff] %v13078_v11 }
 0x346   :  { %15119 = vst [vmem:[#allocation28_spill] sm:$0xff] %v13081_v28  ;;  %v10546_v26 = vpop.f32.mrb[36].mxu1 }
 0x347   :  { %v13089_v19 = vadd.f32 %v10546_v26, %v13086_v21  ;;  %v1597_v62 = vpop.f32.mrb[37].mxu1 }
 0x348   :  { %v13092_v35 = vadd.f32 %v13086_v21, %v1597_v62 }
 0x34a   :  { %v10549_v11 = vpop.f32.mrb[38].mxu1 }
 0x34b   :  { %v13097_v59 = vadd.f32 %v10549_v11, %v13086_v21  ;;  %v13099_v28 = vpop.f32.mrb[39].mxu1 }
 0x34d   :  { %15120 = vst [vmem:[#allocation29_spill] sm:$0xff] %v13097_v59 }
 0x34e   :  { %v10552_v38 = vpop.f32.mrb[40].mxu1 }
 0x34f   :  { %v13102_v61 = vadd.f32 %v10552_v38, %v13086_v21  ;;  %v1617_v15 = vpop.f32.mrb[41].mxu1 }
 0x350   :  { %v13105_v26 = vadd.f32 %v13086_v21, %v1617_v15 }
 0x351   :  { %15121 = vst [vmem:[#allocation30_spill] sm:$0xff] %v13102_v61 }
 0x352   :  { %15122 = vst [vmem:[#allocation31_spill] sm:$0xff] %v13105_v26 }
 0x3ee   :  { %v1711_v40 = vpop.f32.mrb[36].mxu0 }
 0x3ef   :  { %v10561_v34 = vpop.f32.mrb[37].mxu0  ;;  %v1726_v42 = vsel %vm1725_vm6, %v1711_v40, -inf }
 0x3f0   :  { %1727 = vmax.xlane.f32.xlu0 %v1726_v42 }
 0x3f2   :  { %v1716_v11 = vpop.f32.mrb[38].mxu0 }
 0x3f3   :  { %v10564_v45 = vpop.f32.mrb[39].mxu0  ;;  %v1729_v13 = vsel %vm1725_vm6, %v1716_v11, -inf }
 0x3f4   :  { %1730 = vmax.xlane.f32.xlu1 %v1729_v13 }
 0x3f6   :  { %v1721_v38 = vpop.f32.mrb[40].mxu0 }
 0x3f7   :  { %v10567_v61 = vpop.f32.mrb[41].mxu0  ;;  %v1733_v15 = vsel %vm1732_vm7, %v1721_v38, -inf }
 0x3f8   :  { %1734 = vmax.xlane.f32.xlu0 %v1733_v15 }
 0x3fa   :  { %v1938_v52 = vpop.f32.mrb[42].mxu0 }
 0x3fb   :  { %v10591_v24 = vpop.f32.mrb[43].mxu0  ;;  %v1952_v62 = vsel %vm1725_vm6, %v1938_v52, -inf }
 0x3fc   :  { %1953 = vmax.xlane.f32.xlu1 %v1952_v62 }
 0x3fe   :  { %v1943_v34 = vpop.f32.mrb[44].mxu0 }
 0x3ff   :  { %v10594_v59 = vpop.f32.mrb[45].mxu0  ;;  %v1955_v42 = vsel %vm1725_vm6, %v1943_v34, -inf }
 0x400   :  { %1956 = vmax.xlane.f32.xlu0 %v1955_v42 }
 0x402   :  { %v1948_v45 = vpop.f32.mrb[46].mxu0 }
 0x403   :  { %v10597_v26 = vpop.f32.mrb[47].mxu0  ;;  %v1958_v13 = vsel %vm1732_vm7, %v1948_v45, -inf }
 0x404   :  { %1959 = vmax.xlane.f32.xlu1 %v1958_v13 }
 0x47d   :  { %v1728_v8 = vpop.xlane.xlu0 %1727 }
 0x47e   :  { %v1736_v61 = vsub.f32 %v1711_v40, %v1728_v8 }
 0x480   :  { %v1739_v63 = vmul.f32 1.442695, %v1736_v61 }
 0x481   :  { %v1731_v2 = vpop.xlane.xlu1 %1730 }
 0x482   :  { %11973 = vpow2.f32 %v1739_v63  ;;  %v1737_v15 = vsub.f32 %v1716_v11, %v1731_v2 }
 0x484   :  { %v1741_v24 = vmul.f32 1.442695, %v1737_v15 }
 0x485   :  { %v1735_v32 = vpop.xlane.xlu0 %1734 }
 0x486   :  { %11975 = vpow2.f32 %v1741_v24  ;;  %v1738_v62 = vsub.f32 %v1721_v38, %v1735_v32 }
 0x488   :  { %v1743_v7 = vmul.f32 1.442695, %v1738_v62 }
 0x489   :  { %v1954_v59 = vpop.xlane.xlu1 %1953 }
 0x48a   :  { %11977 = vpow2.f32 %v1743_v7  ;;  %v1961_v50 = vsub.f32 %v1938_v52, %v1954_v59 }
 0x48c   :  { %v11974_v42 = vpop.eup %11973  ;;  %v1964_v37 = vmul.f32 1.442695, %v1961_v50 }
 0x48d   :  { %v1957_v26 = vpop.xlane.xlu0 %1956  ;;  %v1745_v44 = vsel %vm1725_vm6, %v11974_v42, 0.0 }
 0x48e   :  { %11979 = vpow2.f32 %v1964_v37  ;;  %v1962_v13 = vsub.f32 %v1943_v34, %v1957_v26  ;;  %1746 = vadd.xlane.f32.xlu0 %v1745_v44 }
 0x490   :  { %v11976_v8 = vpop.eup %11975  ;;  %v1966_v40 = vmul.f32 1.442695, %v1962_v13 }
 0x491   :  { %v1960_v63 = vpop.xlane.xlu1 %1959  ;;  %v1748_v2 = vsel %vm1725_vm6, %v11976_v8, 0.0 }
 0x492   :  { %11981 = vpow2.f32 %v1966_v40  ;;  %v1963_v11 = vsub.f32 %v1948_v45, %v1960_v63  ;;  %1749 = vadd.xlane.f32.xlu1 %v1748_v2  ;;  %v15123_v40 = vpack.c.bf16 %v12953_v54, %v12960_v41  ;;  %v15124_v63 = vmov 0.0  }
 0x494   :  { %v11978_v32 = vpop.eup %11977  ;;  %v1968_v38 = vmul.f32 1.442695, %v1963_v11 }
 0x495   :  { %v1751_v7 = vsel %vm1732_vm7, %v11978_v32, 0.0 }
 0x496   :  { %11983 = vpow2.f32 %v1968_v38  ;;  %1752 = vadd.xlane.f32.xlu0 %v1751_v7  ;;  %v960_v38 = vadd.f32 %v12940_v6, %v12980_v17  ;;  %v15125_v7 = vmov 0.0|0.0  }
 0x498   :  { %v11980_v50 = vpop.eup %11979 }
 0x499   :  { %v1970_v52 = vsel %vm1725_vm6, %v11980_v50, 0.0 }
 0x49a   :  { %1971 = vadd.xlane.f32.xlu1 %v1970_v52  ;;  %v15126_v52 = vpack.c.bf16 %v13019_v56, %v13026_v14  ;;  %v1058_v56 = vadd.f32 %v12906_v16, %v12892_v57  ;;  %v15127_v14 = vpack.c.bf16 %v12956_v55, %v12963_v1  ;;  %v1068_v57 = vadd.f32 %v12906_v16, %v12914_v25 }
 0x49c   :  { %v11982_v37 = vpop.eup %11981 }
 0x49d   :  { %v1973_v44 = vsel %vm1725_vm6, %v11982_v37, 0.0 }
 0x49e   :  { %1974 = vadd.xlane.f32.xlu0 %v1973_v44 }
 0x4a0   :  { %v11984_v34 = vpop.eup %11983 }
 0x4a1   :  { %v1976_v61 = vsel %vm1732_vm7, %v11984_v34, 0.0 }
 0x4a2   :  { %1977 = vadd.xlane.f32.xlu1 %v1976_v61  ;;  %v1176_v61 = vadd.f32 %v13004_v10, %v13043_v31  ;;  %v1063_v10 = vadd.f32 %v12890_v4, %v12906_v16  ;;  %v1284_v31 = vadd.f32 %v12945_v46, %v12982_v18  ;;  %v13183_v4 = vld [vmem:[%s15017_s11 + $0x8] sm:$0xff] }
 0x4a3   :  { %10614 = vmatpush3.msra.mxu0 %v13183_v4 }
 0x4a4   :  { %10624 = vmatprep.subr.mxu0 %v15124_v63 }
 0x51b   :  { %v1747_v45 = vpop.xlane.xlu0 %1746 }
 0x51c   :  { %11985 = vrcp.f32 %v1747_v45 }
 0x51f   :  { %v1750_v15 = vpop.xlane.xlu1 %1749 }
 0x520   :  { %11987 = vrcp.f32 %v1750_v15 }
 0x523   :  { %v1753_v24 = vpop.xlane.xlu0 %1752 }
 0x524   :  { %11989 = vrcp.f32 %v1753_v24 }
 0x526   :  { %v11986_v62 = vpop.eup %11985 }
 0x527   :  { %v1757_v59 = vmul.f32 %v11986_v62, %v11974_v42  ;;  %v1972_v26 = vpop.xlane.xlu1 %1971 }
 0x528   :  { %11991 = vrcp.f32 %v1972_v26 }
 0x529   :  { %10575 = vmatmul.mubr.msk.f32.vlgmr.msra.gmra.mrb[42].mxu1 %vm1725_vm6, %v1757_v59 }
 0x52a   :  { %v11988_v13 = vpop.eup %11987  ;;  %11635 = vmatpush3.bf16.msra.mxu1 %v15123_v40  ;;  %10577 = vmatprep.mubr.msk.f32.mxu1 %vm12239_vm2, %v15124_v63 }
 0x52b   :  { %v1975_v2 = vpop.xlane.xlu0 %1974  ;;  %10602 = vmatprep.subr.mxu1 %v15124_v63  ;;  %v1758_v11 = vmul.f32 %v11988_v13, %v11976_v8 }
 0x52c   :  { %11993 = vrcp.f32 %v1975_v2 }
 0x52d   :  { %10578 = vmatmul.mubr.msk.f32.gmra.mrb[44].mxu1 %vm1725_vm6, %v1758_v11 }
 0x52e   :  { %v11990_v42 = vpop.eup %11989  ;;  %10603 = vmatpush3.msk.msra.mxu1 %vm1769_vm3, %v960_v38  ;;  %10580 = vmatprep.mubr.msk.f32.mxu1 %vm12239_vm2, %v15124_v63 }
 0x52f   :  { %v1978_v54 = vpop.xlane.xlu1 %1977  ;;  %v1759_v41 = vmul.f32 %v11990_v42, %v11978_v32  ;;  %11636 = vmatprep.subr.bf16.mxu1 %v15125_v7 }
 0x530   :  { %11995 = vrcp.f32 %v1978_v54 }
 0x531   :  { %10581 = vmatmul.mubr.msk.f32.gmra.mrb[46].mxu1 %vm1725_vm6, %v1759_v41 }
 0x532   :  { %v11992_v8 = vpop.eup %11991  ;;  %10604 = vmatprep.mubr.msk.f32.mxu1 %vm12239_vm2, %v15124_v63 }
 0x533   :  { %v1982_v6 = vmul.f32 %v11992_v8, %v11980_v50 }
 0x535   :  { %10605 = vmatmul.mubr.msk.f32.vlgmr.msra.gmra.mrb[48].mxu1 %vm1725_vm6, %v1982_v6 }
 0x536   :  { %v11994_v17 = vpop.eup %11993  ;;  %11639 = vmatpush3.bf16.xpose.msk.msra.mxu1 %vm12864_vm5, %v15126_v52  ;;  %10607 = vmatprep.mubr.msk.f32.mxu1 %vm12239_vm2, %v15124_v63 }
 0x537   :  { %v1983_v32 = vmul.f32 %v11994_v17, %v11982_v37  ;;  %10639 = vmatprep.subr.mxu1 %v15124_v63  ;;  %v13190_v37 = vld [vmem:[%s15017_s11] sm:$0xff] }
 0x539   :  { %10608 = vmatmul.mubr.msk.f32.gmra.mrb[50].mxu1 %vm1725_vm6, %v1983_v32 }
 0x53a   :  { %v11996_v44 = vpop.eup %11995  ;;  %10610 = vmatprep.mubr.msk.f32.mxu1 %vm12239_vm2, %v15124_v63 }
 0x53b   :  { %v1984_v50 = vmul.f32 %v11996_v44, %v11984_v34 }
 0x53d   :  { %10611 = vmatmul.mubr.msk.f32.gmra.mrb[52].mxu1 %vm1725_vm6, %v1984_v50 }
 0x53e   :  { %10640 = vmatpush3.xpose.msk.msra.mxu1 %vm1626_vm4, %v1176_v61  ;;  %10641 = vmatprep.mubr.msk.f32.mxu1 %vm12239_vm2, %v15124_v63 }
 0x53f   :  { %11640 = vmatprep.subr.bf16.mxu1 %v15125_v7 }
 0x541   :  { %10642 = vmatmul.mubr.msk.f32.vlgmr.msra.gmra.mrb[54].mxu1 %vm1626_vm4, %v1058_v56 }
 0x542   :  { %11642 = vmatpush3.bf16.msra.mxu1 %v15127_v14  ;;  %10644 = vmatprep.mubr.msk.f32.mxu1 %vm12239_vm2, %v15124_v63 }
 0x543   :  { %10654 = vmatprep.subr.mxu1 %v15124_v63 }
 0x545   :  { %10645 = vmatmul.mubr.msk.f32.gmra.mrb[56].mxu1 %vm1626_vm4, %v1063_v10 }
 0x546   :  { %10655 = vmatpush3.msk.msra.mxu1 %vm1769_vm3, %v1284_v31  ;;  %10647 = vmatprep.mubr.msk.f32.mxu1 %vm12239_vm2, %v15124_v63 }
 0x547   :  { %11643 = vmatprep.subr.bf16.mxu1 %v15125_v7 }
 0x549   :  { %10648 = vmatmul.mubr.msk.f32.gmra.mrb[58].mxu1 %vm1626_vm4, %v1068_v57 }
 0x54a   :  { %10656 = vmatprep.mubr.msk.f32.mxu1 %vm12239_vm2, %v15124_v63 }
 0x5fc   :  { %v1839_v46 = vpop.f32.mrb[42].mxu1 }
 0x5fd   :  { %v10576_v55 = vpop.f32.mrb[43].mxu1 }
 0x600   :  { %v1844_v1 = vpop.f32.mrb[44].mxu1 }
 0x601   :  { %v10579_v16 = vpop.f32.mrb[45].mxu1 }
 0x604   :  { %v1849_v25 = vpop.f32.mrb[46].mxu1 }
 0x605   :  { %v10582_v18 = vpop.f32.mrb[47].mxu1 }
 0x608   :  { %v2063_v34 = vpop.f32.mrb[48].mxu1 }
 0x609   :  { %v10606_v45 = vpop.f32.mrb[49].mxu1  ;;  %10616 = vmatmul.mubr.msk.f32.vlgmr.msra.gmra.mrb[48].mxu0 %vm1626_vm4, %v2063_v34 }
 0x60a   :  { %10618 = vmatprep.mubr.msk.f32.mxu0 %vm12239_vm2, %v15124_v63  ;;  %10625 = vmatpush3.msra.mxu0 %v13190_v37 }
 0x60b   :  { %10665 = vmatprep.subr.mxu0 %v15124_v63 }
 0x60c   :  { %v2068_v15 = vpop.f32.mrb[50].mxu1 }
 0x60d   :  { %v10609_v24 = vpop.f32.mrb[51].mxu1  ;;  %10619 = vmatmul.mubr.msk.f32.gmra.mrb[50].mxu0 %vm1626_vm4, %v2068_v15 }
 0x60e   :  { %10621 = vmatprep.mubr.msk.f32.mxu0 %vm12239_vm2, %v15124_v63  ;;  %v15128_v24 = vpack.c.bf16 %v13022_v27, %v13029_v12  ;;  %v1382_v27 = vadd.f32 %v13070_v39, %v13065_v9  ;;  %v15129_v12 = vpack.c.bf16 %v12881_v3, %v12868_v58  ;;  %v15130_v58 = vpack.c.bf16 %v12846_v36, %v12833_v23 }
 0x610   :  { %v2073_v62 = vpop.f32.mrb[52].mxu1 }
 0x611   :  { %v10612_v59 = vpop.f32.mrb[53].mxu1  ;;  %10622 = vmatmul.mubr.msk.f32.gmra.mrb[52].mxu0 %vm1626_vm4, %v2073_v62 }
 0x612   :  { %10626 = vmatprep.mubr.msk.f32.mxu0 %vm12239_vm2, %v15124_v63 }
 0x614   :  { %v2341_v26 = vpop.f32.mrb[54].mxu1 }
 0x615   :  { %10627 = vmatmul.mubr.msk.f32.vlgmr.msra.gmra.mrb[48].mxu0 %vm1626_vm4, %v1839_v46  ;;  %v10643_v13 = vpop.f32.mrb[55].mxu1  ;;  %v2355_v40 = vsel %vm1725_vm6, %v2341_v26, -inf }
 0x616   :  { %2356 = vmax.xlane.f32.xlu0 %v2355_v40  ;;  %10629 = vmatprep.mubr.msk.f32.mxu0 %vm12239_vm2, %v15124_v63  ;;  %v1500_v13 = vadd.f32 %v13009_v53, %v13045_v43  ;;  %v1387_v53 = vadd.f32 %v13063_v0, %v13070_v39  ;;  %v1392_v43 = vadd.f32 %v13070_v39, %v13075_v49 }
 0x618   :  { %v2346_v2 = vpop.f32.mrb[56].mxu1 }
 0x619   :  { %10630 = vmatmul.mubr.msk.f32.gmra.mrb[50].mxu0 %vm1626_vm4, %v1844_v1  ;;  %v10646_v11 = vpop.f32.mrb[57].mxu1  ;;  %v2358_v38 = vsel %vm1725_vm6, %v2346_v2, -inf  ;;  %v13221_v1 = vld [vmem:[%s15017_s11 + $0x10] sm:$0xff] }
 0x61a   :  { %2359 = vmax.xlane.f32.xlu1 %v2358_v38  ;;  %10632 = vmatprep.mubr.msk.f32.mxu0 %vm12239_vm2, %v15124_v63 }
 0x61b   :  { %10666 = vmatpush3.msra.mxu0 %v13221_v1 }
 0x61c   :  { %v2351_v42 = vpop.f32.mrb[58].mxu1  ;;  %11647 = vmatprep.subr.bf16.mxu0 %v15125_v7 }
 0x61d   :  { %10633 = vmatmul.mubr.msk.f32.gmra.mrb[52].mxu0 %vm1626_vm4, %v1849_v25  ;;  %v10649_v54 = vpop.f32.mrb[59].mxu1  ;;  %v2361_v41 = vsel %vm1732_vm7, %v2351_v42, -inf }
 0x61e   :  { %2362 = vmax.xlane.f32.xlu0 %v2361_v41  ;;  %10667 = vmatprep.mubr.msk.f32.mxu0 %vm12239_vm2, %v15124_v63 }
 0x6a3   :  { %v2357_v8 = vpop.xlane.xlu0 %2356 }
 0x6a4   :  { %v2364_v6 = vsub.f32 %v2341_v26, %v2357_v8 }
 0x6a6   :  { %v2367_v17 = vmul.f32 1.442695, %v2364_v6 }
 0x6a7   :  { %v2360_v52 = vpop.xlane.xlu1 %2359 }
 0x6a8   :  { %11997 = vpow2.f32 %v2367_v17  ;;  %v2365_v32 = vsub.f32 %v2346_v2, %v2360_v52 }
 0x6aa   :  { %v2369_v44 = vmul.f32 1.442695, %v2365_v32 }
 0x6ab   :  { %v2363_v50 = vpop.xlane.xlu0 %2362 }
 0x6ac   :  { %11999 = vpow2.f32 %v2369_v44  ;;  %v2366_v61 = vsub.f32 %v2351_v42, %v2363_v50 }
 0x6ae   :  { %v2371_v56 = vmul.f32 1.442695, %v2366_v61 }
 0x6b0   :  { %12001 = vpow2.f32 %v2371_v56 }
 0x6b2   :  { %v11998_v14 = vpop.eup %11997 }
 0x6b3   :  { %v2373_v10 = vsel %vm1725_vm6, %v11998_v14, 0.0 }
 0x6b4   :  { %2374 = vadd.xlane.f32.xlu1 %v2373_v10 }
 0x6b6   :  { %v12000_v31 = vpop.eup %11999 }
 0x6b7   :  { %v2376_v57 = vsel %vm1725_vm6, %v12000_v31, 0.0 }
 0x6b8   :  { %2377 = vadd.xlane.f32.xlu0 %v2376_v57 }
 0x6ba   :  { %v12002_v46 = vpop.eup %12001 }
 0x6bb   :  { %v2379_v55 = vsel %vm1732_vm7, %v12002_v46, 0.0 }
 0x6bc   :  { %2380 = vadd.xlane.f32.xlu1 %v2379_v55 }
 0x741   :  { %v2375_v16 = vpop.xlane.xlu1 %2374 }
 0x742   :  { %12003 = vrcp.f32 %v2375_v16 }
 0x745   :  { %v2378_v25 = vpop.xlane.xlu0 %2377 }
 0x746   :  { %12005 = vrcp.f32 %v2378_v25 }
 0x749   :  { %v2381_v18 = vpop.xlane.xlu1 %2380 }
 0x74a   :  { %12007 = vrcp.f32 %v2381_v18 }
 0x74c   :  { %v12004_v34 = vpop.eup %12003 }
 0x74d   :  { %v2385_v45 = vmul.f32 %v12004_v34, %v11998_v14 }
 0x74f   :  { %10657 = vmatmul.mubr.msk.f32.vlgmr.msra.gmra.mrb[60].mxu1 %vm1725_vm6, %v2385_v45 }
 0x750   :  { %v12006_v15 = vpop.eup %12005  ;;  %11646 = vmatpush3.bf16.xpose.msk.msra.mxu1 %vm12864_vm5, %v15128_v24  ;;  %10659 = vmatprep.mubr.msk.f32.mxu1 %vm12239_vm2, %v15124_v63 }
 0x751   :  { %v2386_v62 = vmul.f32 %v12006_v15, %v12000_v31  ;;  %10680 = vmatprep.subr.mxu1 %v15124_v63 }
 0x753   :  { %10660 = vmatmul.mubr.msk.f32.gmra.mrb[62].mxu1 %vm1725_vm6, %v2386_v62 }
 0x754   :  { %v12008_v59 = vpop.eup %12007  ;;  %10662 = vmatprep.mubr.msk.f32.mxu1 %vm12239_vm2, %v15124_v63 }
 0x755   :  { %v2387_v26 = vmul.f32 %v12008_v59, %v12002_v46  ;;  %v13325_v59 = vld [vmem:[%s15017_s11 + $0x18] sm:$0xff] }
 0x757   :  { %10663 = vmatmul.mubr.msk.f32.gmra.mrb[64].mxu1 %vm1725_vm6, %v2387_v26 }
 0x758   :  { %10681 = vmatpush3.xpose.msk.msra.mxu1 %vm1626_vm4, %v1500_v13  ;;  %10682 = vmatprep.mubr.msk.f32.mxu1 %vm12239_vm2, %v15124_v63 }
 0x759   :  { %11650 = vmatprep.subr.bf16.mxu1 %v15125_v7 }
 0x75b   :  { %10683 = vmatmul.mubr.msk.f32.vlgmr.msra.gmra.mrb[66].mxu1 %vm1626_vm4, %v1382_v27 }
 0x75c   :  { %11653 = vmatpush3.bf16.xpose.msk.msra.mxu1 %vm12864_vm5, %v15129_v12  ;;  %10685 = vmatprep.mubr.msk.f32.mxu1 %vm12239_vm2, %v15124_v63 }
 0x75d   :  { %10721 = vmatprep.subr.mxu1 %v15124_v63 }
 0x75f   :  { %10686 = vmatmul.mubr.msk.f32.gmra.mrb[68].mxu1 %vm1626_vm4, %v1387_v53 }
 0x760   :  { %10688 = vmatprep.mubr.msk.f32.mxu1 %vm12239_vm2, %v15124_v63 }
 0x763   :  { %10689 = vmatmul.mubr.msk.f32.gmra.mrb[70].mxu1 %vm1626_vm4, %v1392_v43 }
 0x764   :  { %10722 = vmatpush3.xpose.msk.msra.mxu1 %vm1626_vm4, %v12876_v48  ;;  %10723 = vmatprep.mubr.msk.f32.mxu1 %vm12239_vm2, %v15124_v63 }
 0x765   :  { %11654 = vmatprep.subr.bf16.mxu1 %v15125_v7 }
 0x767   :  { %10724 = vmatmul.mubr.msk.f32.vlgmr.msra.gmra.mrb[72].mxu1 %vm1626_vm4, %v12831_v20 }
 0x768   :  { %11656 = vmatpush3.bf16.msra.mxu1 %v15130_v58  ;;  %10726 = vmatprep.mubr.msk.f32.mxu1 %vm12239_vm2, %v15124_v63  ;;  %v15132_v58 = vpack.c.bf16 %v12884_v5, %v12871_v60  ;;  %v15133_v60 = vld [vmem:[#allocation12_spill] sm:$0xff] }
 0x769   :  { %10736 = vmatprep.subr.mxu1 %v15124_v63 }
 0x76b   :  { %10727 = vmatmul.mubr.msk.f32.gmra.mrb[74].mxu1 %vm1626_vm4, %v12844_v33  ;;  %v15131_v33 = vpack.c.bf16 %v13089_v19, %v13092_v35 }
 0x76c   :  { %10737 = vmatpush3.msk.msra.mxu1 %vm1769_vm3, %v12841_v30  ;;  %10729 = vmatprep.mubr.msk.f32.mxu1 %vm12239_vm2, %v15124_v63  ;;  %v1608_v30 = vadd.f32 %v13086_v21, %v13099_v28 }
 0x76d   :  { %11661 = vmatprep.subr.bf16.mxu1 %v15125_v7 }
 0x76f   :  { %10730 = vmatmul.mubr.msk.f32.gmra.mrb[76].mxu1 %vm1626_vm4, %v12839_v29 }
 0x770   :  { %10738 = vmatprep.mubr.msk.f32.mxu1 %vm12239_vm2, %v15124_v63 }
 0x822   :  { %v2466_v20 = vpop.f32.mrb[60].mxu1 }
 0x823   :  { %v10658_v23 = vpop.f32.mrb[61].mxu1  ;;  %10668 = vmatmul.mubr.msk.f32.vlgmr.msra.gmra.mrb[48].mxu0 %vm1626_vm4, %v2466_v20 }
 0x824   :  { %11649 = vmatpush3.bf16.msra.mxu0 %v15131_v33  ;;  %10670 = vmatprep.mubr.msk.f32.mxu0 %vm12239_vm2, %v15124_v63 }
 0x825   :  { %10695 = vmatprep.subr.mxu0 %v15124_v63 }
 0x826   :  { %v2471_v29 = vpop.f32.mrb[62].mxu1 }
 0x827   :  { %v10661_v36 = vpop.f32.mrb[63].mxu1  ;;  %10671 = vmatmul.mubr.msk.f32.gmra.mrb[50].mxu0 %vm1626_vm4, %v2471_v29 }
 0x828   :  { %10696 = vmatpush3.msk.msra.mxu0 %vm1769_vm3, %v1608_v30  ;;  %10673 = vmatprep.mubr.msk.f32.mxu0 %vm12239_vm2, %v15124_v63 }
 0x829   :  { %10706 = vmatprep.subr.mxu0 %v15124_v63 }
 0x82a   :  { %v2476_v19 = vpop.f32.mrb[64].mxu1 }
 0x82b   :  { %v10664_v35 = vpop.f32.mrb[65].mxu1  ;;  %10674 = vmatmul.mubr.msk.f32.gmra.mrb[52].mxu0 %vm1626_vm4, %v2476_v19 }
 0x82c   :  { %10697 = vmatprep.mubr.msk.f32.mxu0 %vm12239_vm2, %v15124_v63 }
 0x82e   :  { %v2658_v48 = vpop.f32.mrb[66].mxu1 }
 0x82f   :  { %v10684_v21 = vpop.f32.mrb[67].mxu1  ;;  %v2672_v28 = vsel %vm1725_vm6, %v2658_v48, -inf }
 0x830   :  { %2673 = vmax.xlane.f32.xlu0 %v2672_v28 }
 0x832   :  { %v2663_v3 = vpop.f32.mrb[68].mxu1 }
 0x833   :  { %v10687_v0 = vpop.f32.mrb[69].mxu1  ;;  %v2675_v9 = vsel %vm1725_vm6, %v2663_v3, -inf }
 0x834   :  { %2676 = vmax.xlane.f32.xlu1 %v2675_v9 }
 0x836   :  { %v2668_v39 = vpop.f32.mrb[70].mxu1 }
 0x837   :  { %v10690_v49 = vpop.f32.mrb[71].mxu1  ;;  %v2678_v40 = vsel %vm1732_vm7, %v2668_v39, -inf }
 0x838   :  { %2679 = vmax.xlane.f32.xlu0 %v2678_v40 }
 0x83a   :  { %v13307_v2 = vpop.f32.mrb[72].mxu1 }
 0x83b   :  { %v10725_v11 = vpop.f32.mrb[73].mxu1  ;;  %v2993_v16 = vsel %vm1725_vm6, %v13307_v2, -inf }
 0x83e   :  { %v13309_v38 = vpop.f32.mrb[74].mxu1 }
 0x83f   :  { %v10728_v42 = vpop.f32.mrb[75].mxu1  ;;  %v2996_v25 = vsel %vm1725_vm6, %v13309_v38, -inf }
 0x842   :  { %v13311_v54 = vpop.f32.mrb[76].mxu1 }
 0x843   :  { %v10731_v41 = vpop.f32.mrb[77].mxu1  ;;  %v2999_v18 = vsel %vm1732_vm7, %v13311_v54, -inf }
 0x8bd   :  { %v2674_v8 = vpop.xlane.xlu0 %2673 }
 0x8be   :  { %v2681_v6 = vsub.f32 %v2658_v48, %v2674_v8 }
 0x8c0   :  { %v2684_v17 = vmul.f32 1.442695, %v2681_v6 }
 0x8c1   :  { %v2677_v52 = vpop.xlane.xlu1 %2676 }
 0x8c2   :  { %12009 = vpow2.f32 %v2684_v17  ;;  %v2682_v32 = vsub.f32 %v2663_v3, %v2677_v52 }
 0x8c4   :  { %v2686_v44 = vmul.f32 1.442695, %v2682_v32 }
 0x8c5   :  { %v2680_v50 = vpop.xlane.xlu0 %2679 }
 0x8c6   :  { %12011 = vpow2.f32 %v2686_v44  ;;  %v2683_v61 = vsub.f32 %v2668_v39, %v2680_v50 }
 0x8c8   :  { %v2688_v56 = vmul.f32 1.442695, %v2683_v61 }
 0x8ca   :  { %12013 = vpow2.f32 %v2688_v56 }
 0x8cc   :  { %v12010_v14 = vpop.eup %12009 }
 0x8cd   :  { %v2690_v10 = vsel %vm1725_vm6, %v12010_v14, 0.0 }
 0x8ce   :  { %2691 = vadd.xlane.f32.xlu1 %v2690_v10 }
 0x8d0   :  { %v12012_v31 = vpop.eup %12011 }
 0x8d1   :  { %v2693_v57 = vsel %vm1725_vm6, %v12012_v31, 0.0 }
 0x8d2   :  { %2694 = vadd.xlane.f32.xlu0 %v2693_v57 }
 0x8d4   :  { %v12014_v46 = vpop.eup %12013 }
 0x8d5   :  { %v2696_v55 = vsel %vm1732_vm7, %v12014_v46, 0.0 }
 0x8d6   :  { %2697 = vadd.xlane.f32.xlu1 %v2696_v55  ;;  %2994 = vmax.xlane.f32.xlu0 %v2993_v16 }
 0x8da   :  { %2997 = vmax.xlane.f32.xlu1 %v2996_v25  ;;  %3000 = vmax.xlane.f32.xlu0 %v2999_v18 }
 0x95b   :  { %v2692_v34 = vpop.xlane.xlu1 %2691 }
 0x95c   :  { %12015 = vrcp.f32 %v2692_v34 }
 0x95f   :  { %v2695_v45 = vpop.xlane.xlu0 %2694 }
 0x960   :  { %12017 = vrcp.f32 %v2695_v45 }
 0x963   :  { %v2698_v15 = vpop.xlane.xlu1 %2697  ;;  %v2995_v5 = vpop.xlane.xlu0 %2994 }
 0x964   :  { %12019 = vrcp.f32 %v2698_v15 }
 0x966   :  { %v12016_v24 = vpop.eup %12015 }
 0x967   :  { %v2702_v62 = vmul.f32 %v12016_v24, %v12010_v14  ;;  %v2998_v29 = vpop.xlane.xlu1 %2997 }
 0x968   :  { %v3003_v35 = vsub.f32 %v13309_v38, %v2998_v29 }
 0x969   :  { %10698 = vmatmul.mubr.msk.f32.vlgmr.msra.gmra.mrb[54].mxu0 %vm1725_vm6, %v2702_v62 }
 0x96a   :  { %v12018_v26 = vpop.eup %12017  ;;  %10700 = vmatprep.mubr.msk.f32.mxu0 %vm12239_vm2, %v15124_v63  ;;  %10707 = vmatpush3.msra.mxu0 %v13325_v59  ;;  %v3007_v0 = vmul.f32 1.442695, %v3003_v35  ;;  %v15139_v35 = vld [vmem:[#allocation24_spill] sm:$0xff] }
 0x96b   :  { %v2703_v13 = vmul.f32 %v12018_v26, %v12012_v31  ;;  %11657 = vmatprep.subr.bf16.mxu0 %v15125_v7 }
 0x96d   :  { %10701 = vmatmul.mubr.msk.f32.gmra.mrb[56].mxu0 %vm1725_vm6, %v2703_v13 }
 0x96e   :  { %v12020_v27 = vpop.eup %12019  ;;  %10703 = vmatprep.mubr.msk.f32.mxu0 %vm12239_vm2, %v15124_v63 }
 0x96f   :  { %v2704_v12 = vmul.f32 %v12020_v27, %v12014_v46 }
 0x971   :  { %10704 = vmatmul.mubr.msk.f32.gmra.mrb[58].mxu0 %vm1725_vm6, %v2704_v12 }
 0x972   :  { %10708 = vmatprep.mubr.msk.f32.mxu0 %vm12239_vm2, %v15124_v63 }
 0xa3c   :  { %v2783_v53 = vpop.f32.mrb[54].mxu0 }
 0xa3d   :  { %v10699_v43 = vpop.f32.mrb[55].mxu0  ;;  %10709 = vmatmul.mubr.msk.f32.vlgmr.msra.gmra.mrb[48].mxu0 %vm1626_vm4, %v2783_v53 }
 0xa3e   :  { %11660 = vmatpush3.bf16.xpose.msk.msra.mxu0 %vm12864_vm5, %v15132_v58  ;;  %10711 = vmatprep.mubr.msk.f32.mxu0 %vm12239_vm2, %v15124_v63  ;;  %v15135_v43 = vld [vmem:[#allocation18_spill] sm:$0xff] }
 0xa3f   :  { %10751 = vmatprep.subr.mxu0 %v15124_v63  ;;  %v15136_v58 = vld [vmem:[#allocation14_spill] sm:$0xff] }
 0xa40   :  { %v2788_v20 = vpop.f32.mrb[56].mxu0 }
 0xa41   :  { %v10702_v23 = vpop.f32.mrb[57].mxu0  ;;  %10712 = vmatmul.mubr.msk.f32.gmra.mrb[50].mxu0 %vm1626_vm4, %v2788_v20  ;;  %v15137_v20 = vpack.c.bf16 %v15135_v43, %v15136_v58 }
 0xa42   :  { %10714 = vmatprep.mubr.msk.f32.mxu0 %vm12239_vm2, %v15124_v63 }
 0xa44   :  { %v2793_v33 = vpop.f32.mrb[58].mxu0 }
 0xa45   :  { %v10705_v30 = vpop.f32.mrb[59].mxu0  ;;  %10715 = vmatmul.mubr.msk.f32.gmra.mrb[52].mxu0 %vm1626_vm4, %v2793_v33 }
 0xa46   :  { %10752 = vmatpush3.xpose.msk.msra.mxu0 %vm1626_vm4, %v12879_v47  ;;  %10753 = vmatprep.mubr.msk.f32.mxu0 %vm12239_vm2, %v15124_v63  ;;  %v15134_v47 = vld [vmem:[#allocation10_spill] sm:$0xff] }
 0xa47   :  { %10777 = vmatprep.subr.mxu0 %v15124_v63 }
 0xa49   :  { %10754 = vmatmul.mubr.msk.f32.vlgmr.msra.gmra.mrb[60].mxu0 %vm1626_vm4, %v12909_v22  ;;  %v3002_v22 = vsub.f32 %v13307_v2, %v2995_v5 }
 0xa4a   :  { %10756 = vmatprep.mubr.msk.f32.mxu0 %vm12239_vm2, %v15124_v63  ;;  %10778 = vmatpush3.msra.mxu0 %v13183_v4  ;;  %v3001_v4 = vpop.xlane.xlu0 %3000 }
 0xa4b   :  { %10788 = vmatprep.subr.mxu0 %v15124_v63  ;;  %v3005_v48 = vmul.f32 1.442695, %v3002_v22  ;;  %v3004_v21 = vsub.f32 %v13311_v54, %v3001_v4 }
 0xa4d   :  { %10757 = vmatmul.mubr.msk.f32.gmra.mrb[62].mxu0 %vm1626_vm4, %v15133_v60  ;;  %12021 = vpow2.f32 %v3005_v48  ;;  %v3009_v9 = vmul.f32 1.442695, %v3004_v21  ;;  %v15138_v60 = vld [vmem:[#allocation16_spill] sm:$0xff] }
 0xa4e   :  { %10759 = vmatprep.mubr.msk.f32.mxu0 %vm12239_vm2, %v15124_v63  ;;  %12023 = vpow2.f32 %v3007_v0  ;;  %v15140_v48 = vld [vmem:[#allocation20_spill] sm:$0xff] }
 0xa4f   :  { %12025 = vpow2.f32 %v3009_v9  ;;  %v15141_v21 = vpack.c.bf16 %v15139_v35, %v15140_v48  ;;  %v15142_v9 = vld [vmem:[#allocation22_spill] sm:$0xff] }
 0xa51   :  { %10760 = vmatmul.mubr.msk.f32.gmra.mrb[64].mxu0 %vm1626_vm4, %v15134_v47 }
 0xa52   :  { %10779 = vmatprep.mubr.msk.f32.mxu0 %vm12239_vm2, %v15124_v63 }
 0xa57   :  { %v12022_v41 = vpop.eup %12021 }
 0xa58   :  { %v12024_v6 = vpop.eup %12023  ;;  %v3011_v32 = vsel %vm1725_vm6, %v12022_v41, 0.0 }
 0xa59   :  { %v12026_v44 = vpop.eup %12025  ;;  %v3014_v50 = vsel %vm1725_vm6, %v12024_v6, 0.0 }
 0xa5a   :  { %v3017_v61 = vsel %vm1732_vm7, %v12026_v44, 0.0 }
 0xb10   :  { %v2874_v36 = vpop.f32.mrb[48].mxu0 }
 0xb11   :  { %2891 = vst.msk [vmem:[#allocation2] sm:$0xff] %vm206_vm1, %v2874_v36  ;;  %v10710_v19 = vpop.f32.mrb[49].mxu0 }
 0xb14   :  { %v2879_v28 = vpop.f32.mrb[50].mxu0 }
 0xb15   :  { %2892 = vst.msk [vmem:[#allocation2 + $0x8] sm:$0xff] %vm206_vm1, %v2879_v28  ;;  %v10713_v3 = vpop.f32.mrb[51].mxu0 }
 0xb18   :  { %v2884_v39 = vpop.f32.mrb[52].mxu0 }
 0xb19   :  { %2894 = vst.msk [vmem:[#allocation2 + $0x10] sm:$0x1] %vm2893_vm8, %v2884_v39  ;;  %v10716_v49 = vpop.f32.mrb[53].mxu0  ;;  %v15143_v39 = vld [vmem:[#allocation9_spill] sm:$0xff] }
 0xb1a   :  { %v15144_v49 = vld [vmem:[#allocation19_spill] sm:$0xff] }
 0xb1c   :  { %v3203_v40 = vpop.f32.mrb[60].mxu0 }
 0xb1d   :  { %v10755_v2 = vpop.f32.mrb[61].mxu0  ;;  %v3217_v11 = vsel %vm1725_vm6, %v3203_v40, -inf }
 0xb1e   :  { %3218 = vmax.xlane.f32.xlu1 %v3217_v11  ;;  %v15147_v11 = vld [vmem:[#allocation13_spill] sm:$0xff] }
 0xb20   :  { %v3208_v38 = vpop.f32.mrb[62].mxu0 }
 0xb21   :  { %v10758_v42 = vpop.f32.mrb[63].mxu0  ;;  %v3220_v54 = vsel %vm1725_vm6, %v3208_v38, -inf }
 0xb22   :  { %3221 = vmax.xlane.f32.xlu0 %v3220_v54  ;;  %v15149_v42 = vld [vmem:[#allocation11_spill] sm:$0xff] }
 0xb24   :  { %v3213_v8 = vpop.f32.mrb[64].mxu0 }
 0xb25   :  { %v10761_v17 = vpop.f32.mrb[65].mxu0  ;;  %v3223_v52 = vsel %vm1732_vm7, %v3213_v8, -inf }
 0xb26   :  { %3224 = vmax.xlane.f32.xlu1 %v3223_v52  ;;  %3012 = vadd.xlane.f32.xlu0 %v3011_v32 }
 0xb2a   :  { %3015 = vadd.xlane.f32.xlu1 %v3014_v50  ;;  %3018 = vadd.xlane.f32.xlu0 %v3017_v61 }
 0xbab   :  { %v3219_v56 = vpop.xlane.xlu1 %3218 }
 0xbac   :  { %v3226_v14 = vsub.f32 %v3203_v40, %v3219_v56  ;;  %v15145_v40 = vld [vmem:[#allocation15_spill] sm:$0xff] }
 0xbad   :  { %v15146_v2 = vpack.c.bf16 %v15144_v49, %v15145_v40  ;;  %v15157_v49 = vld [vmem:[#allocation31_spill] sm:$0xff]  ;;  %v15158_v40 = vld [vmem:[#allocation29_spill] sm:$0xff] }
 0xbae   :  { %v3229_v10 = vmul.f32 1.442695, %v3226_v14 }
 0xbaf   :  { %v3222_v31 = vpop.xlane.xlu0 %3221 }
 0xbb0   :  { %12027 = vpow2.f32 %v3229_v10  ;;  %v3227_v57 = vsub.f32 %v3208_v38, %v3222_v31  ;;  %v15148_v38 = vld [vmem:[#allocation17_spill] sm:$0xff] }
 0xbb2   :  { %v3231_v46 = vmul.f32 1.442695, %v3227_v57 }
 0xbb3   :  { %v3225_v55 = vpop.xlane.xlu1 %3224  ;;  %v3013_v16 = vpop.xlane.xlu0 %3012 }
 0xbb4   :  { %12029 = vpow2.f32 %v3231_v46  ;;  %v3228_v25 = vsub.f32 %v3213_v8, %v3225_v55 }
 0xbb5   :  { %12031 = vrcp.f32 %v3013_v16 }
 0xbb6   :  { %v3233_v18 = vmul.f32 1.442695, %v3228_v25 }
 0xbb7   :  { %v3016_v34 = vpop.xlane.xlu1 %3015  ;;  %v3019_v45 = vpop.xlane.xlu0 %3018 }
 0xbb8   :  { %12033 = vpow2.f32 %v3233_v18 }
 0xbb9   :  { %12035 = vrcp.f32 %v3016_v34 }
 0xbba   :  { %v12028_v15 = vpop.eup %12027  ;;  %12037 = vrcp.f32 %v3019_v45 }
 0xbbb   :  { %v3235_v24 = vsel %vm1725_vm6, %v12028_v15, 0.0 }
 0xbbc   :  { %3236 = vadd.xlane.f32.xlu1 %v3235_v24 }
 0xbbe   :  { %v12030_v62 = vpop.eup %12029 }
 0xbbf   :  { %v12032_v26 = vpop.eup %12031  ;;  %v3238_v13 = vsel %vm1725_vm6, %v12030_v62, 0.0 }
 0xbc0   :  { %v3023_v27 = vmul.f32 %v12032_v26, %v12022_v41  ;;  %3239 = vadd.xlane.f32.xlu0 %v3238_v13 }
 0xbc2   :  { %v12034_v12 = vpop.eup %12033  ;;  %10739 = vmatmul.mubr.msk.f32.vlgmr.msra.gmra.mrb[78].mxu1 %vm1725_vm6, %v3023_v27 }
 0xbc3   :  { %v12036_v53 = vpop.eup %12035  ;;  %11663 = vmatpush3.bf16.msra.mxu1 %v15137_v20  ;;  %v3241_v23 = vsel %vm1732_vm7, %v12034_v12, 0.0  ;;  %10741 = vmatprep.mubr.msk.f32.mxu1 %vm12239_vm2, %v15124_v63 }
 0xbc4   :  { %3242 = vadd.xlane.f32.xlu1 %v3241_v23  ;;  %10766 = vmatprep.subr.mxu1 %v15124_v63  ;;  %v3024_v33 = vmul.f32 %v12036_v53, %v12024_v6  ;;  %v12038_v30 = vpop.eup %12037 }
 0xbc5   :  { %v3025_v47 = vmul.f32 %v12038_v30, %v12026_v44 }
 0xbc6   :  { %10742 = vmatmul.mubr.msk.f32.gmra.mrb[80].mxu1 %vm1725_vm6, %v3024_v33 }
 0xbc7   :  { %10767 = vmatpush3.msk.msra.mxu1 %vm1769_vm3, %v15138_v60  ;;  %10744 = vmatprep.mubr.msk.f32.mxu1 %vm12239_vm2, %v15124_v63 }
 0xbc8   :  { %11664 = vmatprep.subr.bf16.mxu1 %v15125_v7 }
 0xbca   :  { %10745 = vmatmul.mubr.msk.f32.gmra.mrb[82].mxu1 %vm1725_vm6, %v3025_v47 }
 0xbcb   :  { %10768 = vmatprep.mubr.msk.f32.mxu1 %vm12239_vm2, %v15124_v63 }
 0xc49   :  { %v3237_v5 = vpop.xlane.xlu1 %3236 }
 0xc4a   :  { %12039 = vrcp.f32 %v3237_v5 }
 0xc4d   :  { %v3240_v22 = vpop.xlane.xlu0 %3239 }
 0xc4e   :  { %12041 = vrcp.f32 %v3240_v22 }
 0xc51   :  { %v3243_v29 = vpop.xlane.xlu1 %3242 }
 0xc52   :  { %12043 = vrcp.f32 %v3243_v29  ;;  %v15150_v29 = vld [vmem:[#allocation25_spill] sm:$0xff] }
 0xc54   :  { %v12040_v36 = vpop.eup %12039 }
 0xc55   :  { %v3247_v4 = vmul.f32 %v12040_v36, %v12028_v15  ;;  %v15151_v36 = vld [vmem:[#allocation21_spill] sm:$0xff] }
 0xc57   :  { %10769 = vmatmul.mubr.msk.f32.vlgmr.msra.gmra.mrb[84].mxu1 %vm1725_vm6, %v3247_v4  ;;  %v15152_v4 = vpack.c.bf16 %v15150_v29, %v15151_v36 }
 0xc58   :  { %v12042_v19 = vpop.eup %12041  ;;  %11667 = vmatpush3.bf16.xpose.msk.msra.mxu1 %vm12864_vm5, %v15141_v21  ;;  %10771 = vmatprep.mubr.msk.f32.mxu1 %vm12239_vm2, %v15124_v63  ;;  %v15153_v21 = vld [vmem:[#allocation23_spill] sm:$0xff] }
 0xc59   :  { %v3248_v28 = vmul.f32 %v12042_v19, %v12030_v62  ;;  %10803 = vmatprep.subr.mxu1 %v15124_v63 }
 0xc5b   :  { %10772 = vmatmul.mubr.msk.f32.gmra.mrb[86].mxu1 %vm1725_vm6, %v3248_v28  ;;  %v15154_v28 = vld [vmem:[#allocation26_spill] sm:$0xff] }
 0xc5c   :  { %v12044_v3 = vpop.eup %12043  ;;  %10774 = vmatprep.mubr.msk.f32.mxu1 %vm12239_vm2, %v15124_v63 }
 0xc5d   :  { %v3249_v0 = vmul.f32 %v12044_v3, %v12034_v12  ;;  %v15155_v3 = vld [vmem:[#allocation28_spill] sm:$0xff] }
 0xc5f   :  { %10775 = vmatmul.mubr.msk.f32.gmra.mrb[88].mxu1 %vm1725_vm6, %v3249_v0  ;;  %v15156_v0 = vld [vmem:[#allocation27_spill] sm:$0xff] }
 0xc60   :  { %10804 = vmatpush3.xpose.msk.msra.mxu1 %vm1626_vm4, %v15142_v9  ;;  %10805 = vmatprep.mubr.msk.f32.mxu1 %vm12239_vm2, %v15124_v63 }
 0xc61   :  { %11668 = vmatprep.subr.bf16.mxu1 %v15125_v7 }
 0xc63   :  { %10806 = vmatmul.mubr.msk.f32.vlgmr.msra.gmra.mrb[90].mxu1 %vm1626_vm4, %v15143_v39 }
 0xc64   :  { %11670 = vmatpush3.bf16.msra.mxu1 %v15146_v2  ;;  %10808 = vmatprep.mubr.msk.f32.mxu1 %vm12239_vm2, %v15124_v63  ;;  %v15159_v2 = vpack.c.bf16 %v15157_v49, %v15158_v40 }
 0xc65   :  { %10818 = vmatprep.subr.mxu1 %v15124_v63 }
 0xc67   :  { %10809 = vmatmul.mubr.msk.f32.gmra.mrb[92].mxu1 %vm1626_vm4, %v15147_v11 }
 0xc68   :  { %10819 = vmatpush3.msk.msra.mxu1 %vm1769_vm3, %v15148_v38  ;;  %10811 = vmatprep.mubr.msk.f32.mxu1 %vm12239_vm2, %v15124_v63 }
 0xc69   :  { %11671 = vmatprep.subr.bf16.mxu1 %v15125_v7 }
 0xc6b   :  { %10812 = vmatmul.mubr.msk.f32.gmra.mrb[94].mxu1 %vm1626_vm4, %v15149_v42  ;;  %v15160_v42 = vld [vmem:[#allocation30_spill] sm:$0xff] }
 0xc6c   :  { %10820 = vmatprep.mubr.msk.f32.mxu1 %vm12239_vm2, %v15124_v63 }
 0xc95   :  { %v3104_v54 = vpop.f32.mrb[78].mxu1 }
 0xc96   :  { %v10740_v41 = vpop.f32.mrb[79].mxu1 }
 0xc99   :  { %v3109_v8 = vpop.f32.mrb[80].mxu1 }
 0xc9a   :  { %v10743_v6 = vpop.f32.mrb[81].mxu1 }
 0xc9d   :  { %v3114_v17 = vpop.f32.mrb[82].mxu1 }
 0xc9e   :  { %v10746_v52 = vpop.f32.mrb[83].mxu1 }
 0xd2a   :  { %v3328_v32 = vpop.f32.mrb[84].mxu1 }
 0xd2b   :  { %v10770_v44 = vpop.f32.mrb[85].mxu1  ;;  %10780 = vmatmul.mubr.msk.f32.vlgmr.msra.gmra.mrb[66].mxu0 %vm1626_vm4, %v3328_v32 }
 0xd2c   :  { %10782 = vmatprep.mubr.msk.f32.mxu0 %vm12239_vm2, %v15124_v63  ;;  %10789 = vmatpush3.msra.mxu0 %v13190_v37 }
 0xd2d   :  { %10829 = vmatprep.subr.mxu0 %v15124_v63 }
 0xd2e   :  { %v3333_v50 = vpop.f32.mrb[86].mxu1 }
 0xd2f   :  { %v10773_v61 = vpop.f32.mrb[87].mxu1  ;;  %10783 = vmatmul.mubr.msk.f32.gmra.mrb[68].mxu0 %vm1626_vm4, %v3333_v50 }
 0xd30   :  { %10785 = vmatprep.mubr.msk.f32.mxu0 %vm12239_vm2, %v15124_v63 }
 0xd32   :  { %v3338_v56 = vpop.f32.mrb[88].mxu1 }
 0xd33   :  { %v10776_v14 = vpop.f32.mrb[89].mxu1  ;;  %10786 = vmatmul.mubr.msk.f32.gmra.mrb[70].mxu0 %vm1626_vm4, %v3338_v56 }
 0xd34   :  { %10790 = vmatprep.mubr.msk.f32.mxu0 %vm12239_vm2, %v15124_v63 }
 0xd36   :  { %v3605_v10 = vpop.f32.mrb[90].mxu1 }
 0xd37   :  { %10791 = vmatmul.mubr.msk.f32.vlgmr.msra.gmra.mrb[66].mxu0 %vm1626_vm4, %v3104_v54  ;;  %v10807_v37 = vpop.f32.mrb[91].mxu1  ;;  %v3619_v31 = vsel %vm1725_vm6, %v3605_v10, -inf }
 0xd38   :  { %3620 = vmax.xlane.f32.xlu0 %v3619_v31  ;;  %10793 = vmatprep.mubr.msk.f32.mxu0 %vm12239_vm2, %v15124_v63 }
 0xd39   :  { %10830 = vmatpush3.msra.mxu0 %v13221_v1 }
 0xd3a   :  { %v3610_v57 = vpop.f32.mrb[92].mxu1  ;;  %11675 = vmatprep.subr.bf16.mxu0 %v15125_v7 }
 0xd3b   :  { %10794 = vmatmul.mubr.msk.f32.gmra.mrb[68].mxu0 %vm1626_vm4, %v3109_v8  ;;  %v10810_v46 = vpop.f32.mrb[93].mxu1  ;;  %v3622_v55 = vsel %vm1725_vm6, %v3610_v57, -inf }
 0xd3c   :  { %3623 = vmax.xlane.f32.xlu1 %v3622_v55  ;;  %10796 = vmatprep.mubr.msk.f32.mxu0 %vm12239_vm2, %v15124_v63 }
 0xd3e   :  { %v3615_v16 = vpop.f32.mrb[94].mxu1 }
 0xd3f   :  { %10797 = vmatmul.mubr.msk.f32.gmra.mrb[70].mxu0 %vm1626_vm4, %v3114_v17  ;;  %v10813_v25 = vpop.f32.mrb[95].mxu1  ;;  %v3625_v18 = vsel %vm1732_vm7, %v3615_v16, -inf }
 0xd40   :  { %3626 = vmax.xlane.f32.xlu0 %v3625_v18  ;;  %10831 = vmatprep.mubr.msk.f32.mxu0 %vm12239_vm2, %v15124_v63  ;;  %v4156_v18 = vld [vmem:[#allocation2] sm:$0xff] }
 0xdc5   :  { %v3621_v1 = vpop.xlane.xlu0 %3620 }
 0xdc6   :  { %v3628_v34 = vsub.f32 %v3605_v10, %v3621_v1 }
 0xdc8   :  { %v3631_v45 = vmul.f32 1.442695, %v3628_v34 }
 0xdc9   :  { %v3624_v15 = vpop.xlane.xlu1 %3623 }
 0xdca   :  { %12045 = vpow2.f32 %v3631_v45  ;;  %v3629_v24 = vsub.f32 %v3610_v57, %v3624_v15  ;;  %v15161_v45 = vld [vmem:[#allocation3_spill] sm:$0xff] }
 0xdcb   :  { %v4162_v15 = vadd.f32 %v4156_v18, %v15161_v45  ;;  %v15166_v45 = vld [vmem:[#allocation8_spill] sm:$0xff] }
 0xdcc   :  { %v3633_v62 = vmul.f32 1.442695, %v3629_v24  ;;  %v13517_v24 = vld [vmem:[%s15018_s12] ss:$0 sm:$0xff] }
 0xdcd   :  { %v3627_v26 = vpop.xlane.xlu0 %3626 }
 0xdce   :  { %12047 = vpow2.f32 %v3633_v62  ;;  %v3630_v13 = vsub.f32 %v3615_v16, %v3627_v26  ;;  %v4158_v62 = vld [vmem:[#allocation2 + $0x10] sm:$0xff]  ;;  %v4157_v26 = vld [vmem:[#allocation2 + $0x8] sm:$0xff] }
 0xdd0   :  { %v3635_v27 = vmul.f32 1.442695, %v3630_v13 }
 0xdd2   :  { %12049 = vpow2.f32 %v3635_v27 }
 0xdd4   :  { %v12046_v12 = vpop.eup %12045 }
 0xdd5   :  { %v3637_v53 = vsel %vm1725_vm6, %v12046_v12, 0.0 }
 0xdd6   :  { %3638 = vadd.xlane.f32.xlu1 %v3637_v53  ;;  %v15162_v53 = vld [vmem:[#allocation5_spill] sm:$0xff] }
 0xdd8   :  { %v12048_v43 = vpop.eup %12047 }
 0xdd9   :  { %v3640_v58 = vsel %vm1725_vm6, %v12048_v43, 0.0 }
 0xdda   :  { %3641 = vadd.xlane.f32.xlu0 %v3640_v58  ;;  %v15163_v58 = vld [vmem:[#allocation4_spill] sm:$0xff] }
 0xddc   :  { %v12050_v20 = vpop.eup %12049 }
 0xddd   :  { %v3643_v23 = vsel %vm1732_vm7, %v12050_v20, 0.0 }
 0xdde   :  { %3644 = vadd.xlane.f32.xlu1 %v3643_v23 }
 0xe63   :  { %v3639_v33 = vpop.xlane.xlu1 %3638 }
 0xe64   :  { %12051 = vrcp.f32 %v3639_v33 }
 0xe67   :  { %v3642_v30 = vpop.xlane.xlu0 %3641 }
 0xe68   :  { %12053 = vrcp.f32 %v3642_v30 }
 0xe6b   :  { %v3645_v60 = vpop.xlane.xlu1 %3644 }
 0xe6c   :  { %12055 = vrcp.f32 %v3645_v60 }
 0xe6e   :  { %v12052_v47 = vpop.eup %12051 }
 0xe6f   :  { %v3649_v5 = vmul.f32 %v12052_v47, %v12046_v12  ;;  %v13521_v12 = vadd.f32 %v13517_v24, %v4162_v15 }
 0xe71   :  { %10821 = vmatmul.mubr.msk.f32.vlgmr.msra.gmra.mrb[96].mxu1 %vm1725_vm6, %v3649_v5  ;;  %v4183_v33 = vsel %vm206_vm1, %v13521_v12, 0.0 }
 0xe72   :  { %v12054_v22 = vpop.eup %12053  ;;  %11674 = vmatpush3.bf16.xpose.msk.msra.mxu1 %vm12864_vm5, %v15152_v4  ;;  %10823 = vmatprep.mubr.msk.f32.mxu1 %vm12239_vm2, %v15124_v63 }
 0xe73   :  { %v3650_v19 = vmul.f32 %v12054_v22, %v12048_v43  ;;  %10844 = vmatprep.subr.mxu1 %v15124_v63  ;;  %v4164_v43 = vadd.f32 %v4158_v62, %v15162_v53 }
 0xe75   :  { %10824 = vmatmul.mubr.msk.f32.gmra.mrb[98].mxu1 %vm1725_vm6, %v3650_v19  ;;  %v13529_v60 = vadd.f32 %v13517_v24, %v4164_v43 }
 0xe76   :  { %v12056_v35 = vpop.eup %12055  ;;  %10826 = vmatprep.mubr.msk.f32.mxu1 %vm12239_vm2, %v15124_v63 }
 0xe77   :  { %v3651_v48 = vmul.f32 %v12056_v35, %v12050_v20  ;;  %v4163_v20 = vadd.f32 %v4157_v26, %v15163_v58  ;;  %v4189_v5 = vsel %vm206_vm1, %v13529_v60, 0.0 }
 0xe79   :  { %10827 = vmatmul.mubr.msk.f32.gmra.mrb[100].mxu1 %vm1725_vm6, %v3651_v48  ;;  %v13532_v47 = vadd.f32 %v13517_v24, %v4163_v20  ;;  %v4286_v20 = vld [vmem:[%s15019_s15 + $0x8] sm:$0xff] }
 0xe7a   :  { %10845 = vmatpush3.xpose.msk.msra.mxu1 %vm1626_vm4, %v15153_v21  ;;  %10846 = vmatprep.mubr.msk.f32.mxu1 %vm12239_vm2, %v15124_v63 }
 0xe7b   :  { %v4186_v22 = vsel %vm206_vm1, %v13532_v47, 0.0 }
 0xe7d   :  { %10847 = vmatmul.mubr.msk.f32.vlgmr.msra.gmra.mrb[102].mxu1 %vm1626_vm4, %v15154_v28 }
 0xe7e   :  { %10849 = vmatprep.mubr.msk.f32.mxu1 %vm12239_vm2, %v15124_v63 }
 0xe81   :  { %10850 = vmatmul.mubr.msk.f32.gmra.mrb[104].mxu1 %vm1626_vm4, %v15155_v3 }
 0xe82   :  { %10852 = vmatprep.mubr.msk.f32.mxu1 %vm12239_vm2, %v15124_v63 }
 0xe85   :  { %10853 = vmatmul.mubr.msk.f32.gmra.mrb[106].mxu1 %vm1626_vm4, %v15156_v0 }
 0xf44   :  { %v3730_v9 = vpop.f32.mrb[96].mxu1 }
 0xf45   :  { %v10822_v39 = vpop.f32.mrb[97].mxu1  ;;  %10832 = vmatmul.mubr.msk.f32.vlgmr.msra.gmra.mrb[66].mxu0 %vm1626_vm4, %v3730_v9 }
 0xf46   :  { %11677 = vmatpush3.bf16.msra.mxu0 %v15159_v2  ;;  %10834 = vmatprep.mubr.msk.f32.mxu0 %vm12239_vm2, %v15124_v63 }
 0xf47   :  { %10859 = vmatprep.subr.mxu0 %v15124_v63 }
 0xf48   :  { %v3735_v11 = vpop.f32.mrb[98].mxu1 }
 0xf49   :  { %v10825_v38 = vpop.f32.mrb[99].mxu1  ;;  %10835 = vmatmul.mubr.msk.f32.gmra.mrb[68].mxu0 %vm1626_vm4, %v3735_v11 }
 0xf4a   :  { %10860 = vmatpush3.msk.msra.mxu0 %vm1769_vm3, %v15160_v42  ;;  %10837 = vmatprep.mubr.msk.f32.mxu0 %vm12239_vm2, %v15124_v63 }
 0xf4b   :  { %10870 = vmatprep.subr.mxu0 %v15124_v63 }
 0xf4c   :  { %v3740_v54 = vpop.f32.mrb[100].mxu1 }
 0xf4d   :  { %v10828_v41 = vpop.f32.mrb[101].mxu1  ;;  %10838 = vmatmul.mubr.msk.f32.gmra.mrb[70].mxu0 %vm1626_vm4, %v3740_v54 }
 0xf4e   :  { %10861 = vmatprep.mubr.msk.f32.mxu0 %vm12239_vm2, %v15124_v63 }
 0xf50   :  { %v3921_v8 = vpop.f32.mrb[102].mxu1 }
 0xf51   :  { %v10848_v6 = vpop.f32.mrb[103].mxu1  ;;  %v3935_v17 = vsel %vm1725_vm6, %v3921_v8, -inf }
 0xf52   :  { %3936 = vmax.xlane.f32.xlu0 %v3935_v17 }
 0xf54   :  { %v3926_v52 = vpop.f32.mrb[104].mxu1 }
 0xf55   :  { %v10851_v32 = vpop.f32.mrb[105].mxu1  ;;  %v3938_v44 = vsel %vm1725_vm6, %v3926_v52, -inf }
 0xf56   :  { %3939 = vmax.xlane.f32.xlu1 %v3938_v44 }
 0xf58   :  { %v3931_v50 = vpop.f32.mrb[106].mxu1 }
 0xf59   :  { %v10854_v61 = vpop.f32.mrb[107].mxu1  ;;  %v3941_v56 = vsel %vm1732_vm7, %v3931_v50, -inf }
 0xf5a   :  { %3942 = vmax.xlane.f32.xlu0 %v3941_v56 }
 0xfdf   :  { %v3937_v14 = vpop.xlane.xlu0 %3936 }
 0xfe0   :  { %v3944_v10 = vsub.f32 %v3921_v8, %v3937_v14 }
 0xfe2   :  { %v3947_v37 = vmul.f32 1.442695, %v3944_v10 }
 0xfe3   :  { %v3940_v31 = vpop.xlane.xlu1 %3939 }
 0xfe4   :  { %12057 = vpow2.f32 %v3947_v37  ;;  %v3945_v57 = vsub.f32 %v3926_v52, %v3940_v31  ;;  %v15164_v52 = vld [vmem:[#allocation6_spill] sm:$0xff] }
 0xfe6   :  { %v3949_v46 = vmul.f32 1.442695, %v3945_v57  ;;  %v15165_v57 = vld [vmem:[#allocation7_spill] sm:$0xff] }
 0xfe7   :  { %v3943_v55 = vpop.xlane.xlu0 %3942 }
 0xfe8   :  { %12059 = vpow2.f32 %v3949_v46  ;;  %v3946_v16 = vsub.f32 %v3931_v50, %v3943_v55 }
 0xfea   :  { %v3951_v25 = vmul.f32 1.442695, %v3946_v16 }
 0xfec   :  { %12061 = vpow2.f32 %v3951_v25 }
 0xfee   :  { %v12058_v1 = vpop.eup %12057 }
 0xfef   :  { %v3953_v34 = vsel %vm1725_vm6, %v12058_v1, 0.0 }
 0xff0   :  { %3954 = vadd.xlane.f32.xlu1 %v3953_v34 }
 0xff2   :  { %v12060_v13 = vpop.eup %12059 }
 0xff3   :  { %v3956_v27 = vsel %vm1725_vm6, %v12060_v13, 0.0 }
 0xff4   :  { %3957 = vadd.xlane.f32.xlu0 %v3956_v27 }
 0xff6   :  { %v12062_v23 = vpop.eup %12061 }
 0xff7   :  { %v3959_v30 = vsel %vm1732_vm7, %v12062_v23, 0.0 }
 0xff8   :  { %4184 = vadd.xlane.f32.xlu0 %v4183_v33  ;;  %3960 = vadd.xlane.f32.xlu1 %v3959_v30  ;;  %v4287_v33 = vld [vmem:[%s15019_s15 + $0x10] sm:$0xff]  ;;  %v4288_v30 = vld [vmem:[%s15019_s15 + $0x18] sm:$0xff] }
 0xffc   :  { %4190 = vadd.xlane.f32.xlu0 %v4189_v5  ;;  %4187 = vadd.xlane.f32.xlu1 %v4186_v22  ;;  %v11682_v5 = vpack.c.bf16 %v4288_v30, %v4287_v33 }
0x107d   :  { %v3955_v29 = vpop.xlane.xlu1 %3954 }
0x107e   :  { %12063 = vrcp.f32 %v3955_v29 }
0x1081   :  { %v3958_v36 = vpop.xlane.xlu0 %3957 }
0x1082   :  { %12065 = vrcp.f32 %v3958_v36 }
0x1085   :  { %v3961_v4 = vpop.xlane.xlu1 %3960  ;;  %v4185_v38 = vpop.xlane.xlu0 %4184 }
0x1086   :  { %12067 = vrcp.f32 %v3961_v4  ;;  %v4201_v41 = vmul.f32 0.03125, %v4185_v38 }
0x1088   :  { %v12064_v19 = vpop.eup %12063  ;;  %v13563_v56 = vsub.f32 %v13521_v12, %v4201_v41 }
0x1089   :  { %v3965_v35 = vmul.f32 %v12064_v19, %v12058_v1  ;;  %v4188_v44 = vpop.xlane.xlu1 %4187  ;;  %v4191_v50 = vpop.xlane.xlu0 %4190 }
0x108a   :  { %v4202_v10 = vmul.f32 0.03125, %v4188_v44  ;;  %v4203_v37 = vmul.f32 0.03125, %v4191_v50  ;;  %v4213_v25 = vmul.f32 %v13563_v56, %v13563_v56  ;;  %v9444_v44 = vld [vmem:[%s15021_s14] ss:$0 sm:$0xff] }
0x108b   :  { %10862 = vmatmul.mubr.msk.f32.vlgmr.msra.gmra.mrb[72].mxu0 %vm1725_vm6, %v3965_v35 }
0x108c   :  { %v12066_v48 = vpop.eup %12065  ;;  %10864 = vmatprep.mubr.msk.f32.mxu0 %vm12239_vm2, %v15124_v63  ;;  %10871 = vmatpush3.msra.mxu0 %v13325_v59  ;;  %v13574_v18 = vsub.f32 %v13532_v47, %v4202_v10  ;;  %v13577_v1 = vsub.f32 %v13529_v60, %v4203_v37 }
0x108d   :  { %v3966_v21 = vmul.f32 %v12066_v48, %v12060_v13  ;;  %v4219_v13 = vsel %vm206_vm1, %v4213_v25, 0.0 }
0x108e   :  { %v4214_v27 = vmul.f32 %v13574_v18, %v13574_v18  ;;  %v4215_v53 = vmul.f32 %v13577_v1, %v13577_v1 }
0x108f   :  { %10865 = vmatmul.mubr.msk.f32.gmra.mrb[74].mxu0 %vm1725_vm6, %v3966_v21 }
0x1090   :  { %v12068_v28 = vpop.eup %12067  ;;  %10867 = vmatprep.mubr.msk.f32.mxu0 %vm12239_vm2, %v15124_v63  ;;  %v4222_v43 = vsel %vm206_vm1, %v4214_v27, 0.0  ;;  %v4225_v58 = vsel %vm206_vm1, %v4215_v53, 0.0  ;;  %v4444_v27 = vld [vmem:[%s15022_s17 + $0x28] sm:$0xff] }
0x1091   :  { %v3967_v3 = vmul.f32 %v12068_v28, %v12062_v23 }
0x1093   :  { %10868 = vmatmul.mubr.msk.f32.gmra.mrb[76].mxu0 %vm1725_vm6, %v3967_v3 }
0x1094   :  { %10872 = vmatprep.mubr.msk.f32.mxu0 %vm12239_vm2, %v15124_v63 }
0x115e   :  { %v4046_v0 = vpop.f32.mrb[72].mxu0 }
0x115f   :  { %v10863_v9 = vpop.f32.mrb[73].mxu0  ;;  %10873 = vmatmul.mubr.msk.f32.vlgmr.msra.gmra.mrb[66].mxu0 %vm1626_vm4, %v4046_v0 }
0x1160   :  { %10875 = vmatprep.mubr.msk.f32.mxu0 %vm12239_vm2, %v15124_v63 }
0x1162   :  { %v4051_v59 = vpop.f32.mrb[74].mxu0 }
0x1163   :  { %v10866_v39 = vpop.f32.mrb[75].mxu0  ;;  %10876 = vmatmul.mubr.msk.f32.gmra.mrb[68].mxu0 %vm1626_vm4, %v4051_v59 }
0x1164   :  { %10878 = vmatprep.mubr.msk.f32.mxu0 %vm12239_vm2, %v15124_v63 }
0x1166   :  { %v4056_v49 = vpop.f32.mrb[76].mxu0 }
0x1167   :  { %v10869_v40 = vpop.f32.mrb[77].mxu0  ;;  %10879 = vmatmul.mubr.msk.f32.gmra.mrb[70].mxu0 %vm1626_vm4, %v4056_v49 }
0x1232   :  { %v4136_v2 = vpop.f32.mrb[66].mxu0 }
0x1233   :  { %4153 = vst.msk [vmem:[#allocation2 + $0x18] sm:$0xff] %vm206_vm1, %v4136_v2  ;;  %v10874_v11 = vpop.f32.mrb[67].mxu0 }
0x1236   :  { %v4141_v42 = vpop.f32.mrb[68].mxu0 }
0x1237   :  { %4154 = vst.msk [vmem:[#allocation2 + $0x20] sm:$0xff] %vm206_vm1, %v4141_v42  ;;  %v10877_v54 = vpop.f32.mrb[69].mxu0 }
0x123a   :  { %v4146_v8 = vpop.f32.mrb[70].mxu0  ;;  %v4159_v6 = vld [vmem:[#allocation2 + $0x18] sm:$0xff] }
0x123b   :  { %4155 = vst.msk [vmem:[#allocation2 + $0x28] sm:$0x1] %vm2893_vm8, %v4146_v8  ;;  %v10880_v17 = vpop.f32.mrb[71].mxu0  ;;  %v4165_v32 = vadd.f32 %v4159_v6, %v15164_v52  ;;  %v9443_v52 = vld [vmem:[%s15020_s13] ss:$0 sm:$0xff] }
0x123d   :  { %v13560_v61 = vadd.f32 %v13517_v24, %v4165_v32 }
0x123e   :  { %v4160_v14 = vld [vmem:[#allocation2 + $0x20] sm:$0xff] }
0x123f   :  { %v4192_v31 = vsel %vm206_vm1, %v13560_v61, 0.0  ;;  %v4166_v46 = vadd.f32 %v4160_v14, %v15165_v57 }
0x1240   :  { %4193 = vadd.xlane.f32.xlu1 %v4192_v31 }
0x1241   :  { %v13569_v55 = vadd.f32 %v13517_v24, %v4166_v46 }
0x1242   :  { %v4161_v16 = vld [vmem:[#allocation2 + $0x28] sm:$0xff] }
0x1243   :  { %v4195_v34 = vsel %vm206_vm1, %v13569_v55, 0.0  ;;  %v4167_v15 = vadd.f32 %v4161_v16, %v15166_v45 }
0x1244   :  { %4196 = vadd.xlane.f32.xlu0 %v4195_v34 }
0x1245   :  { %v13583_v62 = vadd.f32 %v13517_v24, %v4167_v15  ;;  %v4285_v24 = vld [vmem:[%s15019_s15] sm:$0xff]  ;;  %v4442_v15 = vld [vmem:[%s15022_s17 + $0x18] sm:$0xff] }
0x1246   :  { %v11678_v23 = vpack.c.bf16 %v4286_v20, %v4285_v24 }
0x1247   :  { %v4198_v26 = vsel %vm206_vm1, %v13583_v62, 0.0 }
0x1248   :  { %4199 = vadd.xlane.f32.xlu1 %v4198_v26  ;;  %4220 = vadd.xlane.f32.xlu0 %v4219_v13  ;;  %v4443_v13 = vld [vmem:[%s15022_s17 + $0x20] sm:$0xff] }
0x1249   :  { %11679 = vmatprep.subr.bf16.mxu1 %v11678_v23  ;;  %v11694_v53 = vpack.c.bf16 %v4444_v27, %v4443_v13 }
0x124a   :  { %11681 = vmatpush3.bf16.msra.mxu1 %v11678_v23 }
0x124b   :  { %11683 = vmatprep.subr.bf16.mxu1 %v11682_v5 }
0x124c   :  { %4223 = vadd.xlane.f32.xlu1 %v4222_v43  ;;  %4226 = vadd.xlane.f32.xlu0 %v4225_v58  ;;  %v4445_v43 = vld [vmem:[%s15022_s17 + $0x30] sm:$0xff]  ;;  %v4446_v58 = vld [vmem:[%s15022_s17 + $0x38] sm:$0xff] }
0x124d   :  { %v11698_v24 = vpack.c.bf16 %v4446_v58, %v4445_v43 }
0x124e   :  { %11685 = vmatpush3.bf16.msra.mxu1 %v11682_v5 }
0x12cd   :  { %v4194_v22 = vpop.xlane.xlu1 %4193 }
0x12ce   :  { %v4204_v29 = vmul.f32 0.03125, %v4194_v22 }
0x12d0   :  { %v13607_v36 = vsub.f32 %v13560_v61, %v4204_v29 }
0x12d1   :  { %v4197_v4 = vpop.xlane.xlu0 %4196 }
0x12d2   :  { %v4205_v19 = vmul.f32 0.03125, %v4197_v4  ;;  %v4216_v35 = vmul.f32 %v13607_v36, %v13607_v36 }
0x12d4   :  { %v13612_v48 = vsub.f32 %v13569_v55, %v4205_v19  ;;  %v4228_v21 = vsel %vm206_vm1, %v4216_v35, 0.0 }
0x12d5   :  { %4229 = vadd.xlane.f32.xlu1 %v4228_v21  ;;  %v4200_v28 = vpop.xlane.xlu1 %4199  ;;  %v4221_v3 = vpop.xlane.xlu0 %4220 }
0x12d6   :  { %v4206_v0 = vmul.f32 0.03125, %v4200_v28  ;;  %v4237_v9 = vmul.f32 0.03125, %v4221_v3  ;;  %v4217_v59 = vmul.f32 %v13612_v48, %v13612_v48 }
0x12d8   :  { %v13618_v39 = vsub.f32 %v13583_v62, %v4206_v0  ;;  %v4243_v49 = vadd.f32 1e-06, %v4237_v9  ;;  %v4231_v40 = vsel %vm206_vm1, %v4217_v59, 0.0 }
0x12d9   :  { %v4224_v2 = vpop.xlane.xlu1 %4223  ;;  %4232 = vadd.xlane.f32.xlu0 %v4231_v40  ;;  %v4227_v11 = vpop.xlane.xlu0 %4226 }
0x12da   :  { %12069 = vrsqrt.f32 %v4243_v49  ;;  %v4238_v38 = vmul.f32 0.03125, %v4224_v2  ;;  %v4239_v42 = vmul.f32 0.03125, %v4227_v11  ;;  %v4218_v54 = vmul.f32 %v13618_v39, %v13618_v39 }
0x12dc   :  { %v4244_v41 = vadd.f32 1e-06, %v4238_v38  ;;  %v4245_v8 = vadd.f32 1e-06, %v4239_v42  ;;  %v4234_v6 = vsel %vm206_vm1, %v4218_v54, 0.0 }
0x12dd   :  { %4235 = vadd.xlane.f32.xlu1 %v4234_v6 }
0x12de   :  { %12071 = vrsqrt.f32 %v4244_v41 }
0x12df   :  { %12073 = vrsqrt.f32 %v4245_v8 }
0x12e4   :  { %v12070_v17 = vpop.eup %12069 }
0x12e5   :  { %v4255_v32 = vmul.f32 %v12070_v17, %v13563_v56  ;;  %v4439_v56 = vld [vmem:[%s15022_s17] sm:$0xff] }
0x12e7   :  { %v4267_v50 = vmul.f32 %v9443_v52, %v4255_v32 }
0x12e8   :  { %v12072_v14 = vpop.eup %12071 }
0x12e9   :  { %v12074_v10 = vpop.eup %12073  ;;  %v4256_v37 = vmul.f32 %v12072_v14, %v13574_v18  ;;  %v4279_v31 = vadd.f32 %v9444_v44, %v4267_v50  ;;  %v4440_v18 = vld [vmem:[%s15022_s17 + $0x8] sm:$0xff] }
0x12ea   :  { %v4257_v57 = vmul.f32 %v12074_v10, %v13577_v1  ;;  %v11686_v45 = vpack.c.bf16 %v4440_v18, %v4439_v56  ;;  %v4441_v1 = vld [vmem:[%s15022_s17 + $0x10] sm:$0xff] }
0x12eb   :  { %v4268_v46 = vmul.f32 %v9443_v52, %v4256_v37  ;;  %10889 = vmatprep.mubr.msk.f32.mxu1 %vm206_vm1, %v4279_v31  ;;  %v11690_v26 = vpack.c.bf16 %v4442_v15, %v4441_v1 }
0x12ec   :  { %v4269_v16 = vmul.f32 %v9443_v52, %v4257_v57  ;;  %11687 = vmatprep.subr.bf16.mxu1 %v11686_v45 }
0x12ed   :  { %v4280_v25 = vadd.f32 %v9444_v44, %v4268_v46 }
0x12ee   :  { %v4281_v34 = vadd.f32 %v9444_v44, %v4269_v16 }
0x12ef   :  { %10890 = vmatmul.mubr.msk.f32.vlgmr.msra.gmra.mrb[108].mxu1 %vm206_vm1, %v4280_v25 }
0x12f0   :  { %10892 = vmatprep.mubr.msk.f32.mxu1 %vm206_vm1, %v4281_v34  ;;  %11689 = vmatpush3.bf16.msra.mxu1 %v11686_v45 }
0x12f1   :  { %11691 = vmatprep.subr.bf16.mxu1 %v11690_v26 }
0x12f4   :  { %11693 = vmatpush3.bf16.msra.mxu1 %v11690_v26 }
0x12f5   :  { %11695 = vmatprep.subr.bf16.mxu1 %v11694_v53 }
0x12f8   :  { %11697 = vmatpush3.bf16.msra.mxu1 %v11694_v53 }
0x12f9   :  { %11699 = vmatprep.subr.bf16.mxu1 %v11698_v24 }
0x12fc   :  { %11701 = vmatpush3.bf16.msra.mxu1 %v11698_v24 }
0x1362   :  { %v4230_v20 = vpop.xlane.xlu1 %4229 }
0x1363   :  { %v4240_v23 = vmul.f32 0.03125, %v4230_v20 }
0x1365   :  { %v4246_v33 = vadd.f32 1e-06, %v4240_v23 }
0x1366   :  { %v4233_v30 = vpop.xlane.xlu0 %4232 }
0x1367   :  { %12075 = vrsqrt.f32 %v4246_v33  ;;  %v4241_v5 = vmul.f32 0.03125, %v4233_v30 }
0x1369   :  { %v4247_v22 = vadd.f32 1e-06, %v4241_v5 }
0x136a   :  { %v4236_v29 = vpop.xlane.xlu1 %4235 }
0x136b   :  { %12077 = vrsqrt.f32 %v4247_v22  ;;  %v4242_v4 = vmul.f32 0.03125, %v4236_v29 }
0x136d   :  { %v4248_v19 = vadd.f32 1e-06, %v4242_v4 }
0x136f   :  { %12079 = vrsqrt.f32 %v4248_v19 }
0x1371   :  { %v12076_v35 = vpop.eup %12075 }
0x1372   :  { %v4258_v21 = vmul.f32 %v12076_v35, %v13607_v36  ;;  %v9445_v36 = vld [vmem:[%s15023_s16] ss:$0 sm:$0xff] }
0x1374   :  { %v4270_v28 = vmul.f32 %v9443_v52, %v4258_v21  ;;  %v9458_v21 = vld [vmem:[%s15024_s18] ss:$0 sm:$0xff] }
0x1375   :  { %v12078_v3 = vpop.eup %12077 }
0x1376   :  { %v4282_v0 = vadd.f32 %v9444_v44, %v4270_v28  ;;  %v4259_v9 = vmul.f32 %v12078_v3, %v13612_v48 }
0x1378   :  { %10893 = vmatmul.mubr.msk.f32.gmra.mrb[110].mxu1 %vm206_vm1, %v4282_v0  ;;  %v4271_v59 = vmul.f32 %v9443_v52, %v4259_v9 }
0x1379   :  { %v12080_v49 = vpop.eup %12079 }
0x137a   :  { %v4283_v40 = vadd.f32 %v9444_v44, %v4271_v59  ;;  %v4260_v2 = vmul.f32 %v12080_v49, %v13618_v39 }
0x137c   :  { %10895 = vmatprep.mubr.msk.f32.mxu1 %vm206_vm1, %v4283_v40  ;;  %v4272_v11 = vmul.f32 %v9443_v52, %v4260_v2 }
0x137e   :  { %v4284_v38 = vadd.f32 %v9444_v44, %v4272_v11 }
0x1380   :  { %10896 = vmatmul.mubr.msk.f32.gmra.mrb[112].mxu1 %vm206_vm1, %v4284_v38 }
0x13c2   :  { %v10891_v42 = vpop.f32.mrb[108].mxu1 }
0x13c3   :  { %v4386_v54 = vadd.f32 %v10891_v42, %v9445_v36  ;;  %v4380_v48 = vpop.f32.mrb[109].mxu1 }
0x13c4   :  { %v4381_v41 = vadd.f32 %v9445_v36, %v4380_v48 }
0x13c5   :  { %v4416_v8 = vmul.f32 0.70710677, %v4386_v54  ;;  %v4410_v44 = vmul.f32 0.5, %v4386_v54 }
0x13c6   :  { %v4415_v6 = vmul.f32 0.70710677, %v4381_v41  ;;  %v4409_v50 = vmul.f32 0.5, %v4381_v41 }
0x13c7   :  { %12081 = verf.f32 %v4416_v8 }
0x13c8   :  { %12083 = verf.f32 %v4415_v6 }
0x13d1   :  { %v12082_v17 = vpop.eup %12081 }
0x13d2   :  { %v12084_v39 = vpop.eup %12083  ;;  %v4428_v32 = vadd.f32 1.0, %v12082_v17 }
0x13d3   :  { %v4427_v52 = vadd.f32 1.0, %v12084_v39 }
0x13d4   :  { %v4434_v10 = vmul.f32 %v4428_v32, %v4410_v44 }
0x13d5   :  { %v4433_v14 = vmul.f32 %v4427_v52, %v4409_v50 }
0x13d7   :  { %10914 = vmatprep.mubr.msk.f32.mxu1 %vm4447_vm9, %v4433_v14 }
0x13d8   :  { %10915 = vmatmul.mubr.msk.f32.vlgmr.msra.gmra.mrb[114].mxu1 %vm4447_vm9, %v4434_v10 }
0x144b   :  { %v10894_v37 = vpop.f32.mrb[110].mxu1 }
0x144c   :  { %v4396_v31 = vadd.f32 %v10894_v37, %v9445_v36  ;;  %v4390_v57 = vpop.f32.mrb[111].mxu1 }
0x144d   :  { %v4391_v46 = vadd.f32 %v9445_v36, %v4390_v57  ;;  %v9463_v57 = vld [vmem:[%s15093_s28 + $0x80] sm:$0xff] }
0x144e   :  { %v4418_v16 = vmul.f32 0.70710677, %v4396_v31  ;;  %v4412_v58 = vmul.f32 0.5, %v4396_v31 }
0x144f   :  { %v4417_v25 = vmul.f32 0.70710677, %v4391_v46  ;;  %v4411_v53 = vmul.f32 0.5, %v4391_v46  ;;  %v9464_v46 = vld [vmem:[%s15093_s28 + $0x88] sm:$0xff] }
0x1450   :  { %12085 = verf.f32 %v4418_v16  ;;  %v9487_v16 = vld [vmem:[%s15094_s25 + $0x80] sm:$0xff] }
0x1451   :  { %12087 = verf.f32 %v4417_v25  ;;  %v11702_v25 = vpack.c.bf16 %v9464_v46, %v9463_v57  ;;  %v9478_v57 = vld [vmem:[%s15095_s30 + $0x98] sm:$0xff]  ;;  %v9513_v46 = vld [vmem:[%s15095_s30 + $0xb0] sm:$0xff] }
0x1453   :  { %v10897_v34 = vpop.f32.mrb[112].mxu1  ;;  %11703 = vmatprep.subr.bf16.mxu0 %v11702_v25 }
0x1454   :  { %v4406_v56 = vadd.f32 %v10897_v34, %v9445_v36  ;;  %v4400_v18 = vpop.f32.mrb[113].mxu1  ;;  %v9488_v34 = vld [vmem:[%s15094_s25 + $0x88] sm:$0xff]  ;;  %11705 = vmatpush3.bf16.msra.mxu0 %v11702_v25  ;;  %v9514_v25 = vld [vmem:[%s15095_s30 + $0xb8] sm:$0xff] }
0x1455   :  { %v4401_v45 = vadd.f32 %v9445_v36, %v4400_v18  ;;  %v9465_v18 = vld [vmem:[%s15093_s28 + $0x90] sm:$0xff] }
0x1456   :  { %v4420_v1 = vmul.f32 0.70710677, %v4406_v56  ;;  %v4414_v29 = vmul.f32 0.5, %v4406_v56  ;;  %v11718_v56 = vpack.c.bf16 %v9488_v34, %v9487_v16  ;;  %v11738_v34 = vpack.c.bf16 %v9514_v25, %v9513_v46  ;;  %v9562_v46 = vld [vmem:[%s15094_s25 + $0xd8] sm:$0xff] }
0x1457   :  { %v4419_v15 = vmul.f32 0.70710677, %v4401_v45  ;;  %v4413_v5 = vmul.f32 0.5, %v4401_v45  ;;  %v9466_v45 = vld [vmem:[%s15093_s28 + $0x98] sm:$0xff] }
0x1458   :  { %12089 = verf.f32 %v4420_v1  ;;  %11719 = vmatprep.subr.bf16.mxu1 %v11718_v56  ;;  %v9489_v1 = vld [vmem:[%s15094_s25 + $0x90] sm:$0xff] }
0x1459   :  { %12091 = verf.f32 %v4419_v15  ;;  %11721 = vmatpush3.bf16.msra.mxu1 %v11718_v56  ;;  %v11706_v15 = vpack.c.bf16 %v9466_v45, %v9465_v18  ;;  %v9499_v56 = vld [vmem:[%s15093_s28 + $0xa0] sm:$0xff]  ;;  %v9500_v18 = vld [vmem:[%s15093_s28 + $0xa8] sm:$0xff] }
0x145a   :  { %v12086_v26 = vpop.eup %12085  ;;  %v9535_v45 = vld [vmem:[%s15093_s28 + $0xc0] sm:$0xff] }
0x145b   :  { %v12088_v13 = vpop.eup %12087  ;;  %v4430_v27 = vadd.f32 1.0, %v12086_v26  ;;  %v9490_v26 = vld [vmem:[%s15094_s25 + $0x98] sm:$0xff]  ;;  %11707 = vmatprep.subr.bf16.mxu0 %v11706_v15 }
0x145c   :  { %v4429_v43 = vadd.f32 1.0, %v12088_v13  ;;  %v11722_v13 = vpack.c.bf16 %v9490_v26, %v9489_v1  ;;  %11709 = vmatpush3.bf16.msra.mxu0 %v11706_v15  ;;  %v11726_v1 = vpack.c.bf16 %v9500_v18, %v9499_v56  ;;  %v9536_v15 = vld [vmem:[%s15093_s28 + $0xc8] sm:$0xff]  ;;  %v9583_v18 = vld [vmem:[%s15095_s30 + $0xe0] sm:$0xff] }
0x145d   :  { %v4436_v20 = vmul.f32 %v4430_v27, %v4412_v58  ;;  %v11750_v26 = vpack.c.bf16 %v9536_v15, %v9535_v45  ;;  %v9548_v56 = vld [vmem:[%s15095_s30 + $0xc8] sm:$0xff] }
0x145e   :  { %v4435_v24 = vmul.f32 %v4429_v43, %v4411_v53  ;;  %11723 = vmatprep.subr.bf16.mxu1 %v11722_v13  ;;  %v9584_v45 = vld [vmem:[%s15095_s30 + $0xe8] sm:$0xff] }
0x145f   :  { %11725 = vmatpush3.bf16.msra.mxu1 %v11722_v13  ;;  %v11782_v15 = vpack.c.bf16 %v9584_v45, %v9583_v18 }
0x1460   :  { %10917 = vmatprep.mubr.msk.f32.mxu1 %vm4447_vm9, %v4435_v24 }
0x1461   :  { %10918 = vmatmul.mubr.msk.f32.gmra.mrb[116].mxu1 %vm4447_vm9, %v4436_v20 }
0x1462   :  { %v12090_v23 = vpop.eup %12089 }
0x1463   :  { %v12092_v33 = vpop.eup %12091  ;;  %v4432_v30 = vadd.f32 1.0, %v12090_v23 }
0x1464   :  { %v4431_v22 = vadd.f32 1.0, %v12092_v33 }
0x1465   :  { %v4438_v19 = vmul.f32 %v4432_v30, %v4414_v29 }
0x1466   :  { %v4437_v4 = vmul.f32 %v4431_v22, %v4413_v5 }
0x1468   :  { %10920 = vmatprep.mubr.msk.f32.mxu1 %vm4447_vm9, %v4437_v4 }
0x1469   :  { %10921 = vmatmul.mubr.msk.f32.gmra.mrb[118].mxu1 %vm4447_vm9, %v4438_v19 }
0x14ab   :  { %v10916_v35 = vpop.f32.mrb[114].mxu1 }
0x14ac   :  { %v4562_v28 = vadd.f32 %v10916_v35, %v13532_v47  ;;  %v4532_v3 = vpop.f32.mrb[115].mxu1 }
0x14ad   :  { %v4561_v0 = vadd.f32 %v4532_v3, %v13521_v12 }
0x14ae   :  { %v13680_v9 = vadd.f32 %v9458_v21, %v4562_v28 }
0x14af   :  { %v13682_v59 = vadd.f32 %v9458_v21, %v4561_v0 }
0x14b0   :  { %15167 = vst [vmem:[#allocation12_spill] sm:$0xff] %v13680_v9  ;;  %v4587_v49 = vsel %vm206_vm1, %v13680_v9, 0.0 }
0x14b1   :  { %15168 = vst [vmem:[#allocation10_spill] sm:$0xff] %v13682_v59  ;;  %4588 = vadd.xlane.f32.xlu1 %v4587_v49  ;;  %v4584_v40 = vsel %vm206_vm1, %v13682_v59, 0.0 }
0x14b2   :  { %4585 = vadd.xlane.f32.xlu0 %v4584_v40 }
0x1534   :  { %v10919_v2 = vpop.f32.mrb[116].mxu1 }
0x1535   :  { %v4564_v11 = vadd.f32 %v10919_v2, %v13560_v61  ;;  %v4542_v38 = vpop.f32.mrb[117].mxu1 }
0x1536   :  { %v4563_v47 = vadd.f32 %v4542_v38, %v13529_v60 }
0x1537   :  { %v13690_v36 = vadd.f32 %v9458_v21, %v4564_v11 }
0x1538   :  { %v13692_v12 = vadd.f32 %v9458_v21, %v4563_v47 }
0x1539   :  { %15169 = vst [vmem:[#allocation18_spill] sm:$0xff] %v13690_v36  ;;  %v4593_v42 = vsel %vm206_vm1, %v13690_v36, 0.0 }
0x153a   :  { %15170 = vst [vmem:[#allocation14_spill] sm:$0xff] %v13692_v12  ;;  %4594 = vadd.xlane.f32.xlu1 %v4593_v42  ;;  %v4590_v54 = vsel %vm206_vm1, %v13692_v12, 0.0 }
0x153b   :  { %4591 = vadd.xlane.f32.xlu0 %v4590_v54 }
0x153c   :  { %v10922_v48 = vpop.f32.mrb[118].mxu1 }
0x153d   :  { %v4566_v41 = vadd.f32 %v10922_v48, %v13583_v62  ;;  %v4552_v8 = vpop.f32.mrb[119].mxu1  ;;  %v13771_v48 = vld [vmem:[%s15096_s4 + $0x1] ss:$0 sm:$0xff] }
0x153e   :  { %v4565_v61 = vadd.f32 %v4552_v8, %v13569_v55  ;;  %v4589_v6 = vpop.xlane.xlu1 %4588 }
0x153f   :  { %v13700_v60 = vadd.f32 %v9458_v21, %v4566_v41  ;;  %v4603_v17 = vmul.f32 0.03125, %v4589_v6  ;;  %v4586_v39 = vpop.xlane.xlu0 %4585  ;;  %v13778_v6 = vld [vmem:[%s15097_s2 + $0x1] ss:$0 sm:$0xff] }
0x1540   :  { %v13702_v32 = vadd.f32 %v9458_v21, %v4565_v61  ;;  %v4602_v50 = vmul.f32 0.03125, %v4586_v39 }
0x1541   :  { %15171 = vst [vmem:[#allocation16_spill] sm:$0xff] %v13700_v60  ;;  %v13705_v52 = vsub.f32 %v13680_v9, %v4603_v17  ;;  %v4599_v44 = vsel %vm206_vm1, %v13700_v60, 0.0 }
0x1542   :  { %15172 = vst [vmem:[#allocation24_spill] sm:$0xff] %v13702_v32  ;;  %v13710_v14 = vsub.f32 %v13682_v59, %v4602_v50  ;;  %4600 = vadd.xlane.f32.xlu1 %v4599_v44  ;;  %v4596_v55 = vsel %vm206_vm1, %v13702_v32, 0.0 }
0x1543   :  { %4597 = vadd.xlane.f32.xlu0 %v4596_v55  ;;  %v4615_v62 = vmul.f32 %v13705_v52, %v13705_v52  ;;  %v9511_v55 = vld [vmem:[%s15095_s30 + $0xa0] sm:$0xff] }
0x1544   :  { %v4614_v10 = vmul.f32 %v13710_v14, %v13710_v14 }
0x1545   :  { %v4623_v37 = vsel %vm206_vm1, %v4615_v62, 0.0 }
0x1546   :  { %4624 = vadd.xlane.f32.xlu1 %v4623_v37  ;;  %v4620_v31 = vsel %vm206_vm1, %v4614_v10, 0.0  ;;  %v9512_v10 = vld [vmem:[%s15095_s30 + $0xa8] sm:$0xff] }
0x1547   :  { %4621 = vadd.xlane.f32.xlu0 %v4620_v31  ;;  %v11734_v37 = vpack.c.bf16 %v9512_v10, %v9511_v55  ;;  %v9477_v31 = vld [vmem:[%s15095_s30 + $0x90] sm:$0xff]  ;;  %v9560_v55 = vld [vmem:[%s15094_s25 + $0xc8] sm:$0xff] }
0x1548   :  { %v11714_v16 = vpack.c.bf16 %v9478_v57, %v9477_v31  ;;  %v9526_v31 = vld [vmem:[%s15094_s25 + $0xb8] sm:$0xff]  ;;  %v9561_v57 = vld [vmem:[%s15094_s25 + $0xd0] sm:$0xff] }
0x1549   :  { %11735 = vmatprep.subr.bf16.mxu1 %v11734_v37  ;;  %v11770_v25 = vpack.c.bf16 %v9562_v46, %v9561_v57 }
0x15c7   :  { %v4595_v27 = vpop.xlane.xlu1 %4594 }
0x15c8   :  { %v4605_v53 = vmul.f32 0.03125, %v4595_v27  ;;  %v4592_v43 = vpop.xlane.xlu0 %4591 }
0x15c9   :  { %v4604_v58 = vmul.f32 0.03125, %v4592_v43 }
0x15ca   :  { %v13745_v24 = vsub.f32 %v13690_v36, %v4605_v53 }
0x15cb   :  { %v13748_v20 = vsub.f32 %v13692_v12, %v4604_v58 }
0x15cc   :  { %v4617_v23 = vmul.f32 %v13745_v24, %v13745_v24 }
0x15cd   :  { %v4616_v33 = vmul.f32 %v13748_v20, %v13748_v20 }
0x15ce   :  { %v4629_v30 = vsel %vm206_vm1, %v4617_v23, 0.0 }
0x15cf   :  { %4630 = vadd.xlane.f32.xlu1 %v4629_v30  ;;  %v4601_v5 = vpop.xlane.xlu1 %4600  ;;  %v4626_v22 = vsel %vm206_vm1, %v4616_v33, 0.0 }
0x15d0   :  { %v4607_v29 = vmul.f32 0.03125, %v4601_v5  ;;  %4627 = vadd.xlane.f32.xlu0 %v4626_v22  ;;  %v4598_v4 = vpop.xlane.xlu0 %4597 }
0x15d1   :  { %v4606_v19 = vmul.f32 0.03125, %v4598_v4 }
0x15d2   :  { %v13757_v35 = vsub.f32 %v13700_v60, %v4607_v29 }
0x15d3   :  { %v13760_v21 = vsub.f32 %v13702_v32, %v4606_v19  ;;  %v4625_v28 = vpop.xlane.xlu1 %4624 }
0x15d4   :  { %v4639_v3 = vmul.f32 0.03125, %v4625_v28  ;;  %v4622_v0 = vpop.xlane.xlu0 %4621  ;;  %v4619_v49 = vmul.f32 %v13757_v35, %v13757_v35 }
0x15d5   :  { %v4638_v40 = vmul.f32 0.03125, %v4622_v0  ;;  %v4618_v2 = vmul.f32 %v13760_v21, %v13760_v21 }
0x15d6   :  { %v4645_v11 = vadd.f32 1e-06, %v4639_v3  ;;  %v4635_v38 = vsel %vm206_vm1, %v4619_v49, 0.0 }
0x15d7   :  { %v4644_v47 = vadd.f32 1e-06, %v4638_v40  ;;  %4636 = vadd.xlane.f32.xlu1 %v4635_v38  ;;  %v4632_v42 = vsel %vm206_vm1, %v4618_v2, 0.0 }
0x15d8   :  { %12093 = vrsqrt.f32 %v4645_v11  ;;  %4633 = vadd.xlane.f32.xlu0 %v4632_v42 }
0x15d9   :  { %12095 = vrsqrt.f32 %v4644_v47 }
0x15e2   :  { %v12094_v54 = vpop.eup %12093 }
0x15e3   :  { %v12096_v41 = vpop.eup %12095  ;;  %v4657_v8 = vmul.f32 %v12094_v54, %v13705_v52  ;;  %v9475_v52 = vld [vmem:[%s15095_s30 + $0x80] sm:$0xff] }
0x15e4   :  { %v4656_v61 = vmul.f32 %v12096_v41, %v13710_v14  ;;  %v9476_v14 = vld [vmem:[%s15095_s30 + $0x88] sm:$0xff] }
0x15e5   :  { %v4669_v17 = vmul.f32 %v13771_v48, %v4657_v8  ;;  %v11710_v62 = vpack.c.bf16 %v9476_v14, %v9475_v52  ;;  %v9524_v52 = vld [vmem:[%s15094_s25 + $0xa8] sm:$0xff]  ;;  %v9559_v14 = vld [vmem:[%s15094_s25 + $0xc0] sm:$0xff] }
0x15e6   :  { %v4668_v39 = vmul.f32 %v13771_v48, %v4656_v61  ;;  %v9538_v61 = vld [vmem:[%s15093_s28 + $0xd8] sm:$0xff]  ;;  %v11766_v10 = vpack.c.bf16 %v9560_v55, %v9559_v14 }
0x15e7   :  { %v13786_v44 = vadd.f32 %v13778_v6, %v4669_v17  ;;  %11711 = vmatprep.subr.bf16.mxu0 %v11710_v62 }
0x15e8   :  { %v13783_v50 = vadd.f32 %v13778_v6, %v4668_v39  ;;  %v9523_v39 = vld [vmem:[%s15094_s25 + $0xa0] sm:$0xff] }
0x15ea   :  { %10931 = vmatprep.mubr.msk.f32.mxu0 %vm206_vm1, %v13783_v50  ;;  %10965 = vmatprep.mubr.msk.f32.mxu1 %vm206_vm1, %v13783_v50 }
0x15eb   :  { %10932 = vmatmul.mubr.msk.f32.vlgmr.msra.gmra.mrb[78].mxu0 %vm206_vm1, %v13786_v44  ;;  %10966 = vmatmul.mubr.msk.f32.vlgmr.msra.gmra.mrb[120].mxu1 %vm206_vm1, %v13786_v44 }
0x15ec   :  { %11713 = vmatpush3.bf16.msra.mxu0 %v11710_v62  ;;  %11737 = vmatpush3.bf16.msra.mxu1 %v11734_v37  ;;  %v11742_v62 = vpack.c.bf16 %v9524_v52, %v9523_v39  ;;  %v9525_v37 = vld [vmem:[%s15094_s25 + $0xb0] sm:$0xff]  ;;  %v9480_v39 = vld [vmem:[%s15016_s8 + $0x4] ss:$0 sm:$0xff]  ;;  %v14113_v52 = vld [vmem:[%s15016_s8 + $0x5] ss:$0 sm:$0xff] }
0x15ed   :  { %11715 = vmatprep.subr.bf16.mxu0 %v11714_v16  ;;  %11739 = vmatprep.subr.bf16.mxu1 %v11738_v34 }
0x15f0   :  { %11717 = vmatpush3.bf16.msra.mxu0 %v11714_v16  ;;  %11741 = vmatpush3.bf16.msra.mxu1 %v11738_v34  ;;  %v11746_v16 = vpack.c.bf16 %v9526_v31, %v9525_v37  ;;  %v9547_v34 = vld [vmem:[%s15095_s30 + $0xc0] sm:$0xff] }
0x15f1   :  { %11727 = vmatprep.subr.bf16.mxu0 %v11726_v1  ;;  %11751 = vmatprep.subr.bf16.mxu1 %v11750_v26 }
0x165c   :  { %v4631_v13 = vpop.xlane.xlu1 %4630 }
0x165d   :  { %v4641_v27 = vmul.f32 0.03125, %v4631_v13  ;;  %v4628_v53 = vpop.xlane.xlu0 %4627  ;;  %v9550_v13 = vld [vmem:[%s15095_s30 + $0xd8] sm:$0xff] }
0x165e   :  { %v4640_v43 = vmul.f32 0.03125, %v4628_v53  ;;  %v9586_v53 = vld [vmem:[%s15095_s30 + $0xf8] sm:$0xff] }
0x165f   :  { %v4647_v58 = vadd.f32 1e-06, %v4641_v27  ;;  %v9585_v27 = vld [vmem:[%s15095_s30 + $0xf0] sm:$0xff] }
0x1660   :  { %v4646_v23 = vadd.f32 1e-06, %v4640_v43 }
0x1661   :  { %12097 = vrsqrt.f32 %v4647_v58  ;;  %v11786_v58 = vpack.c.bf16 %v9586_v53, %v9585_v27 }
0x1662   :  { %12099 = vrsqrt.f32 %v4646_v23  ;;  %v9571_v23 = vld [vmem:[%s15093_s28 + $0xe0] sm:$0xff] }
0x1664   :  { %v4637_v33 = vpop.xlane.xlu1 %4636 }
0x1665   :  { %v4643_v30 = vmul.f32 0.03125, %v4637_v33  ;;  %v4634_v5 = vpop.xlane.xlu0 %4633  ;;  %v9572_v33 = vld [vmem:[%s15093_s28 + $0xe8] sm:$0xff] }
0x1666   :  { %v4642_v22 = vmul.f32 0.03125, %v4634_v5  ;;  %v9573_v5 = vld [vmem:[%s15093_s28 + $0xf0] sm:$0xff] }
0x1667   :  { %v4649_v29 = vadd.f32 1e-06, %v4643_v30  ;;  %v11774_v30 = vpack.c.bf16 %v9572_v33, %v9571_v23 }
0x1668   :  { %v4648_v4 = vadd.f32 1e-06, %v4642_v22  ;;  %v9574_v22 = vld [vmem:[%s15093_s28 + $0xf8] sm:$0xff] }
0x1669   :  { %12101 = vrsqrt.f32 %v4649_v29  ;;  %v11778_v29 = vpack.c.bf16 %v9574_v22, %v9573_v5  ;;  %v14140_v5 = vld [vmem:[%s15015_s6 + $0x4] ss:$0 sm:$0xff] }
0x166a   :  { %12103 = vrsqrt.f32 %v4648_v4  ;;  %v9595_v4 = vld [vmem:[%s15094_s25 + $0xe0] sm:$0xff] }
0x166b   :  { %v12098_v19 = vpop.eup %12097 }
0x166c   :  { %v12100_v28 = vpop.eup %12099  ;;  %v4659_v3 = vmul.f32 %v12098_v19, %v13745_v24  ;;  %v9596_v19 = vld [vmem:[%s15094_s25 + $0xe8] sm:$0xff] }
0x166d   :  { %v4658_v0 = vmul.f32 %v12100_v28, %v13748_v20  ;;  %v11790_v28 = vpack.c.bf16 %v9596_v19, %v9595_v4 }
0x166e   :  { %v4671_v49 = vmul.f32 %v13771_v48, %v4659_v3  ;;  %v9597_v3 = vld [vmem:[%s15094_s25 + $0xf0] sm:$0xff] }
0x166f   :  { %v4670_v40 = vmul.f32 %v13771_v48, %v4658_v0  ;;  %v9598_v0 = vld [vmem:[%s15094_s25 + $0xf8] sm:$0xff] }
0x1670   :  { %v13840_v11 = vadd.f32 %v13778_v6, %v4671_v49  ;;  %v11794_v49 = vpack.c.bf16 %v9598_v0, %v9597_v3 }
0x1671   :  { %v13837_v2 = vadd.f32 %v13778_v6, %v4670_v40  ;;  %v14071_v40 = vld [vmem:[%s15014_s10 + $0x4] ss:$0 sm:$0xff] }
0x1673   :  { %v12102_v38 = vpop.eup %12101  ;;  %10934 = vmatprep.mubr.msk.f32.mxu0 %vm206_vm1, %v13837_v2  ;;  %10968 = vmatprep.mubr.msk.f32.mxu1 %vm206_vm1, %v13837_v2 }
0x1674   :  { %v12104_v24 = vpop.eup %12103  ;;  %v4661_v20 = vmul.f32 %v12102_v38, %v13757_v35  ;;  %10935 = vmatmul.mubr.msk.f32.gmra.mrb[80].mxu0 %vm206_vm1, %v13840_v11  ;;  %10969 = vmatmul.mubr.msk.f32.gmra.mrb[122].mxu1 %vm206_vm1, %v13840_v11  ;;  %v9501_v35 = vld [vmem:[%s15093_s28 + $0xb0] sm:$0xff] }
0x1675   :  { %v4660_v47 = vmul.f32 %v12104_v24, %v13760_v21  ;;  %v9502_v21 = vld [vmem:[%s15093_s28 + $0xb8] sm:$0xff] }
0x1676   :  { %v4673_v42 = vmul.f32 %v13771_v48, %v4661_v20 }
0x1677   :  { %v4672_v54 = vmul.f32 %v13771_v48, %v4660_v47  ;;  %v9537_v48 = vld [vmem:[%s15093_s28 + $0xd0] sm:$0xff] }
0x1678   :  { %v13858_v8 = vadd.f32 %v13778_v6, %v4673_v42  ;;  %v11754_v17 = vpack.c.bf16 %v9538_v61, %v9537_v48 }
0x1679   :  { %v13855_v41 = vadd.f32 %v13778_v6, %v4672_v54  ;;  %v11730_v6 = vpack.c.bf16 %v9502_v21, %v9501_v35 }
0x167b   :  { %10937 = vmatprep.mubr.msk.f32.mxu0 %vm206_vm1, %v13855_v41  ;;  %10971 = vmatprep.mubr.msk.f32.mxu1 %vm206_vm1, %v13855_v41 }
0x167c   :  { %10938 = vmatmul.mubr.msk.f32.gmra.mrb[82].mxu0 %vm206_vm1, %v13858_v8  ;;  %10972 = vmatmul.mubr.msk.f32.gmra.mrb[124].mxu1 %vm206_vm1, %v13858_v8 }
0x167d   :  { %10948 = vmatprep.mubr.msk.f32.mxu0 %vm206_vm1, %v13783_v50  ;;  %10999 = vmatprep.mubr.msk.f32.mxu1 %vm206_vm1, %v13783_v50 }
0x1680   :  { %10949 = vmatmul.mubr.msk.f32.vlgmr.msra.gmra.mrb[84].mxu0 %vm206_vm1, %v13786_v44  ;;  %11000 = vmatmul.mubr.msk.f32.vlgmr.msra.gmra.mrb[126].mxu1 %vm206_vm1, %v13786_v44 }
0x1681   :  { %10951 = vmatprep.mubr.msk.f32.mxu0 %vm206_vm1, %v13837_v2  ;;  %11002 = vmatprep.mubr.msk.f32.mxu1 %vm206_vm1, %v13837_v2 }
0x1682   :  { %11729 = vmatpush3.bf16.msra.mxu0 %v11726_v1  ;;  %11753 = vmatpush3.bf16.msra.mxu1 %v11750_v26  ;;  %v11758_v1 = vpack.c.bf16 %v9548_v56, %v9547_v34  ;;  %v9549_v26 = vld [vmem:[%s15095_s30 + $0xd0] sm:$0xff] }
0x1683   :  { %11731 = vmatprep.subr.bf16.mxu0 %v11730_v6  ;;  %11755 = vmatprep.subr.bf16.mxu1 %v11754_v17  ;;  %v11762_v43 = vpack.c.bf16 %v9550_v13, %v9549_v26 }
0x1684   :  { %10952 = vmatmul.mubr.msk.f32.gmra.mrb[86].mxu0 %vm206_vm1, %v13840_v11  ;;  %11003 = vmatmul.mubr.msk.f32.gmra.mrb[128].mxu1 %vm206_vm1, %v13840_v11 }
0x1685   :  { %10954 = vmatprep.mubr.msk.f32.mxu0 %vm206_vm1, %v13855_v41  ;;  %11005 = vmatprep.mubr.msk.f32.mxu1 %vm206_vm1, %v13855_v41 }
0x1686   :  { %11733 = vmatpush3.bf16.msra.mxu0 %v11730_v6  ;;  %11757 = vmatpush3.bf16.msra.mxu1 %v11754_v17 }
0x1687   :  { %11743 = vmatprep.subr.bf16.mxu0 %v11742_v62  ;;  %11767 = vmatprep.subr.bf16.mxu1 %v11766_v10 }
0x1688   :  { %10955 = vmatmul.mubr.msk.f32.gmra.mrb[88].mxu0 %vm206_vm1, %v13858_v8  ;;  %11006 = vmatmul.mubr.msk.f32.gmra.mrb[130].mxu1 %vm206_vm1, %v13858_v8 }
0x1689   :  { %10982 = vmatprep.mubr.msk.f32.mxu0 %vm206_vm1, %v13783_v50  ;;  %11033 = vmatprep.mubr.msk.f32.mxu1 %vm206_vm1, %v13783_v50 }
0x168c   :  { %10983 = vmatmul.mubr.msk.f32.vlgmr.msra.gmra.mrb[90].mxu0 %vm206_vm1, %v13786_v44  ;;  %11034 = vmatmul.mubr.msk.f32.vlgmr.msra.gmra.mrb[132].mxu1 %vm206_vm1, %v13786_v44 }
0x168d   :  { %10985 = vmatprep.mubr.msk.f32.mxu0 %vm206_vm1, %v13837_v2  ;;  %11036 = vmatprep.mubr.msk.f32.mxu1 %vm206_vm1, %v13837_v2 }
0x168e   :  { %11745 = vmatpush3.bf16.msra.mxu0 %v11742_v62  ;;  %11769 = vmatpush3.bf16.msra.mxu1 %v11766_v10 }
0x168f   :  { %11747 = vmatprep.subr.bf16.mxu0 %v11746_v16  ;;  %11771 = vmatprep.subr.bf16.mxu1 %v11770_v25 }
0x1690   :  { %10986 = vmatmul.mubr.msk.f32.gmra.mrb[92].mxu0 %vm206_vm1, %v13840_v11  ;;  %11037 = vmatmul.mubr.msk.f32.gmra.mrb[134].mxu1 %vm206_vm1, %v13840_v11 }
0x1691   :  { %10988 = vmatprep.mubr.msk.f32.mxu0 %vm206_vm1, %v13855_v41  ;;  %11039 = vmatprep.mubr.msk.f32.mxu1 %vm206_vm1, %v13855_v41 }
0x1692   :  { %11749 = vmatpush3.bf16.msra.mxu0 %v11746_v16  ;;  %11773 = vmatpush3.bf16.msra.mxu1 %v11770_v25 }
0x1693   :  { %11759 = vmatprep.subr.bf16.mxu0 %v11758_v1  ;;  %11783 = vmatprep.subr.bf16.mxu1 %v11782_v15 }
0x1694   :  { %10989 = vmatmul.mubr.msk.f32.gmra.mrb[94].mxu0 %vm206_vm1, %v13858_v8  ;;  %11040 = vmatmul.mubr.msk.f32.gmra.mrb[136].mxu1 %vm206_vm1, %v13858_v8 }
0x1695   :  { %11016 = vmatprep.mubr.msk.f32.mxu0 %vm206_vm1, %v13783_v50  ;;  %11067 = vmatprep.mubr.msk.f32.mxu1 %vm206_vm1, %v13783_v50 }
0x1698   :  { %11017 = vmatmul.mubr.msk.f32.vlgmr.msra.gmra.mrb[96].mxu0 %vm206_vm1, %v13786_v44  ;;  %11068 = vmatmul.mubr.msk.f32.vlgmr.msra.gmra.mrb[138].mxu1 %vm206_vm1, %v13786_v44 }
0x1699   :  { %11019 = vmatprep.mubr.msk.f32.mxu0 %vm206_vm1, %v13837_v2  ;;  %11070 = vmatprep.mubr.msk.f32.mxu1 %vm206_vm1, %v13837_v2 }
0x169a   :  { %11761 = vmatpush3.bf16.msra.mxu0 %v11758_v1  ;;  %11785 = vmatpush3.bf16.msra.mxu1 %v11782_v15 }
0x169b   :  { %11763 = vmatprep.subr.bf16.mxu0 %v11762_v43  ;;  %11787 = vmatprep.subr.bf16.mxu1 %v11786_v58 }
0x169c   :  { %11020 = vmatmul.mubr.msk.f32.gmra.mrb[98].mxu0 %vm206_vm1, %v13840_v11  ;;  %11071 = vmatmul.mubr.msk.f32.gmra.mrb[140].mxu1 %vm206_vm1, %v13840_v11 }
0x169d   :  { %11022 = vmatprep.mubr.msk.f32.mxu0 %vm206_vm1, %v13855_v41  ;;  %11073 = vmatprep.mubr.msk.f32.mxu1 %vm206_vm1, %v13855_v41 }
0x169e   :  { %11765 = vmatpush3.bf16.msra.mxu0 %v11762_v43  ;;  %11789 = vmatpush3.bf16.msra.mxu1 %v11786_v58 }
0x169f   :  { %11775 = vmatprep.subr.bf16.mxu0 %v11774_v30  ;;  %11798 = vmatprep.subr.bf16.mxu1 %v15125_v7 }
0x16a0   :  { %11023 = vmatmul.mubr.msk.f32.gmra.mrb[100].mxu0 %vm206_vm1, %v13858_v8  ;;  %11074 = vmatmul.mubr.msk.f32.gmra.mrb[142].mxu1 %vm206_vm1, %v13858_v8 }
0x16a1   :  { %11050 = vmatprep.mubr.msk.f32.mxu0 %vm206_vm1, %v13783_v50  ;;  %11101 = vmatprep.mubr.msk.f32.mxu1 %vm206_vm1, %v13783_v50 }
0x16a4   :  { %11051 = vmatmul.mubr.msk.f32.vlgmr.msra.gmra.mrb[102].mxu0 %vm206_vm1, %v13786_v44  ;;  %11102 = vmatmul.mubr.msk.f32.vlgmr.msra.gmra.mrb[144].mxu1 %vm206_vm1, %v13786_v44 }
0x16a5   :  { %11053 = vmatprep.mubr.msk.f32.mxu0 %vm206_vm1, %v13837_v2  ;;  %11104 = vmatprep.mubr.msk.f32.mxu1 %vm206_vm1, %v13837_v2 }
0x16a6   :  { %11777 = vmatpush3.bf16.msra.mxu0 %v11774_v30 }
0x16a7   :  { %11779 = vmatprep.subr.bf16.mxu0 %v11778_v29 }
0x16a8   :  { %11054 = vmatmul.mubr.msk.f32.gmra.mrb[104].mxu0 %vm206_vm1, %v13840_v11  ;;  %11105 = vmatmul.mubr.msk.f32.gmra.mrb[146].mxu1 %vm206_vm1, %v13840_v11 }
0x16a9   :  { %11056 = vmatprep.mubr.msk.f32.mxu0 %vm206_vm1, %v13855_v41  ;;  %11107 = vmatprep.mubr.msk.f32.mxu1 %vm206_vm1, %v13855_v41 }
0x16aa   :  { %11781 = vmatpush3.bf16.msra.mxu0 %v11778_v29 }
0x16ab   :  { %11791 = vmatprep.subr.bf16.mxu0 %v11790_v28 }
0x16ac   :  { %11057 = vmatmul.mubr.msk.f32.gmra.mrb[106].mxu0 %vm206_vm1, %v13858_v8  ;;  %11108 = vmatmul.mubr.msk.f32.gmra.mrb[148].mxu1 %vm206_vm1, %v13858_v8 }
0x16ad   :  { %11084 = vmatprep.mubr.msk.f32.mxu0 %vm206_vm1, %v13783_v50  ;;  %11133 = vmatprep.mubr.msk.f32.mxu1 %vm12239_vm2, %v15124_v63 }
0x16b0   :  { %11085 = vmatmul.mubr.msk.f32.vlgmr.msra.gmra.mrb[108].mxu0 %vm206_vm1, %v13786_v44 }
0x16b1   :  { %11087 = vmatprep.mubr.msk.f32.mxu0 %vm206_vm1, %v13837_v2  ;;  %11793 = vmatpush3.bf16.msra.mxu0 %v11790_v28 }
0x16b2   :  { %11795 = vmatprep.subr.bf16.mxu0 %v11794_v49 }
0x16b4   :  { %11088 = vmatmul.mubr.msk.f32.gmra.mrb[110].mxu0 %vm206_vm1, %v13840_v11 }
0x16b5   :  { %11090 = vmatprep.mubr.msk.f32.mxu0 %vm206_vm1, %v13855_v41  ;;  %11797 = vmatpush3.bf16.msra.mxu0 %v11794_v49 }
0x16b6   :  { %11802 = vmatprep.subr.bf16.mxu0 %v15125_v7 }
0x16b8   :  { %11091 = vmatmul.mubr.msk.f32.gmra.mrb[112].mxu0 %vm206_vm1, %v13858_v8 }
0x16b9   :  { %11118 = vmatprep.mubr.msk.f32.mxu0 %vm206_vm1, %v13783_v50 }
0x16bc   :  { %11119 = vmatmul.mubr.msk.f32.vlgmr.msra.gmra.mrb[114].mxu0 %vm206_vm1, %v13786_v44 }
0x16bd   :  { %11121 = vmatprep.mubr.msk.f32.mxu0 %vm206_vm1, %v13837_v2 }
0x16be   :  { %v14075_v38 = vpop.f32.mrb[78].mxu0  ;;  %v10967_v24 = vpop.f32.mrb[120].mxu1 }
0x16bf   :  { %v5005_v20 = vadd.f32 %v10967_v24, %v14071_v40  ;;  %v4783_v47 = vpop.f32.mrb[79].mxu0  ;;  %v4999_v42 = vpop.f32.mrb[121].mxu1  ;;  %v14156_v24 = vld [vmem:[%s15015_s6 + $0x5] ss:$0 sm:$0xff] }
0x16c0   :  { %v5000_v50 = vadd.f32 %v14071_v40, %v4999_v42  ;;  %11122 = vmatmul.mubr.msk.f32.gmra.mrb[116].mxu0 %vm206_vm1, %v13840_v11  ;;  %v4784_v49 = vadd.f32 %v14140_v5, %v4783_v47 }
0x16c1   :  { %11124 = vmatprep.mubr.msk.f32.mxu0 %vm206_vm1, %v13855_v41 }
0x16c2   :  { %v11803_v44 = vpack.c.bf16 %v5005_v20, %v5000_v50  ;;  %v14161_v20 = vld [vmem:[%s15015_s6 + $0x6] ss:$0 sm:$0xff] }
0x16c4   :  { %11125 = vmatmul.mubr.msk.f32.gmra.mrb[118].mxu0 %vm206_vm1, %v13858_v8 }
0x16c5   :  { %11804 = vmatpush3.bf16.msra.mxu0 %v11803_v44  ;;  %11148 = vmatprep.mubr.msk.f32.mxu0 %vm12239_vm2, %v15124_v63 }
0x16c6   :  { %11146 = vmatprep.subr.mxu0 %v15124_v63 }
0x1747   :  { %v14088_v2 = vpop.f32.mrb[80].mxu0  ;;  %v10970_v54 = vpop.f32.mrb[122].mxu1 }
0x1748   :  { %v14090_v35 = vpop.f32.mrb[81].mxu0  ;;  %v5009_v21 = vpop.f32.mrb[123].mxu1  ;;  %v14102_v6 = vadd.f32 %v10970_v54, %v14071_v40 }
0x1749   :  { %v5010_v11 = vadd.f32 %v14071_v40, %v5009_v21 }
0x174b   :  { %11147 = vmatpush3.msk.msra.mxu0 %vm1769_vm3, %v5010_v11  ;;  %v4789_v11 = vadd.f32 %v14075_v38, %v14140_v5  ;;  %v14195_v38 = vld [vmem:[%s15014_s10 + $0x5] ss:$0 sm:$0xff] }
0x174c   :  { %11809 = vmatprep.subr.bf16.mxu0 %v15125_v7 }
0x174f   :  { %v14095_v41 = vpop.f32.mrb[82].mxu0  ;;  %v14097_v8 = vpop.f32.mrb[124].mxu1 }
0x1750   :  { %v14099_v48 = vpop.f32.mrb[83].mxu0  ;;  %v5019_v61 = vpop.f32.mrb[125].mxu1 }
0x1751   :  { %v14105_v17 = vadd.f32 %v14071_v40, %v5019_v61 }
0x1753   :  { %v10950_v55 = vpop.f32.mrb[84].mxu0  ;;  %v11001_v62 = vpop.f32.mrb[126].mxu1 }
0x1754   :  { %v4897_v10 = vadd.f32 %v10950_v55, %v9480_v39  ;;  %v5221_v37 = vadd.f32 %v11001_v62, %v14113_v52  ;;  %v4891_v31 = vpop.f32.mrb[85].mxu0  ;;  %v5215_v57 = vpop.f32.mrb[127].mxu1 }
0x1755   :  { %v4892_v46 = vadd.f32 %v9480_v39, %v4891_v31  ;;  %v5216_v16 = vadd.f32 %v14113_v52, %v5215_v57 }
0x1757   :  { %v11799_v25 = vpack.c.bf16 %v4897_v10, %v4892_v46  ;;  %v11806_v34 = vpack.c.bf16 %v5221_v37, %v5216_v16  ;;  %v10953_v56 = vpop.f32.mrb[86].mxu0  ;;  %v11004_v18 = vpop.f32.mrb[128].mxu1  ;;  %v14200_v46 = vld [vmem:[%s15014_s10 + $0x6] ss:$0 sm:$0xff]  ;;  %v4794_v16 = vadd.f32 %v14140_v5, %v14090_v35 }
0x1758   :  { %v14119_v45 = vadd.f32 %v10953_v56, %v9480_v39  ;;  %v14122_v1 = vadd.f32 %v11004_v18, %v14113_v52  ;;  %v4901_v15 = vpop.f32.mrb[87].mxu0  ;;  %v5225_v26 = vpop.f32.mrb[129].mxu1 }
0x1759   :  { %11801 = vmatpush3.bf16.xpose.msk.msra.mxu1 %vm12864_vm5, %v11799_v25  ;;  %v4902_v22 = vadd.f32 %v9480_v39, %v4901_v15  ;;  %v5226_v25 = vadd.f32 %v14113_v52, %v5225_v26 }
0x175a   :  { %15173 = vst [vmem:[#allocation20_spill] sm:$0xff] %v14122_v1  ;;  %11131 = vmatprep.subr.mxu1 %v15124_v63 }
0x175b   :  { %v10956_v13 = vpop.f32.mrb[88].mxu0  ;;  %v11007_v27 = vpop.f32.mrb[130].mxu1 }
0x175c   :  { %v14127_v53 = vadd.f32 %v10956_v13, %v9480_v39  ;;  %v14130_v43 = vadd.f32 %v11007_v27, %v14113_v52  ;;  %v4911_v58 = vpop.f32.mrb[89].mxu0  ;;  %v5235_v23 = vpop.f32.mrb[131].mxu1 }
0x175d   :  { %v14132_v33 = vadd.f32 %v9480_v39, %v4911_v58  ;;  %v14135_v30 = vadd.f32 %v14113_v52, %v5235_v23 }
0x175e   :  { %15174 = vst [vmem:[#allocation22_spill] sm:$0xff] %v14130_v43 }
0x175f   :  { %15175 = vst [vmem:[#allocation9_spill] sm:$0xff] %v14135_v30  ;;  %v10984_v19 = vpop.f32.mrb[90].mxu0  ;;  %v14146_v28 = vpop.f32.mrb[132].mxu1 }
0x1760   :  { %v5107_v3 = vpop.f32.mrb[91].mxu0  ;;  %v14148_v0 = vpop.f32.mrb[133].mxu1 }
0x1761   :  { %11132 = vmatpush3.xpose.msk.msra.mxu1 %vm1626_vm4, %v4902_v22  ;;  %v5108_v35 = vadd.f32 %v14156_v24, %v5107_v3  ;;  %v5113_v3 = vadd.f32 %v10984_v19, %v14156_v24  ;;  %v14259_v19 = vld [vmem:[%s15016_s8 + $0x6] ss:$0 sm:$0xff] }
0x1762   :  { %11805 = vmatprep.subr.bf16.mxu1 %v15125_v7 }
0x1763   :  { %v10987_v42 = vpop.f32.mrb[92].mxu0  ;;  %v11038_v50 = vpop.f32.mrb[134].mxu1 }
0x1764   :  { %v14164_v44 = vadd.f32 %v10987_v42, %v14156_v24  ;;  %v14167_v54 = vadd.f32 %v11038_v50, %v14161_v20  ;;  %v5117_v47 = vpop.f32.mrb[93].mxu0  ;;  %v14169_v21 = vpop.f32.mrb[135].mxu1  ;;  %11134 = vmatmul.mubr.msk.f32.vlgmr.msra.gmra.mrb[150].mxu1 %vm1626_vm4, %v4784_v49 }
0x1765   :  { %11808 = vmatpush3.bf16.xpose.msk.msra.mxu1 %vm12864_vm5, %v11806_v34  ;;  %11136 = vmatprep.mubr.msk.f32.mxu1 %vm12239_vm2, %v15124_v63 }
0x1766   :  { %15176 = vst [vmem:[#allocation19_spill] sm:$0xff] %v14164_v44  ;;  %15177 = vst [vmem:[#allocation15_spill] sm:$0xff] %v14167_v54  ;;  %11161 = vmatprep.subr.mxu1 %v15124_v63 }
0x1767   :  { %v10990_v61 = vpop.f32.mrb[94].mxu0  ;;  %v11041_v39 = vpop.f32.mrb[136].mxu1 }
0x1768   :  { %v14180_v55 = vadd.f32 %v10990_v61, %v14156_v24  ;;  %v14183_v62 = vadd.f32 %v11041_v39, %v14161_v20  ;;  %v5127_v10 = vpop.f32.mrb[95].mxu0  ;;  %v5451_v37 = vpop.f32.mrb[137].mxu1  ;;  %11137 = vmatmul.mubr.msk.f32.gmra.mrb[152].mxu1 %vm1626_vm4, %v4789_v11 }
0x1769   :  { %v14187_v31 = vadd.f32 %v14156_v24, %v5127_v10  ;;  %v14190_v57 = vadd.f32 %v14161_v20, %v5451_v37  ;;  %11139 = vmatprep.mubr.msk.f32.mxu1 %vm12239_vm2, %v15124_v63 }
0x176a   :  { %15178 = vst [vmem:[#allocation13_spill] sm:$0xff] %v14180_v55  ;;  %15179 = vst [vmem:[#allocation17_spill] sm:$0xff] %v14183_v62 }
0x176b   :  { %15180 = vst [vmem:[#allocation11_spill] sm:$0xff] %v14187_v31  ;;  %15181 = vst [vmem:[#allocation25_spill] sm:$0xff] %v14190_v57  ;;  %v11018_v34 = vpop.f32.mrb[96].mxu0  ;;  %v11069_v56 = vpop.f32.mrb[138].mxu1 }
0x176c   :  { %v14208_v18 = vadd.f32 %v11018_v34, %v14195_v38  ;;  %v14211_v15 = vadd.f32 %v11069_v56, %v14200_v46  ;;  %v5323_v13 = vpop.f32.mrb[97].mxu0  ;;  %v5647_v27 = vpop.f32.mrb[139].mxu1  ;;  %11140 = vmatmul.mubr.msk.f32.gmra.mrb[154].mxu1 %vm1626_vm4, %v4794_v16 }
0x176d   :  { %v14215_v58 = vadd.f32 %v14195_v38, %v5323_v13  ;;  %v14218_v23 = vadd.f32 %v14200_v46, %v5647_v27  ;;  %11162 = vmatpush3.xpose.msk.msra.mxu1 %vm1626_vm4, %v5226_v25  ;;  %11163 = vmatprep.mubr.msk.f32.mxu1 %vm12239_vm2, %v15124_v63  ;;  %v14264_v27 = vld [vmem:[%s15016_s8 + $0x7] ss:$0 sm:$0xff] }
0x176e   :  { %11187 = vmatprep.subr.mxu1 %v15124_v63 }
0x176f   :  { %v11021_v22 = vpop.f32.mrb[98].mxu0  ;;  %v11072_v49 = vpop.f32.mrb[140].mxu1 }
0x1770   :  { %v14230_v42 = vadd.f32 %v11021_v22, %v14195_v38  ;;  %v14233_v50 = vadd.f32 %v11072_v49, %v14200_v46  ;;  %v14235_v11 = vpop.f32.mrb[99].mxu0  ;;  %v14237_v61 = vpop.f32.mrb[141].mxu1  ;;  %11164 = vmatmul.mubr.msk.f32.vlgmr.msra.gmra.mrb[156].mxu1 %vm1626_vm4, %v5108_v35  ;;  %v5118_v35 = vadd.f32 %v14156_v24, %v5117_v47 }
0x1771   :  { %11166 = vmatprep.mubr.msk.f32.mxu1 %vm12239_vm2, %v15124_v63 }
0x1772   :  { %15182 = vst [vmem:[#allocation21_spill] sm:$0xff] %v14230_v42  ;;  %15183 = vst [vmem:[#allocation23_spill] sm:$0xff] %v14233_v50 }
0x1773   :  { %v11024_v39 = vpop.f32.mrb[100].mxu0  ;;  %v11075_v10 = vpop.f32.mrb[142].mxu1 }
0x1774   :  { %v14244_v37 = vadd.f32 %v11024_v39, %v14195_v38  ;;  %v14247_v16 = vadd.f32 %v11075_v10, %v14200_v46  ;;  %v5343_v25 = vpop.f32.mrb[101].mxu0  ;;  %v5667_v34 = vpop.f32.mrb[143].mxu1  ;;  %11167 = vmatmul.mubr.msk.f32.gmra.mrb[158].mxu1 %vm1626_vm4, %v5113_v3 }
0x1775   :  { %v14251_v56 = vadd.f32 %v14195_v38, %v5343_v25  ;;  %v14254_v13 = vadd.f32 %v14200_v46, %v5667_v34  ;;  %11169 = vmatprep.mubr.msk.f32.mxu1 %vm12239_vm2, %v15124_v63 }
0x1776   :  { %15184 = vst [vmem:[#allocation26_spill] sm:$0xff] %v14244_v37  ;;  %15185 = vst [vmem:[#allocation28_spill] sm:$0xff] %v14247_v16 }
0x1777   :  { %15186 = vst [vmem:[#allocation27_spill] sm:$0xff] %v14251_v56  ;;  %15187 = vst [vmem:[#allocation31_spill] sm:$0xff] %v14254_v13  ;;  %v11052_v3 = vpop.f32.mrb[102].mxu0  ;;  %v11103_v39 = vpop.f32.mrb[144].mxu1 }
0x1778   :  { %v14274_v10 = vadd.f32 %v11052_v3, %v14259_v19  ;;  %v14277_v25 = vadd.f32 %v11103_v39, %v14264_v27  ;;  %v5539_v34 = vpop.f32.mrb[103].mxu0  ;;  %v5863_v4 = vpop.f32.mrb[145].mxu1  ;;  %11170 = vmatmul.mubr.msk.f32.gmra.mrb[160].mxu1 %vm1626_vm4, %v5118_v35 }
0x1779   :  { %v14281_v24 = vadd.f32 %v14259_v19, %v5539_v34  ;;  %v14284_v47 = vadd.f32 %v14264_v27, %v5863_v4  ;;  %11189 = vmatprep.mubr.msk.f32.mxu1 %vm12239_vm2, %v15124_v63 }
0x177b   :  { %v11055_v49 = vpop.f32.mrb[104].mxu0  ;;  %v11106_v22 = vpop.f32.mrb[146].mxu1 }
0x177c   :  { %v14293_v14 = vadd.f32 %v11055_v49, %v14259_v19  ;;  %v14296_v35 = vadd.f32 %v11106_v22, %v14264_v27  ;;  %v14298_v34 = vpop.f32.mrb[105].mxu0  ;;  %v14300_v4 = vpop.f32.mrb[147].mxu1 }
0x177e   :  { %15188 = vst [vmem:[#allocation29_spill] sm:$0xff] %v14293_v14  ;;  %15189 = vst [vmem:[#allocation30_spill] sm:$0xff] %v14296_v35  ;;  %v14341_v35 = vld [vmem:[%s15014_s10 + $0x7] ss:$0 sm:$0xff] }
0x177f   :  { %v11058_v29 = vpop.f32.mrb[106].mxu0  ;;  %v11109_v26 = vpop.f32.mrb[148].mxu1 }
0x1780   :  { %v14303_v52 = vadd.f32 %v11058_v29, %v14259_v19  ;;  %v14306_v3 = vadd.f32 %v11109_v26, %v14264_v27  ;;  %v5559_v39 = vpop.f32.mrb[107].mxu0  ;;  %v5883_v60 = vpop.f32.mrb[149].mxu1  ;;  %v14325_v26 = vld [vmem:[%s15015_s6 + $0x7] ss:$0 sm:$0xff] }
0x1781   :  { %v14309_v49 = vadd.f32 %v14259_v19, %v5559_v39  ;;  %v14312_v22 = vadd.f32 %v14264_v27, %v5883_v60 }
0x1782   :  { %15190 = vst [vmem:[#allocation3_spill] sm:$0xff] %v14303_v52  ;;  %15191 = vst [vmem:[#allocation5_spill] sm:$0xff] %v14306_v3 }
0x1783   :  { %15192 = vst [vmem:[#allocation4_spill] sm:$0xff] %v14309_v49  ;;  %15193 = vst [vmem:[#allocation6_spill] sm:$0xff] %v14312_v22  ;;  %v14318_v9 = vpop.f32.mrb[108].mxu0 }
0x1784   :  { %v14320_v29 = vpop.f32.mrb[109].mxu0 }
0x1787   :  { %v11089_v39 = vpop.f32.mrb[110].mxu0 }
0x1788   :  { %v14328_v12 = vadd.f32 %v11089_v39, %v14325_v26  ;;  %v14330_v60 = vpop.f32.mrb[111].mxu0 }
0x178a   :  { %15194 = vst [vmem:[#allocation7_spill] sm:$0xff] %v14328_v12 }
0x178b   :  { %v11092_v59 = vpop.f32.mrb[112].mxu0 }
0x178c   :  { %v14333_v32 = vadd.f32 %v11092_v59, %v14325_v26  ;;  %v5775_v36 = vpop.f32.mrb[113].mxu0 }
0x178d   :  { %v14336_v3 = vadd.f32 %v14325_v26, %v5775_v36 }
0x178e   :  { %15195 = vst [vmem:[#allocation8_spill] sm:$0xff] %v14333_v32 }
0x178f   :  { %15196 = vst [vmem:[#allocation32_spill] sm:$0xff] %v14336_v3  ;;  %v11120_v22 = vpop.f32.mrb[114].mxu0 }
0x1790   :  { %v14344_v62 = vadd.f32 %v11120_v22, %v14341_v35  ;;  %v5971_v39 = vpop.f32.mrb[115].mxu0 }
0x1791   :  { %v14347_v12 = vadd.f32 %v14341_v35, %v5971_v39  ;;  %v15233_v51 = vld [vmem:[#allocation7_spill] sm:$0xff] }
0x1793   :  { %v11123_v32 = vpop.f32.mrb[116].mxu0 }
0x1794   :  { %v14352_v36 = vadd.f32 %v11123_v32, %v14341_v35  ;;  %v14354_v3 = vpop.f32.mrb[117].mxu0 }
0x1796   :  { %15197 = vst [vmem:[#allocation33_spill] sm:$0xff] %v14352_v36 }
0x1797   :  { %v11126_v16 = vpop.f32.mrb[118].mxu0 }
0x1798   :  { %v14357_v57 = vadd.f32 %v11126_v16, %v14341_v35  ;;  %v5991_v50 = vpop.f32.mrb[119].mxu0 }
0x1799   :  { %v14360_v22 = vadd.f32 %v14341_v35, %v5991_v50 }
0x179a   :  { %15198 = vst [vmem:[#allocation34_spill] sm:$0xff] %v14357_v57 }
0x179b   :  { %15199 = vst [vmem:[#allocation35_spill] sm:$0xff] %v14360_v22 }
0x1837   :  { %v6084_v13 = vpop.f32.mrb[150].mxu1 }
0x1838   :  { %v11135_v54 = vpop.f32.mrb[151].mxu1  ;;  %v6098_v59 = vsel %vm1725_vm6, %v6084_v13, -inf }
0x1839   :  { %6099 = vmax.xlane.f32.xlu0 %v6098_v59 }
0x183b   :  { %v6089_v32 = vpop.f32.mrb[152].mxu1 }
0x183c   :  { %v11138_v52 = vpop.f32.mrb[153].mxu1  ;;  %v6101_v14 = vsel %vm1725_vm6, %v6089_v32, -inf }
0x183d   :  { %6102 = vmax.xlane.f32.xlu1 %v6101_v14 }
0x183f   :  { %v6094_v49 = vpop.f32.mrb[154].mxu1 }
0x1840   :  { %v11141_v16 = vpop.f32.mrb[155].mxu1  ;;  %v6104_v57 = vsel %vm1732_vm7, %v6094_v49, -inf }
0x1841   :  { %6105 = vmax.xlane.f32.xlu0 %v6104_v57 }
0x1843   :  { %v6309_v50 = vpop.f32.mrb[156].mxu1 }
0x1844   :  { %v11165_v37 = vpop.f32.mrb[157].mxu1  ;;  %v6323_v42 = vsel %vm1725_vm6, %v6309_v50, -inf }
0x1845   :  { %6324 = vmax.xlane.f32.xlu1 %v6323_v42 }
0x1847   :  { %v6314_v39 = vpop.f32.mrb[158].mxu1 }
0x1848   :  { %v11168_v54 = vpop.f32.mrb[159].mxu1  ;;  %v6326_v36 = vsel %vm1725_vm6, %v6314_v39, -inf }
0x1849   :  { %6327 = vmax.xlane.f32.xlu0 %v6326_v36 }
0x184b   :  { %v6319_v59 = vpop.f32.mrb[160].mxu1 }
0x184c   :  { %v11171_v52 = vpop.f32.mrb[161].mxu1  ;;  %v6329_v22 = vsel %vm1732_vm7, %v6319_v59, -inf }
0x184d   :  { %6330 = vmax.xlane.f32.xlu1 %v6329_v22 }
0x18c6   :  { %v6100_v14 = vpop.xlane.xlu0 %6099 }
0x18c7   :  { %v6107_v16 = vsub.f32 %v6084_v13, %v6100_v14 }
0x18c9   :  { %v6110_v56 = vmul.f32 1.442695, %v6107_v16 }
0x18ca   :  { %v6103_v55 = vpop.xlane.xlu1 %6102 }
0x18cb   :  { %12105 = vpow2.f32 %v6110_v56  ;;  %v6108_v57 = vsub.f32 %v6089_v32, %v6103_v55 }
0x18cd   :  { %v6112_v37 = vmul.f32 1.442695, %v6108_v57 }
0x18ce   :  { %v6106_v31 = vpop.xlane.xlu0 %6105 }
0x18cf   :  { %12107 = vpow2.f32 %v6112_v37  ;;  %v6109_v42 = vsub.f32 %v6094_v49, %v6106_v31 }
0x18d1   :  { %v6114_v44 = vmul.f32 1.442695, %v6109_v42 }
0x18d2   :  { %v6325_v54 = vpop.xlane.xlu1 %6324 }
0x18d3   :  { %12109 = vpow2.f32 %v6114_v44  ;;  %v6332_v43 = vsub.f32 %v6309_v50, %v6325_v54 }
0x18d5   :  { %v12106_v36 = vpop.eup %12105  ;;  %v6335_v1 = vmul.f32 1.442695, %v6332_v43 }
0x18d6   :  { %v6328_v52 = vpop.xlane.xlu0 %6327  ;;  %v6116_v30 = vsel %vm1725_vm6, %v12106_v36, 0.0 }
0x18d7   :  { %12111 = vpow2.f32 %v6335_v1  ;;  %v6333_v22 = vsub.f32 %v6314_v39, %v6328_v52  ;;  %6117 = vadd.xlane.f32.xlu0 %v6116_v30 }
0x18d9   :  { %v12108_v13 = vpop.eup %12107  ;;  %v6337_v14 = vmul.f32 1.442695, %v6333_v22 }
0x18da   :  { %v6331_v56 = vpop.xlane.xlu1 %6330  ;;  %v6119_v55 = vsel %vm1725_vm6, %v12108_v13, 0.0 }
0x18db   :  { %12113 = vpow2.f32 %v6337_v14  ;;  %v6334_v32 = vsub.f32 %v6319_v59, %v6331_v56  ;;  %6120 = vadd.xlane.f32.xlu1 %v6119_v55  ;;  %v15200_v14 = vpack.c.bf16 %v14208_v18, %v14215_v58 }
0x18dd   :  { %v12110_v31 = vpop.eup %12109  ;;  %v6339_v49 = vmul.f32 1.442695, %v6334_v32  ;;  %v5334_v32 = vadd.f32 %v14195_v38, %v14235_v11 }
0x18de   :  { %v6122_v44 = vsel %vm1732_vm7, %v12110_v31, 0.0 }
0x18df   :  { %12115 = vpow2.f32 %v6339_v49  ;;  %6123 = vadd.xlane.f32.xlu0 %v6122_v44  ;;  %v15201_v49 = vpack.c.bf16 %v14274_v10, %v14281_v24  ;;  %v5432_v10 = vadd.f32 %v14161_v20, %v14148_v0  ;;  %v15202_v24 = vpack.c.bf16 %v14211_v15, %v14218_v23 }
0x18e0   :  { %v5442_v0 = vadd.f32 %v14161_v20, %v14169_v21 }
0x18e1   :  { %v12112_v43 = vpop.eup %12111 }
0x18e2   :  { %v6341_v50 = vsel %vm1725_vm6, %v12112_v43, 0.0 }
0x18e3   :  { %6342 = vadd.xlane.f32.xlu1 %v6341_v50  ;;  %v5550_v50 = vadd.f32 %v14259_v19, %v14298_v34  ;;  %v5437_v19 = vadd.f32 %v14146_v28, %v14161_v20  ;;  %v5658_v34 = vadd.f32 %v14200_v46, %v14237_v61  ;;  %v14438_v28 = vld [vmem:[%s15017_s11 + $0x28] sm:$0xff] }
0x18e4   :  { %11188 = vmatpush3.msra.mxu1 %v14438_v28 }
0x18e5   :  { %v12114_v1 = vpop.eup %12113  ;;  %11198 = vmatprep.subr.mxu1 %v15124_v63 }
0x18e6   :  { %v6344_v30 = vsel %vm1725_vm6, %v12114_v1, 0.0 }
0x18e7   :  { %6345 = vadd.xlane.f32.xlu0 %v6344_v30 }
0x18e9   :  { %v12116_v39 = vpop.eup %12115 }
0x18ea   :  { %v6347_v16 = vsel %vm1732_vm7, %v12116_v39, 0.0 }
0x18eb   :  { %6348 = vadd.xlane.f32.xlu1 %v6347_v16 }
0x1964   :  { %v6118_v59 = vpop.xlane.xlu0 %6117 }
0x1965   :  { %12117 = vrcp.f32 %v6118_v59 }
0x1968   :  { %v6121_v57 = vpop.xlane.xlu1 %6120 }
0x1969   :  { %12119 = vrcp.f32 %v6121_v57 }
0x196c   :  { %v6124_v37 = vpop.xlane.xlu0 %6123 }
0x196d   :  { %12121 = vrcp.f32 %v6124_v37 }
0x196f   :  { %v12118_v42 = vpop.eup %12117 }
0x1970   :  { %v6128_v54 = vmul.f32 %v12118_v42, %v12106_v36  ;;  %v6343_v52 = vpop.xlane.xlu1 %6342 }
0x1971   :  { %12123 = vrcp.f32 %v6343_v52 }
0x1972   :  { %11149 = vmatmul.mubr.msk.f32.vlgmr.msra.gmra.mrb[120].mxu0 %vm1725_vm6, %v6128_v54 }
0x1973   :  { %v12120_v22 = vpop.eup %12119  ;;  %11811 = vmatpush3.bf16.msra.mxu0 %v15200_v14  ;;  %11151 = vmatprep.mubr.msk.f32.mxu0 %vm12239_vm2, %v15124_v63 }
0x1974   :  { %v6346_v56 = vpop.xlane.xlu0 %6345  ;;  %11176 = vmatprep.subr.mxu0 %v15124_v63  ;;  %v6129_v55 = vmul.f32 %v12120_v22, %v12108_v13 }
0x1975   :  { %12125 = vrcp.f32 %v6346_v56 }
0x1976   :  { %11152 = vmatmul.mubr.msk.f32.gmra.mrb[122].mxu0 %vm1725_vm6, %v6129_v55 }
0x1977   :  { %v12122_v36 = vpop.eup %12121  ;;  %11177 = vmatpush3.msk.msra.mxu0 %vm1769_vm3, %v5334_v32  ;;  %11154 = vmatprep.mubr.msk.f32.mxu0 %vm12239_vm2, %v15124_v63 }
0x1978   :  { %v6349_v18 = vpop.xlane.xlu1 %6348  ;;  %v6130_v58 = vmul.f32 %v12122_v36, %v12110_v31  ;;  %11812 = vmatprep.subr.bf16.mxu0 %v15125_v7 }
0x1979   :  { %12127 = vrcp.f32 %v6349_v18 }
0x197a   :  { %11155 = vmatmul.mubr.msk.f32.gmra.mrb[124].mxu0 %vm1725_vm6, %v6130_v58 }
0x197b   :  { %v12124_v13 = vpop.eup %12123  ;;  %11178 = vmatprep.mubr.msk.f32.mxu0 %vm12239_vm2, %v15124_v63 }
0x197c   :  { %v6353_v38 = vmul.f32 %v12124_v13, %v12112_v43 }
0x197e   :  { %11179 = vmatmul.mubr.msk.f32.vlgmr.msra.gmra.mrb[126].mxu0 %vm1725_vm6, %v6353_v38 }
0x197f   :  { %v12126_v11 = vpop.eup %12125  ;;  %11815 = vmatpush3.bf16.xpose.msk.msra.mxu0 %vm12864_vm5, %v15201_v49  ;;  %11181 = vmatprep.mubr.msk.f32.mxu0 %vm12239_vm2, %v15124_v63 }
0x1980   :  { %v6354_v31 = vmul.f32 %v12126_v11, %v12114_v1  ;;  %11213 = vmatprep.subr.mxu0 %v15124_v63  ;;  %v14445_v1 = vld [vmem:[%s15017_s11 + $0x20] sm:$0xff] }
0x1982   :  { %11182 = vmatmul.mubr.msk.f32.gmra.mrb[128].mxu0 %vm1725_vm6, %v6354_v31 }
0x1983   :  { %v12128_v44 = vpop.eup %12127  ;;  %11184 = vmatprep.mubr.msk.f32.mxu0 %vm12239_vm2, %v15124_v63 }
0x1984   :  { %v6355_v43 = vmul.f32 %v12128_v44, %v12116_v39 }
0x1986   :  { %11185 = vmatmul.mubr.msk.f32.gmra.mrb[130].mxu0 %vm1725_vm6, %v6355_v43 }
0x1987   :  { %11214 = vmatpush3.xpose.msk.msra.mxu0 %vm1626_vm4, %v5550_v50  ;;  %11215 = vmatprep.mubr.msk.f32.mxu0 %vm12239_vm2, %v15124_v63 }
0x1988   :  { %11816 = vmatprep.subr.bf16.mxu0 %v15125_v7 }
0x198a   :  { %11216 = vmatmul.mubr.msk.f32.vlgmr.msra.gmra.mrb[132].mxu0 %vm1626_vm4, %v5432_v10 }
0x198b   :  { %11818 = vmatpush3.bf16.msra.mxu0 %v15202_v24  ;;  %11218 = vmatprep.mubr.msk.f32.mxu0 %vm12239_vm2, %v15124_v63 }
0x198c   :  { %11228 = vmatprep.subr.mxu0 %v15124_v63 }
0x198e   :  { %11219 = vmatmul.mubr.msk.f32.gmra.mrb[134].mxu0 %vm1626_vm4, %v5437_v19 }
0x198f   :  { %11229 = vmatpush3.msk.msra.mxu0 %vm1769_vm3, %v5658_v34  ;;  %11221 = vmatprep.mubr.msk.f32.mxu0 %vm12239_vm2, %v15124_v63 }
0x1990   :  { %11819 = vmatprep.subr.bf16.mxu0 %v15125_v7 }
0x1992   :  { %11222 = vmatmul.mubr.msk.f32.gmra.mrb[136].mxu0 %vm1626_vm4, %v5442_v0 }
0x1993   :  { %11230 = vmatprep.mubr.msk.f32.mxu0 %vm12239_vm2, %v15124_v63 }
0x1a45   :  { %v6209_v46 = vpop.f32.mrb[120].mxu0 }
0x1a46   :  { %v11150_v15 = vpop.f32.mrb[121].mxu0 }
0x1a49   :  { %v6214_v23 = vpop.f32.mrb[122].mxu0 }
0x1a4a   :  { %v11153_v20 = vpop.f32.mrb[123].mxu0 }
0x1a4d   :  { %v6219_v21 = vpop.f32.mrb[124].mxu0 }
0x1a4e   :  { %v11156_v61 = vpop.f32.mrb[125].mxu0 }
0x1a51   :  { %v6434_v30 = vpop.f32.mrb[126].mxu0 }
0x1a52   :  { %v11180_v39 = vpop.f32.mrb[127].mxu0  ;;  %11190 = vmatmul.mubr.msk.f32.vlgmr.msra.gmra.mrb[162].mxu1 %vm1626_vm4, %v6434_v30 }
0x1a53   :  { %11192 = vmatprep.mubr.msk.f32.mxu1 %vm12239_vm2, %v15124_v63  ;;  %11199 = vmatpush3.msra.mxu1 %v14445_v1  ;;  %v15203_v39 = vpack.c.bf16 %v14277_v25, %v14284_v47  ;;  %v5756_v25 = vadd.f32 %v14325_v26, %v14320_v29  ;;  %v15204_v47 = vpack.c.bf16 %v14132_v33, %v14119_v45 }
0x1a54   :  { %11239 = vmatprep.subr.mxu1 %v15124_v63  ;;  %v15205_v45 = vpack.c.bf16 %v14105_v17, %v14102_v6  ;;  %v5025_v33 = vadd.f32 %v14097_v8, %v14071_v40  ;;  %v15206_v40 = vpack.c.bf16 %v14344_v62, %v14347_v12 }
0x1a55   :  { %v6439_v16 = vpop.f32.mrb[128].mxu0 }
0x1a56   :  { %v11183_v59 = vpop.f32.mrb[129].mxu0  ;;  %11193 = vmatmul.mubr.msk.f32.gmra.mrb[164].mxu1 %vm1626_vm4, %v6439_v16 }
0x1a57   :  { %11195 = vmatprep.mubr.msk.f32.mxu1 %vm12239_vm2, %v15124_v63 }
0x1a59   :  { %v6444_v57 = vpop.f32.mrb[130].mxu0 }
0x1a5a   :  { %v11186_v37 = vpop.f32.mrb[131].mxu0  ;;  %11196 = vmatmul.mubr.msk.f32.gmra.mrb[166].mxu1 %vm1626_vm4, %v6444_v57 }
0x1a5b   :  { %11200 = vmatprep.mubr.msk.f32.mxu1 %vm12239_vm2, %v15124_v63  ;;  %v5874_v37 = vadd.f32 %v14264_v27, %v14300_v4  ;;  %v5761_v27 = vadd.f32 %v14318_v9, %v14325_v26  ;;  %v5766_v4 = vadd.f32 %v14325_v26, %v14330_v60  ;;  %v4799_v9 = vadd.f32 %v14088_v2, %v14140_v5 }
0x1a5c   :  { %v4809_v2 = vadd.f32 %v14095_v41, %v14140_v5  ;;  %v5982_v41 = vadd.f32 %v14341_v35, %v14354_v3 }
0x1a5d   :  { %v6712_v42 = vpop.f32.mrb[132].mxu0 }
0x1a5e   :  { %11201 = vmatmul.mubr.msk.f32.vlgmr.msra.gmra.mrb[162].mxu1 %vm1626_vm4, %v6209_v46  ;;  %v11217_v54 = vpop.f32.mrb[133].mxu0  ;;  %v6726_v52 = vsel %vm1725_vm6, %v6712_v42, -inf  ;;  %v14476_v46 = vld [vmem:[%s15017_s11 + $0x30] sm:$0xff] }
0x1a5f   :  { %6727 = vmax.xlane.f32.xlu0 %v6726_v52  ;;  %11203 = vmatprep.mubr.msk.f32.mxu1 %vm12239_vm2, %v15124_v63 }
0x1a60   :  { %11240 = vmatpush3.msra.mxu1 %v14476_v46 }
0x1a61   :  { %v6717_v22 = vpop.f32.mrb[134].mxu0  ;;  %11823 = vmatprep.subr.bf16.mxu1 %v15125_v7 }
0x1a62   :  { %11204 = vmatmul.mubr.msk.f32.gmra.mrb[164].mxu1 %vm1626_vm4, %v6214_v23  ;;  %v11220_v14 = vpop.f32.mrb[135].mxu0  ;;  %v6729_v56 = vsel %vm1725_vm6, %v6717_v22, -inf }
0x1a63   :  { %6730 = vmax.xlane.f32.xlu1 %v6729_v56  ;;  %11206 = vmatprep.mubr.msk.f32.mxu1 %vm12239_vm2, %v15124_v63 }
0x1a65   :  { %v6722_v55 = vpop.f32.mrb[136].mxu0 }
0x1a66   :  { %11207 = vmatmul.mubr.msk.f32.gmra.mrb[166].mxu1 %vm1626_vm4, %v6219_v21  ;;  %v11223_v32 = vpop.f32.mrb[137].mxu0  ;;  %v6732_v36 = vsel %vm1732_vm7, %v6722_v55, -inf }
0x1a67   :  { %6733 = vmax.xlane.f32.xlu0 %v6732_v36  ;;  %11241 = vmatprep.mubr.msk.f32.mxu1 %vm12239_vm2, %v15124_v63 }
0x1aec   :  { %v6728_v18 = vpop.xlane.xlu0 %6727 }
0x1aed   :  { %v6735_v58 = vsub.f32 %v6712_v42, %v6728_v18 }
0x1aef   :  { %v6738_v13 = vmul.f32 1.442695, %v6735_v58 }
0x1af0   :  { %v6731_v38 = vpop.xlane.xlu1 %6730 }
0x1af1   :  { %12129 = vpow2.f32 %v6738_v13  ;;  %v6736_v11 = vsub.f32 %v6717_v22, %v6731_v38 }
0x1af3   :  { %v6740_v49 = vmul.f32 1.442695, %v6736_v11 }
0x1af4   :  { %v6734_v31 = vpop.xlane.xlu0 %6733 }
0x1af5   :  { %12131 = vpow2.f32 %v6740_v49  ;;  %v6737_v44 = vsub.f32 %v6722_v55, %v6734_v31 }
0x1af7   :  { %v6742_v43 = vmul.f32 1.442695, %v6737_v44 }
0x1af9   :  { %12133 = vpow2.f32 %v6742_v43 }
0x1afb   :  { %v12130_v50 = vpop.eup %12129 }
0x1afc   :  { %v6744_v10 = vsel %vm1725_vm6, %v12130_v50, 0.0 }
0x1afd   :  { %6745 = vadd.xlane.f32.xlu1 %v6744_v10 }
0x1aff   :  { %v12132_v24 = vpop.eup %12131 }
0x1b00   :  { %v6747_v19 = vsel %vm1725_vm6, %v12132_v24, 0.0 }
0x1b01   :  { %6748 = vadd.xlane.f32.xlu0 %v6747_v19 }
0x1b03   :  { %v12134_v34 = vpop.eup %12133 }
0x1b04   :  { %v6750_v0 = vsel %vm1732_vm7, %v12134_v34, 0.0 }
0x1b05   :  { %6751 = vadd.xlane.f32.xlu1 %v6750_v0 }
0x1b8a   :  { %v6746_v15 = vpop.xlane.xlu1 %6745 }
0x1b8b   :  { %12135 = vrcp.f32 %v6746_v15 }
0x1b8e   :  { %v6749_v23 = vpop.xlane.xlu0 %6748 }
0x1b8f   :  { %12137 = vrcp.f32 %v6749_v23 }
0x1b92   :  { %v6752_v20 = vpop.xlane.xlu1 %6751 }
0x1b93   :  { %12139 = vrcp.f32 %v6752_v20 }
0x1b95   :  { %v12136_v21 = vpop.eup %12135 }
0x1b96   :  { %v6756_v61 = vmul.f32 %v12136_v21, %v12130_v50 }
0x1b98   :  { %11231 = vmatmul.mubr.msk.f32.vlgmr.msra.gmra.mrb[138].mxu0 %vm1725_vm6, %v6756_v61 }
0x1b99   :  { %v12138_v30 = vpop.eup %12137  ;;  %11822 = vmatpush3.bf16.xpose.msk.msra.mxu0 %vm12864_vm5, %v15203_v39  ;;  %11233 = vmatprep.mubr.msk.f32.mxu0 %vm12239_vm2, %v15124_v63 }
0x1b9a   :  { %v6757_v16 = vmul.f32 %v12138_v30, %v12132_v24  ;;  %11254 = vmatprep.subr.mxu0 %v15124_v63 }
0x1b9c   :  { %11234 = vmatmul.mubr.msk.f32.gmra.mrb[140].mxu0 %vm1725_vm6, %v6757_v16 }
0x1b9d   :  { %v12140_v59 = vpop.eup %12139  ;;  %11236 = vmatprep.mubr.msk.f32.mxu0 %vm12239_vm2, %v15124_v63 }
0x1b9e   :  { %v6758_v57 = vmul.f32 %v12140_v59, %v12134_v34  ;;  %v14584_v59 = vld [vmem:[%s15017_s11 + $0x38] sm:$0xff] }
0x1ba0   :  { %11237 = vmatmul.mubr.msk.f32.gmra.mrb[142].mxu0 %vm1725_vm6, %v6758_v57 }
0x1ba1   :  { %11255 = vmatpush3.xpose.msk.msra.mxu0 %vm1626_vm4, %v5874_v37  ;;  %11256 = vmatprep.mubr.msk.f32.mxu0 %vm12239_vm2, %v15124_v63 }
0x1ba2   :  { %11826 = vmatprep.subr.bf16.mxu0 %v15125_v7 }
0x1ba4   :  { %11257 = vmatmul.mubr.msk.f32.vlgmr.msra.gmra.mrb[144].mxu0 %vm1626_vm4, %v5756_v25 }
0x1ba5   :  { %11829 = vmatpush3.bf16.xpose.msk.msra.mxu0 %vm12864_vm5, %v15204_v47  ;;  %11259 = vmatprep.mubr.msk.f32.mxu0 %vm12239_vm2, %v15124_v63 }
0x1ba6   :  { %11295 = vmatprep.subr.mxu0 %v15124_v63 }
0x1ba8   :  { %11260 = vmatmul.mubr.msk.f32.gmra.mrb[146].mxu0 %vm1626_vm4, %v5761_v27 }
0x1ba9   :  { %11262 = vmatprep.mubr.msk.f32.mxu0 %vm12239_vm2, %v15124_v63 }
0x1bac   :  { %11263 = vmatmul.mubr.msk.f32.gmra.mrb[148].mxu0 %vm1626_vm4, %v5766_v4 }
0x1bad   :  { %11296 = vmatpush3.xpose.msk.msra.mxu0 %vm1626_vm4, %v14127_v53  ;;  %11297 = vmatprep.mubr.msk.f32.mxu0 %vm12239_vm2, %v15124_v63  ;;  %v4804_v53 = vadd.f32 %v14140_v5, %v14099_v48 }
0x1bae   :  { %11830 = vmatprep.subr.bf16.mxu0 %v15125_v7 }
0x1bb0   :  { %11298 = vmatmul.mubr.msk.f32.vlgmr.msra.gmra.mrb[150].mxu0 %vm1626_vm4, %v4799_v9  ;;  %v15207_v9 = vld [vmem:[#allocation9_spill] sm:$0xff] }
0x1bb1   :  { %11832 = vmatpush3.bf16.msra.mxu0 %v15205_v45  ;;  %11300 = vmatprep.mubr.msk.f32.mxu0 %vm12239_vm2, %v15124_v63  ;;  %v15208_v45 = vld [vmem:[#allocation20_spill] sm:$0xff] }
0x1bb2   :  { %11310 = vmatprep.subr.mxu0 %v15124_v63 }
0x1bb4   :  { %11301 = vmatmul.mubr.msk.f32.gmra.mrb[152].mxu0 %vm1626_vm4, %v4804_v53  ;;  %v15209_v53 = vpack.c.bf16 %v15207_v9, %v15208_v45 }
0x1bb5   :  { %11311 = vmatpush3.msk.msra.mxu0 %vm1769_vm3, %v5025_v33  ;;  %11303 = vmatprep.mubr.msk.f32.mxu0 %vm12239_vm2, %v15124_v63 }
0x1bb6   :  { %11837 = vmatprep.subr.bf16.mxu0 %v15125_v7 }
0x1bb8   :  { %11304 = vmatmul.mubr.msk.f32.gmra.mrb[154].mxu0 %vm1626_vm4, %v4809_v2 }
0x1bb9   :  { %11312 = vmatprep.mubr.msk.f32.mxu0 %vm12239_vm2, %v15124_v63 }
0x1c6b   :  { %v6837_v48 = vpop.f32.mrb[138].mxu0 }
0x1c6c   :  { %v11232_v6 = vpop.f32.mrb[139].mxu0  ;;  %11242 = vmatmul.mubr.msk.f32.vlgmr.msra.gmra.mrb[162].mxu1 %vm1626_vm4, %v6837_v48 }
0x1c6d   :  { %11825 = vmatpush3.bf16.msra.mxu1 %v15206_v40  ;;  %11244 = vmatprep.mubr.msk.f32.mxu1 %vm12239_vm2, %v15124_v63  ;;  %v15210_v40 = vld [vmem:[#allocation22_spill] sm:$0xff] }
0x1c6e   :  { %11269 = vmatprep.subr.mxu1 %v15124_v63 }
0x1c6f   :  { %v6842_v8 = vpop.f32.mrb[140].mxu0 }
0x1c70   :  { %v11235_v17 = vpop.f32.mrb[141].mxu0  ;;  %11245 = vmatmul.mubr.msk.f32.gmra.mrb[164].mxu1 %vm1626_vm4, %v6842_v8  ;;  %v15212_v8 = vld [vmem:[#allocation11_spill] sm:$0xff] }
0x1c71   :  { %11270 = vmatpush3.msk.msra.mxu1 %vm1769_vm3, %v5982_v41  ;;  %11247 = vmatprep.mubr.msk.f32.mxu1 %vm12239_vm2, %v15124_v63  ;;  %v15211_v41 = vld [vmem:[#allocation19_spill] sm:$0xff]  ;;  %v15213_v17 = vld [vmem:[#allocation13_spill] sm:$0xff] }
0x1c72   :  { %11280 = vmatprep.subr.mxu1 %v15124_v63 }
0x1c73   :  { %v6847_v12 = vpop.f32.mrb[142].mxu0 }
0x1c74   :  { %v11238_v5 = vpop.f32.mrb[143].mxu0  ;;  %11248 = vmatmul.mubr.msk.f32.gmra.mrb[166].mxu1 %vm1626_vm4, %v6847_v12 }
0x1c75   :  { %11271 = vmatprep.mubr.msk.f32.mxu1 %vm12239_vm2, %v15124_v63 }
0x1c77   :  { %v7029_v62 = vpop.f32.mrb[144].mxu0 }
0x1c78   :  { %v11258_v3 = vpop.f32.mrb[145].mxu0  ;;  %v7043_v35 = vsel %vm1725_vm6, %v7029_v62, -inf }
0x1c79   :  { %7044 = vmax.xlane.f32.xlu0 %v7043_v35 }
0x1c7b   :  { %v7034_v29 = vpop.f32.mrb[146].mxu0 }
0x1c7c   :  { %v11261_v26 = vpop.f32.mrb[147].mxu0  ;;  %v7046_v60 = vsel %vm1725_vm6, %v7034_v29, -inf }
0x1c7d   :  { %7047 = vmax.xlane.f32.xlu1 %v7046_v60 }
0x1c7f   :  { %v7039_v42 = vpop.f32.mrb[148].mxu0 }
0x1c80   :  { %v11264_v54 = vpop.f32.mrb[149].mxu0  ;;  %v7049_v52 = vsel %vm1732_vm7, %v7039_v42, -inf }
0x1c81   :  { %7050 = vmax.xlane.f32.xlu0 %v7049_v52 }
0x1c83   :  { %v14566_v22 = vpop.f32.mrb[150].mxu0 }
0x1c84   :  { %v11299_v14 = vpop.f32.mrb[151].mxu0  ;;  %v7363_v15 = vsel %vm1725_vm6, %v14566_v22, -inf }
0x1c87   :  { %v14568_v56 = vpop.f32.mrb[152].mxu0 }
0x1c88   :  { %v11302_v55 = vpop.f32.mrb[153].mxu0  ;;  %v7366_v23 = vsel %vm1725_vm6, %v14568_v56, -inf }
0x1c8b   :  { %v14570_v32 = vpop.f32.mrb[154].mxu0 }
0x1c8c   :  { %v11305_v36 = vpop.f32.mrb[155].mxu0  ;;  %v7369_v20 = vsel %vm1732_vm7, %v14570_v32, -inf }
0x1d06   :  { %v7045_v18 = vpop.xlane.xlu0 %7044 }
0x1d07   :  { %v7052_v58 = vsub.f32 %v7029_v62, %v7045_v18 }
0x1d09   :  { %v7055_v13 = vmul.f32 1.442695, %v7052_v58 }
0x1d0a   :  { %v7048_v38 = vpop.xlane.xlu1 %7047 }
0x1d0b   :  { %12141 = vpow2.f32 %v7055_v13  ;;  %v7053_v11 = vsub.f32 %v7034_v29, %v7048_v38 }
0x1d0d   :  { %v7057_v49 = vmul.f32 1.442695, %v7053_v11 }
0x1d0e   :  { %v7051_v31 = vpop.xlane.xlu0 %7050 }
0x1d0f   :  { %12143 = vpow2.f32 %v7057_v49  ;;  %v7054_v44 = vsub.f32 %v7039_v42, %v7051_v31 }
0x1d11   :  { %v7059_v43 = vmul.f32 1.442695, %v7054_v44 }
0x1d13   :  { %12145 = vpow2.f32 %v7059_v43 }
0x1d15   :  { %v12142_v50 = vpop.eup %12141 }
0x1d16   :  { %v7061_v10 = vsel %vm1725_vm6, %v12142_v50, 0.0 }
0x1d17   :  { %7062 = vadd.xlane.f32.xlu1 %v7061_v10 }
0x1d19   :  { %v12144_v24 = vpop.eup %12143 }
0x1d1a   :  { %v7064_v19 = vsel %vm1725_vm6, %v12144_v24, 0.0 }
0x1d1b   :  { %7065 = vadd.xlane.f32.xlu0 %v7064_v19 }
0x1d1d   :  { %v12146_v34 = vpop.eup %12145 }
0x1d1e   :  { %v7067_v0 = vsel %vm1732_vm7, %v12146_v34, 0.0 }
0x1d1f   :  { %7068 = vadd.xlane.f32.xlu1 %v7067_v0  ;;  %7364 = vmax.xlane.f32.xlu0 %v7363_v15 }
0x1d23   :  { %7367 = vmax.xlane.f32.xlu1 %v7366_v23  ;;  %7370 = vmax.xlane.f32.xlu0 %v7369_v20 }
0x1da4   :  { %v7063_v21 = vpop.xlane.xlu1 %7062 }
0x1da5   :  { %12147 = vrcp.f32 %v7063_v21 }
0x1da8   :  { %v7066_v61 = vpop.xlane.xlu0 %7065 }
0x1da9   :  { %12149 = vrcp.f32 %v7066_v61 }
0x1dac   :  { %v7069_v30 = vpop.xlane.xlu1 %7068  ;;  %v7365_v12 = vpop.xlane.xlu0 %7364 }
0x1dad   :  { %12151 = vrcp.f32 %v7069_v30  ;;  %v7372_v5 = vsub.f32 %v14566_v22, %v7365_v12 }
0x1daf   :  { %v12148_v39 = vpop.eup %12147  ;;  %v7375_v26 = vmul.f32 1.442695, %v7372_v5 }
0x1db0   :  { %v7073_v16 = vmul.f32 %v12148_v39, %v12142_v50  ;;  %v7368_v62 = vpop.xlane.xlu1 %7367 }
0x1db1   :  { %v7373_v29 = vsub.f32 %v14568_v56, %v7368_v62  ;;  %12153 = vpow2.f32 %v7375_v26  ;;  %v15219_v26 = vld [vmem:[#allocation29_spill] sm:$0xff] }
0x1db2   :  { %11272 = vmatmul.mubr.msk.f32.vlgmr.msra.gmra.mrb[168].mxu1 %vm1725_vm6, %v7073_v16 }
0x1db3   :  { %v12150_v57 = vpop.eup %12149  ;;  %11274 = vmatprep.mubr.msk.f32.mxu1 %vm12239_vm2, %v15124_v63  ;;  %11281 = vmatpush3.msra.mxu1 %v14584_v59  ;;  %v7377_v52 = vmul.f32 1.442695, %v7373_v29  ;;  %v15218_v29 = vld [vmem:[#allocation4_spill] sm:$0xff] }
0x1db4   :  { %v7074_v37 = vmul.f32 %v12150_v57, %v12144_v24  ;;  %11833 = vmatprep.subr.bf16.mxu1 %v15125_v7 }
0x1db5   :  { %12155 = vpow2.f32 %v7377_v52 }
0x1db6   :  { %11275 = vmatmul.mubr.msk.f32.gmra.mrb[170].mxu1 %vm1725_vm6, %v7074_v37 }
0x1db7   :  { %v12152_v25 = vpop.eup %12151  ;;  %11277 = vmatprep.mubr.msk.f32.mxu1 %vm12239_vm2, %v15124_v63 }
0x1db8   :  { %v7075_v47 = vmul.f32 %v12152_v25, %v12146_v34 }
0x1dba   :  { %11278 = vmatmul.mubr.msk.f32.gmra.mrb[172].mxu1 %vm1725_vm6, %v7075_v47 }
0x1dbb   :  { %11282 = vmatprep.mubr.msk.f32.mxu1 %vm12239_vm2, %v15124_v63  ;;  %v12154_v38 = vpop.eup %12153 }
0x1dbc   :  { %v7381_v43 = vsel %vm1725_vm6, %v12154_v38, 0.0 }
0x1dbf   :  { %v12156_v49 = vpop.eup %12155 }
0x1dc0   :  { %v7384_v10 = vsel %vm1725_vm6, %v12156_v49, 0.0 }
0x1e85   :  { %v7154_v27 = vpop.f32.mrb[168].mxu1 }
0x1e86   :  { %v11273_v4 = vpop.f32.mrb[169].mxu1  ;;  %11283 = vmatmul.mubr.msk.f32.vlgmr.msra.gmra.mrb[162].mxu1 %vm1626_vm4, %v7154_v27 }
0x1e87   :  { %11836 = vmatpush3.bf16.xpose.msk.msra.mxu1 %vm12864_vm5, %v15209_v53  ;;  %11285 = vmatprep.mubr.msk.f32.mxu1 %vm12239_vm2, %v15124_v63 }
0x1e88   :  { %11325 = vmatprep.subr.mxu1 %v15124_v63 }
0x1e89   :  { %v7159_v33 = vpop.f32.mrb[170].mxu1 }
0x1e8a   :  { %v11276_v2 = vpop.f32.mrb[171].mxu1  ;;  %11286 = vmatmul.mubr.msk.f32.gmra.mrb[164].mxu1 %vm1626_vm4, %v7159_v33  ;;  %v15214_v33 = vld [vmem:[#allocation27_spill] sm:$0xff] }
0x1e8b   :  { %11288 = vmatprep.mubr.msk.f32.mxu1 %vm12239_vm2, %v15124_v63  ;;  %v15215_v2 = vld [vmem:[#allocation21_spill] sm:$0xff] }
0x1e8d   :  { %v7164_v48 = vpop.f32.mrb[172].mxu1 }
0x1e8e   :  { %v11279_v6 = vpop.f32.mrb[173].mxu1  ;;  %11289 = vmatmul.mubr.msk.f32.gmra.mrb[166].mxu1 %vm1626_vm4, %v7164_v48  ;;  %v15216_v48 = vpack.c.bf16 %v15214_v33, %v15215_v2 }
0x1e8f   :  { %11326 = vmatpush3.xpose.msk.msra.mxu1 %vm1626_vm4, %v15210_v40  ;;  %11327 = vmatprep.mubr.msk.f32.mxu1 %vm12239_vm2, %v15124_v63 }
0x1e90   :  { %11351 = vmatprep.subr.mxu1 %v15124_v63 }
0x1e92   :  { %11328 = vmatmul.mubr.msk.f32.vlgmr.msra.gmra.mrb[174].mxu1 %vm1626_vm4, %v15211_v41 }
0x1e93   :  { %11330 = vmatprep.mubr.msk.f32.mxu1 %vm12239_vm2, %v15124_v63  ;;  %11352 = vmatpush3.msra.mxu1 %v14438_v28  ;;  %v7371_v28 = vpop.xlane.xlu0 %7370 }
0x1e94   :  { %11362 = vmatprep.subr.mxu1 %v15124_v63  ;;  %v7374_v60 = vsub.f32 %v14570_v32, %v7371_v28 }
0x1e96   :  { %11331 = vmatmul.mubr.msk.f32.gmra.mrb[176].mxu1 %vm1626_vm4, %v15212_v8  ;;  %v7379_v14 = vmul.f32 1.442695, %v7374_v60  ;;  %v15217_v8 = vld [vmem:[#allocation26_spill] sm:$0xff]  ;;  %v15220_v60 = vpack.c.bf16 %v15218_v29, %v15219_v26  ;;  %v15232_v26 = vld [vmem:[#allocation5_spill] sm:$0xff] }
0x1e97   :  { %11333 = vmatprep.mubr.msk.f32.mxu1 %vm12239_vm2, %v15124_v63 }
0x1e98   :  { %12157 = vpow2.f32 %v7379_v14  ;;  %v15221_v14 = vld [vmem:[#allocation3_spill] sm:$0xff] }
0x1e9a   :  { %11334 = vmatmul.mubr.msk.f32.gmra.mrb[178].mxu1 %vm1626_vm4, %v15213_v17 }
0x1e9b   :  { %11353 = vmatprep.mubr.msk.f32.mxu1 %vm12239_vm2, %v15124_v63 }
0x1ea2   :  { %v12158_v50 = vpop.eup %12157 }
0x1ea3   :  { %v7387_v24 = vsel %vm1732_vm7, %v12158_v50, 0.0 }
0x1f59   :  { %v7245_v3 = vpop.f32.mrb[162].mxu1 }
0x1f5a   :  { %7262 = vst.msk [vmem:[#allocation2] sm:$0xff] %vm206_vm1, %v7245_v3  ;;  %v11284_v35 = vpop.f32.mrb[163].mxu1 }
0x1f5d   :  { %v7250_v42 = vpop.f32.mrb[164].mxu1 }
0x1f5e   :  { %7263 = vst.msk [vmem:[#allocation2 + $0x8] sm:$0xff] %vm206_vm1, %v7250_v42  ;;  %v11287_v54 = vpop.f32.mrb[165].mxu1 }
0x1f61   :  { %v7255_v55 = vpop.f32.mrb[166].mxu1 }
0x1f62   :  { %7264 = vst.msk [vmem:[#allocation2 + $0x10] sm:$0x1] %vm2893_vm8, %v7255_v55  ;;  %v11290_v22 = vpop.f32.mrb[167].mxu1  ;;  %v15222_v55 = vld [vmem:[#allocation15_spill] sm:$0xff] }
0x1f63   :  { %v15223_v22 = vld [vmem:[#allocation31_spill] sm:$0xff] }
0x1f65   :  { %v7573_v36 = vpop.f32.mrb[174].mxu1 }
0x1f66   :  { %v11329_v18 = vpop.f32.mrb[175].mxu1  ;;  %v7587_v56 = vsel %vm1725_vm6, %v7573_v36, -inf }
0x1f67   :  { %7588 = vmax.xlane.f32.xlu1 %v7587_v56  ;;  %v15226_v56 = vld [vmem:[#allocation25_spill] sm:$0xff] }
0x1f69   :  { %v7578_v58 = vpop.f32.mrb[176].mxu1 }
0x1f6a   :  { %v11332_v32 = vpop.f32.mrb[177].mxu1  ;;  %v7590_v13 = vsel %vm1725_vm6, %v7578_v58, -inf }
0x1f6b   :  { %7591 = vmax.xlane.f32.xlu0 %v7590_v13  ;;  %v15228_v32 = vld [vmem:[#allocation17_spill] sm:$0xff] }
0x1f6d   :  { %v7583_v11 = vpop.f32.mrb[178].mxu1 }
0x1f6e   :  { %v11335_v31 = vpop.f32.mrb[179].mxu1  ;;  %v7593_v44 = vsel %vm1732_vm7, %v7583_v11, -inf }
0x1f6f   :  { %7594 = vmax.xlane.f32.xlu1 %v7593_v44  ;;  %7382 = vadd.xlane.f32.xlu0 %v7381_v43 }
0x1f73   :  { %7385 = vadd.xlane.f32.xlu1 %v7384_v10  ;;  %7388 = vadd.xlane.f32.xlu0 %v7387_v24 }
0x1ff4   :  { %v7589_v19 = vpop.xlane.xlu1 %7588 }
0x1ff5   :  { %v7596_v34 = vsub.f32 %v7573_v36, %v7589_v19  ;;  %v15224_v36 = vld [vmem:[#allocation23_spill] sm:$0xff] }
0x1ff6   :  { %v15225_v18 = vpack.c.bf16 %v15223_v22, %v15224_v36 }
0x1ff7   :  { %v7599_v0 = vmul.f32 1.442695, %v7596_v34 }
0x1ff8   :  { %v7592_v15 = vpop.xlane.xlu0 %7591 }
0x1ff9   :  { %12159 = vpow2.f32 %v7599_v0  ;;  %v7597_v23 = vsub.f32 %v7578_v58, %v7592_v15  ;;  %v15227_v58 = vld [vmem:[#allocation28_spill] sm:$0xff] }
0x1ffb   :  { %v7601_v20 = vmul.f32 1.442695, %v7597_v23 }
0x1ffc   :  { %v7595_v21 = vpop.xlane.xlu1 %7594  ;;  %v7383_v61 = vpop.xlane.xlu0 %7382 }
0x1ffd   :  { %12161 = vpow2.f32 %v7601_v20  ;;  %v7598_v30 = vsub.f32 %v7583_v11, %v7595_v21 }
0x1ffe   :  { %12163 = vrcp.f32 %v7383_v61 }
0x1fff   :  { %v7603_v39 = vmul.f32 1.442695, %v7598_v30 }
0x2000   :  { %v7386_v16 = vpop.xlane.xlu1 %7385  ;;  %v7389_v57 = vpop.xlane.xlu0 %7388 }
0x2001   :  { %12165 = vpow2.f32 %v7603_v39 }
0x2002   :  { %12167 = vrcp.f32 %v7386_v16 }
0x2003   :  { %v12160_v37 = vpop.eup %12159  ;;  %12169 = vrcp.f32 %v7389_v57 }
0x2004   :  { %v7605_v25 = vsel %vm1725_vm6, %v12160_v37, 0.0 }
0x2005   :  { %7606 = vadd.xlane.f32.xlu1 %v7605_v25 }
0x2007   :  { %v12162_v47 = vpop.eup %12161 }
0x2008   :  { %v12164_v27 = vpop.eup %12163  ;;  %v7608_v4 = vsel %vm1725_vm6, %v12162_v47, 0.0 }
0x2009   :  { %v7393_v9 = vmul.f32 %v12164_v27, %v12154_v38  ;;  %7609 = vadd.xlane.f32.xlu0 %v7608_v4 }
0x200b   :  { %v12166_v45 = vpop.eup %12165  ;;  %11313 = vmatmul.mubr.msk.f32.vlgmr.msra.gmra.mrb[156].mxu0 %vm1725_vm6, %v7393_v9 }
0x200c   :  { %v12168_v53 = vpop.eup %12167  ;;  %11839 = vmatpush3.bf16.msra.mxu0 %v15216_v48  ;;  %v7611_v6 = vsel %vm1732_vm7, %v12166_v45, 0.0  ;;  %11315 = vmatprep.mubr.msk.f32.mxu0 %vm12239_vm2, %v15124_v63 }
0x200d   :  { %7612 = vadd.xlane.f32.xlu1 %v7611_v6  ;;  %11340 = vmatprep.subr.mxu0 %v15124_v63  ;;  %v7394_v40 = vmul.f32 %v12168_v53, %v12156_v49  ;;  %v12170_v41 = vpop.eup %12169 }
0x200e   :  { %v7395_v17 = vmul.f32 %v12170_v41, %v12158_v50 }
0x200f   :  { %11316 = vmatmul.mubr.msk.f32.gmra.mrb[158].mxu0 %vm1725_vm6, %v7394_v40 }
0x2010   :  { %11341 = vmatpush3.msk.msra.mxu0 %vm1769_vm3, %v15217_v8  ;;  %11318 = vmatprep.mubr.msk.f32.mxu0 %vm12239_vm2, %v15124_v63 }
0x2011   :  { %11840 = vmatprep.subr.bf16.mxu0 %v15125_v7 }
0x2013   :  { %11319 = vmatmul.mubr.msk.f32.gmra.mrb[160].mxu0 %vm1725_vm6, %v7395_v17 }
0x2014   :  { %11342 = vmatprep.mubr.msk.f32.mxu0 %vm12239_vm2, %v15124_v63 }
0x2092   :  { %v7607_v12 = vpop.xlane.xlu1 %7606 }
0x2093   :  { %12171 = vrcp.f32 %v7607_v12 }
0x2096   :  { %v7610_v5 = vpop.xlane.xlu0 %7609 }
0x2097   :  { %12173 = vrcp.f32 %v7610_v5  ;;  %v15229_v5 = vld [vmem:[#allocation6_spill] sm:$0xff] }
0x209a   :  { %v7613_v62 = vpop.xlane.xlu1 %7612 }
0x209b   :  { %12175 = vrcp.f32 %v7613_v62  ;;  %v15230_v62 = vld [vmem:[#allocation30_spill] sm:$0xff] }
0x209d   :  { %v12172_v3 = vpop.eup %12171 }
0x209e   :  { %v7617_v28 = vmul.f32 %v12172_v3, %v12160_v37  ;;  %v15231_v3 = vpack.c.bf16 %v15229_v5, %v15230_v62 }
0x20a0   :  { %11343 = vmatmul.mubr.msk.f32.vlgmr.msra.gmra.mrb[162].mxu0 %vm1725_vm6, %v7617_v28 }
0x20a1   :  { %v12174_v35 = vpop.eup %12173  ;;  %11843 = vmatpush3.bf16.xpose.msk.msra.mxu0 %vm12864_vm5, %v15220_v60  ;;  %11345 = vmatprep.mubr.msk.f32.mxu0 %vm12239_vm2, %v15124_v63  ;;  %v15234_v60 = vld [vmem:[#allocation32_spill] sm:$0xff] }
0x20a2   :  { %v7618_v42 = vmul.f32 %v12174_v35, %v12162_v47  ;;  %11377 = vmatprep.subr.mxu0 %v15124_v63 }
0x20a4   :  { %11346 = vmatmul.mubr.msk.f32.gmra.mrb[164].mxu0 %vm1725_vm6, %v7618_v42  ;;  %v15235_v42 = vld [vmem:[#allocation8_spill] sm:$0xff] }
0x20a5   :  { %v12176_v54 = vpop.eup %12175  ;;  %11348 = vmatprep.mubr.msk.f32.mxu0 %vm12239_vm2, %v15124_v63 }
0x20a6   :  { %v7619_v52 = vmul.f32 %v12176_v54, %v12166_v45 }
0x20a8   :  { %11349 = vmatmul.mubr.msk.f32.gmra.mrb[166].mxu0 %vm1725_vm6, %v7619_v52 }
0x20a9   :  { %11378 = vmatpush3.xpose.msk.msra.mxu0 %vm1626_vm4, %v15221_v14  ;;  %11379 = vmatprep.mubr.msk.f32.mxu0 %vm12239_vm2, %v15124_v63  ;;  %v15236_v14 = vld [vmem:[#allocation35_spill] sm:$0xff] }
0x20aa   :  { %11844 = vmatprep.subr.bf16.mxu0 %v15125_v7 }
0x20ac   :  { %11380 = vmatmul.mubr.msk.f32.vlgmr.msra.gmra.mrb[168].mxu0 %vm1626_vm4, %v15222_v55  ;;  %v15237_v55 = vld [vmem:[#allocation33_spill] sm:$0xff] }
0x20ad   :  { %11846 = vmatpush3.bf16.msra.mxu0 %v15225_v18  ;;  %11382 = vmatprep.mubr.msk.f32.mxu0 %vm12239_vm2, %v15124_v63  ;;  %v15238_v22 = vpack.c.bf16 %v15236_v14, %v15237_v55 }
0x20ae   :  { %11392 = vmatprep.subr.mxu0 %v15124_v63 }
0x20b0   :  { %11383 = vmatmul.mubr.msk.f32.gmra.mrb[170].mxu0 %vm1626_vm4, %v15226_v56  ;;  %v15239_v56 = vld [vmem:[#allocation34_spill] sm:$0xff] }
0x20b1   :  { %11393 = vmatpush3.msk.msra.mxu0 %vm1769_vm3, %v15227_v58  ;;  %11385 = vmatprep.mubr.msk.f32.mxu0 %vm12239_vm2, %v15124_v63 }
0x20b2   :  { %11847 = vmatprep.subr.bf16.mxu0 %v15125_v7 }
0x20b4   :  { %11386 = vmatmul.mubr.msk.f32.gmra.mrb[172].mxu0 %vm1626_vm4, %v15228_v32 }
0x20b5   :  { %11394 = vmatprep.mubr.msk.f32.mxu0 %vm12239_vm2, %v15124_v63 }
0x20de   :  { %v7474_v13 = vpop.f32.mrb[156].mxu0 }
0x20df   :  { %v11314_v38 = vpop.f32.mrb[157].mxu0 }
0x20e2   :  { %v7479_v11 = vpop.f32.mrb[158].mxu0 }
0x20e3   :  { %v11317_v49 = vpop.f32.mrb[159].mxu0 }
0x20e6   :  { %v7484_v31 = vpop.f32.mrb[160].mxu0 }
0x20e7   :  { %v11320_v44 = vpop.f32.mrb[161].mxu0 }
0x2173   :  { %v7698_v43 = vpop.f32.mrb[162].mxu0 }
0x2174   :  { %v11344_v50 = vpop.f32.mrb[163].mxu0  ;;  %11354 = vmatmul.mubr.msk.f32.vlgmr.msra.gmra.mrb[180].mxu1 %vm1626_vm4, %v7698_v43 }
0x2175   :  { %11356 = vmatprep.mubr.msk.f32.mxu1 %vm12239_vm2, %v15124_v63  ;;  %11363 = vmatpush3.msra.mxu1 %v14445_v1 }
0x2176   :  { %11403 = vmatprep.subr.mxu1 %v15124_v63 }
0x2177   :  { %v7703_v10 = vpop.f32.mrb[164].mxu0 }
0x2178   :  { %v11347_v24 = vpop.f32.mrb[165].mxu0  ;;  %11357 = vmatmul.mubr.msk.f32.gmra.mrb[182].mxu1 %vm1626_vm4, %v7703_v10 }
0x2179   :  { %11359 = vmatprep.mubr.msk.f32.mxu1 %vm12239_vm2, %v15124_v63 }
0x217b   :  { %v7708_v19 = vpop.f32.mrb[166].mxu0 }
0x217c   :  { %v11350_v34 = vpop.f32.mrb[167].mxu0  ;;  %11360 = vmatmul.mubr.msk.f32.gmra.mrb[184].mxu1 %vm1626_vm4, %v7708_v19 }
0x217d   :  { %11364 = vmatprep.mubr.msk.f32.mxu1 %vm12239_vm2, %v15124_v63 }
0x217f   :  { %v7975_v0 = vpop.f32.mrb[168].mxu0 }
0x2180   :  { %11365 = vmatmul.mubr.msk.f32.vlgmr.msra.gmra.mrb[180].mxu1 %vm1626_vm4, %v7474_v13  ;;  %v11381_v1 = vpop.f32.mrb[169].mxu0  ;;  %v7989_v15 = vsel %vm1725_vm6, %v7975_v0, -inf }
0x2181   :  { %7990 = vmax.xlane.f32.xlu0 %v7989_v15  ;;  %11367 = vmatprep.mubr.msk.f32.mxu1 %vm12239_vm2, %v15124_v63 }
0x2182   :  { %11404 = vmatpush3.msra.mxu1 %v14476_v46 }
0x2183   :  { %v7980_v23 = vpop.f32.mrb[170].mxu0  ;;  %11851 = vmatprep.subr.bf16.mxu1 %v15125_v7 }
0x2184   :  { %11368 = vmatmul.mubr.msk.f32.gmra.mrb[182].mxu1 %vm1626_vm4, %v7479_v11  ;;  %v11384_v20 = vpop.f32.mrb[171].mxu0  ;;  %v7992_v21 = vsel %vm1725_vm6, %v7980_v23, -inf }
0x2185   :  { %7993 = vmax.xlane.f32.xlu1 %v7992_v21  ;;  %11370 = vmatprep.mubr.msk.f32.mxu1 %vm12239_vm2, %v15124_v63 }
0x2187   :  { %v7985_v61 = vpop.f32.mrb[172].mxu0 }
0x2188   :  { %11371 = vmatmul.mubr.msk.f32.gmra.mrb[184].mxu1 %vm1626_vm4, %v7484_v31  ;;  %v11387_v30 = vpop.f32.mrb[173].mxu0  ;;  %v7995_v39 = vsel %vm1732_vm7, %v7985_v61, -inf }
0x2189   :  { %7996 = vmax.xlane.f32.xlu0 %v7995_v39  ;;  %11405 = vmatprep.mubr.msk.f32.mxu1 %vm12239_vm2, %v15124_v63 }
0x220e   :  { %v7991_v7 = vpop.xlane.xlu0 %7990 }
0x220f   :  { %v7998_v46 = vsub.f32 %v7975_v0, %v7991_v7  ;;  %v15240_v7 = vld [vmem:[#allocation10_spill] sm:$0xff] }
0x2211   :  { %v8001_v16 = vmul.f32 1.442695, %v7998_v46 }
0x2212   :  { %v7994_v57 = vpop.xlane.xlu1 %7993 }
0x2213   :  { %12177 = vpow2.f32 %v8001_v16  ;;  %v7999_v37 = vsub.f32 %v7980_v23, %v7994_v57  ;;  %v14776_v16 = vld [vmem:[%s15018_s12 + $0x1] ss:$0 sm:$0xff]  ;;  %v8528_v57 = vld [vmem:[#allocation2 + $0x10] sm:$0xff] }
0x2215   :  { %v8003_v25 = vmul.f32 1.442695, %v7999_v37  ;;  %v8527_v37 = vld [vmem:[#allocation2 + $0x8] sm:$0xff] }
0x2216   :  { %v7997_v47 = vpop.xlane.xlu0 %7996 }
0x2217   :  { %12179 = vpow2.f32 %v8003_v25  ;;  %v8000_v27 = vsub.f32 %v7985_v61, %v7997_v47  ;;  %v8526_v61 = vld [vmem:[#allocation2] sm:$0xff] }
0x2218   :  { %v8532_v46 = vadd.f32 %v8526_v61, %v15240_v7  ;;  %v15245_v61 = vld [vmem:[#allocation16_spill] sm:$0xff] }
0x2219   :  { %v8005_v4 = vmul.f32 1.442695, %v8000_v27 }
0x221a   :  { %v14780_v27 = vadd.f32 %v14776_v16, %v8532_v46 }
0x221b   :  { %12181 = vpow2.f32 %v8005_v4  ;;  %v15241_v4 = vld [vmem:[#allocation14_spill] sm:$0xff] }
0x221d   :  { %v12178_v9 = vpop.eup %12177 }
0x221e   :  { %v8007_v45 = vsel %vm1725_vm6, %v12178_v9, 0.0 }
0x221f   :  { %8008 = vadd.xlane.f32.xlu1 %v8007_v45  ;;  %v15242_v45 = vld [vmem:[#allocation12_spill] sm:$0xff] }
0x2221   :  { %v12180_v53 = vpop.eup %12179 }
0x2222   :  { %v8010_v33 = vsel %vm1725_vm6, %v12180_v53, 0.0 }
0x2223   :  { %8011 = vadd.xlane.f32.xlu0 %v8010_v33 }
0x2225   :  { %v12182_v2 = vpop.eup %12181 }
0x2226   :  { %v8013_v48 = vsel %vm1732_vm7, %v12182_v2, 0.0 }
0x2227   :  { %8014 = vadd.xlane.f32.xlu1 %v8013_v48 }
0x22ac   :  { %v8009_v6 = vpop.xlane.xlu1 %8008 }
0x22ad   :  { %12183 = vrcp.f32 %v8009_v6 }
0x22b0   :  { %v8012_v40 = vpop.xlane.xlu0 %8011 }
0x22b1   :  { %12185 = vrcp.f32 %v8012_v40 }
0x22b4   :  { %v8015_v41 = vpop.xlane.xlu1 %8014 }
0x22b5   :  { %12187 = vrcp.f32 %v8015_v41 }
0x22b7   :  { %v12184_v8 = vpop.eup %12183 }
0x22b8   :  { %v8019_v17 = vmul.f32 %v12184_v8, %v12178_v9  ;;  %v8534_v9 = vadd.f32 %v8528_v57, %v15241_v4  ;;  %v9726_v4 = vld [vmem:[%s15019_s15 + $0x28] sm:$0xff] }
0x22ba   :  { %11395 = vmatmul.mubr.msk.f32.vlgmr.msra.gmra.mrb[174].mxu0 %vm1725_vm6, %v8019_v17  ;;  %v14788_v6 = vadd.f32 %v14776_v16, %v8534_v9 }
0x22bb   :  { %v12186_v12 = vpop.eup %12185  ;;  %11850 = vmatpush3.bf16.xpose.msk.msra.mxu0 %vm12864_vm5, %v15231_v3  ;;  %11397 = vmatprep.mubr.msk.f32.mxu0 %vm12239_vm2, %v15124_v63 }
0x22bc   :  { %v8020_v28 = vmul.f32 %v12186_v12, %v12180_v53  ;;  %11418 = vmatprep.subr.mxu0 %v15124_v63  ;;  %v8533_v53 = vadd.f32 %v8527_v37, %v15242_v45  ;;  %v8562_v41 = vsel %vm206_vm1, %v14788_v6, 0.0  ;;  %v9727_v45 = vld [vmem:[%s15019_s15 + $0x30] sm:$0xff] }
0x22be   :  { %11398 = vmatmul.mubr.msk.f32.gmra.mrb[176].mxu0 %vm1725_vm6, %v8020_v28  ;;  %v14791_v40 = vadd.f32 %v14776_v16, %v8533_v53  ;;  %v9728_v53 = vld [vmem:[%s15019_s15 + $0x38] sm:$0xff] }
0x22bf   :  { %v12188_v35 = vpop.eup %12187  ;;  %11400 = vmatprep.mubr.msk.f32.mxu0 %vm12239_vm2, %v15124_v63 }
0x22c0   :  { %v8021_v29 = vmul.f32 %v12188_v35, %v12182_v2  ;;  %v8556_v2 = vsel %vm206_vm1, %v14780_v27, 0.0  ;;  %v8559_v8 = vsel %vm206_vm1, %v14791_v40, 0.0 }
0x22c2   :  { %11401 = vmatmul.mubr.msk.f32.gmra.mrb[178].mxu0 %vm1725_vm6, %v8021_v29 }
0x22c3   :  { %11419 = vmatpush3.xpose.msk.msra.mxu0 %vm1626_vm4, %v15232_v26  ;;  %11420 = vmatprep.mubr.msk.f32.mxu0 %vm12239_vm2, %v15124_v63 }
0x22c6   :  { %11421 = vmatmul.mubr.msk.f32.vlgmr.msra.gmra.mrb[180].mxu0 %vm1626_vm4, %v15233_v51 }
0x22c7   :  { %11423 = vmatprep.mubr.msk.f32.mxu0 %vm12239_vm2, %v15124_v63 }
0x22ca   :  { %11424 = vmatmul.mubr.msk.f32.gmra.mrb[182].mxu0 %vm1626_vm4, %v15234_v60 }
0x22cb   :  { %11426 = vmatprep.mubr.msk.f32.mxu0 %vm12239_vm2, %v15124_v63 }
0x22ce   :  { %11427 = vmatmul.mubr.msk.f32.gmra.mrb[184].mxu0 %vm1626_vm4, %v15235_v42 }
0x238d   :  { %v8100_v54 = vpop.f32.mrb[174].mxu0 }
0x238e   :  { %v11396_v52 = vpop.f32.mrb[175].mxu0  ;;  %11406 = vmatmul.mubr.msk.f32.vlgmr.msra.gmra.mrb[180].mxu1 %vm1626_vm4, %v8100_v54 }
0x238f   :  { %11853 = vmatpush3.bf16.msra.mxu1 %v15238_v22  ;;  %11408 = vmatprep.mubr.msk.f32.mxu1 %vm12239_vm2, %v15124_v63 }
0x2390   :  { %11433 = vmatprep.subr.mxu1 %v15124_v63 }
0x2391   :  { %v8105_v36 = vpop.f32.mrb[176].mxu0 }
0x2392   :  { %v11399_v18 = vpop.f32.mrb[177].mxu0  ;;  %11409 = vmatmul.mubr.msk.f32.gmra.mrb[182].mxu1 %vm1626_vm4, %v8105_v36 }
0x2393   :  { %11434 = vmatpush3.msk.msra.mxu1 %vm1769_vm3, %v15239_v56  ;;  %11411 = vmatprep.mubr.msk.f32.mxu1 %vm12239_vm2, %v15124_v63 }
0x2394   :  { %11444 = vmatprep.subr.mxu1 %v15124_v63 }
0x2395   :  { %v8110_v58 = vpop.f32.mrb[178].mxu0 }
0x2396   :  { %v11402_v32 = vpop.f32.mrb[179].mxu0  ;;  %11412 = vmatmul.mubr.msk.f32.gmra.mrb[184].mxu1 %vm1626_vm4, %v8110_v58 }
0x2397   :  { %11435 = vmatprep.mubr.msk.f32.mxu1 %vm12239_vm2, %v15124_v63 }
0x2399   :  { %v8291_v13 = vpop.f32.mrb[180].mxu0 }
0x239a   :  { %v11422_v38 = vpop.f32.mrb[181].mxu0  ;;  %v8305_v11 = vsel %vm1725_vm6, %v8291_v13, -inf }
0x239b   :  { %8306 = vmax.xlane.f32.xlu0 %v8305_v11 }
0x239d   :  { %v8296_v49 = vpop.f32.mrb[182].mxu0 }
0x239e   :  { %v11425_v31 = vpop.f32.mrb[183].mxu0  ;;  %v8308_v44 = vsel %vm1725_vm6, %v8296_v49, -inf }
0x239f   :  { %8309 = vmax.xlane.f32.xlu1 %v8308_v44 }
0x23a1   :  { %v8301_v43 = vpop.f32.mrb[184].mxu0 }
0x23a2   :  { %v11428_v50 = vpop.f32.mrb[185].mxu0  ;;  %v8311_v10 = vsel %vm1732_vm7, %v8301_v43, -inf }
0x23a3   :  { %8312 = vmax.xlane.f32.xlu0 %v8311_v10 }
0x2428   :  { %v8307_v24 = vpop.xlane.xlu0 %8306 }
0x2429   :  { %v8314_v19 = vsub.f32 %v8291_v13, %v8307_v24 }
0x242b   :  { %v8317_v34 = vmul.f32 1.442695, %v8314_v19  ;;  %v15244_v19 = vld [vmem:[#allocation24_spill] sm:$0xff] }
0x242c   :  { %v8310_v0 = vpop.xlane.xlu1 %8309 }
0x242d   :  { %12189 = vpow2.f32 %v8317_v34  ;;  %v8315_v1 = vsub.f32 %v8296_v49, %v8310_v0 }
0x242f   :  { %v8319_v15 = vmul.f32 1.442695, %v8315_v1 }
0x2430   :  { %v8313_v23 = vpop.xlane.xlu0 %8312 }
0x2431   :  { %12191 = vpow2.f32 %v8319_v15  ;;  %v8316_v20 = vsub.f32 %v8301_v43, %v8313_v23 }
0x2433   :  { %v8321_v21 = vmul.f32 1.442695, %v8316_v20 }
0x2435   :  { %12193 = vpow2.f32 %v8321_v21 }
0x2437   :  { %v12190_v30 = vpop.eup %12189 }
0x2438   :  { %v8323_v39 = vsel %vm1725_vm6, %v12190_v30, 0.0 }
0x2439   :  { %8324 = vadd.xlane.f32.xlu1 %v8323_v39 }
0x243b   :  { %v12192_v25 = vpop.eup %12191 }
0x243c   :  { %v8326_v47 = vsel %vm1725_vm6, %v12192_v25, 0.0 }
0x243d   :  { %8327 = vadd.xlane.f32.xlu0 %v8326_v47 }
0x243f   :  { %v12194_v33 = vpop.eup %12193 }
0x2440   :  { %v8329_v48 = vsel %vm1732_vm7, %v12194_v33, 0.0 }
0x2441   :  { %8557 = vadd.xlane.f32.xlu0 %v8556_v2  ;;  %8330 = vadd.xlane.f32.xlu1 %v8329_v48 }
0x2445   :  { %8563 = vadd.xlane.f32.xlu0 %v8562_v41  ;;  %8560 = vadd.xlane.f32.xlu1 %v8559_v8 }
0x24c6   :  { %v8325_v17 = vpop.xlane.xlu1 %8324 }
0x24c7   :  { %12195 = vrcp.f32 %v8325_v17 }
0x24ca   :  { %v8328_v12 = vpop.xlane.xlu0 %8327 }
0x24cb   :  { %12197 = vrcp.f32 %v8328_v12 }
0x24ce   :  { %v8331_v5 = vpop.xlane.xlu1 %8330  ;;  %v8558_v22 = vpop.xlane.xlu0 %8557 }
0x24cf   :  { %12199 = vrcp.f32 %v8331_v5  ;;  %v8574_v56 = vmul.f32 0.03125, %v8558_v22 }
0x24d1   :  { %v12196_v62 = vpop.eup %12195  ;;  %v14822_v44 = vsub.f32 %v14780_v27, %v8574_v56 }
0x24d2   :  { %v8335_v3 = vmul.f32 %v12196_v62, %v12190_v30  ;;  %v8561_v11 = vpop.xlane.xlu1 %8560  ;;  %v8564_v49 = vpop.xlane.xlu0 %8563 }
0x24d3   :  { %v8575_v50 = vmul.f32 0.03125, %v8561_v11  ;;  %v8576_v10 = vmul.f32 0.03125, %v8564_v49  ;;  %v8586_v15 = vmul.f32 %v14822_v44, %v14822_v44 }
0x24d4   :  { %11436 = vmatmul.mubr.msk.f32.vlgmr.msra.gmra.mrb[186].mxu1 %vm1725_vm6, %v8335_v3 }
0x24d5   :  { %v12198_v28 = vpop.eup %12197  ;;  %11438 = vmatprep.mubr.msk.f32.mxu1 %vm12239_vm2, %v15124_v63  ;;  %11445 = vmatpush3.msra.mxu1 %v14584_v59  ;;  %v14833_v23 = vsub.f32 %v14791_v40, %v8575_v50  ;;  %v14836_v20 = vsub.f32 %v14788_v6, %v8576_v10  ;;  %v8592_v46 = vsel %vm206_vm1, %v8586_v15, 0.0 }
0x24d6   :  { %v8336_v35 = vmul.f32 %v12198_v28, %v12192_v25 }
0x24d7   :  { %v8587_v57 = vmul.f32 %v14833_v23, %v14833_v23  ;;  %v8588_v37 = vmul.f32 %v14836_v20, %v14836_v20 }
0x24d8   :  { %11439 = vmatmul.mubr.msk.f32.gmra.mrb[188].mxu1 %vm1725_vm6, %v8336_v35 }
0x24d9   :  { %v12200_v29 = vpop.eup %12199  ;;  %11441 = vmatprep.mubr.msk.f32.mxu1 %vm12239_vm2, %v15124_v63  ;;  %v8595_v25 = vsel %vm206_vm1, %v8587_v57, 0.0  ;;  %v8598_v47 = vsel %vm206_vm1, %v8588_v37, 0.0  ;;  %v9744_v57 = vld [vmem:[%s15022_s17 + $0x78] sm:$0xff] }
0x24da   :  { %v8337_v26 = vmul.f32 %v12200_v29, %v12194_v33  ;;  %v11858_v33 = vpack.c.bf16 %v9728_v53, %v9727_v45 }
0x24dc   :  { %11442 = vmatmul.mubr.msk.f32.gmra.mrb[190].mxu1 %vm1725_vm6, %v8337_v26 }
0x24dd   :  { %11446 = vmatprep.mubr.msk.f32.mxu1 %vm12239_vm2, %v15124_v63 }
0x25a7   :  { %v8416_v51 = vpop.f32.mrb[186].mxu1 }
0x25a8   :  { %v11437_v60 = vpop.f32.mrb[187].mxu1  ;;  %11447 = vmatmul.mubr.msk.f32.vlgmr.msra.gmra.mrb[180].mxu1 %vm1626_vm4, %v8416_v51 }
0x25a9   :  { %11449 = vmatprep.mubr.msk.f32.mxu1 %vm12239_vm2, %v15124_v63 }
0x25ab   :  { %v8421_v59 = vpop.f32.mrb[188].mxu1 }
0x25ac   :  { %v11440_v42 = vpop.f32.mrb[189].mxu1  ;;  %11450 = vmatmul.mubr.msk.f32.gmra.mrb[182].mxu1 %vm1626_vm4, %v8421_v59 }
0x25ad   :  { %11452 = vmatprep.mubr.msk.f32.mxu1 %vm12239_vm2, %v15124_v63  ;;  %v15243_v63 = vld [vmem:[#allocation18_spill] sm:$0xff] }
0x25af   :  { %v8426_v54 = vpop.f32.mrb[190].mxu1 }
0x25b0   :  { %v11443_v52 = vpop.f32.mrb[191].mxu1  ;;  %11453 = vmatmul.mubr.msk.f32.gmra.mrb[184].mxu1 %vm1626_vm4, %v8426_v54 }
0x267b   :  { %v8506_v14 = vpop.f32.mrb[180].mxu1 }
0x267c   :  { %8523 = vst.msk [vmem:[#allocation2 + $0x18] sm:$0xff] %vm206_vm1, %v8506_v14  ;;  %v11448_v55 = vpop.f32.mrb[181].mxu1 }
0x267f   :  { %v8511_v36 = vpop.f32.mrb[182].mxu1 }
0x2680   :  { %8524 = vst.msk [vmem:[#allocation2 + $0x20] sm:$0xff] %vm206_vm1, %v8511_v36  ;;  %v11451_v18 = vpop.f32.mrb[183].mxu1 }
0x2683   :  { %v8516_v58 = vpop.f32.mrb[184].mxu1  ;;  %v8529_v32 = vld [vmem:[#allocation2 + $0x18] sm:$0xff] }
0x2684   :  { %8525 = vst.msk [vmem:[#allocation2 + $0x28] sm:$0x1] %vm2893_vm8, %v8516_v58  ;;  %v11454_v13 = vpop.f32.mrb[185].mxu1  ;;  %v8535_v38 = vadd.f32 %v8529_v32, %v15243_v63  ;;  %v9723_v58 = vld [vmem:[%s15020_s13 + $0x1] ss:$0 sm:$0xff] }
0x2685   :  { %v9724_v13 = vld [vmem:[%s15021_s14 + $0x1] ss:$0 sm:$0xff] }
0x2686   :  { %v14819_v31 = vadd.f32 %v14776_v16, %v8535_v38 }
0x2687   :  { %v8530_v43 = vld [vmem:[#allocation2 + $0x20] sm:$0xff] }
0x2688   :  { %v8565_v24 = vsel %vm206_vm1, %v14819_v31, 0.0  ;;  %v8536_v34 = vadd.f32 %v8530_v43, %v15244_v19 }
0x2689   :  { %8566 = vadd.xlane.f32.xlu1 %v8565_v24 }
0x268a   :  { %v14828_v0 = vadd.f32 %v14776_v16, %v8536_v34 }
0x268b   :  { %v8531_v1 = vld [vmem:[#allocation2 + $0x28] sm:$0xff] }
0x268c   :  { %v8568_v21 = vsel %vm206_vm1, %v14828_v0, 0.0  ;;  %v8537_v30 = vadd.f32 %v8531_v1, %v15245_v61  ;;  %v9738_v1 = vld [vmem:[%s15022_s17 + $0x48] sm:$0xff]  ;;  %v9741_v61 = vld [vmem:[%s15022_s17 + $0x60] sm:$0xff] }
0x268d   :  { %8569 = vadd.xlane.f32.xlu0 %v8568_v21 }
0x268e   :  { %v14842_v39 = vadd.f32 %v14776_v16, %v8537_v30  ;;  %v9725_v16 = vld [vmem:[%s15019_s15 + $0x20] sm:$0xff]  ;;  %v9742_v30 = vld [vmem:[%s15022_s17 + $0x68] sm:$0xff] }
0x268f   :  { %v11854_v9 = vpack.c.bf16 %v9726_v4, %v9725_v16 }
0x2690   :  { %v8571_v7 = vsel %vm206_vm1, %v14842_v39, 0.0 }
0x2691   :  { %8572 = vadd.xlane.f32.xlu1 %v8571_v7  ;;  %8593 = vadd.xlane.f32.xlu0 %v8592_v46  ;;  %v11870_v7 = vpack.c.bf16 %v9742_v30, %v9741_v61  ;;  %v9743_v46 = vld [vmem:[%s15022_s17 + $0x70] sm:$0xff] }
0x2692   :  { %11855 = vmatprep.subr.bf16.mxu0 %v11854_v9  ;;  %v11874_v37 = vpack.c.bf16 %v9744_v57, %v9743_v46 }
0x2693   :  { %11857 = vmatpush3.bf16.msra.mxu0 %v11854_v9 }
0x2694   :  { %11859 = vmatprep.subr.bf16.mxu0 %v11858_v33 }
0x2695   :  { %8596 = vadd.xlane.f32.xlu1 %v8595_v25  ;;  %8599 = vadd.xlane.f32.xlu0 %v8598_v47 }
0x2697   :  { %11861 = vmatpush3.bf16.msra.mxu0 %v11858_v33 }
0x2716   :  { %v8567_v2 = vpop.xlane.xlu1 %8566 }
0x2717   :  { %v8577_v48 = vmul.f32 0.03125, %v8567_v2 }
0x2719   :  { %v14866_v41 = vsub.f32 %v14819_v31, %v8577_v48 }
0x271a   :  { %v8570_v8 = vpop.xlane.xlu0 %8569 }
0x271b   :  { %v8578_v17 = vmul.f32 0.03125, %v8570_v8  ;;  %v8589_v12 = vmul.f32 %v14866_v41, %v14866_v41 }
0x271d   :  { %v14871_v5 = vsub.f32 %v14828_v0, %v8578_v17  ;;  %v8601_v62 = vsel %vm206_vm1, %v8589_v12, 0.0 }
0x271e   :  { %8602 = vadd.xlane.f32.xlu1 %v8601_v62  ;;  %v8573_v3 = vpop.xlane.xlu1 %8572  ;;  %v8594_v28 = vpop.xlane.xlu0 %8593 }
0x271f   :  { %v8579_v35 = vmul.f32 0.03125, %v8573_v3  ;;  %v8610_v29 = vmul.f32 0.03125, %v8594_v28  ;;  %v8590_v26 = vmul.f32 %v14871_v5, %v14871_v5 }
0x2721   :  { %v14877_v51 = vsub.f32 %v14842_v39, %v8579_v35  ;;  %v8616_v60 = vadd.f32 1e-06, %v8610_v29  ;;  %v8604_v59 = vsel %vm206_vm1, %v8590_v26, 0.0 }
0x2722   :  { %v8597_v42 = vpop.xlane.xlu1 %8596  ;;  %8605 = vadd.xlane.f32.xlu0 %v8604_v59  ;;  %v8600_v54 = vpop.xlane.xlu0 %8599 }
0x2723   :  { %12201 = vrsqrt.f32 %v8616_v60  ;;  %v8611_v52 = vmul.f32 0.03125, %v8597_v42  ;;  %v8612_v14 = vmul.f32 0.03125, %v8600_v54  ;;  %v8591_v55 = vmul.f32 %v14877_v51, %v14877_v51 }
0x2725   :  { %v8617_v22 = vadd.f32 1e-06, %v8611_v52  ;;  %v8618_v36 = vadd.f32 1e-06, %v8612_v14  ;;  %v8607_v18 = vsel %vm206_vm1, %v8591_v55, 0.0 }
0x2726   :  { %8608 = vadd.xlane.f32.xlu1 %v8607_v18 }
0x2727   :  { %12203 = vrsqrt.f32 %v8617_v22 }
0x2728   :  { %12205 = vrsqrt.f32 %v8618_v36 }
0x272d   :  { %v12202_v56 = vpop.eup %12201 }
0x272e   :  { %v8628_v32 = vmul.f32 %v12202_v56, %v14822_v44  ;;  %v9737_v44 = vld [vmem:[%s15022_s17 + $0x40] sm:$0xff] }
0x272f   :  { %v11862_v15 = vpack.c.bf16 %v9738_v1, %v9737_v44 }
0x2730   :  { %v8640_v63 = vmul.f32 %v9723_v58, %v8628_v32 }
0x2731   :  { %v12204_v38 = vpop.eup %12203  ;;  %11863 = vmatprep.subr.bf16.mxu0 %v11862_v15 }
0x2732   :  { %v12206_v11 = vpop.eup %12205  ;;  %v8629_v49 = vmul.f32 %v12204_v38, %v14833_v23  ;;  %v8652_v43 = vadd.f32 %v9724_v13, %v8640_v63  ;;  %v9739_v23 = vld [vmem:[%s15022_s17 + $0x50] sm:$0xff] }
0x2733   :  { %v8630_v50 = vmul.f32 %v12206_v11, %v14836_v20  ;;  %v9740_v20 = vld [vmem:[%s15022_s17 + $0x58] sm:$0xff] }
0x2734   :  { %v8641_v10 = vmul.f32 %v9723_v58, %v8629_v49  ;;  %11463 = vmatprep.mubr.msk.f32.mxu0 %vm206_vm1, %v8652_v43  ;;  %v11866_v21 = vpack.c.bf16 %v9740_v20, %v9739_v23 }
0x2735   :  { %v8642_v24 = vmul.f32 %v9723_v58, %v8630_v50 }
0x2736   :  { %v8653_v19 = vadd.f32 %v9724_v13, %v8641_v10 }
0x2737   :  { %v8654_v34 = vadd.f32 %v9724_v13, %v8642_v24 }
0x2738   :  { %11464 = vmatmul.mubr.msk.f32.vlgmr.msra.gmra.mrb[186].mxu0 %vm206_vm1, %v8653_v19 }
0x2739   :  { %11466 = vmatprep.mubr.msk.f32.mxu0 %vm206_vm1, %v8654_v34  ;;  %11865 = vmatpush3.bf16.msra.mxu0 %v11862_v15 }
0x273a   :  { %11867 = vmatprep.subr.bf16.mxu0 %v11866_v21 }
0x273d   :  { %11869 = vmatpush3.bf16.msra.mxu0 %v11866_v21 }
0x273e   :  { %11871 = vmatprep.subr.bf16.mxu0 %v11870_v7 }
0x2741   :  { %11873 = vmatpush3.bf16.msra.mxu0 %v11870_v7 }
0x2742   :  { %11875 = vmatprep.subr.bf16.mxu0 %v11874_v37 }
0x2745   :  { %11877 = vmatpush3.bf16.msra.mxu0 %v11874_v37 }
0x27ab   :  { %v8603_v25 = vpop.xlane.xlu1 %8602 }
0x27ac   :  { %v8613_v47 = vmul.f32 0.03125, %v8603_v25 }
0x27ae   :  { %v8619_v16 = vadd.f32 1e-06, %v8613_v47 }
0x27af   :  { %v8606_v4 = vpop.xlane.xlu0 %8605 }
0x27b0   :  { %12207 = vrsqrt.f32 %v8619_v16  ;;  %v8614_v9 = vmul.f32 0.03125, %v8606_v4 }
0x27b2   :  { %v8620_v45 = vadd.f32 1e-06, %v8614_v9 }
0x27b3   :  { %v8609_v53 = vpop.xlane.xlu1 %8608 }
0x27b4   :  { %12209 = vrsqrt.f32 %v8620_v45  ;;  %v8615_v33 = vmul.f32 0.03125, %v8609_v53 }
0x27b6   :  { %v8621_v2 = vadd.f32 1e-06, %v8615_v33  ;;  %v9752_v33 = vld [vmem:[%s15024_s18 + $0x1] ss:$0 sm:$0xff] }
0x27b8   :  { %12211 = vrsqrt.f32 %v8621_v2 }
0x27ba   :  { %v12208_v48 = vpop.eup %12207 }
0x27bb   :  { %v8631_v8 = vmul.f32 %v12208_v48, %v14866_v41  ;;  %v9730_v41 = vld [vmem:[%s15023_s16 + $0x1] ss:$0 sm:$0xff] }
0x27bd   :  { %v8643_v17 = vmul.f32 %v9723_v58, %v8631_v8 }
0x27be   :  { %v12210_v12 = vpop.eup %12209 }
0x27bf   :  { %v8655_v62 = vadd.f32 %v9724_v13, %v8643_v17  ;;  %v8632_v3 = vmul.f32 %v12210_v12, %v14871_v5 }
0x27c1   :  { %11467 = vmatmul.mubr.msk.f32.gmra.mrb[188].mxu0 %vm206_vm1, %v8655_v62  ;;  %v8644_v28 = vmul.f32 %v9723_v58, %v8632_v3 }
0x27c2   :  { %v12212_v35 = vpop.eup %12211 }
0x27c3   :  { %v8656_v29 = vadd.f32 %v9724_v13, %v8644_v28  ;;  %v8633_v26 = vmul.f32 %v12212_v35, %v14877_v51 }
0x27c5   :  { %11469 = vmatprep.mubr.msk.f32.mxu0 %vm206_vm1, %v8656_v29  ;;  %v8645_v60 = vmul.f32 %v9723_v58, %v8633_v26 }
0x27c7   :  { %v8657_v59 = vadd.f32 %v9724_v13, %v8645_v60 }
0x27c9   :  { %11470 = vmatmul.mubr.msk.f32.gmra.mrb[190].mxu0 %vm206_vm1, %v8657_v59 }
0x280b   :  { %v11465_v42 = vpop.f32.mrb[186].mxu0 }
0x280c   :  { %v8761_v54 = vadd.f32 %v11465_v42, %v9730_v41  ;;  %v8755_v5 = vpop.f32.mrb[187].mxu0 }
0x280d   :  { %v8756_v52 = vadd.f32 %v9730_v41, %v8755_v5 }
0x280e   :  { %v8791_v14 = vmul.f32 0.70710677, %v8761_v54  ;;  %v8785_v58 = vmul.f32 0.5, %v8761_v54 }
0x280f   :  { %v8790_v55 = vmul.f32 0.70710677, %v8756_v52  ;;  %v8784_v18 = vmul.f32 0.5, %v8756_v52 }
0x2810   :  { %12213 = verf.f32 %v8791_v14 }
0x2811   :  { %12215 = verf.f32 %v8790_v55 }
0x281a   :  { %v12214_v22 = vpop.eup %12213 }
0x281b   :  { %v12216_v51 = vpop.eup %12215  ;;  %v8803_v36 = vadd.f32 1.0, %v12214_v22 }
0x281c   :  { %v8802_v56 = vadd.f32 1.0, %v12216_v51 }
0x281d   :  { %v8809_v13 = vmul.f32 %v8803_v36, %v8785_v58 }
0x281e   :  { %v8808_v32 = vmul.f32 %v8802_v56, %v8784_v18 }
0x2820   :  { %11488 = vmatprep.mubr.msk.f32.mxu0 %vm4447_vm9, %v8808_v32 }
0x2821   :  { %11489 = vmatmul.mubr.msk.f32.vlgmr.msra.gmra.mrb[192].mxu0 %vm4447_vm9, %v8809_v13  ;;  %v9060_v13 = vld [vmem:[%s15025_s21] sm:$0xff] }
0x2894   :  { %v11468_v63 = vpop.f32.mrb[188].mxu0 }
0x2895   :  { %v8771_v38 = vadd.f32 %v11468_v63, %v9730_v41  ;;  %v8765_v11 = vpop.f32.mrb[189].mxu0  ;;  %v9061_v63 = vld [vmem:[%s15025_s21 + $0x8] sm:$0xff] }
0x2896   :  { %v8766_v49 = vadd.f32 %v9730_v41, %v8765_v11  ;;  %v9062_v11 = vld [vmem:[%s15025_s21 + $0x10] sm:$0xff] }
0x2897   :  { %v8793_v43 = vmul.f32 0.70710677, %v8771_v38  ;;  %v8787_v30 = vmul.f32 0.5, %v8771_v38  ;;  %v11878_v38 = vpack.c.bf16 %v9061_v63, %v9060_v13 }
0x2898   :  { %v8792_v50 = vmul.f32 0.70710677, %v8766_v49  ;;  %v8786_v21 = vmul.f32 0.5, %v8766_v49  ;;  %v9063_v49 = vld [vmem:[%s15025_s21 + $0x18] sm:$0xff] }
0x2899   :  { %12217 = verf.f32 %v8793_v43  ;;  %11879 = vmatprep.subr.bf16.mxu1 %v11878_v38  ;;  %v11882_v43 = vpack.c.bf16 %v9063_v49, %v9062_v11 }
0x289a   :  { %12219 = verf.f32 %v8792_v50  ;;  %11881 = vmatpush3.bf16.msra.mxu1 %v11878_v38 }
0x289b   :  { %11883 = vmatprep.subr.bf16.mxu1 %v11882_v43 }
0x289c   :  { %v11471_v10 = vpop.f32.mrb[190].mxu0 }
0x289d   :  { %v8781_v24 = vadd.f32 %v11471_v10, %v9730_v41  ;;  %v8775_v19 = vpop.f32.mrb[191].mxu0 }
0x289e   :  { %v8776_v34 = vadd.f32 %v9730_v41, %v8775_v19  ;;  %11885 = vmatpush3.bf16.msra.mxu1 %v11882_v43 }
0x289f   :  { %v8795_v44 = vmul.f32 0.70710677, %v8781_v24  ;;  %v8789_v4 = vmul.f32 0.5, %v8781_v24 }
0x28a0   :  { %v8794_v1 = vmul.f32 0.70710677, %v8776_v34  ;;  %v8788_v47 = vmul.f32 0.5, %v8776_v34 }
0x28a1   :  { %12221 = verf.f32 %v8795_v44 }
0x28a2   :  { %12223 = verf.f32 %v8794_v1 }
0x28a3   :  { %v12218_v15 = vpop.eup %12217 }
0x28a4   :  { %v12220_v23 = vpop.eup %12219  ;;  %v8805_v20 = vadd.f32 1.0, %v12218_v15 }
0x28a5   :  { %v8804_v61 = vadd.f32 1.0, %v12220_v23 }
0x28a6   :  { %v8811_v46 = vmul.f32 %v8805_v20, %v8787_v30 }
0x28a7   :  { %v8810_v7 = vmul.f32 %v8804_v61, %v8786_v21 }
0x28a9   :  { %11491 = vmatprep.mubr.msk.f32.mxu0 %vm4447_vm9, %v8810_v7 }
0x28aa   :  { %11492 = vmatmul.mubr.msk.f32.gmra.mrb[194].mxu0 %vm4447_vm9, %v8811_v46 }
0x28ab   :  { %v12222_v57 = vpop.eup %12221 }
0x28ac   :  { %v12224_v37 = vpop.eup %12223  ;;  %v8807_v25 = vadd.f32 1.0, %v12222_v57 }
0x28ad   :  { %v8806_v16 = vadd.f32 1.0, %v12224_v37 }
0x28ae   :  { %v8813_v45 = vmul.f32 %v8807_v25, %v8789_v4 }
0x28af   :  { %v8812_v9 = vmul.f32 %v8806_v16, %v8788_v47 }
0x28b1   :  { %11494 = vmatprep.mubr.msk.f32.mxu0 %vm4447_vm9, %v8812_v9 }
0x28b2   :  { %11495 = vmatmul.mubr.msk.f32.gmra.mrb[196].mxu0 %vm4447_vm9, %v8813_v45 }
0x28f4   :  { %v11490_v53 = vpop.f32.mrb[192].mxu0 }
0x28f5   :  { %v8937_v2 = vadd.f32 %v11490_v53, %v14791_v40  ;;  %v8907_v48 = vpop.f32.mrb[193].mxu0 }
0x28f6   :  { %v8936_v8 = vadd.f32 %v8907_v48, %v14780_v27 }
0x28f7   :  { %v8951_v17 = vadd.f32 %v9752_v33, %v8937_v2 }
0x28f8   :  { %v8950_v12 = vadd.f32 %v9752_v33, %v8936_v8  ;;  %v9753_v8 = vld [vmem:[%s15026_s19] ss:$0 sm:$0xff] }
0x28f9   :  { %v8961_v62 = vsel %vm206_vm1, %v8951_v17, 0.0 }
0x28fa   :  { %8962 = vadd.xlane.f32.xlu1 %v8961_v62  ;;  %v8958_v3 = vsel %vm206_vm1, %v8950_v12, 0.0 }
0x28fb   :  { %8959 = vadd.xlane.f32.xlu0 %v8958_v3  ;;  %v9754_v3 = vld [vmem:[%s15027_s20] ss:$0 sm:$0xff] }
0x297d   :  { %v11493_v28 = vpop.f32.mrb[194].mxu0 }
0x297e   :  { %v8939_v35 = vadd.f32 %v11493_v28, %v14819_v31  ;;  %v8917_v29 = vpop.f32.mrb[195].mxu0 }
0x297f   :  { %v8938_v26 = vadd.f32 %v8917_v29, %v14788_v6 }
0x2980   :  { %v8953_v60 = vadd.f32 %v9752_v33, %v8939_v35 }
0x2981   :  { %v8952_v59 = vadd.f32 %v9752_v33, %v8938_v26 }
0x2982   :  { %v8967_v40 = vsel %vm206_vm1, %v8953_v60, 0.0 }
0x2983   :  { %8968 = vadd.xlane.f32.xlu1 %v8967_v40  ;;  %v8964_v27 = vsel %vm206_vm1, %v8952_v59, 0.0 }
0x2984   :  { %8965 = vadd.xlane.f32.xlu0 %v8964_v27 }
0x2985   :  { %v11496_v41 = vpop.f32.mrb[196].mxu0 }
0x2986   :  { %v8941_v42 = vadd.f32 %v11496_v41, %v14842_v39  ;;  %v8927_v54 = vpop.f32.mrb[197].mxu0 }
0x2987   :  { %v8940_v5 = vadd.f32 %v8927_v54, %v14828_v0  ;;  %v8963_v52 = vpop.xlane.xlu1 %8962 }
0x2988   :  { %v8955_v14 = vadd.f32 %v9752_v33, %v8941_v42  ;;  %v8977_v31 = vmul.f32 0.03125, %v8963_v52  ;;  %v8960_v55 = vpop.xlane.xlu0 %8959 }
0x2989   :  { %v8954_v22 = vadd.f32 %v9752_v33, %v8940_v5  ;;  %v8976_v6 = vmul.f32 0.03125, %v8960_v55 }
0x298a   :  { %v8983_v51 = vsub.f32 %v8951_v17, %v8977_v31  ;;  %v8973_v36 = vsel %vm206_vm1, %v8955_v14, 0.0 }
0x298b   :  { %v8982_v18 = vsub.f32 %v8950_v12, %v8976_v6  ;;  %8974 = vadd.xlane.f32.xlu1 %v8973_v36  ;;  %v8970_v56 = vsel %vm206_vm1, %v8954_v22, 0.0 }
0x298c   :  { %8971 = vadd.xlane.f32.xlu0 %v8970_v56  ;;  %v8989_v58 = vmul.f32 %v8983_v51, %v8983_v51 }
0x298d   :  { %v8988_v32 = vmul.f32 %v8982_v18, %v8982_v18 }
0x298e   :  { %v8997_v39 = vsel %vm206_vm1, %v8989_v58, 0.0 }
0x298f   :  { %8998 = vadd.xlane.f32.xlu1 %v8997_v39  ;;  %v8994_v0 = vsel %vm206_vm1, %v8988_v32, 0.0 }
0x2990   :  { %8995 = vadd.xlane.f32.xlu0 %v8994_v0 }
0x2a10   :  { %v8969_v50 = vpop.xlane.xlu1 %8968 }
0x2a11   :  { %v8979_v10 = vmul.f32 0.03125, %v8969_v50  ;;  %v8966_v24 = vpop.xlane.xlu0 %8965  ;;  %v9755_v50 = vld [vmem:[%s15028_s22] ss:$0 sm:$0xff] }
0x2a12   :  { %v8978_v19 = vmul.f32 0.03125, %v8966_v24 }
0x2a13   :  { %v8985_v34 = vsub.f32 %v8953_v60, %v8979_v10 }
0x2a14   :  { %v8984_v44 = vsub.f32 %v8952_v59, %v8978_v19 }
0x2a15   :  { %v8991_v1 = vmul.f32 %v8985_v34, %v8985_v34 }
0x2a16   :  { %v8990_v15 = vmul.f32 %v8984_v44, %v8984_v44 }
0x2a17   :  { %v9003_v23 = vsel %vm206_vm1, %v8991_v1, 0.0 }
0x2a18   :  { %9004 = vadd.xlane.f32.xlu1 %v9003_v23  ;;  %v8975_v20 = vpop.xlane.xlu1 %8974  ;;  %v9000_v21 = vsel %vm206_vm1, %v8990_v15, 0.0 }
0x2a19   :  { %v8981_v61 = vmul.f32 0.03125, %v8975_v20  ;;  %9001 = vadd.xlane.f32.xlu0 %v9000_v21  ;;  %v8972_v30 = vpop.xlane.xlu0 %8971 }
0x2a1a   :  { %v8980_v7 = vmul.f32 0.03125, %v8972_v30 }
0x2a1b   :  { %v8987_v46 = vsub.f32 %v8955_v14, %v8981_v61 }
0x2a1c   :  { %v8986_v57 = vsub.f32 %v8954_v22, %v8980_v7  ;;  %v8999_v37 = vpop.xlane.xlu1 %8998 }
0x2a1d   :  { %v9013_v25 = vmul.f32 0.03125, %v8999_v37  ;;  %v8996_v47 = vpop.xlane.xlu0 %8995  ;;  %v8993_v16 = vmul.f32 %v8987_v46, %v8987_v46 }
0x2a1e   :  { %v9012_v4 = vmul.f32 0.03125, %v8996_v47  ;;  %v8992_v9 = vmul.f32 %v8986_v57, %v8986_v57 }
0x2a1f   :  { %v9019_v45 = vadd.f32 1e-06, %v9013_v25  ;;  %v9009_v53 = vsel %vm206_vm1, %v8993_v16, 0.0 }
0x2a20   :  { %v9018_v33 = vadd.f32 1e-06, %v9012_v4  ;;  %9010 = vadd.xlane.f32.xlu1 %v9009_v53  ;;  %v9006_v2 = vsel %vm206_vm1, %v8992_v9, 0.0 }
0x2a21   :  { %12225 = vrsqrt.f32 %v9019_v45  ;;  %9007 = vadd.xlane.f32.xlu0 %v9006_v2 }
0x2a22   :  { %12227 = vrsqrt.f32 %v9018_v33 }
0x2a2b   :  { %v12226_v48 = vpop.eup %12225 }
0x2a2c   :  { %v12228_v17 = vpop.eup %12227  ;;  %v9031_v12 = vmul.f32 %v12226_v48, %v8983_v51 }
0x2a2d   :  { %v9030_v62 = vmul.f32 %v12228_v17, %v8982_v18 }
0x2a2e   :  { %v9043_v28 = vmul.f32 %v9753_v8, %v9031_v12 }
0x2a2f   :  { %v9042_v35 = vmul.f32 %v9753_v8, %v9030_v62 }
0x2a30   :  { %v9055_v26 = vadd.f32 %v9754_v3, %v9043_v28 }
0x2a31   :  { %v9054_v29 = vadd.f32 %v9754_v3, %v9042_v35 }
0x2a33   :  { %11505 = vmatprep.mubr.msk.f32.mxu1 %vm206_vm1, %v9054_v29 }
0x2a34   :  { %11506 = vmatmul.mubr.msk.f32.vlgmr.msra.gmra.mrb[192].mxu1 %vm206_vm1, %v9055_v26 }
0x2aa5   :  { %v9005_v60 = vpop.xlane.xlu1 %9004 }
0x2aa6   :  { %v9015_v59 = vmul.f32 0.03125, %v9005_v60  ;;  %v9002_v40 = vpop.xlane.xlu0 %9001 }
0x2aa7   :  { %v9014_v27 = vmul.f32 0.03125, %v9002_v40 }
0x2aa8   :  { %v9021_v41 = vadd.f32 1e-06, %v9015_v59 }
0x2aa9   :  { %v9020_v42 = vadd.f32 1e-06, %v9014_v27 }
0x2aaa   :  { %12229 = vrsqrt.f32 %v9021_v41 }
0x2aab   :  { %12231 = vrsqrt.f32 %v9020_v42 }
0x2aad   :  { %v9011_v54 = vpop.xlane.xlu1 %9010 }
0x2aae   :  { %v9017_v5 = vmul.f32 0.03125, %v9011_v54  ;;  %v9008_v52 = vpop.xlane.xlu0 %9007 }
0x2aaf   :  { %v9016_v14 = vmul.f32 0.03125, %v9008_v52 }
0x2ab0   :  { %v9023_v31 = vadd.f32 1e-06, %v9017_v5 }
0x2ab1   :  { %v9022_v55 = vadd.f32 1e-06, %v9016_v14 }
0x2ab2   :  { %12233 = vrsqrt.f32 %v9023_v31 }
0x2ab3   :  { %12235 = vrsqrt.f32 %v9022_v55 }
0x2ab4   :  { %v12230_v22 = vpop.eup %12229 }
0x2ab5   :  { %v12232_v6 = vpop.eup %12231  ;;  %v9033_v51 = vmul.f32 %v12230_v22, %v8985_v34 }
0x2ab6   :  { %v9032_v36 = vmul.f32 %v12232_v6, %v8984_v44 }
0x2ab7   :  { %v9045_v18 = vmul.f32 %v9753_v8, %v9033_v51 }
0x2ab8   :  { %v9044_v56 = vmul.f32 %v9753_v8, %v9032_v36 }
0x2ab9   :  { %v9057_v32 = vadd.f32 %v9754_v3, %v9045_v18 }
0x2aba   :  { %v9056_v58 = vadd.f32 %v9754_v3, %v9044_v56 }
0x2abc   :  { %v12234_v39 = vpop.eup %12233  ;;  %11508 = vmatprep.mubr.msk.f32.mxu1 %vm206_vm1, %v9056_v58 }
0x2abd   :  { %v12236_v0 = vpop.eup %12235  ;;  %11509 = vmatmul.mubr.msk.f32.gmra.mrb[194].mxu1 %vm206_vm1, %v9057_v32  ;;  %v9035_v13 = vmul.f32 %v12234_v39, %v8987_v46 }
0x2abe   :  { %v9034_v63 = vmul.f32 %v12236_v0, %v8986_v57 }
0x2abf   :  { %v9047_v38 = vmul.f32 %v9753_v8, %v9035_v13 }
0x2ac0   :  { %v9046_v11 = vmul.f32 %v9753_v8, %v9034_v63 }
0x2ac1   :  { %v9059_v43 = vadd.f32 %v9754_v3, %v9047_v38 }
0x2ac2   :  { %v9058_v49 = vadd.f32 %v9754_v3, %v9046_v11 }
0x2ac4   :  { %11511 = vmatprep.mubr.msk.f32.mxu1 %vm206_vm1, %v9058_v49 }
0x2ac5   :  { %11512 = vmatmul.mubr.msk.f32.gmra.mrb[196].mxu1 %vm206_vm1, %v9059_v43 }
0x2b07   :  { %v11507_v10 = vpop.f32.mrb[192].mxu1 }
0x2b08   :  { %v9161_v24 = vadd.f32 %v11507_v10, %v9755_v50  ;;  %v9155_v19 = vpop.f32.mrb[193].mxu1 }
0x2b09   :  { %v9156_v34 = vadd.f32 %v9755_v50, %v9155_v19 }
0x2b0a   :  { %9186 = vst.msk [vmem:[%s15029_s23 + $0x8] sm:$0xff] %vm9184_vm10, %v9161_v24 }
0x2b0b   :  { %9185 = vst.msk [vmem:[%s15029_s23] sm:$0xff] %vm9184_vm10, %v9156_v34 }
0x2b90   :  { %v11510_v44 = vpop.f32.mrb[194].mxu1 }
0x2b91   :  { %v9171_v1 = vadd.f32 %v11510_v44, %v9755_v50  ;;  %v9165_v15 = vpop.f32.mrb[195].mxu1 }
0x2b92   :  { %v9166_v23 = vadd.f32 %v9755_v50, %v9165_v15 }
0x2b93   :  { %9188 = vst.msk [vmem:[%s15029_s23 + $0x18] sm:$0xff] %vm9184_vm10, %v9171_v1 }
0x2b94   :  { %9187 = vst.msk [vmem:[%s15029_s23 + $0x10] sm:$0xff] %vm9184_vm10, %v9166_v23 }
0x2b98   :  { %v11513_v20 = vpop.f32.mrb[196].mxu1 }
0x2b99   :  { %v9181_v21 = vadd.f32 %v11513_v20, %v9755_v50  ;;  %v9175_v61 = vpop.f32.mrb[197].mxu1 }
0x2b9a   :  { %v9176_v30 = vadd.f32 %v9755_v50, %v9175_v61 }
0x2b9b   :  { %9190 = vst.msk [vmem:[%s15029_s23 + $0x28] sm:$0xff] %vm9184_vm10, %v9181_v21 }
0x2b9c   :  { %9189 = vst.msk [vmem:[%s15029_s23 + $0x20] sm:$0xff] %vm9184_vm10, %v9176_v30 }

</bundles_post_ra>
